<compile_context>
chip_gen: v7x
topology: tpu7x:2x2x1
jax: 0.10.0
libtpu: 0.0.40
codegen_flags: <defaults>
</compile_context>

<pallas_src>
import functools

import numpy as np
import jax
import jax.numpy as jnp
from jax.experimental import pallas as pl
from jax.experimental.pallas import tpu as pltpu

EPS = 1e-5  # PyTorch BatchNorm default eps

# ---- fixed geometry for the default 28x28 two-block config -----------------
WP0 = 30                 # zero-padded stage-0 frame width (28 + 2)
S0 = WP0 * WP0           # 900  flattened padded frame, stage 0
WP1 = 16                 # zero-padded stage-1 frame width (14 + 2)
S1 = WP1 * WP1           # 256  flattened padded frame, stage 1
TAP0 = [dy * WP0 + dx for dy in range(3) for dx in range(3)]   # 3x3 tap offsets
TAP1 = [dy * WP1 + dx for dy in range(3) for dx in range(3)]
LM0 = 2 * 13 * WP0 + 2 * 13 + 1    # 807  pool-0 anchor span (per image)
LM1 = 2 * 6 * WP1 + 2 * 6 + 1      # 205  pool-1 anchor span (per image)
FEAT_LANES = 64          # per-channel pooled feature lanes (49 valid, lane-padded)


# ----------------------------- Pallas kernels -------------------------------

def _trunk_kernel(x_ref, w0_ref, b0_ref, m0_ref, w1_ref, s1_ref, g0_ref,
                  w2_ref, b2_ref, m1_ref, w3_ref, s3_ref, g1_ref,
                  out_ref,
                  pad0_ref, stk1_ref, act1_ref, in1_ref, stk2_ref,
                  pad1_ref, stk3_ref, act3_ref, *, ipb):
    """conv0 -> conv1(+BN,ReLU) -> pool -> conv2 -> conv3(+BN,ReLU) -> pool
    for a block of `ipb` images, everything VMEM-resident."""
    f32 = jnp.float32
    bf16 = jnp.bfloat16
    ns0 = ipb * S0          # lane-concatenated stage-0 frames
    l0 = ns0 - 62           # trimmed conv1 compute range
    ns1 = ipb * S1
    l1 = ns1 - 34

    # conv_0_0 (Cin=1): single K=9 f32 matmul over the whole block; bias, then
    # the per-image ring mask zeroes the pad ring (aligned full-width store).
    a0 = jnp.dot(w0_ref[...], x_ref[...], preferred_element_type=f32)
    pad0_ref[...] = ((a0 + b0_ref[...]) * m0_ref[...]).astype(bf16)

    # conv_0_1 + folded BatchNorm2d + ReLU: stack the 9 shifted taps on
    # sublanes (K = 9*16 = 144) and issue ONE bf16 MXU matmul for the block.
    for t in range(9):
        stk1_ref[16 * t:16 * (t + 1), :] = pad0_ref[:, TAP0[t]:TAP0[t] + l0]
    a1 = jnp.dot(w1_ref[...], stk1_ref[...], preferred_element_type=f32)
    act1_ref[...] = jnp.maximum(a1 + s1_ref[...], 0.0).astype(bf16)

    # MaxPool2d(2,2): 4-way shifted max, then a per-image bf16 0/1 selection
    # matmul that compacts the stride-2 anchors and re-embeds them into the
    # zero-padded 16x16 frame of the next stage (ring columns of g0 are zero).
    in1_ref[...] = jnp.zeros(in1_ref.shape, in1_ref.dtype)   # zero 17-lane borders
    for n in range(ipb):
        b = n * S0
        m4 = jnp.maximum(
            jnp.maximum(act1_ref[:, b:b + LM0],
                        act1_ref[:, b + 1:b + 1 + LM0]),
            jnp.maximum(act1_ref[:, b + WP0:b + WP0 + LM0],
                        act1_ref[:, b + WP0 + 1:b + WP0 + 1 + LM0]))
        sel = jnp.dot(m4, g0_ref[...], preferred_element_type=f32)
        in1_ref[:, 17 + n * S1:17 + (n + 1) * S1] = sel.astype(bf16)

    # conv_1_0: tap-stacked K=144 bf16 matmul over the full padded frames,
    # bias + ring mask -> aligned full-width store into pad1 (no pre-zeroing).
    for t in range(9):
        stk2_ref[16 * t:16 * (t + 1), :] = in1_ref[:, TAP1[t]:TAP1[t] + ns1]
    a2 = jnp.dot(w2_ref[...], stk2_ref[...], preferred_element_type=f32)
    pad1_ref[...] = ((a2 + b2_ref[...]) * m1_ref[...]).astype(bf16)

    # conv_1_1 + folded BatchNorm2d + ReLU: K = 9*32 = 288 bf16 matmul.
    for t in range(9):
        stk3_ref[32 * t:32 * (t + 1), :] = pad1_ref[:, TAP1[t]:TAP1[t] + l1]
    a3 = jnp.dot(w3_ref[...], stk3_ref[...], preferred_element_type=f32)
    act3_ref[...] = jnp.maximum(a3 + s3_ref[...], 0.0).astype(bf16)

    # MaxPool2d(2,2) -> 7x7 (AdaptiveAvgPool2d((7,7)) is the identity here);
    # per-image bf16 selection matmul emits a lane-padded (32, 64) tile whose
    # row-major layout is the torch.flatten(1) feature order.
    for n in range(ipb):
        b = n * S1
        m4 = jnp.maximum(
            jnp.maximum(act3_ref[:, b:b + LM1],
                        act3_ref[:, b + 1:b + 1 + LM1]),
            jnp.maximum(act3_ref[:, b + WP1:b + WP1 + LM1],
                        act3_ref[:, b + WP1 + 1:b + WP1 + 1 + LM1]))
        sel = jnp.dot(m4, g1_ref[...], preferred_element_type=f32)
        out_ref[32 * n:32 * (n + 1), :] = sel.astype(out_ref.dtype)


def _fc_kernel(x_ref, w1_ref, s1_ref, w2_ref, b2_ref, o_ref):
    """dense0 (+folded BN1d) -> ReLU -> output head.  x_ref is already bf16
    (trunk output), weights are bf16, accumulation/epilogue in f32."""
    h = jnp.dot(x_ref[...], w1_ref[...], preferred_element_type=jnp.float32)
    h = jnp.maximum(h + s1_ref[...], 0.0)
    o = jnp.dot(h.astype(jnp.bfloat16), w2_ref[...],
                preferred_element_type=jnp.float32)
    o_ref[...] = o + b2_ref[...]


# ----------------------------- Pallas wrappers ------------------------------

def _trunk_call(x_stk, m0, m1, prep, n, ipb):
    nblk = n // ipb
    ns0 = ipb * S0
    ns1 = ipb * S1
    l0 = ns0 - 62
    l1 = ns1 - 34
    kern = functools.partial(_trunk_kernel, ipb=ipb)
    return pl.pallas_call(
        kern,
        out_shape=jax.ShapeDtypeStruct((nblk, ipb * 32, FEAT_LANES), jnp.bfloat16),
        grid=(nblk,),
        in_specs=[
            pl.BlockSpec((None, 9, ns0), lambda b: (b, 0, 0)),   # stacked conv0 taps
            pl.BlockSpec((16, 9), lambda b: (0, 0)),             # conv0 weights (f32)
            pl.BlockSpec((16, 1), lambda b: (0, 0)),             # conv0 bias
            pl.BlockSpec((1, ns0), lambda b: (0, 0)),            # stage-0 ring mask
            pl.BlockSpec((16, 144), lambda b: (0, 0)),           # conv1 (BN folded, bf16)
            pl.BlockSpec((16, 1), lambda b: (0, 0)),             # conv1 shift
            pl.BlockSpec((LM0, S1), lambda b: (0, 0)),           # pool-0 selection (bf16)
            pl.BlockSpec((32, 144), lambda b: (0, 0)),           # conv2 weights (bf16)
            pl.BlockSpec((32, 1), lambda b: (0, 0)),             # conv2 bias
            pl.BlockSpec((1, ns1), lambda b: (0, 0)),            # stage-1 ring mask
            pl.BlockSpec((32, 288), lambda b: (0, 0)),           # conv3 (BN folded, bf16)
            pl.BlockSpec((32, 1), lambda b: (0, 0)),             # conv3 shift
            pl.BlockSpec((LM1, FEAT_LANES), lambda b: (0, 0)),   # pool-1 selection (bf16)
        ],
        out_specs=pl.BlockSpec((None, ipb * 32, FEAT_LANES), lambda b: (b, 0, 0)),
        scratch_shapes=[
            pltpu.VMEM((16, ns0), jnp.bfloat16),        # pad0: conv0 output, zero ring
            pltpu.VMEM((144, l0), jnp.bfloat16),        # stk1: conv1 tap stack
            pltpu.VMEM((16, l0), jnp.bfloat16),         # act1: conv1 activations
            pltpu.VMEM((16, ns1 + 34), jnp.bfloat16),   # in1:  stage-1 padded input (ext)
            pltpu.VMEM((144, ns1), jnp.bfloat16),       # stk2: conv2 tap stack
            pltpu.VMEM((32, ns1), jnp.bfloat16),        # pad1: conv2 output, zero ring
            pltpu.VMEM((288, l1), jnp.bfloat16),        # stk3: conv3 tap stack
            pltpu.VMEM((32, l1), jnp.bfloat16),         # act3: conv3 activations
        ],
        compiler_params=pltpu.CompilerParams(
            dimension_semantics=("parallel",)),          # v7x dual-TC sharding if nblk>1
    )(x_stk, prep['w0'], prep['b0'], m0, prep['w1'], prep['s1'], prep['g0'],
      prep['w2'], prep['b2'], m1, prep['w3'], prep['s3'], prep['g1'])


def _fc_call(feats, prep):
    n, k = feats.shape
    return pl.pallas_call(
        _fc_kernel,
        out_shape=jax.ShapeDtypeStruct((n, 128), jnp.float32),
        grid=(1,),
        in_specs=[
            pl.BlockSpec((n, k), lambda i: (0, 0)),
            pl.BlockSpec((k, 512), lambda i: (0, 0)),
            pl.BlockSpec((1, 512), lambda i: (0, 0)),
            pl.BlockSpec((512, 128), lambda i: (0, 0)),
            pl.BlockSpec((1, 128), lambda i: (0, 0)),
        ],
        out_specs=pl.BlockSpec((n, 128), lambda i: (0, 0)),
        compiler_params=pltpu.CompilerParams(dimension_semantics=("arbitrary",)),
    )(feats, prep['fc_w1'], prep['fc_s1'], prep['fc_w2'], prep['fc_b2'])


# ---------------------- constant builders (numpy, host) ---------------------

def _ring_mask(wp):
    """1.0 at interior positions of a flattened wp x wp padded frame, 0 on the ring."""
    m = np.zeros((1, wp * wp), np.float32)
    for h in range(1, wp - 1):
        m[0, h * wp + 1: h * wp + wp - 1] = 1.0
    return m


def _pool0_matrix():
    """0/1 map: 2x2-max anchor (trimmed flat idx) -> zero-padded 16x16 frame."""
    g = np.zeros((LM0, S1), np.float32)
    for h2 in range(14):
        for w2 in range(14):
            g[2 * h2 * WP0 + 2 * w2, (h2 + 1) * WP1 + (w2 + 1)] = 1.0
    return g


def _pool1_matrix():
    """0/1 map: 2x2-max anchor (trimmed flat idx) -> dense 7x7 (lane-padded to 64)."""
    g = np.zeros((LM1, FEAT_LANES), np.float32)
    for h2 in range(7):
        for w2 in range(7):
            g[2 * h2 * WP1 + 2 * w2, h2 * 7 + w2] = 1.0
    return g


# ------------------------------- parameters ---------------------------------

def init_params(key):
    ks = iter(jax.random.split(key, 40))
    p = {}

    def conv_p(cin, cout):
        bound = 1.0 / (cin * 9) ** 0.5
        w = jax.random.uniform(next(ks), (cout, cin, 3, 3), jnp.float32, -bound, bound)
        b = jax.random.uniform(next(ks), (cout,), jnp.float32, -bound, bound)
        return w, b

    def lin_p(cin, cout):
        bound = 1.0 / cin ** 0.5
        w = jax.random.uniform(next(ks), (cout, cin), jnp.float32, -bound, bound)
        b = jax.random.uniform(next(ks), (cout,), jnp.float32, -bound, bound)
        return w, b

    def bn_p(c):  # (gamma, beta, running_mean, running_var) — eval-mode stats
        gamma = 1.0 + 0.1 * jax.random.normal(next(ks), (c,), jnp.float32)
        beta = 0.1 * jax.random.normal(next(ks), (c,), jnp.float32)
        mean = 0.1 * jax.random.normal(next(ks), (c,), jnp.float32)
        var = jax.random.uniform(next(ks), (c,), jnp.float32, 0.5, 1.5)
        return gamma, beta, mean, var

    p['conv0'] = conv_p(1, 16)
    p['conv1'] = conv_p(16, 16)
    p['bn0'] = bn_p(16)
    p['conv2'] = conv_p(16, 32)
    p['conv3'] = conv_p(32, 32)
    p['bn1'] = bn_p(32)
    p['fc0'] = lin_p(7 * 7 * 32, 500)
    p['bn_fc0'] = bn_p(500)
    p['out'] = lin_p(500, 10)
    return p


def prepare_params(p):
    """One-time preprocessing: BN folding, tap-major weight relayout,
    bf16 casts, lane-dense padding of the FC stack."""
    def fold_bn(bn):
        gamma, beta, mean, var = bn
        scale = gamma / jnp.sqrt(var + EPS)
        shift = beta - mean * scale
        return scale, shift

    def tapmat(w):  # (Cout, Cin, 3, 3) -> (Cout, 9*Cin), K index = tap*Cin + cin
        co, ci = w.shape[0], w.shape[1]
        return jnp.transpose(w, (0, 2, 3, 1)).reshape(co, 9 * ci)

    prep = {}
    w0, b0 = p['conv0']
    prep['w0'] = w0.reshape(16, 9)                       # Cin = 1, keep f32
    prep['b0'] = b0.reshape(-1, 1)

    w1, b1 = p['conv1']
    sc1, sh1 = fold_bn(p['bn0'])
    prep['w1'] = (tapmat(w1) * sc1[:, None]).astype(jnp.bfloat16)
    prep['s1'] = (b1 * sc1 + sh1).reshape(-1, 1)

    w2, b2 = p['conv2']
    prep['w2'] = tapmat(w2).astype(jnp.bfloat16)
    prep['b2'] = b2.reshape(-1, 1)

    w3, b3 = p['conv3']
    sc3, sh3 = fold_bn(p['bn1'])
    prep['w3'] = (tapmat(w3) * sc3[:, None]).astype(jnp.bfloat16)
    prep['s3'] = (b3 * sc3 + sh3).reshape(-1, 1)

    prep['g0'] = jnp.asarray(_pool0_matrix(), jnp.bfloat16)
    prep['g1'] = jnp.asarray(_pool1_matrix(), jnp.bfloat16)

    # fc0 (+BN1d folded), consuming the (N, 32*64) lane-padded feature layout
    # (feature c*49+p lives at lane c*64+p of the trunk output reshape).
    wf, bf = p['fc0']                                    # (500, 1568), (500,)
    scf, shf = fold_bn(p['bn_fc0'])
    wfs = (wf * scf[:, None]).T                          # (1568, 500)
    wfs = jnp.pad(wfs.reshape(32, 49, 500),
                  ((0, 0), (0, FEAT_LANES - 49), (0, 0))).reshape(32 * FEAT_LANES, 500)
    fc_w1 = jnp.zeros((32 * FEAT_LANES, 512), jnp.float32).at[:, :500].set(wfs)
    prep['fc_w1'] = fc_w1.astype(jnp.bfloat16)
    prep['fc_s1'] = jnp.zeros((1, 512), jnp.float32).at[0, :500].set(bf * scf + shf)

    wo, bo = p['out']                                    # (10, 500), (10,)
    fc_w2 = jnp.zeros((512, 128), jnp.float32).at[:500, :10].set(wo.T)
    prep['fc_w2'] = fc_w2.astype(jnp.bfloat16)
    prep['fc_b2'] = jnp.zeros((1, 128), jnp.float32).at[0, :10].set(bo)
    return prep


# --------------------------------- forward ----------------------------------

def vgg_like_forward(x_nchw, prep, images_per_block=None):
    n = x_nchw.shape[0]
    assert x_nchw.shape[1:] == (1, 28, 28), "default VggLikeNet config expects (N,1,28,28)"
    ipb = n if images_per_block is None else images_per_block
    assert n % ipb == 0
    nblk = n // ipb

    # Host-side prep: per-image zero-padded 30x30 frames, flattened and
    # lane-concatenated over the batch; the 9 conv_0_0 taps (Cin=1) are
    # pre-stacked so the kernel's first conv is a single matmul.
    x = x_nchw.astype(jnp.float32)[:, 0]                           # (N, 28, 28)
    xflat = jnp.pad(x, ((0, 0), (1, 1), (1, 1))).reshape(n * S0)
    xext = jnp.pad(xflat, (31, 31))
    x_stk = jnp.stack([xext[s:s + n * S0] for s in TAP0], axis=0)  # (9, N*900)
    x_stk = x_stk.reshape(9, nblk, ipb * S0).transpose(1, 0, 2)    # (nblk, 9, ipb*900)

    m0 = jnp.asarray(np.tile(_ring_mask(WP0), (1, ipb)))           # (1, ipb*900)
    m1 = jnp.asarray(np.tile(_ring_mask(WP1), (1, ipb)))           # (1, ipb*256)

    feats = _trunk_call(x_stk, m0, m1, prep, n, ipb)   # (nblk, ipb*32, 64) bf16
    # Row-major bit-identical reshape: row n*32+c, lane p -> (n, c*64+p), i.e.
    # the NCHW torch.flatten(1) order with 49->64 lane padding already baked
    # into the FC weights.  AdaptiveAvgPool2d((7,7)) is the identity here.
    feats = feats.reshape(n, 32 * FEAT_LANES)

    # TODO(synk): Dropout2d / Dropout are eval-mode identities (train-mode RNG
    # masking not reproduced); BatchNorm uses folded running statistics.
    logits = _fc_call(feats, prep)                     # (N, 128) f32
    return logits[:, :10]


if __name__ == "__main__":
    key = jax.random.PRNGKey(0)
    pkey, xkey = jax.random.split(key)
    params = init_params(pkey)
    prep = prepare_params(params)

    # PyTorch-style NCHW input: batch=2, 1 channel, 28x28 (module default in_size).
    x = jax.random.normal(xkey, (2, 1, 28, 28), jnp.float32)

    out = jax.jit(vgg_like_forward)(x, prep)
    out = jax.block_until_ready(out)
    assert out.shape == (2, 10) and out.dtype == jnp.float32
    assert bool(jnp.all(jnp.isfinite(out)))
    print("KERNEL_OK")
</pallas_src>

<mosaic_0001>
module attributes {stable_mosaic.version = 11 : i64} {
  func.func @_fc_kernel(%arg0: i32, %arg1: memref<2x2048xbf16, #tpu.memory_space<vmem>>, %arg2: memref<2048x512xbf16, #tpu.memory_space<vmem>>, %arg3: memref<1x512xf32, #tpu.memory_space<vmem>>, %arg4: memref<512x128xbf16, #tpu.memory_space<vmem>>, %arg5: memref<1x128xf32, #tpu.memory_space<vmem>>, %arg6: memref<2x128xf32, #tpu.memory_space<vmem>>) attributes {dimension_semantics = [#tpu.dimension_semantics<arbitrary>], iteration_bounds = array<i64: 1>, scalar_prefetch = 0 : i64, scratch_operands = 0 : i64, tpu.core_type = #tpu.core_type<tc>, window_params = [{pipeline_mode = #tpu.pipeline_mode<synchronous>, transform_indices = @transform_0, window_bounds = array<i64: 2, 2048>}, {pipeline_mode = #tpu.pipeline_mode<synchronous>, transform_indices = @transform_1, window_bounds = array<i64: 2048, 512>}, {pipeline_mode = #tpu.pipeline_mode<synchronous>, transform_indices = @transform_2, window_bounds = array<i64: 1, 512>}, {pipeline_mode = #tpu.pipeline_mode<synchronous>, transform_indices = @transform_3, window_bounds = array<i64: 512, 128>}, {pipeline_mode = #tpu.pipeline_mode<synchronous>, transform_indices = @transform_4, window_bounds = array<i64: 1, 128>}, {pipeline_mode = #tpu.pipeline_mode<synchronous>, transform_indices = @transform_5, window_bounds = array<i64: 2, 128>}]} {
    %c0 = arith.constant 0 : index
    %c0_0 = arith.constant 0 : index
    %0 = vector.load %arg1[%c0, %c0_0] : memref<2x2048xbf16, #tpu.memory_space<vmem>>, vector<2x2048xbf16>
    %c0_1 = arith.constant 0 : index
    %c0_2 = arith.constant 0 : index
    %1 = vector.load %arg2[%c0_1, %c0_2] : memref<2048x512xbf16, #tpu.memory_space<vmem>>, vector<2048x512xbf16>
    %cst = arith.constant dense<0.000000e+00> : vector<2x512xf32>
    %2 = tpu.matmul %0, %1, %cst {dimension_numbers = #tpu.dot_dimension_numbers<[1], [0], [0], [1], [0, 0, 1, 1], [], []>} : vector<2x2048xbf16>, vector<2048x512xbf16>, vector<2x512xf32> -> vector<2x512xf32>
    %c0_3 = arith.constant 0 : index
    %c0_4 = arith.constant 0 : index
    %3 = vector.load %arg3[%c0_3, %c0_4] : memref<1x512xf32, #tpu.memory_space<vmem>>, vector<1x512xf32>
    %4 = vector.broadcast %3 : vector<1x512xf32> to vector<2x512xf32>
    %5 = arith.addf %2, %4 : vector<2x512xf32>
    %cst_5 = arith.constant 0.000000e+00 : f32
    %6 = vector.broadcast %cst_5 : f32 to vector<2x512xf32>
    %7 = arith.maximumf %5, %6 : vector<2x512xf32>
    %8 = arith.truncf %7 : vector<2x512xf32> to vector<2x512xbf16>
    %c0_6 = arith.constant 0 : index
    %c0_7 = arith.constant 0 : index
    %9 = vector.load %arg4[%c0_6, %c0_7] : memref<512x128xbf16, #tpu.memory_space<vmem>>, vector<512x128xbf16>
    %cst_8 = arith.constant dense<0.000000e+00> : vector<2x128xf32>
    %10 = tpu.matmul %8, %9, %cst_8 {dimension_numbers = #tpu.dot_dimension_numbers<[1], [0], [0], [1], [0, 0, 1, 1], [], []>} : vector<2x512xbf16>, vector<512x128xbf16>, vector<2x128xf32> -> vector<2x128xf32>
    %c0_9 = arith.constant 0 : index
    %c0_10 = arith.constant 0 : index
    %11 = vector.load %arg5[%c0_9, %c0_10] : memref<1x128xf32, #tpu.memory_space<vmem>>, vector<1x128xf32>
    %12 = vector.broadcast %11 : vector<1x128xf32> to vector<2x128xf32>
    %13 = arith.addf %10, %12 : vector<2x128xf32>
    %c0_11 = arith.constant 0 : index
    %c0_12 = arith.constant 0 : index
    %14 = vector.load %arg6[%c0_11, %c0_12] : memref<2x128xf32, #tpu.memory_space<vmem>>, vector<2x128xf32>
    tpu.vector_store %arg6[%c0_11, %c0_12], %13 {strides = array<i32>} : memref<2x128xf32, #tpu.memory_space<vmem>>, vector<2x128xf32>,
    return
  }
  func.func @transform_0(%arg0: i32) -> (i32, i32) {
    %c0_i32 = arith.constant 0 : i32
    %c0_i32_0 = arith.constant 0 : i32
    %c0_i32_1 = arith.constant 0 : i32
    return %c0_i32, %c0_i32_0 : i32, i32
  }
  func.func @transform_1(%arg0: i32) -> (i32, i32) {
    %c0_i32 = arith.constant 0 : i32
    %c0_i32_0 = arith.constant 0 : i32
    %c0_i32_1 = arith.constant 0 : i32
    return %c0_i32, %c0_i32_0 : i32, i32
  }
  func.func @transform_2(%arg0: i32) -> (i32, i32) {
    %c0_i32 = arith.constant 0 : i32
    %c0_i32_0 = arith.constant 0 : i32
    %c0_i32_1 = arith.constant 0 : i32
    return %c0_i32, %c0_i32_0 : i32, i32
  }
  func.func @transform_3(%arg0: i32) -> (i32, i32) {
    %c0_i32 = arith.constant 0 : i32
    %c0_i32_0 = arith.constant 0 : i32
    %c0_i32_1 = arith.constant 0 : i32
    return %c0_i32, %c0_i32_0 : i32, i32
  }
  func.func @transform_4(%arg0: i32) -> (i32, i32) {
    %c0_i32 = arith.constant 0 : i32
    %c0_i32_0 = arith.constant 0 : i32
    %c0_i32_1 = arith.constant 0 : i32
    return %c0_i32, %c0_i32_0 : i32, i32
  }
  func.func @transform_5(%arg0: i32) -> (i32, i32) {
    %c0_i32 = arith.constant 0 : i32
    %c0_i32_0 = arith.constant 0 : i32
    %c0_i32_1 = arith.constant 0 : i32
    return %c0_i32, %c0_i32_0 : i32, i32
  }
}

module attributes {stable_mosaic.version = 11 : i64} {
  func.func @_trunk_kernel(%arg0: i32, %arg1: memref<1x9x1800xf32, #tpu.memory_space<vmem>>, %arg2: memref<16x9xf32, #tpu.memory_space<vmem>>, %arg3: memref<16x1xf32, #tpu.memory_space<vmem>>, %arg4: memref<1x1800xf32, #tpu.memory_space<vmem>>, %arg5: memref<16x144xbf16, #tpu.memory_space<vmem>>, %arg6: memref<16x1xf32, #tpu.memory_space<vmem>>, %arg7: memref<807x256xbf16, #tpu.memory_space<vmem>>, %arg8: memref<32x144xbf16, #tpu.memory_space<vmem>>, %arg9: memref<32x1xf32, #tpu.memory_space<vmem>>, %arg10: memref<1x512xf32, #tpu.memory_space<vmem>>, %arg11: memref<32x288xbf16, #tpu.memory_space<vmem>>, %arg12: memref<32x1xf32, #tpu.memory_space<vmem>>, %arg13: memref<205x64xbf16, #tpu.memory_space<vmem>>, %arg14: memref<1x64x64xbf16, #tpu.memory_space<vmem>>, %arg15: memref<16x1800xbf16, #tpu.memory_space<vmem>>, %arg16: memref<144x1738xbf16, #tpu.memory_space<vmem>>, %arg17: memref<16x1738xbf16, #tpu.memory_space<vmem>>, %arg18: memref<16x546xbf16, #tpu.memory_space<vmem>>, %arg19: memref<144x512xbf16, #tpu.memory_space<vmem>>, %arg20: memref<32x512xbf16, #tpu.memory_space<vmem>>, %arg21: memref<288x478xbf16, #tpu.memory_space<vmem>>, %arg22: memref<32x478xbf16, #tpu.memory_space<vmem>>) attributes {dimension_semantics = [#tpu.dimension_semantics<parallel>], iteration_bounds = array<i64: 1>, scalar_prefetch = 0 : i64, scratch_operands = 8 : i64, tpu.core_type = #tpu.core_type<tc>, window_params = [{transform_indices = @transform_0, window_bounds = array<i64: 1, 9, 1800>}, {pipeline_mode = #tpu.pipeline_mode<synchronous>, transform_indices = @transform_1, window_bounds = array<i64: 16, 9>}, {pipeline_mode = #tpu.pipeline_mode<synchronous>, transform_indices = @transform_2, window_bounds = array<i64: 16, 1>}, {pipeline_mode = #tpu.pipeline_mode<synchronous>, transform_indices = @transform_3, window_bounds = array<i64: 1, 1800>}, {pipeline_mode = #tpu.pipeline_mode<synchronous>, transform_indices = @transform_4, window_bounds = array<i64: 16, 144>}, {pipeline_mode = #tpu.pipeline_mode<synchronous>, transform_indices = @transform_5, window_bounds = array<i64: 16, 1>}, {pipeline_mode = #tpu.pipeline_mode<synchronous>, transform_indices = @transform_6, window_bounds = array<i64: 807, 256>}, {pipeline_mode = #tpu.pipeline_mode<synchronous>, transform_indices = @transform_7, window_bounds = array<i64: 32, 144>}, {pipeline_mode = #tpu.pipeline_mode<synchronous>, transform_indices = @transform_8, window_bounds = array<i64: 32, 1>}, {pipeline_mode = #tpu.pipeline_mode<synchronous>, transform_indices = @transform_9, window_bounds = array<i64: 1, 512>}, {pipeline_mode = #tpu.pipeline_mode<synchronous>, transform_indices = @transform_10, window_bounds = array<i64: 32, 288>}, {pipeline_mode = #tpu.pipeline_mode<synchronous>, transform_indices = @transform_11, window_bounds = array<i64: 32, 1>}, {pipeline_mode = #tpu.pipeline_mode<synchronous>, transform_indices = @transform_12, window_bounds = array<i64: 205, 64>}, {transform_indices = @transform_13, window_bounds = array<i64: 1, 64, 64>}]} {
    %c0 = arith.constant 0 : index
    %c0_0 = arith.constant 0 : index
    %0 = vector.load %arg2[%c0, %c0_0] : memref<16x9xf32, #tpu.memory_space<vmem>>, vector<16x9xf32>
    %c0_1 = arith.constant 0 : index
    %c0_2 = arith.constant 0 : index
    %c0_3 = arith.constant 0 : index
    %1 = vector.load %arg1[%c0_1, %c0_2, %c0_3] : memref<1x9x1800xf32, #tpu.memory_space<vmem>>, vector<1x9x1800xf32>
    %2 = vector.shape_cast %1 : vector<1x9x1800xf32> to vector<9x1800xf32>
    %cst = arith.constant dense<0.000000e+00> : vector<16x1800xf32>
    %3 = tpu.matmul %0, %2, %cst {dimension_numbers = #tpu.dot_dimension_numbers<[1], [0], [0], [1], [0, 0, 1, 1], [], []>} : vector<16x9xf32>, vector<9x1800xf32>, vector<16x1800xf32> -> vector<16x1800xf32>
    %c0_4 = arith.constant 0 : index
    %c0_5 = arith.constant 0 : index
    %4 = vector.load %arg3[%c0_4, %c0_5] : memref<16x1xf32, #tpu.memory_space<vmem>>, vector<16x1xf32>
    %5 = vector.broadcast %4 : vector<16x1xf32> to vector<16x1800xf32>
    %6 = arith.addf %3, %5 : vector<16x1800xf32>
    %c0_6 = arith.constant 0 : index
    %c0_7 = arith.constant 0 : index
    %7 = vector.load %arg4[%c0_6, %c0_7] : memref<1x1800xf32, #tpu.memory_space<vmem>>, vector<1x1800xf32>
    %8 = vector.broadcast %7 : vector<1x1800xf32> to vector<16x1800xf32>
    %9 = arith.mulf %6, %8 : vector<16x1800xf32>
    %10 = arith.truncf %9 : vector<16x1800xf32> to vector<16x1800xbf16>
    %c0_8 = arith.constant 0 : index
    %c0_9 = arith.constant 0 : index
    %11 = vector.load %arg15[%c0_8, %c0_9] : memref<16x1800xbf16, #tpu.memory_space<vmem>>, vector<16x1800xbf16>
    tpu.vector_store %arg15[%c0_8, %c0_9], %10 {strides = array<i32>} : memref<16x1800xbf16, #tpu.memory_space<vmem>>, vector<16x1800xbf16>,
    %c0_10 = arith.constant 0 : index
    %c0_11 = arith.constant 0 : index
    %12 = vector.load %arg15[%c0_10, %c0_11] : memref<16x1800xbf16, #tpu.memory_space<vmem>>, vector<16x1738xbf16>
    %c0_12 = arith.constant 0 : index
    %c0_13 = arith.constant 0 : index
    %13 = vector.load %arg16[%c0_12, %c0_13] : memref<144x1738xbf16, #tpu.memory_space<vmem>>, vector<16x1738xbf16>
    tpu.vector_store %arg16[%c0_12, %c0_13], %12 {strides = array<i32>} : memref<144x1738xbf16, #tpu.memory_space<vmem>>, vector<16x1738xbf16>,
    %c0_14 = arith.constant 0 : index
    %c1 = arith.constant 1 : index
    %14 = vector.load %arg15[%c0_14, %c1] : memref<16x1800xbf16, #tpu.memory_space<vmem>>, vector<16x1738xbf16>
    %c16 = arith.constant 16 : index
    %c0_15 = arith.constant 0 : index
    %15 = vector.load %arg16[%c16, %c0_15] : memref<144x1738xbf16, #tpu.memory_space<vmem>>, vector<16x1738xbf16>
    tpu.vector_store %arg16[%c16, %c0_15], %14 {strides = array<i32>} : memref<144x1738xbf16, #tpu.memory_space<vmem>>, vector<16x1738xbf16>,
    %c0_16 = arith.constant 0 : index
    %c2 = arith.constant 2 : index
    %16 = vector.load %arg15[%c0_16, %c2] : memref<16x1800xbf16, #tpu.memory_space<vmem>>, vector<16x1738xbf16>
    %c32 = arith.constant 32 : index
    %c0_17 = arith.constant 0 : index
    %17 = vector.load %arg16[%c32, %c0_17] : memref<144x1738xbf16, #tpu.memory_space<vmem>>, vector<16x1738xbf16>
    tpu.vector_store %arg16[%c32, %c0_17], %16 {strides = array<i32>} : memref<144x1738xbf16, #tpu.memory_space<vmem>>, vector<16x1738xbf16>,
    %c0_18 = arith.constant 0 : index
    %c30 = arith.constant 30 : index
    %18 = vector.load %arg15[%c0_18, %c30] : memref<16x1800xbf16, #tpu.memory_space<vmem>>, vector<16x1738xbf16>
    %c48 = arith.constant 48 : index
    %c0_19 = arith.constant 0 : index
    %19 = vector.load %arg16[%c48, %c0_19] : memref<144x1738xbf16, #tpu.memory_space<vmem>>, vector<16x1738xbf16>
    tpu.vector_store %arg16[%c48, %c0_19], %18 {strides = array<i32>} : memref<144x1738xbf16, #tpu.memory_space<vmem>>, vector<16x1738xbf16>,
    %c0_20 = arith.constant 0 : index
    %c31 = arith.constant 31 : index
    %20 = vector.load %arg15[%c0_20, %c31] : memref<16x1800xbf16, #tpu.memory_space<vmem>>, vector<16x1738xbf16>
    %c64 = arith.constant 64 : index
    %c0_21 = arith.constant 0 : index
    %21 = vector.load %arg16[%c64, %c0_21] : memref<144x1738xbf16, #tpu.memory_space<vmem>>, vector<16x1738xbf16>
    tpu.vector_store %arg16[%c64, %c0_21], %20 {strides = array<i32>} : memref<144x1738xbf16, #tpu.memory_space<vmem>>, vector<16x1738xbf16>,
    %c0_22 = arith.constant 0 : index
    %c32_23 = arith.constant 32 : index
    %22 = vector.load %arg15[%c0_22, %c32_23] : memref<16x1800xbf16, #tpu.memory_space<vmem>>, vector<16x1738xbf16>
    %c80 = arith.constant 80 : index
    %c0_24 = arith.constant 0 : index
    %23 = vector.load %arg16[%c80, %c0_24] : memref<144x1738xbf16, #tpu.memory_space<vmem>>, vector<16x1738xbf16>
    tpu.vector_store %arg16[%c80, %c0_24], %22 {strides = array<i32>} : memref<144x1738xbf16, #tpu.memory_space<vmem>>, vector<16x1738xbf16>,
    %c0_25 = arith.constant 0 : index
    %c60 = arith.constant 60 : index
    %24 = vector.load %arg15[%c0_25, %c60] : memref<16x1800xbf16, #tpu.memory_space<vmem>>, vector<16x1738xbf16>
    %c96 = arith.constant 96 : index
    %c0_26 = arith.constant 0 : index
    %25 = vector.load %arg16[%c96, %c0_26] : memref<144x1738xbf16, #tpu.memory_space<vmem>>, vector<16x1738xbf16>
    tpu.vector_store %arg16[%c96, %c0_26], %24 {strides = array<i32>} : memref<144x1738xbf16, #tpu.memory_space<vmem>>, vector<16x1738xbf16>,
    %c0_27 = arith.constant 0 : index
    %c61 = arith.constant 61 : index
    %26 = vector.load %arg15[%c0_27, %c61] : memref<16x1800xbf16, #tpu.memory_space<vmem>>, vector<16x1738xbf16>
    %c112 = arith.constant 112 : index
    %c0_28 = arith.constant 0 : index
    %27 = vector.load %arg16[%c112, %c0_28] : memref<144x1738xbf16, #tpu.memory_space<vmem>>, vector<16x1738xbf16>
    tpu.vector_store %arg16[%c112, %c0_28], %26 {strides = array<i32>} : memref<144x1738xbf16, #tpu.memory_space<vmem>>, vector<16x1738xbf16>,
    %c0_29 = arith.constant 0 : index
    %c62 = arith.constant 62 : index
    %28 = vector.load %arg15[%c0_29, %c62] : memref<16x1800xbf16, #tpu.memory_space<vmem>>, vector<16x1738xbf16>
    %c128 = arith.constant 128 : index
    %c0_30 = arith.constant 0 : index
    %29 = vector.load %arg16[%c128, %c0_30] : memref<144x1738xbf16, #tpu.memory_space<vmem>>, vector<16x1738xbf16>
    tpu.vector_store %arg16[%c128, %c0_30], %28 {strides = array<i32>} : memref<144x1738xbf16, #tpu.memory_space<vmem>>, vector<16x1738xbf16>,
    %c0_31 = arith.constant 0 : index
    %c0_32 = arith.constant 0 : index
    %30 = vector.load %arg5[%c0_31, %c0_32] : memref<16x144xbf16, #tpu.memory_space<vmem>>, vector<16x144xbf16>
    %c0_33 = arith.constant 0 : index
    %c0_34 = arith.constant 0 : index
    %31 = vector.load %arg16[%c0_33, %c0_34] : memref<144x1738xbf16, #tpu.memory_space<vmem>>, vector<144x1738xbf16>
    %cst_35 = arith.constant dense<0.000000e+00> : vector<16x1738xf32>
    %32 = tpu.matmul %30, %31, %cst_35 {dimension_numbers = #tpu.dot_dimension_numbers<[1], [0], [0], [1], [0, 0, 1, 1], [], []>} : vector<16x144xbf16>, vector<144x1738xbf16>, vector<16x1738xf32> -> vector<16x1738xf32>
    %c0_36 = arith.constant 0 : index
    %c0_37 = arith.constant 0 : index
    %33 = vector.load %arg6[%c0_36, %c0_37] : memref<16x1xf32, #tpu.memory_space<vmem>>, vector<16x1xf32>
    %34 = vector.broadcast %33 : vector<16x1xf32> to vector<16x1738xf32>
    %35 = arith.addf %32, %34 : vector<16x1738xf32>
    %cst_38 = arith.constant 0.000000e+00 : f32
    %36 = vector.broadcast %cst_38 : f32 to vector<16x1738xf32>
    %37 = arith.maximumf %35, %36 : vector<16x1738xf32>
    %38 = arith.truncf %37 : vector<16x1738xf32> to vector<16x1738xbf16>
    %c0_39 = arith.constant 0 : index
    %c0_40 = arith.constant 0 : index
    %39 = vector.load %arg17[%c0_39, %c0_40] : memref<16x1738xbf16, #tpu.memory_space<vmem>>, vector<16x1738xbf16>
    tpu.vector_store %arg17[%c0_39, %c0_40], %38 {strides = array<i32>} : memref<16x1738xbf16, #tpu.memory_space<vmem>>, vector<16x1738xbf16>,
    %cst_41 = arith.constant 0.000000e+00 : bf16
    %40 = vector.broadcast %cst_41 : bf16 to vector<16x546xbf16>
    %c0_42 = arith.constant 0 : index
    %c0_43 = arith.constant 0 : index
    %41 = vector.load %arg18[%c0_42, %c0_43] : memref<16x546xbf16, #tpu.memory_space<vmem>>, vector<16x546xbf16>
    tpu.vector_store %arg18[%c0_42, %c0_43], %40 {strides = array<i32>} : memref<16x546xbf16, #tpu.memory_space<vmem>>, vector<16x546xbf16>,
    %c0_44 = arith.constant 0 : index
    %c0_45 = arith.constant 0 : index
    %42 = vector.load %arg17[%c0_44, %c0_45] : memref<16x1738xbf16, #tpu.memory_space<vmem>>, vector<16x807xbf16>
    %c0_46 = arith.constant 0 : index
    %c1_47 = arith.constant 1 : index
    %43 = vector.load %arg17[%c0_46, %c1_47] : memref<16x1738xbf16, #tpu.memory_space<vmem>>, vector<16x807xbf16>
    %44 = arith.maximumf %42, %43 : vector<16x807xbf16>
    %c0_48 = arith.constant 0 : index
    %c30_49 = arith.constant 30 : index
    %45 = vector.load %arg17[%c0_48, %c30_49] : memref<16x1738xbf16, #tpu.memory_space<vmem>>, vector<16x807xbf16>
    %c0_50 = arith.constant 0 : index
    %c31_51 = arith.constant 31 : index
    %46 = vector.load %arg17[%c0_50, %c31_51] : memref<16x1738xbf16, #tpu.memory_space<vmem>>, vector<16x807xbf16>
    %47 = arith.maximumf %45, %46 : vector<16x807xbf16>
    %48 = arith.maximumf %44, %47 : vector<16x807xbf16>
    %c0_52 = arith.constant 0 : index
    %c0_53 = arith.constant 0 : index
    %49 = vector.load %arg7[%c0_52, %c0_53] : memref<807x256xbf16, #tpu.memory_space<vmem>>, vector<807x256xbf16>
    %cst_54 = arith.constant dense<0.000000e+00> : vector<16x256xf32>
    %50 = tpu.matmul %48, %49, %cst_54 {dimension_numbers = #tpu.dot_dimension_numbers<[1], [0], [0], [1], [0, 0, 1, 1], [], []>} : vector<16x807xbf16>, vector<807x256xbf16>, vector<16x256xf32> -> vector<16x256xf32>
    %51 = arith.truncf %50 : vector<16x256xf32> to vector<16x256xbf16>
    %c0_55 = arith.constant 0 : index
    %c17 = arith.constant 17 : index
    %52 = vector.load %arg18[%c0_55, %c17] : memref<16x546xbf16, #tpu.memory_space<vmem>>, vector<16x256xbf16>
    tpu.vector_store %arg18[%c0_55, %c17], %51 {strides = array<i32>} : memref<16x546xbf16, #tpu.memory_space<vmem>>, vector<16x256xbf16>,
    %c0_56 = arith.constant 0 : index
    %c900 = arith.constant 900 : index
    %53 = vector.load %arg17[%c0_56, %c900] : memref<16x1738xbf16, #tpu.memory_space<vmem>>, vector<16x807xbf16>
    %c0_57 = arith.constant 0 : index
    %c901 = arith.constant 901 : index
    %54 = vector.load %arg17[%c0_57, %c901] : memref<16x1738xbf16, #tpu.memory_space<vmem>>, vector<16x807xbf16>
    %55 = arith.maximumf %53, %54 : vector<16x807xbf16>
    %c0_58 = arith.constant 0 : index
    %c930 = arith.constant 930 : index
    %56 = vector.load %arg17[%c0_58, %c930] : memref<16x1738xbf16, #tpu.memory_space<vmem>>, vector<16x807xbf16>
    %c0_59 = arith.constant 0 : index
    %c931 = arith.constant 931 : index
    %57 = vector.load %arg17[%c0_59, %c931] : memref<16x1738xbf16, #tpu.memory_space<vmem>>, vector<16x807xbf16>
    %58 = arith.maximumf %56, %57 : vector<16x807xbf16>
    %59 = arith.maximumf %55, %58 : vector<16x807xbf16>
    %c0_60 = arith.constant 0 : index
    %c0_61 = arith.constant 0 : index
    %60 = vector.load %arg7[%c0_60, %c0_61] : memref<807x256xbf16, #tpu.memory_space<vmem>>, vector<807x256xbf16>
    %cst_62 = arith.constant dense<0.000000e+00> : vector<16x256xf32>
    %61 = tpu.matmul %59, %60, %cst_62 {dimension_numbers = #tpu.dot_dimension_numbers<[1], [0], [0], [1], [0, 0, 1, 1], [], []>} : vector<16x807xbf16>, vector<807x256xbf16>, vector<16x256xf32> -> vector<16x256xf32>
    %62 = arith.truncf %61 : vector<16x256xf32> to vector<16x256xbf16>
    %c0_63 = arith.constant 0 : index
    %c273 = arith.constant 273 : index
    %63 = vector.load %arg18[%c0_63, %c273] : memref<16x546xbf16, #tpu.memory_space<vmem>>, vector<16x256xbf16>
    tpu.vector_store %arg18[%c0_63, %c273], %62 {strides = array<i32>} : memref<16x546xbf16, #tpu.memory_space<vmem>>, vector<16x256xbf16>,
    %c0_64 = arith.constant 0 : index
    %c0_65 = arith.constant 0 : index
    %64 = vector.load %arg18[%c0_64, %c0_65] : memref<16x546xbf16, #tpu.memory_space<vmem>>, vector<16x512xbf16>
    %c0_66 = arith.constant 0 : index
    %c0_67 = arith.constant 0 : index
    %65 = vector.load %arg19[%c0_66, %c0_67] : memref<144x512xbf16, #tpu.memory_space<vmem>>, vector<16x512xbf16>
    tpu.vector_store %arg19[%c0_66, %c0_67], %64 {strides = array<i32>} : memref<144x512xbf16, #tpu.memory_space<vmem>>, vector<16x512xbf16>,
    %c0_68 = arith.constant 0 : index
    %c1_69 = arith.constant 1 : index
    %66 = vector.load %arg18[%c0_68, %c1_69] : memref<16x546xbf16, #tpu.memory_space<vmem>>, vector<16x512xbf16>
    %c16_70 = arith.constant 16 : index
    %c0_71 = arith.constant 0 : index
    %67 = vector.load %arg19[%c16_70, %c0_71] : memref<144x512xbf16, #tpu.memory_space<vmem>>, vector<16x512xbf16>
    tpu.vector_store %arg19[%c16_70, %c0_71], %66 {strides = array<i32>} : memref<144x512xbf16, #tpu.memory_space<vmem>>, vector<16x512xbf16>,
    %c0_72 = arith.constant 0 : index
    %c2_73 = arith.constant 2 : index
    %68 = vector.load %arg18[%c0_72, %c2_73] : memref<16x546xbf16, #tpu.memory_space<vmem>>, vector<16x512xbf16>
    %c32_74 = arith.constant 32 : index
    %c0_75 = arith.constant 0 : index
    %69 = vector.load %arg19[%c32_74, %c0_75] : memref<144x512xbf16, #tpu.memory_space<vmem>>, vector<16x512xbf16>
    tpu.vector_store %arg19[%c32_74, %c0_75], %68 {strides = array<i32>} : memref<144x512xbf16, #tpu.memory_space<vmem>>, vector<16x512xbf16>,
    %c0_76 = arith.constant 0 : index
    %c16_77 = arith.constant 16 : index
    %70 = vector.load %arg18[%c0_76, %c16_77] : memref<16x546xbf16, #tpu.memory_space<vmem>>, vector<16x512xbf16>
    %c48_78 = arith.constant 48 : index
    %c0_79 = arith.constant 0 : index
    %71 = vector.load %arg19[%c48_78, %c0_79] : memref<144x512xbf16, #tpu.memory_space<vmem>>, vector<16x512xbf16>
    tpu.vector_store %arg19[%c48_78, %c0_79], %70 {strides = array<i32>} : memref<144x512xbf16, #tpu.memory_space<vmem>>, vector<16x512xbf16>,
    %c0_80 = arith.constant 0 : index
    %c17_81 = arith.constant 17 : index
    %72 = vector.load %arg18[%c0_80, %c17_81] : memref<16x546xbf16, #tpu.memory_space<vmem>>, vector<16x512xbf16>
    %c64_82 = arith.constant 64 : index
    %c0_83 = arith.constant 0 : index
    %73 = vector.load %arg19[%c64_82, %c0_83] : memref<144x512xbf16, #tpu.memory_space<vmem>>, vector<16x512xbf16>
    tpu.vector_store %arg19[%c64_82, %c0_83], %72 {strides = array<i32>} : memref<144x512xbf16, #tpu.memory_space<vmem>>, vector<16x512xbf16>,
    %c0_84 = arith.constant 0 : index
    %c18 = arith.constant 18 : index
    %74 = vector.load %arg18[%c0_84, %c18] : memref<16x546xbf16, #tpu.memory_space<vmem>>, vector<16x512xbf16>
    %c80_85 = arith.constant 80 : index
    %c0_86 = arith.constant 0 : index
    %75 = vector.load %arg19[%c80_85, %c0_86] : memref<144x512xbf16, #tpu.memory_space<vmem>>, vector<16x512xbf16>
    tpu.vector_store %arg19[%c80_85, %c0_86], %74 {strides = array<i32>} : memref<144x512xbf16, #tpu.memory_space<vmem>>, vector<16x512xbf16>,
    %c0_87 = arith.constant 0 : index
    %c32_88 = arith.constant 32 : index
    %76 = vector.load %arg18[%c0_87, %c32_88] : memref<16x546xbf16, #tpu.memory_space<vmem>>, vector<16x512xbf16>
    %c96_89 = arith.constant 96 : index
    %c0_90 = arith.constant 0 : index
    %77 = vector.load %arg19[%c96_89, %c0_90] : memref<144x512xbf16, #tpu.memory_space<vmem>>, vector<16x512xbf16>
    tpu.vector_store %arg19[%c96_89, %c0_90], %76 {strides = array<i32>} : memref<144x512xbf16, #tpu.memory_space<vmem>>, vector<16x512xbf16>,
    %c0_91 = arith.constant 0 : index
    %c33 = arith.constant 33 : index
    %78 = vector.load %arg18[%c0_91, %c33] : memref<16x546xbf16, #tpu.memory_space<vmem>>, vector<16x512xbf16>
    %c112_92 = arith.constant 112 : index
    %c0_93 = arith.constant 0 : index
    %79 = vector.load %arg19[%c112_92, %c0_93] : memref<144x512xbf16, #tpu.memory_space<vmem>>, vector<16x512xbf16>
    tpu.vector_store %arg19[%c112_92, %c0_93], %78 {strides = array<i32>} : memref<144x512xbf16, #tpu.memory_space<vmem>>, vector<16x512xbf16>,
    %c0_94 = arith.constant 0 : index
    %c34 = arith.constant 34 : index
    %80 = vector.load %arg18[%c0_94, %c34] : memref<16x546xbf16, #tpu.memory_space<vmem>>, vector<16x512xbf16>
    %c128_95 = arith.constant 128 : index
    %c0_96 = arith.constant 0 : index
    %81 = vector.load %arg19[%c128_95, %c0_96] : memref<144x512xbf16, #tpu.memory_space<vmem>>, vector<16x512xbf16>
    tpu.vector_store %arg19[%c128_95, %c0_96], %80 {strides = array<i32>} : memref<144x512xbf16, #tpu.memory_space<vmem>>, vector<16x512xbf16>,
    %c0_97 = arith.constant 0 : index
    %c0_98 = arith.constant 0 : index
    %82 = vector.load %arg8[%c0_97, %c0_98] : memref<32x144xbf16, #tpu.memory_space<vmem>>, vector<32x144xbf16>
    %c0_99 = arith.constant 0 : index
    %c0_100 = arith.constant 0 : index
    %83 = vector.load %arg19[%c0_99, %c0_100] : memref<144x512xbf16, #tpu.memory_space<vmem>>, vector<144x512xbf16>
    %cst_101 = arith.constant dense<0.000000e+00> : vector<32x512xf32>
    %84 = tpu.matmul %82, %83, %cst_101 {dimension_numbers = #tpu.dot_dimension_numbers<[1], [0], [0], [1], [0, 0, 1, 1], [], []>} : vector<32x144xbf16>, vector<144x512xbf16>, vector<32x512xf32> -> vector<32x512xf32>
    %c0_102 = arith.constant 0 : index
    %c0_103 = arith.constant 0 : index
    %85 = vector.load %arg9[%c0_102, %c0_103] : memref<32x1xf32, #tpu.memory_space<vmem>>, vector<32x1xf32>
    %86 = vector.broadcast %85 : vector<32x1xf32> to vector<32x512xf32>
    %87 = arith.addf %84, %86 : vector<32x512xf32>
    %c0_104 = arith.constant 0 : index
    %c0_105 = arith.constant 0 : index
    %88 = vector.load %arg10[%c0_104, %c0_105] : memref<1x512xf32, #tpu.memory_space<vmem>>, vector<1x512xf32>
    %89 = vector.broadcast %88 : vector<1x512xf32> to vector<32x512xf32>
    %90 = arith.mulf %87, %89 : vector<32x512xf32>
    %91 = arith.truncf %90 : vector<32x512xf32> to vector<32x512xbf16>
    %c0_106 = arith.constant 0 : index
    %c0_107 = arith.constant 0 : index
    %92 = vector.load %arg20[%c0_106, %c0_107] : memref<32x512xbf16, #tpu.memory_space<vmem>>, vector<32x512xbf16>
    tpu.vector_store %arg20[%c0_106, %c0_107], %91 {strides = array<i32>} : memref<32x512xbf16, #tpu.memory_space<vmem>>, vector<32x512xbf16>,
    %c0_108 = arith.constant 0 : index
    %c0_109 = arith.constant 0 : index
    %93 = vector.load %arg20[%c0_108, %c0_109] : memref<32x512xbf16, #tpu.memory_space<vmem>>, vector<32x478xbf16>
    %c0_110 = arith.constant 0 : index
    %c0_111 = arith.constant 0 : index
    %94 = vector.load %arg21[%c0_110, %c0_111] : memref<288x478xbf16, #tpu.memory_space<vmem>>, vector<32x478xbf16>
    tpu.vector_store %arg21[%c0_110, %c0_111], %93 {strides = array<i32>} : memref<288x478xbf16, #tpu.memory_space<vmem>>, vector<32x478xbf16>,
    %c0_112 = arith.constant 0 : index
    %c1_113 = arith.constant 1 : index
    %95 = vector.load %arg20[%c0_112, %c1_113] : memref<32x512xbf16, #tpu.memory_space<vmem>>, vector<32x478xbf16>
    %c32_114 = arith.constant 32 : index
    %c0_115 = arith.constant 0 : index
    %96 = vector.load %arg21[%c32_114, %c0_115] : memref<288x478xbf16, #tpu.memory_space<vmem>>, vector<32x478xbf16>
    tpu.vector_store %arg21[%c32_114, %c0_115], %95 {strides = array<i32>} : memref<288x478xbf16, #tpu.memory_space<vmem>>, vector<32x478xbf16>,
    %c0_116 = arith.constant 0 : index
    %c2_117 = arith.constant 2 : index
    %97 = vector.load %arg20[%c0_116, %c2_117] : memref<32x512xbf16, #tpu.memory_space<vmem>>, vector<32x478xbf16>
    %c64_118 = arith.constant 64 : index
    %c0_119 = arith.constant 0 : index
    %98 = vector.load %arg21[%c64_118, %c0_119] : memref<288x478xbf16, #tpu.memory_space<vmem>>, vector<32x478xbf16>
    tpu.vector_store %arg21[%c64_118, %c0_119], %97 {strides = array<i32>} : memref<288x478xbf16, #tpu.memory_space<vmem>>, vector<32x478xbf16>,
    %c0_120 = arith.constant 0 : index
    %c16_121 = arith.constant 16 : index
    %99 = vector.load %arg20[%c0_120, %c16_121] : memref<32x512xbf16, #tpu.memory_space<vmem>>, vector<32x478xbf16>
    %c96_122 = arith.constant 96 : index
    %c0_123 = arith.constant 0 : index
    %100 = vector.load %arg21[%c96_122, %c0_123] : memref<288x478xbf16, #tpu.memory_space<vmem>>, vector<32x478xbf16>
    tpu.vector_store %arg21[%c96_122, %c0_123], %99 {strides = array<i32>} : memref<288x478xbf16, #tpu.memory_space<vmem>>, vector<32x478xbf16>,
    %c0_124 = arith.constant 0 : index
    %c17_125 = arith.constant 17 : index
    %101 = vector.load %arg20[%c0_124, %c17_125] : memref<32x512xbf16, #tpu.memory_space<vmem>>, vector<32x478xbf16>
    %c128_126 = arith.constant 128 : index
    %c0_127 = arith.constant 0 : index
    %102 = vector.load %arg21[%c128_126, %c0_127] : memref<288x478xbf16, #tpu.memory_space<vmem>>, vector<32x478xbf16>
    tpu.vector_store %arg21[%c128_126, %c0_127], %101 {strides = array<i32>} : memref<288x478xbf16, #tpu.memory_space<vmem>>, vector<32x478xbf16>,
    %c0_128 = arith.constant 0 : index
    %c18_129 = arith.constant 18 : index
    %103 = vector.load %arg20[%c0_128, %c18_129] : memref<32x512xbf16, #tpu.memory_space<vmem>>, vector<32x478xbf16>
    %c160 = arith.constant 160 : index
    %c0_130 = arith.constant 0 : index
    %104 = vector.load %arg21[%c160, %c0_130] : memref<288x478xbf16, #tpu.memory_space<vmem>>, vector<32x478xbf16>
    tpu.vector_store %arg21[%c160, %c0_130], %103 {strides = array<i32>} : memref<288x478xbf16, #tpu.memory_space<vmem>>, vector<32x478xbf16>,
    %c0_131 = arith.constant 0 : index
    %c32_132 = arith.constant 32 : index
    %105 = vector.load %arg20[%c0_131, %c32_132] : memref<32x512xbf16, #tpu.memory_space<vmem>>, vector<32x478xbf16>
    %c192 = arith.constant 192 : index
    %c0_133 = arith.constant 0 : index
    %106 = vector.load %arg21[%c192, %c0_133] : memref<288x478xbf16, #tpu.memory_space<vmem>>, vector<32x478xbf16>
    tpu.vector_store %arg21[%c192, %c0_133], %105 {strides = array<i32>} : memref<288x478xbf16, #tpu.memory_space<vmem>>, vector<32x478xbf16>,
    %c0_134 = arith.constant 0 : index
    %c33_135 = arith.constant 33 : index
    %107 = vector.load %arg20[%c0_134, %c33_135] : memref<32x512xbf16, #tpu.memory_space<vmem>>, vector<32x478xbf16>
    %c224 = arith.constant 224 : index
    %c0_136 = arith.constant 0 : index
    %108 = vector.load %arg21[%c224, %c0_136] : memref<288x478xbf16, #tpu.memory_space<vmem>>, vector<32x478xbf16>
    tpu.vector_store %arg21[%c224, %c0_136], %107 {strides = array<i32>} : memref<288x478xbf16, #tpu.memory_space<vmem>>, vector<32x478xbf16>,
    %c0_137 = arith.constant 0 : index
    %c34_138 = arith.constant 34 : index
    %109 = vector.load %arg20[%c0_137, %c34_138] : memref<32x512xbf16, #tpu.memory_space<vmem>>, vector<32x478xbf16>
    %c256 = arith.constant 256 : index
    %c0_139 = arith.constant 0 : index
    %110 = vector.load %arg21[%c256, %c0_139] : memref<288x478xbf16, #tpu.memory_space<vmem>>, vector<32x478xbf16>
    tpu.vector_store %arg21[%c256, %c0_139], %109 {strides = array<i32>} : memref<288x478xbf16, #tpu.memory_space<vmem>>, vector<32x478xbf16>,
    %c0_140 = arith.constant 0 : index
    %c0_141 = arith.constant 0 : index
    %111 = vector.load %arg11[%c0_140, %c0_141] : memref<32x288xbf16, #tpu.memory_space<vmem>>, vector<32x288xbf16>
    %c0_142 = arith.constant 0 : index
    %c0_143 = arith.constant 0 : index
    %112 = vector.load %arg21[%c0_142, %c0_143] : memref<288x478xbf16, #tpu.memory_space<vmem>>, vector<288x478xbf16>
    %cst_144 = arith.constant dense<0.000000e+00> : vector<32x478xf32>
    %113 = tpu.matmul %111, %112, %cst_144 {dimension_numbers = #tpu.dot_dimension_numbers<[1], [0], [0], [1], [0, 0, 1, 1], [], []>} : vector<32x288xbf16>, vector<288x478xbf16>, vector<32x478xf32> -> vector<32x478xf32>
    %c0_145 = arith.constant 0 : index
    %c0_146 = arith.constant 0 : index
    %114 = vector.load %arg12[%c0_145, %c0_146] : memref<32x1xf32, #tpu.memory_space<vmem>>, vector<32x1xf32>
    %115 = vector.broadcast %114 : vector<32x1xf32> to vector<32x478xf32>
    %116 = arith.addf %113, %115 : vector<32x478xf32>
    %cst_147 = arith.constant 0.000000e+00 : f32
    %117 = vector.broadcast %cst_147 : f32 to vector<32x478xf32>
    %118 = arith.maximumf %116, %117 : vector<32x478xf32>
    %119 = arith.truncf %118 : vector<32x478xf32> to vector<32x478xbf16>
    %c0_148 = arith.constant 0 : index
    %c0_149 = arith.constant 0 : index
    %120 = vector.load %arg22[%c0_148, %c0_149] : memref<32x478xbf16, #tpu.memory_space<vmem>>, vector<32x478xbf16>
    tpu.vector_store %arg22[%c0_148, %c0_149], %119 {strides = array<i32>} : memref<32x478xbf16, #tpu.memory_space<vmem>>, vector<32x478xbf16>,
    %c0_150 = arith.constant 0 : index
    %c0_151 = arith.constant 0 : index
    %121 = vector.load %arg22[%c0_150, %c0_151] : memref<32x478xbf16, #tpu.memory_space<vmem>>, vector<32x205xbf16>
    %c0_152 = arith.constant 0 : index
    %c1_153 = arith.constant 1 : index
    %122 = vector.load %arg22[%c0_152, %c1_153] : memref<32x478xbf16, #tpu.memory_space<vmem>>, vector<32x205xbf16>
    %123 = arith.maximumf %121, %122 : vector<32x205xbf16>
    %c0_154 = arith.constant 0 : index
    %c16_155 = arith.constant 16 : index
    %124 = vector.load %arg22[%c0_154, %c16_155] : memref<32x478xbf16, #tpu.memory_space<vmem>>, vector<32x205xbf16>
    %c0_156 = arith.constant 0 : index
    %c17_157 = arith.constant 17 : index
    %125 = vector.load %arg22[%c0_156, %c17_157] : memref<32x478xbf16, #tpu.memory_space<vmem>>, vector<32x205xbf16>
    %126 = arith.maximumf %124, %125 : vector<32x205xbf16>
    %127 = arith.maximumf %123, %126 : vector<32x205xbf16>
    %c0_158 = arith.constant 0 : index
    %c0_159 = arith.constant 0 : index
    %128 = vector.load %arg13[%c0_158, %c0_159] : memref<205x64xbf16, #tpu.memory_space<vmem>>, vector<205x64xbf16>
    %cst_160 = arith.constant dense<0.000000e+00> : vector<32x64xf32>
    %129 = tpu.matmul %127, %128, %cst_160 {dimension_numbers = #tpu.dot_dimension_numbers<[1], [0], [0], [1], [0, 0, 1, 1], [], []>} : vector<32x205xbf16>, vector<205x64xbf16>, vector<32x64xf32> -> vector<32x64xf32>
    %130 = arith.truncf %129 : vector<32x64xf32> to vector<32x64xbf16>
    %c0_161 = arith.constant 0 : index
    %c0_162 = arith.constant 0 : index
    %c0_163 = arith.constant 0 : index
    %131 = vector.load %arg14[%c0_161, %c0_162, %c0_163] : memref<1x64x64xbf16, #tpu.memory_space<vmem>>, vector<1x32x64xbf16>
    %132 = vector.shape_cast %131 : vector<1x32x64xbf16> to vector<32x64xbf16>
    %133 = vector.shape_cast %130 : vector<32x64xbf16> to vector<1x32x64xbf16>
    tpu.vector_store %arg14[%c0_161, %c0_162, %c0_163], %133 {strides = array<i32>} : memref<1x64x64xbf16, #tpu.memory_space<vmem>>, vector<1x32x64xbf16>,
    %c0_164 = arith.constant 0 : index
    %c256_165 = arith.constant 256 : index
    %134 = vector.load %arg22[%c0_164, %c256_165] : memref<32x478xbf16, #tpu.memory_space<vmem>>, vector<32x205xbf16>
    %c0_166 = arith.constant 0 : index
    %c257 = arith.constant 257 : index
    %135 = vector.load %arg22[%c0_166, %c257] : memref<32x478xbf16, #tpu.memory_space<vmem>>, vector<32x205xbf16>
    %136 = arith.maximumf %134, %135 : vector<32x205xbf16>
    %c0_167 = arith.constant 0 : index
    %c272 = arith.constant 272 : index
    %137 = vector.load %arg22[%c0_167, %c272] : memref<32x478xbf16, #tpu.memory_space<vmem>>, vector<32x205xbf16>
    %c0_168 = arith.constant 0 : index
    %c273_169 = arith.constant 273 : index
    %138 = vector.load %arg22[%c0_168, %c273_169] : memref<32x478xbf16, #tpu.memory_space<vmem>>, vector<32x205xbf16>
    %139 = arith.maximumf %137, %138 : vector<32x205xbf16>
    %140 = arith.maximumf %136, %139 : vector<32x205xbf16>
    %c0_170 = arith.constant 0 : index
    %c0_171 = arith.constant 0 : index
    %141 = vector.load %arg13[%c0_170, %c0_171] : memref<205x64xbf16, #tpu.memory_space<vmem>>, vector<205x64xbf16>
    %cst_172 = arith.constant dense<0.000000e+00> : vector<32x64xf32>
    %142 = tpu.matmul %140, %141, %cst_172 {dimension_numbers = #tpu.dot_dimension_numbers<[1], [0], [0], [1], [0, 0, 1, 1], [], []>} : vector<32x205xbf16>, vector<205x64xbf16>, vector<32x64xf32> -> vector<32x64xf32>
    %143 = arith.truncf %142 : vector<32x64xf32> to vector<32x64xbf16>
    %c0_173 = arith.constant 0 : index
    %c32_174 = arith.constant 32 : index
    %c0_175 = arith.constant 0 : index
    %144 = vector.load %arg14[%c0_173, %c32_174, %c0_175] : memref<1x64x64xbf16, #tpu.memory_space<vmem>>, vector<1x32x64xbf16>
    %145 = vector.shape_cast %144 : vector<1x32x64xbf16> to vector<32x64xbf16>
    %146 = vector.shape_cast %143 : vector<32x64xbf16> to vector<1x32x64xbf16>
    tpu.vector_store %arg14[%c0_173, %c32_174, %c0_175], %146 {strides = array<i32>} : memref<1x64x64xbf16, #tpu.memory_space<vmem>>, vector<1x32x64xbf16>,
    return
  }
  func.func @transform_0(%arg0: i32) -> (i32, i32, i32) {
    %c0_i32 = arith.constant 0 : i32
    %c0_i32_0 = arith.constant 0 : i32
    %c0_i32_1 = arith.constant 0 : i32
    return %arg0, %c0_i32, %c0_i32_0 : i32, i32, i32
  }
  func.func @transform_1(%arg0: i32) -> (i32, i32) {
    %c0_i32 = arith.constant 0 : i32
    %c0_i32_0 = arith.constant 0 : i32
    %c0_i32_1 = arith.constant 0 : i32
    return %c0_i32, %c0_i32_0 : i32, i32
  }
  func.func @transform_2(%arg0: i32) -> (i32, i32) {
    %c0_i32 = arith.constant 0 : i32
    %c0_i32_0 = arith.constant 0 : i32
    %c0_i32_1 = arith.constant 0 : i32
    return %c0_i32, %c0_i32_0 : i32, i32
  }
  func.func @transform_3(%arg0: i32) -> (i32, i32) {
    %c0_i32 = arith.constant 0 : i32
    %c0_i32_0 = arith.constant 0 : i32
    %c0_i32_1 = arith.constant 0 : i32
    return %c0_i32, %c0_i32_0 : i32, i32
  }
  func.func @transform_4(%arg0: i32) -> (i32, i32) {
    %c0_i32 = arith.constant 0 : i32
    %c0_i32_0 = arith.constant 0 : i32
    %c0_i32_1 = arith.constant 0 : i32
    return %c0_i32, %c0_i32_0 : i32, i32
  }
  func.func @transform_5(%arg0: i32) -> (i32, i32) {
    %c0_i32 = arith.constant 0 : i32
    %c0_i32_0 = arith.constant 0 : i32
    %c0_i32_1 = arith.constant 0 : i32
    return %c0_i32, %c0_i32_0 : i32, i32
  }
  func.func @transform_6(%arg0: i32) -> (i32, i32) {
    %c0_i32 = arith.constant 0 : i32
    %c0_i32_0 = arith.constant 0 : i32
    %c0_i32_1 = arith.constant 0 : i32
    return %c0_i32, %c0_i32_0 : i32, i32
  }
  func.func @transform_7(%arg0: i32) -> (i32, i32) {
    %c0_i32 = arith.constant 0 : i32
    %c0_i32_0 = arith.constant 0 : i32
    %c0_i32_1 = arith.constant 0 : i32
    return %c0_i32, %c0_i32_0 : i32, i32
  }
  func.func @transform_8(%arg0: i32) -> (i32, i32) {
    %c0_i32 = arith.constant 0 : i32
    %c0_i32_0 = arith.constant 0 : i32
    %c0_i32_1 = arith.constant 0 : i32
    return %c0_i32, %c0_i32_0 : i32, i32
  }
  func.func @transform_9(%arg0: i32) -> (i32, i32) {
    %c0_i32 = arith.constant 0 : i32
    %c0_i32_0 = arith.constant 0 : i32
    %c0_i32_1 = arith.constant 0 : i32
    return %c0_i32, %c0_i32_0 : i32, i32
  }
  func.func @transform_10(%arg0: i32) -> (i32, i32) {
    %c0_i32 = arith.constant 0 : i32
    %c0_i32_0 = arith.constant 0 : i32
    %c0_i32_1 = arith.constant 0 : i32
    return %c0_i32, %c0_i32_0 : i32, i32
  }
  func.func @transform_11(%arg0: i32) -> (i32, i32) {
    %c0_i32 = arith.constant 0 : i32
    %c0_i32_0 = arith.constant 0 : i32
    %c0_i32_1 = arith.constant 0 : i32
    return %c0_i32, %c0_i32_0 : i32, i32
  }
  func.func @transform_12(%arg0: i32) -> (i32, i32) {
    %c0_i32 = arith.constant 0 : i32
    %c0_i32_0 = arith.constant 0 : i32
    %c0_i32_1 = arith.constant 0 : i32
    return %c0_i32, %c0_i32_0 : i32, i32
  }
  func.func @transform_13(%arg0: i32) -> (i32, i32, i32) {
    %c0_i32 = arith.constant 0 : i32
    %c0_i32_0 = arith.constant 0 : i32
    %c0_i32_1 = arith.constant 0 : i32
    return %arg0, %c0_i32, %c0_i32_0 : i32, i32, i32
  }
}

</mosaic_0001>

<bundles_post_ra>
// kernel: vgg_like_forward.3
= control target key start
LH: loop header
LB: loop body
LE: loop exit
PB: predicated region body
PF: predicated region fallthrough
CT: control target
= control target key end

     0   :  { %10 = vsyncpa [#allocation3], 0  ;;  %s6090_s0 = inlined_call_operand.vmem [shape: bf16[2,2048], index: 0, kind: input, shape index: {}]   ;;  %s6091_s1 = inlined_call_operand.hbm [shape: bf16[2048,512], index: 1, kind: input, shape index: {}]   ;;  %s6092_s2 = inlined_call_operand.hbm [shape: f32[1,512], index: 2, kind: input, shape index: {}]   ;;  %s6093_s3 = inlined_call_operand.hbm [shape: bf16[512,128], index: 3, kind: input, shape index: {}]   ;;  %s6094_s4 = inlined_call_operand.hbm [shape: f32[1,128], index: 4, kind: input, shape index: {}]   ;;  %s6095_s5 = inlined_call_operand.hbm [shape: f32[2,128], index: 5, kind: output, shape index: {}]  }
   0x1   :  { %11 = vsyncpa [#allocation6], 0 }
   0x2   :  { %12 = vsyncpa [#allocation9], 0 }
   0x3   :  { %13 = vsyncpa [#allocation4], 0  ;;  %s5889_s18 = smov [#allocation5]   ;;  %s5890_s20 = smov [#allocation2]  }
   0x4   :  { %s34_s19 = sshll.u32 %s5889_s18, 4  ;;  %s21_s21 = sshll.u32 %s5890_s20, 4  ;;  %s35_s19 = int_to_ptr.vmem [resolvable:$true] %s34_s19  ;;  %s5929_s21 = int_to_ptr.vmem [resolvable:$true] %s21_s21 }
   0x5   :  { %s5771_s24 = scalar_lea.hbm %s6092_s2, 64 }
   0x6   :  { %p5772_p0 = scmp.ne.s32.totalorder %s6092_s2, %s5771_s24  ;;  %p5775_p1 = scmp.lt.u32.totalorder %s5771_s24, %s6092_s2 }
   0x8   :  { %p5777_p2 = pnand %p5775_p1, %p5772_p0 }
   0xa   :  { %5780 = shalt.err (!%p5777_p2)
}
   0xb   :  { %s5781_s29 = scalar_lea.vmem %s35_s19, 64  ;;  %p5786_p4 = scmp.lt.s32.totalorder %s35_s19, %s35_s19 }
   0xc   :  { %p5782_p3 = scmp.ne.s32.totalorder %s35_s19, %s5781_s29  ;;  %p5787_p5 = scmp.lt.s32.totalorder %s5781_s29, %s5781_s29 }
   0xe   :  { %p5788_p6 = por %p5787_p5, %p5786_p4 }
  0x10   :  { %p5789_p7 = pnand %p5788_p6, %p5782_p3 }
  0x12   :  { %5792 = shalt.err (!%p5789_p7)
}
  0x13   :  { %37 = dma.hbm_to_vmem [thread:$0]  %s6092_s2, 64, %s35_s19, [#allocation6]  }
  0x14   :  { %s5793_s9 = scalar_lea.hbm %s6091_s1, 65536 }
  0x15   :  { %p5794_p8 = scmp.ne.s32.totalorder %s6091_s1, %s5793_s9  ;;  %p5797_p9 = scmp.lt.u32.totalorder %s5793_s9, %s6091_s1 }
  0x17   :  { %p5799_p10 = pnand %p5797_p9, %p5794_p8 }
  0x19   :  { %5802 = shalt.err (!%p5799_p10)
}
  0x1a   :  { %s5803_s14 = scalar_lea.vmem %s5929_s21, 65536  ;;  %p5808_p12 = scmp.lt.s32.totalorder %s5929_s21, %s5929_s21 }
  0x1b   :  { %p5804_p11 = scmp.ne.s32.totalorder %s5929_s21, %s5803_s14  ;;  %p5809_p13 = scmp.lt.s32.totalorder %s5803_s14, %s5803_s14 }
  0x1d   :  { %p5810_p0 = por %p5809_p13, %p5808_p12 }
  0x1f   :  { %p5811_p1 = pnand %p5810_p0, %p5804_p11 }
  0x21   :  { %5814 = shalt.err (!%p5811_p1)
}
  0x22   :  { %s5891_s2 = smov 256   ;;  %s5892_s15 = smov 16  }
  0x23   :  { %27 = dma.hbm_to_vmem [thread:$0]  %s6091_s1, 65536, %s5929_s21, [#allocation3], %s5891_s2, %s5891_s2, %s5892_s15  }
  0x24   :  { %s5893_s18 = smov [#allocation7]   ;;  %s5815_s23 = scalar_lea.hbm %s6093_s3, 4096 }
  0x25   :  { %s43_s19 = sshll.u32 %s5893_s18, 4  ;;  %p5816_p2 = scmp.ne.s32.totalorder %s6093_s3, %s5815_s23  ;;  %s44_s19 = int_to_ptr.vmem [resolvable:$true] %s43_s19 }
  0x26   :  { %p5819_p3 = scmp.lt.u32.totalorder %s5815_s23, %s6093_s3 }
  0x28   :  { %p5821_p4 = pnand %p5819_p3, %p5816_p2 }
  0x2a   :  { %5824 = shalt.err (!%p5821_p4)
}
  0x2b   :  { %s5825_s28 = scalar_lea.vmem %s44_s19, 4096  ;;  %p5830_p6 = scmp.lt.s32.totalorder %s44_s19, %s44_s19 }
  0x2c   :  { %p5826_p5 = scmp.ne.s32.totalorder %s44_s19, %s5825_s28  ;;  %p5831_p7 = scmp.lt.s32.totalorder %s5825_s28, %s5825_s28 }
  0x2e   :  { %p5832_p8 = por %p5831_p7, %p5830_p6 }
  0x30   :  { %p5833_p9 = pnand %p5832_p8, %p5826_p5 }
  0x32   :  { %5836 = shalt.err (!%p5833_p9)
}
  0x33   :  { %s5894_s1 = smov 64   ;;  %s5895_s21 = smov 4  }
  0x34   :  { %49 = dma.hbm_to_vmem [thread:$0]  %s6093_s3, 4096, %s44_s19, [#allocation6], %s5894_s1, %s5894_s1, %s5895_s21  }
  0x35   :  { %s5896_s6 = smov [#allocation8]   ;;  %s5837_s10 = scalar_lea.hbm %s6094_s4, 16 }
  0x36   :  { %s56_s7 = sshll.u32 %s5896_s6, 4  ;;  %p5838_p10 = scmp.ne.s32.totalorder %s6094_s4, %s5837_s10  ;;  %s57_s7 = int_to_ptr.vmem [resolvable:$true] %s56_s7 }
  0x37   :  { %p5841_p11 = scmp.lt.u32.totalorder %s5837_s10, %s6094_s4 }
  0x39   :  { %p5843_p12 = pnand %p5841_p11, %p5838_p10 }
  0x3b   :  { %5846 = shalt.err (!%p5843_p12)
}
  0x3c   :  { %s5847_s2 = scalar_lea.vmem %s57_s7, 16  ;;  %s5851_s3 = scalar_lea.vmem %s57_s7, 32 }
  0x3d   :  { %p5848_p13 = scmp.ne.s32.totalorder %s57_s7, %s5847_s2  ;;  %p5852_p0 = scmp.lt.s32.totalorder %s57_s7, %s57_s7 }
  0x3e   :  { %p5853_p1 = scmp.lt.s32.totalorder %s5851_s3, %s5847_s2 }
  0x40   :  { %p5854_p2 = por %p5853_p1, %p5852_p0 }
  0x42   :  { %p5855_p3 = pnand %p5854_p2, %p5848_p13 }
  0x44   :  { %5858 = shalt.err (!%p5855_p3)
}
  0x45   :  { %59 = dma.hbm_to_vmem [thread:$0]  %s6094_s4, 16, %s57_s7, [#allocation9]  }
  0x46   :  { %5881 = dma.done.wait [#allocation3], 65536  }
  0x47   :  { %5882 = vsyncadd [#allocation3], 4294901760 }
  0x48   :  { %5883 = dma.done.wait [#allocation6], 4160  }
  0x49   :  { %5884 = vsyncadd [#allocation6], 4294963136 }
  0x4a   :  { %5885 = dma.done.wait [#allocation9], 16  }
  0x4b   :  { %5886 = vsyncadd [#allocation9], 4294967280  ;;  %v4969_v0 = vld [vmem:[#allocation2 + $0x4] ss:$16 sps:$4 sm:$0xff]   ;;  %v4971_v1 = vld [vmem:[#allocation2 + $0xc] ss:$16 sps:$4 sm:$0xff]   ;;  %v589_v36 = vlaneseq }
  0x4c   :  { %3285 = vmatprep.subr.bf16.mxu0 %v4969_v0  ;;  %v4973_v2 = vld [vmem:[#allocation2] ss:$16 sps:$4 sm:$0xff]   ;;  %v4974_v3 = vld [vmem:[#allocation2 + $0x8] ss:$16 sps:$4 sm:$0xff]   ;;  %3613 = vmatprep.subr.bf16.mxu1 %v4971_v1  ;;  %v4975_v4 = vld [vmem:[#allocation2 + $0x24] ss:$16 sps:$4 sm:$0xff]  }
  0x4d   :  { %3286 = vmatpush1.bf16.msra.mxu0 %v4973_v2  ;;  %3614 = vmatpush1.bf16.msra.mxu1 %v4974_v3  ;;  %v4977_v5 = vld [vmem:[#allocation2 + $0x2c] ss:$16 sps:$4 sm:$0xff]   ;;  %v4979_v6 = vld [vmem:[#allocation2 + $0x20] ss:$16 sps:$4 sm:$0xff]   ;;  %v4980_v7 = vld [vmem:[#allocation2 + $0x28] ss:$16 sps:$4 sm:$0xff]  }
  0x4e   :  { %3287 = vmatprep.subr.bf16.mxu0 %v4975_v4  ;;  %3615 = vmatprep.subr.bf16.mxu1 %v4977_v5  ;;  %v4981_v8 = vld [vmem:[#allocation2 + $0x44] ss:$16 sps:$4 sm:$0xff]   ;;  %v4983_v9 = vld [vmem:[#allocation2 + $0x4c] ss:$16 sps:$4 sm:$0xff]   ;;  %v4985_v10 = vld [vmem:[#allocation2 + $0x40] ss:$16 sps:$4 sm:$0xff]  }
  0x4f   :  { %v4986_v11 = vld [vmem:[#allocation2 + $0x48] ss:$16 sps:$4 sm:$0xff]   ;;  %v4987_v12 = vld [vmem:[#allocation2 + $0x64] ss:$16 sps:$4 sm:$0xff]   ;;  %v4989_v13 = vld [vmem:[#allocation2 + $0x6c] ss:$16 sps:$4 sm:$0xff]  }
  0x50   :  { %v4991_v14 = vld [vmem:[#allocation2 + $0x60] ss:$16 sps:$4 sm:$0xff]   ;;  %v4992_v15 = vld [vmem:[#allocation2 + $0x68] ss:$16 sps:$4 sm:$0xff]   ;;  %v4993_v16 = vld [vmem:[#allocation2 + $0x84] ss:$16 sps:$4 sm:$0xff]  }
  0x51   :  { %3288 = vmatpush1.bf16.msra.mxu0 %v4979_v6  ;;  %3616 = vmatpush1.bf16.msra.mxu1 %v4980_v7  ;;  %v4995_v17 = vld [vmem:[#allocation2 + $0x8c] ss:$16 sps:$4 sm:$0xff]   ;;  %v4997_v18 = vld [vmem:[#allocation2 + $0x80] ss:$16 sps:$4 sm:$0xff]   ;;  %v4998_v19 = vld [vmem:[#allocation2 + $0x88] ss:$16 sps:$4 sm:$0xff]  }
  0x52   :  { %3289 = vmatprep.subr.bf16.mxu0 %v4981_v8  ;;  %3617 = vmatprep.subr.bf16.mxu1 %v4983_v9  ;;  %v4999_v20 = vld [vmem:[#allocation2 + $0xa4] ss:$16 sps:$4 sm:$0xff]   ;;  %v5001_v21 = vld [vmem:[#allocation2 + $0xac] ss:$16 sps:$4 sm:$0xff]   ;;  %v5003_v22 = vld [vmem:[#allocation2 + $0xa0] ss:$16 sps:$4 sm:$0xff]  }
  0x53   :  { %v5004_v23 = vld [vmem:[#allocation2 + $0xa8] ss:$16 sps:$4 sm:$0xff]   ;;  %v5005_v24 = vld [vmem:[#allocation2 + $0xc4] ss:$16 sps:$4 sm:$0xff]   ;;  %v5007_v25 = vld [vmem:[#allocation2 + $0xcc] ss:$16 sps:$4 sm:$0xff]  }
  0x54   :  { %v5009_v26 = vld [vmem:[#allocation2 + $0xc0] ss:$16 sps:$4 sm:$0xff]   ;;  %v5010_v27 = vld [vmem:[#allocation2 + $0xc8] ss:$16 sps:$4 sm:$0xff]   ;;  %v5011_v28 = vld [vmem:[#allocation2 + $0xe4] ss:$16 sps:$4 sm:$0xff]  }
  0x55   :  { %3290 = vmatpush1.bf16.msra.mxu0 %v4985_v10  ;;  %3618 = vmatpush1.bf16.msra.mxu1 %v4986_v11  ;;  %v5013_v29 = vld [vmem:[#allocation2 + $0xec] ss:$16 sps:$4 sm:$0xff]   ;;  %v5015_v30 = vld [vmem:[#allocation2 + $0xe0] ss:$16 sps:$4 sm:$0xff]   ;;  %v5016_v31 = vld [vmem:[#allocation2 + $0xe8] ss:$16 sps:$4 sm:$0xff]  }
  0x56   :  { %3291 = vmatprep.subr.bf16.mxu0 %v4987_v12  ;;  %3619 = vmatprep.subr.bf16.mxu1 %v4989_v13  ;;  %v5017_v32 = vld [vmem:[#allocation2 + $0x104] ss:$16 sps:$4 sm:$0xff]   ;;  %v5019_v33 = vld [vmem:[#allocation2 + $0x10c] ss:$16 sps:$4 sm:$0xff]   ;;  %v5021_v34 = vld [vmem:[#allocation2 + $0x100] ss:$16 sps:$4 sm:$0xff]  }
  0x57   :  { %v5022_v35 = vld [vmem:[#allocation2 + $0x108] ss:$16 sps:$4 sm:$0xff]   ;;  %v5897_v37 = vmov 1966171168   ;;  %v5023_v39 = vld [vmem:[#allocation2 + $0x124] ss:$16 sps:$4 sm:$0xff]  }
  0x58   :  { %v613_v38 = vunpack.c.l.s4 %v5897_v37  ;;  %v5025_v40 = vld [vmem:[#allocation2 + $0x12c] ss:$16 sps:$4 sm:$0xff]   ;;  %v5027_v41 = vld [vmem:[#allocation2 + $0x120] ss:$16 sps:$4 sm:$0xff]   ;;  %v5984_v42 = vshrl.u32 %v589_v36, 7 }
  0x59   :  { %3292 = vmatpush1.bf16.msra.mxu0 %v4991_v14  ;;  %3620 = vmatpush1.bf16.msra.mxu1 %v4992_v15  ;;  %v5028_v44 = vld [vmem:[#allocation2 + $0x128] ss:$16 sps:$4 sm:$0xff]   ;;  %v5029_v45 = vld [vmem:[#allocation2 + $0x144] ss:$16 sps:$4 sm:$0xff]   ;;  %v5031_v46 = vld [vmem:[#allocation2 + $0x14c] ss:$16 sps:$4 sm:$0xff]  }
  0x5a   :  { %3293 = vmatprep.subr.bf16.mxu0 %v4993_v16  ;;  %3621 = vmatprep.subr.bf16.mxu1 %v4995_v17  ;;  %v614_v43 = vunpack.c.0.s8 %v613_v38  ;;  %v5033_v47 = vld [vmem:[#allocation2 + $0x140] ss:$16 sps:$4 sm:$0xff]   ;;  %v5034_v48 = vld [vmem:[#allocation2 + $0x148] ss:$16 sps:$4 sm:$0xff]   ;;  %v5035_v50 = vld [vmem:[#allocation2 + $0x164] ss:$16 sps:$4 sm:$0xff]  }
  0x5b   :  { %v5037_v51 = vld [vmem:[#allocation2 + $0x16c] ss:$16 sps:$4 sm:$0xff]   ;;  %v5992_v52 = vld [vmem:[%s6090_s0] sm:$0xff]  ;;  %v5040_v55 = vld [vmem:[#allocation2 + $0x168] ss:$16 sps:$4 sm:$0xff]  }
  0x5c   :  { %v5987_v49 = vsub.s32 %v614_v43, %v5984_v42  ;;  %v5039_v53 = vld [vmem:[#allocation2 + $0x160] ss:$16 sps:$4 sm:$0xff]   ;;  %v5041_v56 = vld [vmem:[#allocation2 + $0x184] ss:$16 sps:$4 sm:$0xff]   ;;  %v5043_v57 = vld [vmem:[#allocation2 + $0x18c] ss:$16 sps:$4 sm:$0xff]  }
  0x5d   :  { %3294 = vmatpush1.bf16.msra.mxu0 %v4997_v18  ;;  %3622 = vmatpush1.bf16.msra.mxu1 %v4998_v19  ;;  %v5045_v59 = vld [vmem:[#allocation2 + $0x180] ss:$16 sps:$4 sm:$0xff]   ;;  %v5046_v61 = vld [vmem:[#allocation2 + $0x188] ss:$16 sps:$4 sm:$0xff]   ;;  %v5047_v62 = vld [vmem:[#allocation2 + $0x1a4] ss:$16 sps:$4 sm:$0xff]  }
  0x5e   :  { %3295 = vmatprep.subr.bf16.mxu0 %v4999_v20  ;;  %3623 = vmatprep.subr.bf16.mxu1 %v5001_v21  ;;  %v618_v54 = vrot.slane %v5992_v52, %v5987_v49  ;;  %v5049_v63 = vld [vmem:[#allocation2 + $0x1ac] ss:$16 sps:$4 sm:$0xff]   ;;  %v5051_v0 = vld [vmem:[#allocation2 + $0x1a0] ss:$16 sps:$4 sm:$0xff]   ;;  %v5052_v1 = vld [vmem:[#allocation2 + $0x1a8] ss:$16 sps:$4 sm:$0xff]  }
  0x5f   :  { %v5053_v2 = vld [vmem:[#allocation2 + $0x1c4] ss:$16 sps:$4 sm:$0xff]   ;;  %v5055_v3 = vld [vmem:[#allocation2 + $0x1cc] ss:$16 sps:$4 sm:$0xff]   ;;  %v5057_v4 = vld [vmem:[#allocation2 + $0x1c0] ss:$16 sps:$4 sm:$0xff]  }
  0x60   :  { %v626_v58 = vcombine.high %v618_v54, %v618_v54  ;;  %v5058_v5 = vld [vmem:[#allocation2 + $0x1c8] ss:$16 sps:$4 sm:$0xff]   ;;  %v5059_v6 = vld [vmem:[#allocation2 + $0x1e4] ss:$16 sps:$4 sm:$0xff]   ;;  %v5061_v7 = vld [vmem:[#allocation2 + $0x1ec] ss:$16 sps:$4 sm:$0xff]   ;;  %v5998_v13 = vrot.slane %v618_v54, %v5987_v49 }
  0x61   :  { %3296 = vmatpush1.bf16.msra.mxu0 %v5003_v22  ;;  %3624 = vmatpush1.bf16.msra.mxu1 %v5004_v23  ;;  %v5063_v8 = vld [vmem:[#allocation2 + $0x1e0] ss:$16 sps:$4 sm:$0xff]   ;;  %v5064_v9 = vld [vmem:[#allocation2 + $0x1e8] ss:$16 sps:$4 sm:$0xff]   ;;  %v5067_v10 = vld [vmem:[#allocation2 + $0x204] ss:$16 sps:$4 sm:$0xff]  }
  0x62   :  { %3297 = vmatprep.subr.bf16.mxu0 %v5005_v24  ;;  %3625 = vmatprep.subr.bf16.mxu1 %v5007_v25  ;;  %v648_v60 = vrot.slane %v626_v58, %v5987_v49  ;;  %v5070_v11 = vld [vmem:[#allocation2 + $0x20c] ss:$16 sps:$4 sm:$0xff]   ;;  %v5065_v12 = vld [vmem:[#allocation2 + $0x200] ss:$16 sps:$4 sm:$0xff]   ;;  %v5068_v14 = vld [vmem:[#allocation2 + $0x208] ss:$16 sps:$4 sm:$0xff]  }
  0x63   :  { %v5073_v15 = vld [vmem:[#allocation2 + $0x224] ss:$16 sps:$4 sm:$0xff]   ;;  %v5076_v16 = vld [vmem:[#allocation2 + $0x22c] ss:$16 sps:$4 sm:$0xff]   ;;  %v5071_v18 = vld [vmem:[#allocation2 + $0x220] ss:$16 sps:$4 sm:$0xff]  }
  0x64   :  { %3317 = vmatprep.mubr.bf16.mxu0 %v648_v60  ;;  %3645 = vmatprep.mubr.bf16.mxu1 %v648_v60  ;;  %v658_v17 = vcombine.high %v648_v60, %v648_v60  ;;  %v5074_v19 = vld [vmem:[#allocation2 + $0x228] ss:$16 sps:$4 sm:$0xff]   ;;  %v5079_v20 = vld [vmem:[#allocation2 + $0x244] ss:$16 sps:$4 sm:$0xff]   ;;  %v5082_v21 = vld [vmem:[#allocation2 + $0x24c] ss:$16 sps:$4 sm:$0xff]  }
  0x65   :  { %3298 = vmatpush1.bf16.msra.mxu0 %v5009_v26  ;;  %3626 = vmatpush1.bf16.msra.mxu1 %v5010_v27  ;;  %v5077_v22 = vld [vmem:[#allocation2 + $0x240] ss:$16 sps:$4 sm:$0xff]   ;;  %v5080_v23 = vld [vmem:[#allocation2 + $0x248] ss:$16 sps:$4 sm:$0xff]   ;;  %v5085_v24 = vld [vmem:[#allocation2 + $0x264] ss:$16 sps:$4 sm:$0xff]  }
  0x66   :  { %3299 = vmatprep.subr.bf16.mxu0 %v5011_v28  ;;  %3627 = vmatprep.subr.bf16.mxu1 %v5013_v29  ;;  %v5088_v25 = vld [vmem:[#allocation2 + $0x26c] ss:$16 sps:$4 sm:$0xff]   ;;  %v5083_v26 = vld [vmem:[#allocation2 + $0x260] ss:$16 sps:$4 sm:$0xff]   ;;  %v5086_v27 = vld [vmem:[#allocation2 + $0x268] ss:$16 sps:$4 sm:$0xff]  }
  0x67   :  { %v5091_v28 = vld [vmem:[#allocation2 + $0x284] ss:$16 sps:$4 sm:$0xff]   ;;  %v5094_v29 = vld [vmem:[#allocation2 + $0x28c] ss:$16 sps:$4 sm:$0xff]   ;;  %v5101_v38 = vld [vmem:[#allocation2 + $0x2c0] ss:$16 sps:$4 sm:$0xff]  }
  0x68   :  { %v5103_v36 = vld [vmem:[#allocation2 + $0x2c4] ss:$16 sps:$4 sm:$0xff]   ;;  %v5106_v37 = vld [vmem:[#allocation2 + $0x2cc] ss:$16 sps:$4 sm:$0xff]   ;;  %v5107_v43 = vld [vmem:[#allocation2 + $0x2e0] ss:$16 sps:$4 sm:$0xff]  }
  0x69   :  { %3300 = vmatpush1.bf16.msra.mxu0 %v5015_v30  ;;  %3628 = vmatpush1.bf16.msra.mxu1 %v5016_v31  ;;  %v5089_v30 = vld [vmem:[#allocation2 + $0x280] ss:$16 sps:$4 sm:$0xff]   ;;  %v5092_v31 = vld [vmem:[#allocation2 + $0x288] ss:$16 sps:$4 sm:$0xff]   ;;  %v5136_v60 = vld [vmem:[#allocation2 + $0x36c] ss:$16 sps:$4 sm:$0xff]  }
  0x6a   :  { %3301 = vmatprep.subr.bf16.mxu0 %v5017_v32  ;;  %3629 = vmatprep.subr.bf16.mxu1 %v5019_v33  ;;  %v5097_v32 = vld [vmem:[#allocation2 + $0x2a4] ss:$16 sps:$4 sm:$0xff]   ;;  %v5100_v33 = vld [vmem:[#allocation2 + $0x2ac] ss:$16 sps:$4 sm:$0xff]   ;;  %v5122_v54 = vld [vmem:[#allocation2 + $0x328] ss:$16 sps:$4 sm:$0xff]  }
  0x6b   :  { %v5128_v58 = vld [vmem:[#allocation2 + $0x348] ss:$16 sps:$4 sm:$0xff]  }
  0x6d   :  { %3302 = vmatpush1.bf16.msra.mxu0 %v5021_v34  ;;  %3630 = vmatpush1.bf16.msra.mxu1 %v5022_v35  ;;  %v5095_v34 = vld [vmem:[#allocation2 + $0x2a0] ss:$16 sps:$4 sm:$0xff]   ;;  %v5098_v35 = vld [vmem:[#allocation2 + $0x2a8] ss:$16 sps:$4 sm:$0xff]  }
  0x6e   :  { %3303 = vmatprep.subr.bf16.mxu0 %v5023_v39  ;;  %3631 = vmatprep.subr.bf16.mxu1 %v5025_v40  ;;  %v5104_v39 = vld [vmem:[#allocation2 + $0x2c8] ss:$16 sps:$4 sm:$0xff]   ;;  %v5109_v40 = vld [vmem:[#allocation2 + $0x2e4] ss:$16 sps:$4 sm:$0xff]  }
  0x71   :  { %3304 = vmatpush1.bf16.msra.mxu0 %v5027_v41  ;;  %3632 = vmatpush1.bf16.msra.mxu1 %v5028_v44  ;;  %v5112_v41 = vld [vmem:[#allocation2 + $0x2ec] ss:$16 sps:$4 sm:$0xff]   ;;  %v5110_v44 = vld [vmem:[#allocation2 + $0x2e8] ss:$16 sps:$4 sm:$0xff]  }
  0x72   :  { %3305 = vmatprep.subr.bf16.mxu0 %v5029_v45  ;;  %3633 = vmatprep.subr.bf16.mxu1 %v5031_v46  ;;  %v5115_v45 = vld [vmem:[#allocation2 + $0x304] ss:$16 sps:$4 sm:$0xff]   ;;  %v5118_v46 = vld [vmem:[#allocation2 + $0x30c] ss:$16 sps:$4 sm:$0xff]  }
  0x75   :  { %3306 = vmatpush1.bf16.msra.mxu0 %v5033_v47  ;;  %3634 = vmatpush1.bf16.msra.mxu1 %v5034_v48  ;;  %v5113_v47 = vld [vmem:[#allocation2 + $0x300] ss:$16 sps:$4 sm:$0xff]   ;;  %v5116_v48 = vld [vmem:[#allocation2 + $0x308] ss:$16 sps:$4 sm:$0xff]  }
  0x76   :  { %3307 = vmatprep.subr.bf16.mxu0 %v5035_v50  ;;  %3635 = vmatprep.subr.bf16.mxu1 %v5037_v51  ;;  %v5121_v50 = vld [vmem:[#allocation2 + $0x324] ss:$16 sps:$4 sm:$0xff]   ;;  %v5124_v51 = vld [vmem:[#allocation2 + $0x32c] ss:$16 sps:$4 sm:$0xff]  }
  0x79   :  { %3308 = vmatpush1.bf16.msra.mxu0 %v5039_v53  ;;  %3636 = vmatpush1.bf16.msra.mxu1 %v5040_v55  ;;  %v5119_v53 = vld [vmem:[#allocation2 + $0x320] ss:$16 sps:$4 sm:$0xff]   ;;  %v5127_v55 = vld [vmem:[#allocation2 + $0x344] ss:$16 sps:$4 sm:$0xff]  }
  0x7a   :  { %3309 = vmatprep.subr.bf16.mxu0 %v5041_v56  ;;  %3637 = vmatprep.subr.bf16.mxu1 %v5043_v57  ;;  %v5130_v56 = vld [vmem:[#allocation2 + $0x34c] ss:$16 sps:$4 sm:$0xff]   ;;  %v5125_v57 = vld [vmem:[#allocation2 + $0x340] ss:$16 sps:$4 sm:$0xff]  }
  0x7d   :  { %3310 = vmatpush1.bf16.msra.mxu0 %v5045_v59  ;;  %3638 = vmatpush1.bf16.msra.mxu1 %v5046_v61  ;;  %v5133_v59 = vld [vmem:[#allocation2 + $0x364] ss:$16 sps:$4 sm:$0xff]   ;;  %v5131_v61 = vld [vmem:[#allocation2 + $0x360] ss:$16 sps:$4 sm:$0xff]  }
  0x7e   :  { %3311 = vmatprep.subr.bf16.mxu0 %v5047_v62  ;;  %3639 = vmatprep.subr.bf16.mxu1 %v5049_v63  ;;  %v5134_v62 = vld [vmem:[#allocation2 + $0x368] ss:$16 sps:$4 sm:$0xff]   ;;  %v5139_v63 = vld [vmem:[#allocation2 + $0x384] ss:$16 sps:$4 sm:$0xff]  }
  0x81   :  { %3312 = vmatpush1.bf16.msra.mxu0 %v5051_v0  ;;  %3640 = vmatpush1.bf16.msra.mxu1 %v5052_v1  ;;  %v5142_v0 = vld [vmem:[#allocation2 + $0x38c] ss:$16 sps:$4 sm:$0xff]   ;;  %v5137_v1 = vld [vmem:[#allocation2 + $0x380] ss:$16 sps:$4 sm:$0xff]  }
  0x82   :  { %3313 = vmatprep.subr.bf16.mxu0 %v5053_v2  ;;  %3641 = vmatprep.subr.bf16.mxu1 %v5055_v3  ;;  %v5140_v2 = vld [vmem:[#allocation2 + $0x388] ss:$16 sps:$4 sm:$0xff]   ;;  %v5145_v3 = vld [vmem:[#allocation2 + $0x3a4] ss:$16 sps:$4 sm:$0xff]  }
  0x85   :  { %3314 = vmatpush1.bf16.msra.mxu0 %v5057_v4  ;;  %3642 = vmatpush1.bf16.msra.mxu1 %v5058_v5  ;;  %v5148_v4 = vld [vmem:[#allocation2 + $0x3ac] ss:$16 sps:$4 sm:$0xff]   ;;  %v5143_v5 = vld [vmem:[#allocation2 + $0x3a0] ss:$16 sps:$4 sm:$0xff]  }
  0x86   :  { %3315 = vmatprep.subr.bf16.mxu0 %v5059_v6  ;;  %3643 = vmatprep.subr.bf16.mxu1 %v5061_v7  ;;  %v5146_v6 = vld [vmem:[#allocation2 + $0x3a8] ss:$16 sps:$4 sm:$0xff]   ;;  %v5151_v7 = vld [vmem:[#allocation2 + $0x3c4] ss:$16 sps:$4 sm:$0xff]  }
  0x89   :  { %3316 = vmatpush1.bf16.msra.mxu0 %v5063_v8  ;;  %3644 = vmatpush1.bf16.msra.mxu1 %v5064_v9  ;;  %v5154_v8 = vld [vmem:[#allocation2 + $0x3cc] ss:$16 sps:$4 sm:$0xff]   ;;  %v611_v9 = vcombine.high %v5992_v52, %v5992_v52 }
  0x8a   :  { %3326 = vmatprep.subr.bf16.mxu0 %v5067_v10  ;;  %3654 = vmatprep.subr.bf16.mxu1 %v5070_v11  ;;  %v5149_v10 = vld [vmem:[#allocation2 + $0x3c0] ss:$16 sps:$4 sm:$0xff]   ;;  %v5152_v11 = vld [vmem:[#allocation2 + $0x3c8] ss:$16 sps:$4 sm:$0xff]  }
  0x8c   :  { %3318 = vmatmul.mubr.bf16.vlgmr.msra.gmra.mrb[0].mxu0 %v5998_v13  ;;  %3646 = vmatmul.mubr.bf16.vlgmr.msra.gmra.mrb[0].mxu1 %v5998_v13 }
  0x8d   :  { %3327 = vmatpush1.bf16.msra.mxu0 %v5065_v12  ;;  %3655 = vmatpush1.bf16.msra.mxu1 %v5068_v14  ;;  %v5157_v12 = vld [vmem:[#allocation2 + $0x3e4] ss:$16 sps:$4 sm:$0xff]   ;;  %v5160_v14 = vld [vmem:[#allocation2 + $0x3ec] ss:$16 sps:$4 sm:$0xff]  }
  0x8e   :  { %3328 = vmatprep.subr.bf16.mxu0 %v5073_v15  ;;  %3656 = vmatprep.subr.bf16.mxu1 %v5076_v16  ;;  %v6005_v15 = vrot.slane %v611_v9, %v5987_v49  ;;  %v5155_v16 = vld [vmem:[#allocation2 + $0x3e0] ss:$16 sps:$4 sm:$0xff]   ;;  %v5236_v9 = vld [vmem:[#allocation2 + $0x588] ss:$16 sps:$4 sm:$0xff]  }
  0x8f   :  { %3358 = vmatprep.mubr.bf16.mxu0 %v658_v17  ;;  %3686 = vmatprep.mubr.bf16.mxu1 %v658_v17  ;;  %v5158_v17 = vld [vmem:[#allocation2 + $0x3e8] ss:$16 sps:$4 sm:$0xff]  }
  0x90   :  { %v627_v52 = vcombine.high %v6005_v15, %v6005_v15 }
  0x91   :  { %3329 = vmatpush1.bf16.msra.mxu0 %v5071_v18  ;;  %3657 = vmatpush1.bf16.msra.mxu1 %v5074_v19  ;;  %v5163_v18 = vld [vmem:[#allocation2 + $0x404] ss:$16 sps:$4 sm:$0xff]   ;;  %v5166_v19 = vld [vmem:[#allocation2 + $0x40c] ss:$16 sps:$4 sm:$0xff]  }
  0x92   :  { %3330 = vmatprep.subr.bf16.mxu0 %v5079_v20  ;;  %3658 = vmatprep.subr.bf16.mxu1 %v5082_v21  ;;  %v5161_v20 = vld [vmem:[#allocation2 + $0x400] ss:$16 sps:$4 sm:$0xff]   ;;  %v656_v21 = vcombine.high %v5998_v13, %v5998_v13  ;;  %v5178_v13 = vld [vmem:[#allocation2 + $0x44c] ss:$16 sps:$4 sm:$0xff]  }
  0x95   :  { %3331 = vmatpush1.bf16.msra.mxu0 %v5077_v22  ;;  %3659 = vmatpush1.bf16.msra.mxu1 %v5080_v23  ;;  %v5164_v22 = vld [vmem:[#allocation2 + $0x408] ss:$16 sps:$4 sm:$0xff]   ;;  %v5169_v23 = vld [vmem:[#allocation2 + $0x424] ss:$16 sps:$4 sm:$0xff]  }
  0x96   :  { %3332 = vmatprep.subr.bf16.mxu0 %v5085_v24  ;;  %3660 = vmatprep.subr.bf16.mxu1 %v5088_v25  ;;  %v5172_v24 = vld [vmem:[#allocation2 + $0x42c] ss:$16 sps:$4 sm:$0xff]   ;;  %v6012_v25 = vrot.slane %v627_v52, %v5987_v49  ;;  %v5253_v52 = vld [vmem:[#allocation2 + $0x5e4] ss:$16 sps:$4 sm:$0xff]  }
  0x99   :  { %3333 = vmatpush1.bf16.msra.mxu0 %v5083_v26  ;;  %3661 = vmatpush1.bf16.msra.mxu1 %v5086_v27  ;;  %v5167_v26 = vld [vmem:[#allocation2 + $0x420] ss:$16 sps:$4 sm:$0xff]   ;;  %v5170_v27 = vld [vmem:[#allocation2 + $0x428] ss:$16 sps:$4 sm:$0xff]  }
  0x9a   :  { %3334 = vmatprep.subr.bf16.mxu0 %v5091_v28  ;;  %3662 = vmatprep.subr.bf16.mxu1 %v5094_v29  ;;  %v5175_v28 = vld [vmem:[#allocation2 + $0x444] ss:$16 sps:$4 sm:$0xff]   ;;  %v5173_v29 = vld [vmem:[#allocation2 + $0x440] ss:$16 sps:$4 sm:$0xff]  }
  0x9d   :  { %3335 = vmatpush1.bf16.msra.mxu0 %v5089_v30  ;;  %3663 = vmatpush1.bf16.msra.mxu1 %v5092_v31  ;;  %v5176_v30 = vld [vmem:[#allocation2 + $0x448] ss:$16 sps:$4 sm:$0xff]   ;;  %v5181_v31 = vld [vmem:[#allocation2 + $0x464] ss:$16 sps:$4 sm:$0xff]  }
  0x9e   :  { %3336 = vmatprep.subr.bf16.mxu0 %v5097_v32  ;;  %3664 = vmatprep.subr.bf16.mxu1 %v5100_v33  ;;  %v5184_v32 = vld [vmem:[#allocation2 + $0x46c] ss:$16 sps:$4 sm:$0xff]   ;;  %v5179_v33 = vld [vmem:[#allocation2 + $0x460] ss:$16 sps:$4 sm:$0xff]  }
  0xa1   :  { %3337 = vmatpush1.bf16.msra.mxu0 %v5095_v34  ;;  %3665 = vmatpush1.bf16.msra.mxu1 %v5098_v35  ;;  %v5182_v34 = vld [vmem:[#allocation2 + $0x468] ss:$16 sps:$4 sm:$0xff]   ;;  %v5187_v35 = vld [vmem:[#allocation2 + $0x484] ss:$16 sps:$4 sm:$0xff]  }
  0xa2   :  { %3338 = vmatprep.subr.bf16.mxu0 %v5103_v36  ;;  %3666 = vmatprep.subr.bf16.mxu1 %v5106_v37  ;;  %v5190_v36 = vld [vmem:[#allocation2 + $0x48c] ss:$16 sps:$4 sm:$0xff]   ;;  %v5185_v37 = vld [vmem:[#allocation2 + $0x480] ss:$16 sps:$4 sm:$0xff]  }
  0xa5   :  { %3339 = vmatpush1.bf16.msra.mxu0 %v5101_v38  ;;  %3667 = vmatpush1.bf16.msra.mxu1 %v5104_v39  ;;  %v5188_v38 = vld [vmem:[#allocation2 + $0x488] ss:$16 sps:$4 sm:$0xff]   ;;  %v5193_v39 = vld [vmem:[#allocation2 + $0x4a4] ss:$16 sps:$4 sm:$0xff]  }
  0xa6   :  { %3340 = vmatprep.subr.bf16.mxu0 %v5109_v40  ;;  %3668 = vmatprep.subr.bf16.mxu1 %v5112_v41  ;;  %v5196_v40 = vld [vmem:[#allocation2 + $0x4ac] ss:$16 sps:$4 sm:$0xff]   ;;  %v5191_v41 = vld [vmem:[#allocation2 + $0x4a0] ss:$16 sps:$4 sm:$0xff]  }
  0xa9   :  { %3341 = vmatpush1.bf16.msra.mxu0 %v5107_v43  ;;  %3669 = vmatpush1.bf16.msra.mxu1 %v5110_v44  ;;  %v5194_v43 = vld [vmem:[#allocation2 + $0x4a8] ss:$16 sps:$4 sm:$0xff]   ;;  %v5199_v44 = vld [vmem:[#allocation2 + $0x4c4] ss:$16 sps:$4 sm:$0xff]  }
  0xaa   :  { %3342 = vmatprep.subr.bf16.mxu0 %v5115_v45  ;;  %3670 = vmatprep.subr.bf16.mxu1 %v5118_v46  ;;  %v5202_v45 = vld [vmem:[#allocation2 + $0x4cc] ss:$16 sps:$4 sm:$0xff]   ;;  %v5197_v46 = vld [vmem:[#allocation2 + $0x4c0] ss:$16 sps:$4 sm:$0xff]  }
  0xad   :  { %3343 = vmatpush1.bf16.msra.mxu0 %v5113_v47  ;;  %3671 = vmatpush1.bf16.msra.mxu1 %v5116_v48  ;;  %v5200_v47 = vld [vmem:[#allocation2 + $0x4c8] ss:$16 sps:$4 sm:$0xff]   ;;  %v5205_v48 = vld [vmem:[#allocation2 + $0x4e4] ss:$16 sps:$4 sm:$0xff]  }
  0xae   :  { %3344 = vmatprep.subr.bf16.mxu0 %v5121_v50  ;;  %3672 = vmatprep.subr.bf16.mxu1 %v5124_v51  ;;  %v5208_v50 = vld [vmem:[#allocation2 + $0x4ec] ss:$16 sps:$4 sm:$0xff]   ;;  %v5203_v51 = vld [vmem:[#allocation2 + $0x4e0] ss:$16 sps:$4 sm:$0xff]  }
  0xb1   :  { %3345 = vmatpush1.bf16.msra.mxu0 %v5119_v53  ;;  %3673 = vmatpush1.bf16.msra.mxu1 %v5122_v54  ;;  %v5206_v53 = vld [vmem:[#allocation2 + $0x4e8] ss:$16 sps:$4 sm:$0xff]   ;;  %v5211_v54 = vld [vmem:[#allocation2 + $0x504] ss:$16 sps:$4 sm:$0xff]  }
  0xb2   :  { %3346 = vmatprep.subr.bf16.mxu0 %v5127_v55  ;;  %3674 = vmatprep.subr.bf16.mxu1 %v5130_v56  ;;  %v5214_v55 = vld [vmem:[#allocation2 + $0x50c] ss:$16 sps:$4 sm:$0xff]   ;;  %v5209_v56 = vld [vmem:[#allocation2 + $0x500] ss:$16 sps:$4 sm:$0xff]  }
  0xb5   :  { %3347 = vmatpush1.bf16.msra.mxu0 %v5125_v57  ;;  %3675 = vmatpush1.bf16.msra.mxu1 %v5128_v58  ;;  %v5212_v57 = vld [vmem:[#allocation2 + $0x508] ss:$16 sps:$4 sm:$0xff]   ;;  %v5217_v58 = vld [vmem:[#allocation2 + $0x524] ss:$16 sps:$4 sm:$0xff]  }
  0xb6   :  { %3348 = vmatprep.subr.bf16.mxu0 %v5133_v59  ;;  %3676 = vmatprep.subr.bf16.mxu1 %v5136_v60  ;;  %v5220_v59 = vld [vmem:[#allocation2 + $0x52c] ss:$16 sps:$4 sm:$0xff]   ;;  %v5215_v60 = vld [vmem:[#allocation2 + $0x520] ss:$16 sps:$4 sm:$0xff]  }
  0xb9   :  { %3349 = vmatpush1.bf16.msra.mxu0 %v5131_v61  ;;  %3677 = vmatpush1.bf16.msra.mxu1 %v5134_v62  ;;  %v5218_v61 = vld [vmem:[#allocation2 + $0x528] ss:$16 sps:$4 sm:$0xff]   ;;  %v5223_v62 = vld [vmem:[#allocation2 + $0x544] ss:$16 sps:$4 sm:$0xff]  }
  0xba   :  { %3350 = vmatprep.subr.bf16.mxu0 %v5139_v63  ;;  %3678 = vmatprep.subr.bf16.mxu1 %v5142_v0  ;;  %v5226_v63 = vld [vmem:[#allocation2 + $0x54c] ss:$16 sps:$4 sm:$0xff]   ;;  %v5221_v0 = vld [vmem:[#allocation2 + $0x540] ss:$16 sps:$4 sm:$0xff]  }
  0xbd   :  { %3351 = vmatpush1.bf16.msra.mxu0 %v5137_v1  ;;  %3679 = vmatpush1.bf16.msra.mxu1 %v5140_v2  ;;  %v5224_v1 = vld [vmem:[#allocation2 + $0x548] ss:$16 sps:$4 sm:$0xff]   ;;  %v5229_v2 = vld [vmem:[#allocation2 + $0x564] ss:$16 sps:$4 sm:$0xff]  }
  0xbe   :  { %3352 = vmatprep.subr.bf16.mxu0 %v5145_v3  ;;  %3680 = vmatprep.subr.bf16.mxu1 %v5148_v4  ;;  %v5232_v3 = vld [vmem:[#allocation2 + $0x56c] ss:$16 sps:$4 sm:$0xff]   ;;  %v5227_v4 = vld [vmem:[#allocation2 + $0x560] ss:$16 sps:$4 sm:$0xff]  }
  0xc1   :  { %3353 = vmatpush1.bf16.msra.mxu0 %v5143_v5  ;;  %3681 = vmatpush1.bf16.msra.mxu1 %v5146_v6  ;;  %v5230_v5 = vld [vmem:[#allocation2 + $0x568] ss:$16 sps:$4 sm:$0xff]   ;;  %v5235_v6 = vld [vmem:[#allocation2 + $0x584] ss:$16 sps:$4 sm:$0xff]  }
  0xc2   :  { %3354 = vmatprep.subr.bf16.mxu0 %v5151_v7  ;;  %3682 = vmatprep.subr.bf16.mxu1 %v5154_v8  ;;  %v5238_v7 = vld [vmem:[#allocation2 + $0x58c] ss:$16 sps:$4 sm:$0xff]   ;;  %v5233_v8 = vld [vmem:[#allocation2 + $0x580] ss:$16 sps:$4 sm:$0xff]  }
  0xc5   :  { %3355 = vmatpush1.bf16.msra.mxu0 %v5149_v10  ;;  %3683 = vmatpush1.bf16.msra.mxu1 %v5152_v11  ;;  %v5241_v10 = vld [vmem:[#allocation2 + $0x5a4] ss:$16 sps:$4 sm:$0xff]   ;;  %v5244_v11 = vld [vmem:[#allocation2 + $0x5ac] ss:$16 sps:$4 sm:$0xff]  }
  0xc6   :  { %3356 = vmatprep.subr.bf16.mxu0 %v5157_v12  ;;  %3684 = vmatprep.subr.bf16.mxu1 %v5160_v14  ;;  %v5239_v12 = vld [vmem:[#allocation2 + $0x5a0] ss:$16 sps:$4 sm:$0xff]   ;;  %v5242_v14 = vld [vmem:[#allocation2 + $0x5a8] ss:$16 sps:$4 sm:$0xff]  }
  0xc9   :  { %3357 = vmatpush1.bf16.msra.mxu0 %v5155_v16  ;;  %3685 = vmatpush1.bf16.msra.mxu1 %v5158_v17  ;;  %v5247_v16 = vld [vmem:[#allocation2 + $0x5c4] ss:$16 sps:$4 sm:$0xff]   ;;  %v5250_v17 = vld [vmem:[#allocation2 + $0x5cc] ss:$16 sps:$4 sm:$0xff]  }
  0xca   :  { %3367 = vmatprep.subr.bf16.mxu0 %v5163_v18  ;;  %3695 = vmatprep.subr.bf16.mxu1 %v5166_v19  ;;  %v5245_v18 = vld [vmem:[#allocation2 + $0x5c0] ss:$16 sps:$4 sm:$0xff]   ;;  %v5248_v19 = vld [vmem:[#allocation2 + $0x5c8] ss:$16 sps:$4 sm:$0xff]  }
  0xcc   :  { %3359 = vmatmul.mubr.bf16.vlgmr.msra.gmra.mrb[0].mxu0 %v656_v21  ;;  %3687 = vmatmul.mubr.bf16.vlgmr.msra.gmra.mrb[0].mxu1 %v656_v21  ;;  %v5251_v21 = vld [vmem:[#allocation2 + $0x5e0] ss:$16 sps:$4 sm:$0xff]  }
  0xcd   :  { %3368 = vmatpush1.bf16.msra.mxu0 %v5161_v20  ;;  %3696 = vmatpush1.bf16.msra.mxu1 %v5164_v22  ;;  %v5256_v20 = vld [vmem:[#allocation2 + $0x5ec] ss:$16 sps:$4 sm:$0xff]   ;;  %v5254_v22 = vld [vmem:[#allocation2 + $0x5e8] ss:$16 sps:$4 sm:$0xff]  }
  0xce   :  { %3369 = vmatprep.subr.bf16.mxu0 %v5169_v23  ;;  %3697 = vmatprep.subr.bf16.mxu1 %v5172_v24  ;;  %v5260_v23 = vld [vmem:[#allocation2 + $0x604] ss:$16 sps:$4 sm:$0xff]   ;;  %v5263_v24 = vld [vmem:[#allocation2 + $0x60c] ss:$16 sps:$4 sm:$0xff]  }
  0xcf   :  { %3399 = vmatprep.mubr.bf16.mxu0 %v6012_v25  ;;  %3727 = vmatprep.mubr.bf16.mxu1 %v6012_v25 }
  0xd1   :  { %3370 = vmatpush1.bf16.msra.mxu0 %v5167_v26  ;;  %3698 = vmatpush1.bf16.msra.mxu1 %v5170_v27  ;;  %v5258_v26 = vld [vmem:[#allocation2 + $0x600] ss:$16 sps:$4 sm:$0xff]   ;;  %v6018_v27 = vrot.slane %v6005_v15, %v5987_v49  ;;  %v5272_v15 = vld [vmem:[#allocation2 + $0x644] ss:$16 sps:$4 sm:$0xff]  }
  0xd2   :  { %3371 = vmatprep.subr.bf16.mxu0 %v5175_v28  ;;  %3699 = vmatprep.subr.bf16.mxu1 %v5178_v13  ;;  %v5261_v28 = vld [vmem:[#allocation2 + $0x608] ss:$16 sps:$4 sm:$0xff]   ;;  %v5266_v13 = vld [vmem:[#allocation2 + $0x624] ss:$16 sps:$4 sm:$0xff]  }
  0xd5   :  { %3372 = vmatpush1.bf16.msra.mxu0 %v5173_v29  ;;  %3700 = vmatpush1.bf16.msra.mxu1 %v5176_v30  ;;  %v5269_v29 = vld [vmem:[#allocation2 + $0x62c] ss:$16 sps:$4 sm:$0xff]   ;;  %v659_v30 = vcombine.high %v6012_v25, %v6012_v25  ;;  %v5278_v25 = vld [vmem:[#allocation2 + $0x664] ss:$16 sps:$4 sm:$0xff]  }
  0xd6   :  { %3373 = vmatprep.subr.bf16.mxu0 %v5181_v31  ;;  %3701 = vmatprep.subr.bf16.mxu1 %v5184_v32  ;;  %v5264_v31 = vld [vmem:[#allocation2 + $0x620] ss:$16 sps:$4 sm:$0xff]   ;;  %v5267_v32 = vld [vmem:[#allocation2 + $0x628] ss:$16 sps:$4 sm:$0xff]  }
  0xd9   :  { %3374 = vmatpush1.bf16.msra.mxu0 %v5179_v33  ;;  %3702 = vmatpush1.bf16.msra.mxu1 %v5182_v34  ;;  %v5275_v33 = vld [vmem:[#allocation2 + $0x64c] ss:$16 sps:$4 sm:$0xff]   ;;  %v5270_v34 = vld [vmem:[#allocation2 + $0x640] ss:$16 sps:$4 sm:$0xff]  }
  0xda   :  { %3375 = vmatprep.subr.bf16.mxu0 %v5187_v35  ;;  %3703 = vmatprep.subr.bf16.mxu1 %v5190_v36  ;;  %v5273_v35 = vld [vmem:[#allocation2 + $0x648] ss:$16 sps:$4 sm:$0xff]   ;;  %v5281_v36 = vld [vmem:[#allocation2 + $0x66c] ss:$16 sps:$4 sm:$0xff]  }
  0xdd   :  { %3376 = vmatpush1.bf16.msra.mxu0 %v5185_v37  ;;  %3704 = vmatpush1.bf16.msra.mxu1 %v5188_v38  ;;  %v5276_v37 = vld [vmem:[#allocation2 + $0x660] ss:$16 sps:$4 sm:$0xff]   ;;  %v5279_v38 = vld [vmem:[#allocation2 + $0x668] ss:$16 sps:$4 sm:$0xff]  }
  0xde   :  { %3377 = vmatprep.subr.bf16.mxu0 %v5193_v39  ;;  %3705 = vmatprep.subr.bf16.mxu1 %v5196_v40  ;;  %v5284_v39 = vld [vmem:[#allocation2 + $0x684] ss:$16 sps:$4 sm:$0xff]   ;;  %v5287_v40 = vld [vmem:[#allocation2 + $0x68c] ss:$16 sps:$4 sm:$0xff]  }
  0xe1   :  { %3378 = vmatpush1.bf16.msra.mxu0 %v5191_v41  ;;  %3706 = vmatpush1.bf16.msra.mxu1 %v5194_v43  ;;  %v5282_v41 = vld [vmem:[#allocation2 + $0x680] ss:$16 sps:$4 sm:$0xff]   ;;  %v5285_v43 = vld [vmem:[#allocation2 + $0x688] ss:$16 sps:$4 sm:$0xff]  }
  0xe2   :  { %3379 = vmatprep.subr.bf16.mxu0 %v5199_v44  ;;  %3707 = vmatprep.subr.bf16.mxu1 %v5202_v45  ;;  %v5290_v44 = vld [vmem:[#allocation2 + $0x6a4] ss:$16 sps:$4 sm:$0xff]   ;;  %v5293_v45 = vld [vmem:[#allocation2 + $0x6ac] ss:$16 sps:$4 sm:$0xff]  }
  0xe5   :  { %3380 = vmatpush1.bf16.msra.mxu0 %v5197_v46  ;;  %3708 = vmatpush1.bf16.msra.mxu1 %v5200_v47  ;;  %v5288_v46 = vld [vmem:[#allocation2 + $0x6a0] ss:$16 sps:$4 sm:$0xff]   ;;  %v5291_v47 = vld [vmem:[#allocation2 + $0x6a8] ss:$16 sps:$4 sm:$0xff]  }
  0xe6   :  { %3381 = vmatprep.subr.bf16.mxu0 %v5205_v48  ;;  %3709 = vmatprep.subr.bf16.mxu1 %v5208_v50  ;;  %v5296_v48 = vld [vmem:[#allocation2 + $0x6c4] ss:$16 sps:$4 sm:$0xff]   ;;  %v5299_v50 = vld [vmem:[#allocation2 + $0x6cc] ss:$16 sps:$4 sm:$0xff]  }
  0xe9   :  { %3382 = vmatpush1.bf16.msra.mxu0 %v5203_v51  ;;  %3710 = vmatpush1.bf16.msra.mxu1 %v5206_v53  ;;  %v5294_v51 = vld [vmem:[#allocation2 + $0x6c0] ss:$16 sps:$4 sm:$0xff]   ;;  %v5297_v53 = vld [vmem:[#allocation2 + $0x6c8] ss:$16 sps:$4 sm:$0xff]  }
  0xea   :  { %3383 = vmatprep.subr.bf16.mxu0 %v5211_v54  ;;  %3711 = vmatprep.subr.bf16.mxu1 %v5214_v55  ;;  %v5302_v54 = vld [vmem:[#allocation2 + $0x6e4] ss:$16 sps:$4 sm:$0xff]   ;;  %v5305_v55 = vld [vmem:[#allocation2 + $0x6ec] ss:$16 sps:$4 sm:$0xff]  }
  0xed   :  { %3384 = vmatpush1.bf16.msra.mxu0 %v5209_v56  ;;  %3712 = vmatpush1.bf16.msra.mxu1 %v5212_v57  ;;  %v5300_v56 = vld [vmem:[#allocation2 + $0x6e0] ss:$16 sps:$4 sm:$0xff]   ;;  %v5303_v57 = vld [vmem:[#allocation2 + $0x6e8] ss:$16 sps:$4 sm:$0xff]  }
  0xee   :  { %3385 = vmatprep.subr.bf16.mxu0 %v5217_v58  ;;  %3713 = vmatprep.subr.bf16.mxu1 %v5220_v59  ;;  %v5308_v58 = vld [vmem:[#allocation2 + $0x704] ss:$16 sps:$4 sm:$0xff]   ;;  %v5311_v59 = vld [vmem:[#allocation2 + $0x70c] ss:$16 sps:$4 sm:$0xff]  }
  0xf1   :  { %3386 = vmatpush1.bf16.msra.mxu0 %v5215_v60  ;;  %3714 = vmatpush1.bf16.msra.mxu1 %v5218_v61  ;;  %v5306_v60 = vld [vmem:[#allocation2 + $0x700] ss:$16 sps:$4 sm:$0xff]   ;;  %v5309_v61 = vld [vmem:[#allocation2 + $0x708] ss:$16 sps:$4 sm:$0xff]  }
  0xf2   :  { %3387 = vmatprep.subr.bf16.mxu0 %v5223_v62  ;;  %3715 = vmatprep.subr.bf16.mxu1 %v5226_v63  ;;  %v5314_v62 = vld [vmem:[#allocation2 + $0x724] ss:$16 sps:$4 sm:$0xff]   ;;  %v5317_v63 = vld [vmem:[#allocation2 + $0x72c] ss:$16 sps:$4 sm:$0xff]  }
  0xf5   :  { %3388 = vmatpush1.bf16.msra.mxu0 %v5221_v0  ;;  %3716 = vmatpush1.bf16.msra.mxu1 %v5224_v1  ;;  %v5312_v0 = vld [vmem:[#allocation2 + $0x720] ss:$16 sps:$4 sm:$0xff]   ;;  %v5315_v1 = vld [vmem:[#allocation2 + $0x728] ss:$16 sps:$4 sm:$0xff]  }
  0xf6   :  { %3389 = vmatprep.subr.bf16.mxu0 %v5229_v2  ;;  %3717 = vmatprep.subr.bf16.mxu1 %v5232_v3  ;;  %v5320_v2 = vld [vmem:[#allocation2 + $0x744] ss:$16 sps:$4 sm:$0xff]   ;;  %v5323_v3 = vld [vmem:[#allocation2 + $0x74c] ss:$16 sps:$4 sm:$0xff]  }
  0xf9   :  { %3390 = vmatpush1.bf16.msra.mxu0 %v5227_v4  ;;  %3718 = vmatpush1.bf16.msra.mxu1 %v5230_v5  ;;  %v5318_v4 = vld [vmem:[#allocation2 + $0x740] ss:$16 sps:$4 sm:$0xff]   ;;  %v5321_v5 = vld [vmem:[#allocation2 + $0x748] ss:$16 sps:$4 sm:$0xff]  }
  0xfa   :  { %3391 = vmatprep.subr.bf16.mxu0 %v5235_v6  ;;  %3719 = vmatprep.subr.bf16.mxu1 %v5238_v7  ;;  %v5326_v6 = vld [vmem:[#allocation2 + $0x764] ss:$16 sps:$4 sm:$0xff]   ;;  %v5329_v7 = vld [vmem:[#allocation2 + $0x76c] ss:$16 sps:$4 sm:$0xff]  }
  0xfd   :  { %3392 = vmatpush1.bf16.msra.mxu0 %v5233_v8  ;;  %3720 = vmatpush1.bf16.msra.mxu1 %v5236_v9  ;;  %v5324_v8 = vld [vmem:[#allocation2 + $0x760] ss:$16 sps:$4 sm:$0xff]   ;;  %v5327_v9 = vld [vmem:[#allocation2 + $0x768] ss:$16 sps:$4 sm:$0xff]  }
  0xfe   :  { %3393 = vmatprep.subr.bf16.mxu0 %v5241_v10  ;;  %3721 = vmatprep.subr.bf16.mxu1 %v5244_v11  ;;  %v5332_v10 = vld [vmem:[#allocation2 + $0x784] ss:$16 sps:$4 sm:$0xff]   ;;  %v5335_v11 = vld [vmem:[#allocation2 + $0x78c] ss:$16 sps:$4 sm:$0xff]  }
 0x101   :  { %3394 = vmatpush1.bf16.msra.mxu0 %v5239_v12  ;;  %3722 = vmatpush1.bf16.msra.mxu1 %v5242_v14  ;;  %v5330_v12 = vld [vmem:[#allocation2 + $0x780] ss:$16 sps:$4 sm:$0xff]   ;;  %v5333_v14 = vld [vmem:[#allocation2 + $0x788] ss:$16 sps:$4 sm:$0xff]  }
 0x102   :  { %3395 = vmatprep.subr.bf16.mxu0 %v5247_v16  ;;  %3723 = vmatprep.subr.bf16.mxu1 %v5250_v17  ;;  %v5338_v16 = vld [vmem:[#allocation2 + $0x7a4] ss:$16 sps:$4 sm:$0xff]   ;;  %v5341_v17 = vld [vmem:[#allocation2 + $0x7ac] ss:$16 sps:$4 sm:$0xff]  }
 0x105   :  { %3396 = vmatpush1.bf16.msra.mxu0 %v5245_v18  ;;  %3724 = vmatpush1.bf16.msra.mxu1 %v5248_v19  ;;  %v5336_v18 = vld [vmem:[#allocation2 + $0x7a0] ss:$16 sps:$4 sm:$0xff]   ;;  %v5339_v19 = vld [vmem:[#allocation2 + $0x7a8] ss:$16 sps:$4 sm:$0xff]  }
 0x106   :  { %3397 = vmatprep.subr.bf16.mxu0 %v5253_v52  ;;  %3725 = vmatprep.subr.bf16.mxu1 %v5256_v20  ;;  %v5344_v52 = vld [vmem:[#allocation2 + $0x7c4] ss:$16 sps:$4 sm:$0xff]   ;;  %v5347_v20 = vld [vmem:[#allocation2 + $0x7cc] ss:$16 sps:$4 sm:$0xff]  }
 0x109   :  { %3398 = vmatpush1.bf16.msra.mxu0 %v5251_v21  ;;  %3726 = vmatpush1.bf16.msra.mxu1 %v5254_v22  ;;  %v6027_v21 = vld [vmem:[%s6090_s0 + $0x8] sm:$0xff]  ;;  %v5342_v22 = vld [vmem:[#allocation2 + $0x7c0] ss:$16 sps:$4 sm:$0xff]   ;;  %s5898_s0 = smov [#allocation10]  }
 0x10a   :  { %3408 = vmatprep.subr.bf16.mxu0 %v5260_v23  ;;  %3736 = vmatprep.subr.bf16.mxu1 %v5263_v24  ;;  %v5345_v23 = vld [vmem:[#allocation2 + $0x7c8] ss:$16 sps:$4 sm:$0xff]   ;;  %v5350_v24 = vld [vmem:[#allocation2 + $0x7e4] ss:$16 sps:$4 sm:$0xff]   ;;  %s4299_s20 = sshll.u32 %s5898_s0, 4  ;;  %s4300_s20 = int_to_ptr.vmem [resolvable:$true] %s4299_s20 }
 0x10b   :  { %s5859_s22 = scalar_lea.vmem %s4300_s20, 32  ;;  %p5864_p5 = scmp.lt.s32.totalorder %s4300_s20, %s4300_s20 }
 0x10c   :  { %3400 = vmatmul.mubr.bf16.vlgmr.msra.gmra.mrb[0].mxu0 %v6018_v27  ;;  %3728 = vmatmul.mubr.bf16.vlgmr.msra.gmra.mrb[0].mxu1 %v6018_v27  ;;  %p5860_p4 = scmp.ne.s32.totalorder %s4300_s20, %s5859_s22  ;;  %p5865_p6 = scmp.lt.s32.totalorder %s5859_s22, %s5859_s22 }
 0x10d   :  { %3409 = vmatpush1.bf16.msra.mxu0 %v5258_v26  ;;  %3737 = vmatpush1.bf16.msra.mxu1 %v5261_v28  ;;  %v5353_v26 = vld [vmem:[#allocation2 + $0x7ec] ss:$16 sps:$4 sm:$0xff]   ;;  %v6031_v28 = vrot.slane %v6027_v21, %v5987_v49 }
 0x10e   :  { %3410 = vmatprep.subr.bf16.mxu0 %v5266_v13  ;;  %3738 = vmatprep.subr.bf16.mxu1 %v5269_v29  ;;  %v5348_v13 = vld [vmem:[#allocation2 + $0x7e0] ss:$16 sps:$4 sm:$0xff]   ;;  %v5351_v29 = vld [vmem:[#allocation2 + $0x7e8] ss:$16 sps:$4 sm:$0xff]   ;;  %p5866_p7 = por %p5865_p6, %p5864_p5 }
 0x10f   :  { %3440 = vmatprep.mubr.bf16.mxu0 %v659_v30  ;;  %3768 = vmatprep.mubr.bf16.mxu1 %v659_v30  ;;  %v5356_v30 = vld [vmem:[#allocation2 + $0x804] ss:$16 sps:$4 sm:$0xff]  }
 0x110   :  { %p5867_p8 = pnand %p5866_p7, %p5860_p4 }
 0x111   :  { %3411 = vmatpush1.bf16.msra.mxu0 %v5264_v31  ;;  %3739 = vmatpush1.bf16.msra.mxu1 %v5267_v32  ;;  %v5359_v31 = vld [vmem:[#allocation2 + $0x80c] ss:$16 sps:$4 sm:$0xff]   ;;  %v675_v32 = vcombine.high %v6031_v28, %v6031_v28 }
 0x112   :  { %3412 = vmatprep.subr.bf16.mxu0 %v5272_v15  ;;  %3740 = vmatprep.subr.bf16.mxu1 %v5275_v33  ;;  %v657_v15 = vcombine.high %v6018_v27, %v6018_v27  ;;  %v5354_v33 = vld [vmem:[#allocation2 + $0x800] ss:$16 sps:$4 sm:$0xff]   ;;  %v5368_v27 = vld [vmem:[#allocation2 + $0x844] ss:$16 sps:$4 sm:$0xff]  }
 0x115   :  { %3413 = vmatpush1.bf16.msra.mxu0 %v5270_v34  ;;  %3741 = vmatpush1.bf16.msra.mxu1 %v5273_v35  ;;  %v5357_v34 = vld [vmem:[#allocation2 + $0x808] ss:$16 sps:$4 sm:$0xff]   ;;  %v5362_v35 = vld [vmem:[#allocation2 + $0x824] ss:$16 sps:$4 sm:$0xff]  }
 0x116   :  { %3414 = vmatprep.subr.bf16.mxu0 %v5278_v25  ;;  %3742 = vmatprep.subr.bf16.mxu1 %v5281_v36  ;;  %v5365_v25 = vld [vmem:[#allocation2 + $0x82c] ss:$16 sps:$4 sm:$0xff]   ;;  %v6038_v36 = vrot.slane %v675_v32, %v5987_v49  ;;  %v5441_v32 = vld [vmem:[#allocation2 + $0x9c8] ss:$16 sps:$4 sm:$0xff]  }
 0x119   :  { %3415 = vmatpush1.bf16.msra.mxu0 %v5276_v37  ;;  %3743 = vmatpush1.bf16.msra.mxu1 %v5279_v38  ;;  %v5360_v37 = vld [vmem:[#allocation2 + $0x820] ss:$16 sps:$4 sm:$0xff]   ;;  %v5363_v38 = vld [vmem:[#allocation2 + $0x828] ss:$16 sps:$4 sm:$0xff]  }
 0x11a   :  { %3416 = vmatprep.subr.bf16.mxu0 %v5284_v39  ;;  %3744 = vmatprep.subr.bf16.mxu1 %v5287_v40  ;;  %v5371_v39 = vld [vmem:[#allocation2 + $0x84c] ss:$16 sps:$4 sm:$0xff]   ;;  %v5366_v40 = vld [vmem:[#allocation2 + $0x840] ss:$16 sps:$4 sm:$0xff]  }
 0x11d   :  { %3417 = vmatpush1.bf16.msra.mxu0 %v5282_v41  ;;  %3745 = vmatpush1.bf16.msra.mxu1 %v5285_v43  ;;  %v5369_v41 = vld [vmem:[#allocation2 + $0x848] ss:$16 sps:$4 sm:$0xff]   ;;  %v5374_v43 = vld [vmem:[#allocation2 + $0x864] ss:$16 sps:$4 sm:$0xff]  }
 0x11e   :  { %3418 = vmatprep.subr.bf16.mxu0 %v5290_v44  ;;  %3746 = vmatprep.subr.bf16.mxu1 %v5293_v45  ;;  %v5377_v44 = vld [vmem:[#allocation2 + $0x86c] ss:$16 sps:$4 sm:$0xff]   ;;  %v5372_v45 = vld [vmem:[#allocation2 + $0x860] ss:$16 sps:$4 sm:$0xff]  }
 0x121   :  { %3419 = vmatpush1.bf16.msra.mxu0 %v5288_v46  ;;  %3747 = vmatpush1.bf16.msra.mxu1 %v5291_v47  ;;  %v5375_v46 = vld [vmem:[#allocation2 + $0x868] ss:$16 sps:$4 sm:$0xff]   ;;  %v5380_v47 = vld [vmem:[#allocation2 + $0x884] ss:$16 sps:$4 sm:$0xff]  }
 0x122   :  { %3420 = vmatprep.subr.bf16.mxu0 %v5296_v48  ;;  %3748 = vmatprep.subr.bf16.mxu1 %v5299_v50  ;;  %v5383_v48 = vld [vmem:[#allocation2 + $0x88c] ss:$16 sps:$4 sm:$0xff]   ;;  %v5378_v50 = vld [vmem:[#allocation2 + $0x880] ss:$16 sps:$4 sm:$0xff]  }
 0x125   :  { %3421 = vmatpush1.bf16.msra.mxu0 %v5294_v51  ;;  %3749 = vmatpush1.bf16.msra.mxu1 %v5297_v53  ;;  %v5381_v51 = vld [vmem:[#allocation2 + $0x888] ss:$16 sps:$4 sm:$0xff]   ;;  %v5386_v53 = vld [vmem:[#allocation2 + $0x8a4] ss:$16 sps:$4 sm:$0xff]  }
 0x126   :  { %3422 = vmatprep.subr.bf16.mxu0 %v5302_v54  ;;  %3750 = vmatprep.subr.bf16.mxu1 %v5305_v55  ;;  %v5389_v54 = vld [vmem:[#allocation2 + $0x8ac] ss:$16 sps:$4 sm:$0xff]   ;;  %v5384_v55 = vld [vmem:[#allocation2 + $0x8a0] ss:$16 sps:$4 sm:$0xff]  }
 0x129   :  { %3423 = vmatpush1.bf16.msra.mxu0 %v5300_v56  ;;  %3751 = vmatpush1.bf16.msra.mxu1 %v5303_v57  ;;  %v5387_v56 = vld [vmem:[#allocation2 + $0x8a8] ss:$16 sps:$4 sm:$0xff]   ;;  %v5392_v57 = vld [vmem:[#allocation2 + $0x8c4] ss:$16 sps:$4 sm:$0xff]  }
 0x12a   :  { %3424 = vmatprep.subr.bf16.mxu0 %v5308_v58  ;;  %3752 = vmatprep.subr.bf16.mxu1 %v5311_v59  ;;  %v5395_v58 = vld [vmem:[#allocation2 + $0x8cc] ss:$16 sps:$4 sm:$0xff]   ;;  %v5390_v59 = vld [vmem:[#allocation2 + $0x8c0] ss:$16 sps:$4 sm:$0xff]  }
 0x12d   :  { %3425 = vmatpush1.bf16.msra.mxu0 %v5306_v60  ;;  %3753 = vmatpush1.bf16.msra.mxu1 %v5309_v61  ;;  %v5393_v60 = vld [vmem:[#allocation2 + $0x8c8] ss:$16 sps:$4 sm:$0xff]   ;;  %v5398_v61 = vld [vmem:[#allocation2 + $0x8e4] ss:$16 sps:$4 sm:$0xff]  }
 0x12e   :  { %3426 = vmatprep.subr.bf16.mxu0 %v5314_v62  ;;  %3754 = vmatprep.subr.bf16.mxu1 %v5317_v63  ;;  %v5401_v62 = vld [vmem:[#allocation2 + $0x8ec] ss:$16 sps:$4 sm:$0xff]   ;;  %v5396_v63 = vld [vmem:[#allocation2 + $0x8e0] ss:$16 sps:$4 sm:$0xff]  }
 0x131   :  { %3427 = vmatpush1.bf16.msra.mxu0 %v5312_v0  ;;  %3755 = vmatpush1.bf16.msra.mxu1 %v5315_v1  ;;  %v5399_v0 = vld [vmem:[#allocation2 + $0x8e8] ss:$16 sps:$4 sm:$0xff]   ;;  %v5404_v1 = vld [vmem:[#allocation2 + $0x904] ss:$16 sps:$4 sm:$0xff]  }
 0x132   :  { %3428 = vmatprep.subr.bf16.mxu0 %v5320_v2  ;;  %3756 = vmatprep.subr.bf16.mxu1 %v5323_v3  ;;  %v5407_v2 = vld [vmem:[#allocation2 + $0x90c] ss:$16 sps:$4 sm:$0xff]   ;;  %v5402_v3 = vld [vmem:[#allocation2 + $0x900] ss:$16 sps:$4 sm:$0xff]  }
 0x135   :  { %3429 = vmatpush1.bf16.msra.mxu0 %v5318_v4  ;;  %3757 = vmatpush1.bf16.msra.mxu1 %v5321_v5  ;;  %v5405_v4 = vld [vmem:[#allocation2 + $0x908] ss:$16 sps:$4 sm:$0xff]   ;;  %v5410_v5 = vld [vmem:[#allocation2 + $0x924] ss:$16 sps:$4 sm:$0xff]  }
 0x136   :  { %3430 = vmatprep.subr.bf16.mxu0 %v5326_v6  ;;  %3758 = vmatprep.subr.bf16.mxu1 %v5329_v7  ;;  %v5413_v6 = vld [vmem:[#allocation2 + $0x92c] ss:$16 sps:$4 sm:$0xff]   ;;  %v5408_v7 = vld [vmem:[#allocation2 + $0x920] ss:$16 sps:$4 sm:$0xff]  }
 0x139   :  { %3431 = vmatpush1.bf16.msra.mxu0 %v5324_v8  ;;  %3759 = vmatpush1.bf16.msra.mxu1 %v5327_v9  ;;  %v5411_v8 = vld [vmem:[#allocation2 + $0x928] ss:$16 sps:$4 sm:$0xff]   ;;  %v5416_v9 = vld [vmem:[#allocation2 + $0x944] ss:$16 sps:$4 sm:$0xff]  }
 0x13a   :  { %3432 = vmatprep.subr.bf16.mxu0 %v5332_v10  ;;  %3760 = vmatprep.subr.bf16.mxu1 %v5335_v11  ;;  %v5419_v10 = vld [vmem:[#allocation2 + $0x94c] ss:$16 sps:$4 sm:$0xff]   ;;  %v5414_v11 = vld [vmem:[#allocation2 + $0x940] ss:$16 sps:$4 sm:$0xff]  }
 0x13d   :  { %3433 = vmatpush1.bf16.msra.mxu0 %v5330_v12  ;;  %3761 = vmatpush1.bf16.msra.mxu1 %v5333_v14  ;;  %v5417_v12 = vld [vmem:[#allocation2 + $0x948] ss:$16 sps:$4 sm:$0xff]   ;;  %v5422_v14 = vld [vmem:[#allocation2 + $0x964] ss:$16 sps:$4 sm:$0xff]  }
 0x13e   :  { %3434 = vmatprep.subr.bf16.mxu0 %v5338_v16  ;;  %3762 = vmatprep.subr.bf16.mxu1 %v5341_v17  ;;  %v5425_v16 = vld [vmem:[#allocation2 + $0x96c] ss:$16 sps:$4 sm:$0xff]   ;;  %v5420_v17 = vld [vmem:[#allocation2 + $0x960] ss:$16 sps:$4 sm:$0xff]  }
 0x141   :  { %3435 = vmatpush1.bf16.msra.mxu0 %v5336_v18  ;;  %3763 = vmatpush1.bf16.msra.mxu1 %v5339_v19  ;;  %v5423_v18 = vld [vmem:[#allocation2 + $0x968] ss:$16 sps:$4 sm:$0xff]   ;;  %v5428_v19 = vld [vmem:[#allocation2 + $0x984] ss:$16 sps:$4 sm:$0xff]  }
 0x142   :  { %3436 = vmatprep.subr.bf16.mxu0 %v5344_v52  ;;  %3764 = vmatprep.subr.bf16.mxu1 %v5347_v20  ;;  %v5431_v52 = vld [vmem:[#allocation2 + $0x98c] ss:$16 sps:$4 sm:$0xff]   ;;  %v5426_v20 = vld [vmem:[#allocation2 + $0x980] ss:$16 sps:$4 sm:$0xff]  }
 0x145   :  { %3437 = vmatpush1.bf16.msra.mxu0 %v5342_v22  ;;  %3765 = vmatpush1.bf16.msra.mxu1 %v5345_v23  ;;  %v5429_v22 = vld [vmem:[#allocation2 + $0x988] ss:$16 sps:$4 sm:$0xff]   ;;  %v5434_v23 = vld [vmem:[#allocation2 + $0x9a4] ss:$16 sps:$4 sm:$0xff]  }
 0x146   :  { %3438 = vmatprep.subr.bf16.mxu0 %v5350_v24  ;;  %3766 = vmatprep.subr.bf16.mxu1 %v5353_v26  ;;  %v5437_v24 = vld [vmem:[#allocation2 + $0x9ac] ss:$16 sps:$4 sm:$0xff]   ;;  %v5432_v26 = vld [vmem:[#allocation2 + $0x9a0] ss:$16 sps:$4 sm:$0xff]  }
 0x149   :  { %3439 = vmatpush1.bf16.msra.mxu0 %v5348_v13  ;;  %3767 = vmatpush1.bf16.msra.mxu1 %v5351_v29  ;;  %v5435_v13 = vld [vmem:[#allocation2 + $0x9a8] ss:$16 sps:$4 sm:$0xff]   ;;  %v5440_v29 = vld [vmem:[#allocation2 + $0x9c4] ss:$16 sps:$4 sm:$0xff]  }
 0x14a   :  { %3449 = vmatprep.subr.bf16.mxu0 %v5356_v30  ;;  %3777 = vmatprep.subr.bf16.mxu1 %v5359_v31  ;;  %v5443_v30 = vld [vmem:[#allocation2 + $0x9cc] ss:$16 sps:$4 sm:$0xff]   ;;  %v5438_v31 = vld [vmem:[#allocation2 + $0x9c0] ss:$16 sps:$4 sm:$0xff]  }
 0x14c   :  { %3441 = vmatmul.mubr.bf16.vlgmr.msra.gmra.mrb[0].mxu0 %v657_v15  ;;  %3769 = vmatmul.mubr.bf16.vlgmr.msra.gmra.mrb[0].mxu1 %v657_v15  ;;  %v5446_v15 = vld [vmem:[#allocation2 + $0x9e4] ss:$16 sps:$4 sm:$0xff]  }
 0x14d   :  { %3450 = vmatpush1.bf16.msra.mxu0 %v5354_v33  ;;  %3778 = vmatpush1.bf16.msra.mxu1 %v5357_v34  ;;  %v5449_v33 = vld [vmem:[#allocation2 + $0x9ec] ss:$16 sps:$4 sm:$0xff]   ;;  %v5444_v34 = vld [vmem:[#allocation2 + $0x9e0] ss:$16 sps:$4 sm:$0xff]  }
 0x14e   :  { %3451 = vmatprep.subr.bf16.mxu0 %v5362_v35  ;;  %3779 = vmatprep.subr.bf16.mxu1 %v5365_v25  ;;  %v5447_v35 = vld [vmem:[#allocation2 + $0x9e8] ss:$16 sps:$4 sm:$0xff]   ;;  %v5452_v25 = vld [vmem:[#allocation2 + $0xa04] ss:$16 sps:$4 sm:$0xff]  }
 0x14f   :  { %3481 = vmatprep.mubr.bf16.mxu0 %v6038_v36  ;;  %3809 = vmatprep.mubr.bf16.mxu1 %v6038_v36 }
 0x151   :  { %3452 = vmatpush1.bf16.msra.mxu0 %v5360_v37  ;;  %3780 = vmatpush1.bf16.msra.mxu1 %v5363_v38  ;;  %v5455_v37 = vld [vmem:[#allocation2 + $0xa0c] ss:$16 sps:$4 sm:$0xff]   ;;  %v6044_v38 = vrot.slane %v6031_v28, %v5987_v49  ;;  %v5459_v28 = vld [vmem:[#allocation2 + $0xa28] ss:$16 sps:$4 sm:$0xff]  }
 0x152   :  { %3453 = vmatprep.subr.bf16.mxu0 %v5368_v27  ;;  %3781 = vmatprep.subr.bf16.mxu1 %v5371_v39  ;;  %v5450_v27 = vld [vmem:[#allocation2 + $0xa00] ss:$16 sps:$4 sm:$0xff]   ;;  %v5453_v39 = vld [vmem:[#allocation2 + $0xa08] ss:$16 sps:$4 sm:$0xff]  }
 0x155   :  { %3454 = vmatpush1.bf16.msra.mxu0 %v5366_v40  ;;  %3782 = vmatpush1.bf16.msra.mxu1 %v5369_v41  ;;  %v5458_v40 = vld [vmem:[#allocation2 + $0xa24] ss:$16 sps:$4 sm:$0xff]   ;;  %v5461_v41 = vld [vmem:[#allocation2 + $0xa2c] ss:$16 sps:$4 sm:$0xff]  }
 0x156   :  { %3455 = vmatprep.subr.bf16.mxu0 %v5374_v43  ;;  %3783 = vmatprep.subr.bf16.mxu1 %v5377_v44  ;;  %v707_v43 = vcombine.high %v6038_v36, %v6038_v36  ;;  %v5456_v44 = vld [vmem:[#allocation2 + $0xa20] ss:$16 sps:$4 sm:$0xff]   ;;  %v5470_v36 = vld [vmem:[#allocation2 + $0xa64] ss:$16 sps:$4 sm:$0xff]  }
 0x159   :  { %3456 = vmatpush1.bf16.msra.mxu0 %v5372_v45  ;;  %3784 = vmatpush1.bf16.msra.mxu1 %v5375_v46  ;;  %v5464_v45 = vld [vmem:[#allocation2 + $0xa44] ss:$16 sps:$4 sm:$0xff]   ;;  %v5467_v46 = vld [vmem:[#allocation2 + $0xa4c] ss:$16 sps:$4 sm:$0xff]  }
 0x15a   :  { %3457 = vmatprep.subr.bf16.mxu0 %v5380_v47  ;;  %3785 = vmatprep.subr.bf16.mxu1 %v5383_v48  ;;  %v5462_v47 = vld [vmem:[#allocation2 + $0xa40] ss:$16 sps:$4 sm:$0xff]   ;;  %v5465_v48 = vld [vmem:[#allocation2 + $0xa48] ss:$16 sps:$4 sm:$0xff]  }
 0x15d   :  { %3458 = vmatpush1.bf16.msra.mxu0 %v5378_v50  ;;  %3786 = vmatpush1.bf16.msra.mxu1 %v5381_v51  ;;  %v5473_v50 = vld [vmem:[#allocation2 + $0xa6c] ss:$16 sps:$4 sm:$0xff]   ;;  %v5468_v51 = vld [vmem:[#allocation2 + $0xa60] ss:$16 sps:$4 sm:$0xff]  }
 0x15e   :  { %3459 = vmatprep.subr.bf16.mxu0 %v5386_v53  ;;  %3787 = vmatprep.subr.bf16.mxu1 %v5389_v54  ;;  %v5471_v53 = vld [vmem:[#allocation2 + $0xa68] ss:$16 sps:$4 sm:$0xff]   ;;  %v5476_v54 = vld [vmem:[#allocation2 + $0xa84] ss:$16 sps:$4 sm:$0xff]  }
 0x161   :  { %3460 = vmatpush1.bf16.msra.mxu0 %v5384_v55  ;;  %3788 = vmatpush1.bf16.msra.mxu1 %v5387_v56  ;;  %v5479_v55 = vld [vmem:[#allocation2 + $0xa8c] ss:$16 sps:$4 sm:$0xff]   ;;  %v5474_v56 = vld [vmem:[#allocation2 + $0xa80] ss:$16 sps:$4 sm:$0xff]  }
 0x162   :  { %3461 = vmatprep.subr.bf16.mxu0 %v5392_v57  ;;  %3789 = vmatprep.subr.bf16.mxu1 %v5395_v58  ;;  %v5477_v57 = vld [vmem:[#allocation2 + $0xa88] ss:$16 sps:$4 sm:$0xff]   ;;  %v5482_v58 = vld [vmem:[#allocation2 + $0xaa4] ss:$16 sps:$4 sm:$0xff]  }
 0x165   :  { %3462 = vmatpush1.bf16.msra.mxu0 %v5390_v59  ;;  %3790 = vmatpush1.bf16.msra.mxu1 %v5393_v60  ;;  %v5485_v59 = vld [vmem:[#allocation2 + $0xaac] ss:$16 sps:$4 sm:$0xff]   ;;  %v5480_v60 = vld [vmem:[#allocation2 + $0xaa0] ss:$16 sps:$4 sm:$0xff]  }
 0x166   :  { %3463 = vmatprep.subr.bf16.mxu0 %v5398_v61  ;;  %3791 = vmatprep.subr.bf16.mxu1 %v5401_v62  ;;  %v5483_v61 = vld [vmem:[#allocation2 + $0xaa8] ss:$16 sps:$4 sm:$0xff]   ;;  %v5488_v62 = vld [vmem:[#allocation2 + $0xac4] ss:$16 sps:$4 sm:$0xff]  }
 0x169   :  { %3464 = vmatpush1.bf16.msra.mxu0 %v5396_v63  ;;  %3792 = vmatpush1.bf16.msra.mxu1 %v5399_v0  ;;  %v5491_v63 = vld [vmem:[#allocation2 + $0xacc] ss:$16 sps:$4 sm:$0xff]   ;;  %v5486_v0 = vld [vmem:[#allocation2 + $0xac0] ss:$16 sps:$4 sm:$0xff]  }
 0x16a   :  { %3465 = vmatprep.subr.bf16.mxu0 %v5404_v1  ;;  %3793 = vmatprep.subr.bf16.mxu1 %v5407_v2  ;;  %v5489_v1 = vld [vmem:[#allocation2 + $0xac8] ss:$16 sps:$4 sm:$0xff]   ;;  %v5494_v2 = vld [vmem:[#allocation2 + $0xae4] ss:$16 sps:$4 sm:$0xff]  }
 0x16d   :  { %3466 = vmatpush1.bf16.msra.mxu0 %v5402_v3  ;;  %3794 = vmatpush1.bf16.msra.mxu1 %v5405_v4  ;;  %v5497_v3 = vld [vmem:[#allocation2 + $0xaec] ss:$16 sps:$4 sm:$0xff]   ;;  %v5492_v4 = vld [vmem:[#allocation2 + $0xae0] ss:$16 sps:$4 sm:$0xff]  }
 0x16e   :  { %3467 = vmatprep.subr.bf16.mxu0 %v5410_v5  ;;  %3795 = vmatprep.subr.bf16.mxu1 %v5413_v6  ;;  %v5495_v5 = vld [vmem:[#allocation2 + $0xae8] ss:$16 sps:$4 sm:$0xff]   ;;  %v5500_v6 = vld [vmem:[#allocation2 + $0xb04] ss:$16 sps:$4 sm:$0xff]  }
 0x171   :  { %3468 = vmatpush1.bf16.msra.mxu0 %v5408_v7  ;;  %3796 = vmatpush1.bf16.msra.mxu1 %v5411_v8  ;;  %v5503_v7 = vld [vmem:[#allocation2 + $0xb0c] ss:$16 sps:$4 sm:$0xff]   ;;  %v5498_v8 = vld [vmem:[#allocation2 + $0xb00] ss:$16 sps:$4 sm:$0xff]  }
 0x172   :  { %3469 = vmatprep.subr.bf16.mxu0 %v5416_v9  ;;  %3797 = vmatprep.subr.bf16.mxu1 %v5419_v10  ;;  %v5501_v9 = vld [vmem:[#allocation2 + $0xb08] ss:$16 sps:$4 sm:$0xff]   ;;  %v5506_v10 = vld [vmem:[#allocation2 + $0xb24] ss:$16 sps:$4 sm:$0xff]  }
 0x175   :  { %3470 = vmatpush1.bf16.msra.mxu0 %v5414_v11  ;;  %3798 = vmatpush1.bf16.msra.mxu1 %v5417_v12  ;;  %v5509_v11 = vld [vmem:[#allocation2 + $0xb2c] ss:$16 sps:$4 sm:$0xff]   ;;  %v5504_v12 = vld [vmem:[#allocation2 + $0xb20] ss:$16 sps:$4 sm:$0xff]  }
 0x176   :  { %3471 = vmatprep.subr.bf16.mxu0 %v5422_v14  ;;  %3799 = vmatprep.subr.bf16.mxu1 %v5425_v16  ;;  %v5507_v14 = vld [vmem:[#allocation2 + $0xb28] ss:$16 sps:$4 sm:$0xff]   ;;  %v5512_v16 = vld [vmem:[#allocation2 + $0xb44] ss:$16 sps:$4 sm:$0xff]  }
 0x179   :  { %3472 = vmatpush1.bf16.msra.mxu0 %v5420_v17  ;;  %3800 = vmatpush1.bf16.msra.mxu1 %v5423_v18  ;;  %v5515_v17 = vld [vmem:[#allocation2 + $0xb4c] ss:$16 sps:$4 sm:$0xff]   ;;  %v5510_v18 = vld [vmem:[#allocation2 + $0xb40] ss:$16 sps:$4 sm:$0xff]  }
 0x17a   :  { %3473 = vmatprep.subr.bf16.mxu0 %v5428_v19  ;;  %3801 = vmatprep.subr.bf16.mxu1 %v5431_v52  ;;  %v5513_v19 = vld [vmem:[#allocation2 + $0xb48] ss:$16 sps:$4 sm:$0xff]   ;;  %v5518_v52 = vld [vmem:[#allocation2 + $0xb64] ss:$16 sps:$4 sm:$0xff]  }
 0x17d   :  { %3474 = vmatpush1.bf16.msra.mxu0 %v5426_v20  ;;  %3802 = vmatpush1.bf16.msra.mxu1 %v5429_v22  ;;  %v5521_v20 = vld [vmem:[#allocation2 + $0xb6c] ss:$16 sps:$4 sm:$0xff]   ;;  %v5516_v22 = vld [vmem:[#allocation2 + $0xb60] ss:$16 sps:$4 sm:$0xff]  }
 0x17e   :  { %3475 = vmatprep.subr.bf16.mxu0 %v5434_v23  ;;  %3803 = vmatprep.subr.bf16.mxu1 %v5437_v24  ;;  %v5519_v23 = vld [vmem:[#allocation2 + $0xb68] ss:$16 sps:$4 sm:$0xff]   ;;  %v5524_v24 = vld [vmem:[#allocation2 + $0xb84] ss:$16 sps:$4 sm:$0xff]  }
 0x181   :  { %3476 = vmatpush1.bf16.msra.mxu0 %v5432_v26  ;;  %3804 = vmatpush1.bf16.msra.mxu1 %v5435_v13  ;;  %v5527_v26 = vld [vmem:[#allocation2 + $0xb8c] ss:$16 sps:$4 sm:$0xff]   ;;  %v5522_v13 = vld [vmem:[#allocation2 + $0xb80] ss:$16 sps:$4 sm:$0xff]  }
 0x182   :  { %3477 = vmatprep.subr.bf16.mxu0 %v5440_v29  ;;  %3805 = vmatprep.subr.bf16.mxu1 %v5443_v30  ;;  %v5525_v29 = vld [vmem:[#allocation2 + $0xb88] ss:$16 sps:$4 sm:$0xff]   ;;  %v5530_v30 = vld [vmem:[#allocation2 + $0xba4] ss:$16 sps:$4 sm:$0xff]  }
 0x185   :  { %3478 = vmatpush1.bf16.msra.mxu0 %v5438_v31  ;;  %3806 = vmatpush1.bf16.msra.mxu1 %v5441_v32  ;;  %v5533_v31 = vld [vmem:[#allocation2 + $0xbac] ss:$16 sps:$4 sm:$0xff]   ;;  %v5528_v32 = vld [vmem:[#allocation2 + $0xba0] ss:$16 sps:$4 sm:$0xff]  }
 0x186   :  { %3479 = vmatprep.subr.bf16.mxu0 %v5446_v15  ;;  %3807 = vmatprep.subr.bf16.mxu1 %v5449_v33  ;;  %v5531_v15 = vld [vmem:[#allocation2 + $0xba8] ss:$16 sps:$4 sm:$0xff]   ;;  %v5536_v33 = vld [vmem:[#allocation2 + $0xbc4] ss:$16 sps:$4 sm:$0xff]  }
 0x189   :  { %3480 = vmatpush1.bf16.msra.mxu0 %v5444_v34  ;;  %3808 = vmatpush1.bf16.msra.mxu1 %v5447_v35  ;;  %v5539_v34 = vld [vmem:[#allocation2 + $0xbcc] ss:$16 sps:$4 sm:$0xff]   ;;  %v660_v35 = vcombine.high %v6027_v21, %v6027_v21 }
 0x18a   :  { %3490 = vmatprep.subr.bf16.mxu0 %v5452_v25  ;;  %3818 = vmatprep.subr.bf16.mxu1 %v5455_v37  ;;  %v5534_v25 = vld [vmem:[#allocation2 + $0xbc0] ss:$16 sps:$4 sm:$0xff]   ;;  %v5537_v37 = vld [vmem:[#allocation2 + $0xbc8] ss:$16 sps:$4 sm:$0xff]  }
 0x18c   :  { %3482 = vmatmul.mubr.bf16.vlgmr.msra.gmra.mrb[0].mxu0 %v6044_v38  ;;  %3810 = vmatmul.mubr.bf16.vlgmr.msra.gmra.mrb[0].mxu1 %v6044_v38 }
 0x18d   :  { %3491 = vmatpush1.bf16.msra.mxu0 %v5450_v27  ;;  %3819 = vmatpush1.bf16.msra.mxu1 %v5453_v39  ;;  %v5542_v27 = vld [vmem:[#allocation2 + $0xbe4] ss:$16 sps:$4 sm:$0xff]   ;;  %v5545_v39 = vld [vmem:[#allocation2 + $0xbec] ss:$16 sps:$4 sm:$0xff]  }
 0x18e   :  { %3492 = vmatprep.subr.bf16.mxu0 %v5458_v40  ;;  %3820 = vmatprep.subr.bf16.mxu1 %v5461_v41  ;;  %v6053_v40 = vrot.slane %v660_v35, %v5987_v49  ;;  %v5540_v41 = vld [vmem:[#allocation2 + $0xbe0] ss:$16 sps:$4 sm:$0xff]   ;;  %v5621_v35 = vld [vmem:[#allocation2 + $0xd88] ss:$16 sps:$4 sm:$0xff]  }
 0x18f   :  { %3522 = vmatprep.mubr.bf16.mxu0 %v707_v43  ;;  %3850 = vmatprep.mubr.bf16.mxu1 %v707_v43  ;;  %v5543_v43 = vld [vmem:[#allocation2 + $0xbe8] ss:$16 sps:$4 sm:$0xff]  }
 0x190   :  { %v676_v21 = vcombine.high %v6053_v40, %v6053_v40 }
 0x191   :  { %3493 = vmatpush1.bf16.msra.mxu0 %v5456_v44  ;;  %3821 = vmatpush1.bf16.msra.mxu1 %v5459_v28  ;;  %v5548_v44 = vld [vmem:[#allocation2 + $0xc04] ss:$16 sps:$4 sm:$0xff]   ;;  %v5551_v28 = vld [vmem:[#allocation2 + $0xc0c] ss:$16 sps:$4 sm:$0xff]  }
 0x192   :  { %3494 = vmatprep.subr.bf16.mxu0 %v5464_v45  ;;  %3822 = vmatprep.subr.bf16.mxu1 %v5467_v46  ;;  %v705_v45 = vcombine.high %v6044_v38, %v6044_v38  ;;  %v5546_v46 = vld [vmem:[#allocation2 + $0xc00] ss:$16 sps:$4 sm:$0xff]   ;;  %v5560_v38 = vld [vmem:[#allocation2 + $0xc44] ss:$16 sps:$4 sm:$0xff]  }
 0x195   :  { %3495 = vmatpush1.bf16.msra.mxu0 %v5462_v47  ;;  %3823 = vmatpush1.bf16.msra.mxu1 %v5465_v48  ;;  %v5549_v47 = vld [vmem:[#allocation2 + $0xc08] ss:$16 sps:$4 sm:$0xff]   ;;  %v5554_v48 = vld [vmem:[#allocation2 + $0xc24] ss:$16 sps:$4 sm:$0xff]  }
 0x196   :  { %3496 = vmatprep.subr.bf16.mxu0 %v5470_v36  ;;  %3824 = vmatprep.subr.bf16.mxu1 %v5473_v50  ;;  %v5557_v36 = vld [vmem:[#allocation2 + $0xc2c] ss:$16 sps:$4 sm:$0xff]   ;;  %v6060_v50 = vrot.slane %v676_v21, %v5987_v49  ;;  %v5638_v21 = vld [vmem:[#allocation2 + $0xde4] ss:$16 sps:$4 sm:$0xff]  }
 0x199   :  { %3497 = vmatpush1.bf16.msra.mxu0 %v5468_v51  ;;  %3825 = vmatpush1.bf16.msra.mxu1 %v5471_v53  ;;  %v5552_v51 = vld [vmem:[#allocation2 + $0xc20] ss:$16 sps:$4 sm:$0xff]   ;;  %v5555_v53 = vld [vmem:[#allocation2 + $0xc28] ss:$16 sps:$4 sm:$0xff]  }
 0x19a   :  { %3498 = vmatprep.subr.bf16.mxu0 %v5476_v54  ;;  %3826 = vmatprep.subr.bf16.mxu1 %v5479_v55  ;;  %v5563_v54 = vld [vmem:[#allocation2 + $0xc4c] ss:$16 sps:$4 sm:$0xff]   ;;  %v5558_v55 = vld [vmem:[#allocation2 + $0xc40] ss:$16 sps:$4 sm:$0xff]  }
 0x19d   :  { %3499 = vmatpush1.bf16.msra.mxu0 %v5474_v56  ;;  %3827 = vmatpush1.bf16.msra.mxu1 %v5477_v57  ;;  %v5561_v56 = vld [vmem:[#allocation2 + $0xc48] ss:$16 sps:$4 sm:$0xff]   ;;  %v5566_v57 = vld [vmem:[#allocation2 + $0xc64] ss:$16 sps:$4 sm:$0xff]  }
 0x19e   :  { %3500 = vmatprep.subr.bf16.mxu0 %v5482_v58  ;;  %3828 = vmatprep.subr.bf16.mxu1 %v5485_v59  ;;  %v5569_v58 = vld [vmem:[#allocation2 + $0xc6c] ss:$16 sps:$4 sm:$0xff]   ;;  %v5564_v59 = vld [vmem:[#allocation2 + $0xc60] ss:$16 sps:$4 sm:$0xff]  }
 0x1a1   :  { %3501 = vmatpush1.bf16.msra.mxu0 %v5480_v60  ;;  %3829 = vmatpush1.bf16.msra.mxu1 %v5483_v61  ;;  %v5567_v60 = vld [vmem:[#allocation2 + $0xc68] ss:$16 sps:$4 sm:$0xff]   ;;  %v5572_v61 = vld [vmem:[#allocation2 + $0xc84] ss:$16 sps:$4 sm:$0xff]  }
 0x1a2   :  { %3502 = vmatprep.subr.bf16.mxu0 %v5488_v62  ;;  %3830 = vmatprep.subr.bf16.mxu1 %v5491_v63  ;;  %v5575_v62 = vld [vmem:[#allocation2 + $0xc8c] ss:$16 sps:$4 sm:$0xff]   ;;  %v5570_v63 = vld [vmem:[#allocation2 + $0xc80] ss:$16 sps:$4 sm:$0xff]  }
 0x1a5   :  { %3503 = vmatpush1.bf16.msra.mxu0 %v5486_v0  ;;  %3831 = vmatpush1.bf16.msra.mxu1 %v5489_v1  ;;  %v5573_v0 = vld [vmem:[#allocation2 + $0xc88] ss:$16 sps:$4 sm:$0xff]   ;;  %v5578_v1 = vld [vmem:[#allocation2 + $0xca4] ss:$16 sps:$4 sm:$0xff]  }
 0x1a6   :  { %3504 = vmatprep.subr.bf16.mxu0 %v5494_v2  ;;  %3832 = vmatprep.subr.bf16.mxu1 %v5497_v3  ;;  %v5581_v2 = vld [vmem:[#allocation2 + $0xcac] ss:$16 sps:$4 sm:$0xff]   ;;  %v5576_v3 = vld [vmem:[#allocation2 + $0xca0] ss:$16 sps:$4 sm:$0xff]  }
 0x1a9   :  { %3505 = vmatpush1.bf16.msra.mxu0 %v5492_v4  ;;  %3833 = vmatpush1.bf16.msra.mxu1 %v5495_v5  ;;  %v5579_v4 = vld [vmem:[#allocation2 + $0xca8] ss:$16 sps:$4 sm:$0xff]   ;;  %v5584_v5 = vld [vmem:[#allocation2 + $0xcc4] ss:$16 sps:$4 sm:$0xff]  }
 0x1aa   :  { %3506 = vmatprep.subr.bf16.mxu0 %v5500_v6  ;;  %3834 = vmatprep.subr.bf16.mxu1 %v5503_v7  ;;  %v5587_v6 = vld [vmem:[#allocation2 + $0xccc] ss:$16 sps:$4 sm:$0xff]   ;;  %v5582_v7 = vld [vmem:[#allocation2 + $0xcc0] ss:$16 sps:$4 sm:$0xff]  }
 0x1ad   :  { %3507 = vmatpush1.bf16.msra.mxu0 %v5498_v8  ;;  %3835 = vmatpush1.bf16.msra.mxu1 %v5501_v9  ;;  %v5585_v8 = vld [vmem:[#allocation2 + $0xcc8] ss:$16 sps:$4 sm:$0xff]   ;;  %v5590_v9 = vld [vmem:[#allocation2 + $0xce4] ss:$16 sps:$4 sm:$0xff]  }
 0x1ae   :  { %3508 = vmatprep.subr.bf16.mxu0 %v5506_v10  ;;  %3836 = vmatprep.subr.bf16.mxu1 %v5509_v11  ;;  %v5593_v10 = vld [vmem:[#allocation2 + $0xcec] ss:$16 sps:$4 sm:$0xff]   ;;  %v5588_v11 = vld [vmem:[#allocation2 + $0xce0] ss:$16 sps:$4 sm:$0xff]  }
 0x1b1   :  { %3509 = vmatpush1.bf16.msra.mxu0 %v5504_v12  ;;  %3837 = vmatpush1.bf16.msra.mxu1 %v5507_v14  ;;  %v5591_v12 = vld [vmem:[#allocation2 + $0xce8] ss:$16 sps:$4 sm:$0xff]   ;;  %v5596_v14 = vld [vmem:[#allocation2 + $0xd04] ss:$16 sps:$4 sm:$0xff]  }
 0x1b2   :  { %3510 = vmatprep.subr.bf16.mxu0 %v5512_v16  ;;  %3838 = vmatprep.subr.bf16.mxu1 %v5515_v17  ;;  %v5599_v16 = vld [vmem:[#allocation2 + $0xd0c] ss:$16 sps:$4 sm:$0xff]   ;;  %v5594_v17 = vld [vmem:[#allocation2 + $0xd00] ss:$16 sps:$4 sm:$0xff]  }
 0x1b5   :  { %3511 = vmatpush1.bf16.msra.mxu0 %v5510_v18  ;;  %3839 = vmatpush1.bf16.msra.mxu1 %v5513_v19  ;;  %v5597_v18 = vld [vmem:[#allocation2 + $0xd08] ss:$16 sps:$4 sm:$0xff]   ;;  %v5602_v19 = vld [vmem:[#allocation2 + $0xd24] ss:$16 sps:$4 sm:$0xff]  }
 0x1b6   :  { %3512 = vmatprep.subr.bf16.mxu0 %v5518_v52  ;;  %3840 = vmatprep.subr.bf16.mxu1 %v5521_v20  ;;  %v5605_v52 = vld [vmem:[#allocation2 + $0xd2c] ss:$16 sps:$4 sm:$0xff]   ;;  %v5600_v20 = vld [vmem:[#allocation2 + $0xd20] ss:$16 sps:$4 sm:$0xff]  }
 0x1b9   :  { %3513 = vmatpush1.bf16.msra.mxu0 %v5516_v22  ;;  %3841 = vmatpush1.bf16.msra.mxu1 %v5519_v23  ;;  %v5603_v22 = vld [vmem:[#allocation2 + $0xd28] ss:$16 sps:$4 sm:$0xff]   ;;  %v5608_v23 = vld [vmem:[#allocation2 + $0xd44] ss:$16 sps:$4 sm:$0xff]  }
 0x1ba   :  { %3514 = vmatprep.subr.bf16.mxu0 %v5524_v24  ;;  %3842 = vmatprep.subr.bf16.mxu1 %v5527_v26  ;;  %v5611_v24 = vld [vmem:[#allocation2 + $0xd4c] ss:$16 sps:$4 sm:$0xff]   ;;  %v5606_v26 = vld [vmem:[#allocation2 + $0xd40] ss:$16 sps:$4 sm:$0xff]  }
 0x1bd   :  { %3515 = vmatpush1.bf16.msra.mxu0 %v5522_v13  ;;  %3843 = vmatpush1.bf16.msra.mxu1 %v5525_v29  ;;  %v5609_v13 = vld [vmem:[#allocation2 + $0xd48] ss:$16 sps:$4 sm:$0xff]   ;;  %v5614_v29 = vld [vmem:[#allocation2 + $0xd64] ss:$16 sps:$4 sm:$0xff]  }
 0x1be   :  { %3516 = vmatprep.subr.bf16.mxu0 %v5530_v30  ;;  %3844 = vmatprep.subr.bf16.mxu1 %v5533_v31  ;;  %v5617_v30 = vld [vmem:[#allocation2 + $0xd6c] ss:$16 sps:$4 sm:$0xff]   ;;  %v5612_v31 = vld [vmem:[#allocation2 + $0xd60] ss:$16 sps:$4 sm:$0xff]  }
 0x1c1   :  { %3517 = vmatpush1.bf16.msra.mxu0 %v5528_v32  ;;  %3845 = vmatpush1.bf16.msra.mxu1 %v5531_v15  ;;  %v5615_v32 = vld [vmem:[#allocation2 + $0xd68] ss:$16 sps:$4 sm:$0xff]   ;;  %v5620_v15 = vld [vmem:[#allocation2 + $0xd84] ss:$16 sps:$4 sm:$0xff]  }
 0x1c2   :  { %3518 = vmatprep.subr.bf16.mxu0 %v5536_v33  ;;  %3846 = vmatprep.subr.bf16.mxu1 %v5539_v34  ;;  %v5623_v33 = vld [vmem:[#allocation2 + $0xd8c] ss:$16 sps:$4 sm:$0xff]   ;;  %v5618_v34 = vld [vmem:[#allocation2 + $0xd80] ss:$16 sps:$4 sm:$0xff]  }
 0x1c5   :  { %3519 = vmatpush1.bf16.msra.mxu0 %v5534_v25  ;;  %3847 = vmatpush1.bf16.msra.mxu1 %v5537_v37  ;;  %v5626_v25 = vld [vmem:[#allocation2 + $0xda4] ss:$16 sps:$4 sm:$0xff]   ;;  %v5629_v37 = vld [vmem:[#allocation2 + $0xdac] ss:$16 sps:$4 sm:$0xff]  }
 0x1c6   :  { %3520 = vmatprep.subr.bf16.mxu0 %v5542_v27  ;;  %3848 = vmatprep.subr.bf16.mxu1 %v5545_v39  ;;  %v5624_v27 = vld [vmem:[#allocation2 + $0xda0] ss:$16 sps:$4 sm:$0xff]   ;;  %v5627_v39 = vld [vmem:[#allocation2 + $0xda8] ss:$16 sps:$4 sm:$0xff]  }
 0x1c9   :  { %3521 = vmatpush1.bf16.msra.mxu0 %v5540_v41  ;;  %3849 = vmatpush1.bf16.msra.mxu1 %v5543_v43  ;;  %v5632_v41 = vld [vmem:[#allocation2 + $0xdc4] ss:$16 sps:$4 sm:$0xff]   ;;  %v5635_v43 = vld [vmem:[#allocation2 + $0xdcc] ss:$16 sps:$4 sm:$0xff]  }
 0x1ca   :  { %3531 = vmatprep.subr.bf16.mxu0 %v5548_v44  ;;  %3859 = vmatprep.subr.bf16.mxu1 %v5551_v28  ;;  %v5630_v44 = vld [vmem:[#allocation2 + $0xdc0] ss:$16 sps:$4 sm:$0xff]   ;;  %v5633_v28 = vld [vmem:[#allocation2 + $0xdc8] ss:$16 sps:$4 sm:$0xff]  }
 0x1cc   :  { %3523 = vmatmul.mubr.bf16.vlgmr.msra.gmra.mrb[0].mxu0 %v705_v45  ;;  %3851 = vmatmul.mubr.bf16.vlgmr.msra.gmra.mrb[0].mxu1 %v705_v45  ;;  %v5641_v45 = vld [vmem:[#allocation2 + $0xdec] ss:$16 sps:$4 sm:$0xff]  }
 0x1cd   :  { %3532 = vmatpush1.bf16.msra.mxu0 %v5546_v46  ;;  %3860 = vmatpush1.bf16.msra.mxu1 %v5549_v47  ;;  %v5636_v46 = vld [vmem:[#allocation2 + $0xde0] ss:$16 sps:$4 sm:$0xff]   ;;  %v5639_v47 = vld [vmem:[#allocation2 + $0xde8] ss:$16 sps:$4 sm:$0xff]  }
 0x1ce   :  { %3533 = vmatprep.subr.bf16.mxu0 %v5554_v48  ;;  %3861 = vmatprep.subr.bf16.mxu1 %v5557_v36  ;;  %v5645_v48 = vld [vmem:[#allocation2 + $0xe04] ss:$16 sps:$4 sm:$0xff]   ;;  %v5648_v36 = vld [vmem:[#allocation2 + $0xe0c] ss:$16 sps:$4 sm:$0xff]  }
 0x1cf   :  { %3563 = vmatprep.mubr.bf16.mxu0 %v6060_v50  ;;  %3891 = vmatprep.mubr.bf16.mxu1 %v6060_v50 }
 0x1d1   :  { %3534 = vmatpush1.bf16.msra.mxu0 %v5552_v51  ;;  %3862 = vmatpush1.bf16.msra.mxu1 %v5555_v53  ;;  %v6066_v51 = vrot.slane %v6053_v40, %v5987_v49  ;;  %v5643_v53 = vld [vmem:[#allocation2 + $0xe00] ss:$16 sps:$4 sm:$0xff]   ;;  %v5652_v49 = vld [vmem:[#allocation2 + $0xe28] ss:$16 sps:$4 sm:$0xff]   ;;  %v5657_v40 = vld [vmem:[#allocation2 + $0xe44] ss:$16 sps:$4 sm:$0xff]  }
 0x1d2   :  { %3535 = vmatprep.subr.bf16.mxu0 %v5560_v38  ;;  %3863 = vmatprep.subr.bf16.mxu1 %v5563_v54  ;;  %v5646_v38 = vld [vmem:[#allocation2 + $0xe08] ss:$16 sps:$4 sm:$0xff]   ;;  %v5651_v54 = vld [vmem:[#allocation2 + $0xe24] ss:$16 sps:$4 sm:$0xff]  }
 0x1d5   :  { %3536 = vmatpush1.bf16.msra.mxu0 %v5558_v55  ;;  %3864 = vmatpush1.bf16.msra.mxu1 %v5561_v56  ;;  %v5654_v55 = vld [vmem:[#allocation2 + $0xe2c] ss:$16 sps:$4 sm:$0xff]   ;;  %v708_v56 = vcombine.high %v6060_v50, %v6060_v50  ;;  %v5663_v50 = vld [vmem:[#allocation2 + $0xe64] ss:$16 sps:$4 sm:$0xff]  }
 0x1d6   :  { %3537 = vmatprep.subr.bf16.mxu0 %v5566_v57  ;;  %3865 = vmatprep.subr.bf16.mxu1 %v5569_v58  ;;  %v5649_v57 = vld [vmem:[#allocation2 + $0xe20] ss:$16 sps:$4 sm:$0xff]   ;;  %v5660_v58 = vld [vmem:[#allocation2 + $0xe4c] ss:$16 sps:$4 sm:$0xff]  }
 0x1d9   :  { %3538 = vmatpush1.bf16.msra.mxu0 %v5564_v59  ;;  %3866 = vmatpush1.bf16.msra.mxu1 %v5567_v60  ;;  %v5655_v59 = vld [vmem:[#allocation2 + $0xe40] ss:$16 sps:$4 sm:$0xff]   ;;  %v5658_v60 = vld [vmem:[#allocation2 + $0xe48] ss:$16 sps:$4 sm:$0xff]  }
 0x1da   :  { %3539 = vmatprep.subr.bf16.mxu0 %v5572_v61  ;;  %3867 = vmatprep.subr.bf16.mxu1 %v5575_v62  ;;  %v5666_v61 = vld [vmem:[#allocation2 + $0xe6c] ss:$16 sps:$4 sm:$0xff]   ;;  %v5661_v62 = vld [vmem:[#allocation2 + $0xe60] ss:$16 sps:$4 sm:$0xff]  }
 0x1dd   :  { %3540 = vmatpush1.bf16.msra.mxu0 %v5570_v63  ;;  %3868 = vmatpush1.bf16.msra.mxu1 %v5573_v0  ;;  %v5664_v63 = vld [vmem:[#allocation2 + $0xe68] ss:$16 sps:$4 sm:$0xff]   ;;  %v5669_v0 = vld [vmem:[#allocation2 + $0xe84] ss:$16 sps:$4 sm:$0xff]  }
 0x1de   :  { %3541 = vmatprep.subr.bf16.mxu0 %v5578_v1  ;;  %3869 = vmatprep.subr.bf16.mxu1 %v5581_v2  ;;  %v5672_v1 = vld [vmem:[#allocation2 + $0xe8c] ss:$16 sps:$4 sm:$0xff]   ;;  %v5667_v2 = vld [vmem:[#allocation2 + $0xe80] ss:$16 sps:$4 sm:$0xff]  }
 0x1e1   :  { %3542 = vmatpush1.bf16.msra.mxu0 %v5576_v3  ;;  %3870 = vmatpush1.bf16.msra.mxu1 %v5579_v4  ;;  %v5670_v3 = vld [vmem:[#allocation2 + $0xe88] ss:$16 sps:$4 sm:$0xff]   ;;  %v5675_v4 = vld [vmem:[#allocation2 + $0xea4] ss:$16 sps:$4 sm:$0xff]  }
 0x1e2   :  { %3543 = vmatprep.subr.bf16.mxu0 %v5584_v5  ;;  %3871 = vmatprep.subr.bf16.mxu1 %v5587_v6  ;;  %v5678_v5 = vld [vmem:[#allocation2 + $0xeac] ss:$16 sps:$4 sm:$0xff]   ;;  %v5673_v6 = vld [vmem:[#allocation2 + $0xea0] ss:$16 sps:$4 sm:$0xff]  }
 0x1e5   :  { %3544 = vmatpush1.bf16.msra.mxu0 %v5582_v7  ;;  %3872 = vmatpush1.bf16.msra.mxu1 %v5585_v8  ;;  %v5676_v7 = vld [vmem:[#allocation2 + $0xea8] ss:$16 sps:$4 sm:$0xff]   ;;  %v5681_v8 = vld [vmem:[#allocation2 + $0xec4] ss:$16 sps:$4 sm:$0xff]  }
 0x1e6   :  { %3545 = vmatprep.subr.bf16.mxu0 %v5590_v9  ;;  %3873 = vmatprep.subr.bf16.mxu1 %v5593_v10  ;;  %v5684_v9 = vld [vmem:[#allocation2 + $0xecc] ss:$16 sps:$4 sm:$0xff]   ;;  %v5679_v10 = vld [vmem:[#allocation2 + $0xec0] ss:$16 sps:$4 sm:$0xff]  }
 0x1e9   :  { %3546 = vmatpush1.bf16.msra.mxu0 %v5588_v11  ;;  %3874 = vmatpush1.bf16.msra.mxu1 %v5591_v12  ;;  %v5682_v11 = vld [vmem:[#allocation2 + $0xec8] ss:$16 sps:$4 sm:$0xff]   ;;  %v5687_v12 = vld [vmem:[#allocation2 + $0xee4] ss:$16 sps:$4 sm:$0xff]  }
 0x1ea   :  { %3547 = vmatprep.subr.bf16.mxu0 %v5596_v14  ;;  %3875 = vmatprep.subr.bf16.mxu1 %v5599_v16  ;;  %v5690_v14 = vld [vmem:[#allocation2 + $0xeec] ss:$16 sps:$4 sm:$0xff]   ;;  %v5685_v16 = vld [vmem:[#allocation2 + $0xee0] ss:$16 sps:$4 sm:$0xff]  }
 0x1ed   :  { %3548 = vmatpush1.bf16.msra.mxu0 %v5594_v17  ;;  %3876 = vmatpush1.bf16.msra.mxu1 %v5597_v18  ;;  %v5688_v17 = vld [vmem:[#allocation2 + $0xee8] ss:$16 sps:$4 sm:$0xff]   ;;  %v5693_v18 = vld [vmem:[#allocation2 + $0xf04] ss:$16 sps:$4 sm:$0xff]  }
 0x1ee   :  { %3549 = vmatprep.subr.bf16.mxu0 %v5602_v19  ;;  %3877 = vmatprep.subr.bf16.mxu1 %v5605_v52  ;;  %v5696_v19 = vld [vmem:[#allocation2 + $0xf0c] ss:$16 sps:$4 sm:$0xff]   ;;  %v5691_v52 = vld [vmem:[#allocation2 + $0xf00] ss:$16 sps:$4 sm:$0xff]  }
 0x1f1   :  { %3550 = vmatpush1.bf16.msra.mxu0 %v5600_v20  ;;  %3878 = vmatpush1.bf16.msra.mxu1 %v5603_v22  ;;  %v5694_v20 = vld [vmem:[#allocation2 + $0xf08] ss:$16 sps:$4 sm:$0xff]   ;;  %v5699_v22 = vld [vmem:[#allocation2 + $0xf24] ss:$16 sps:$4 sm:$0xff]  }
 0x1f2   :  { %3551 = vmatprep.subr.bf16.mxu0 %v5608_v23  ;;  %3879 = vmatprep.subr.bf16.mxu1 %v5611_v24  ;;  %v5702_v23 = vld [vmem:[#allocation2 + $0xf2c] ss:$16 sps:$4 sm:$0xff]   ;;  %v5697_v24 = vld [vmem:[#allocation2 + $0xf20] ss:$16 sps:$4 sm:$0xff]  }
 0x1f5   :  { %3552 = vmatpush1.bf16.msra.mxu0 %v5606_v26  ;;  %3880 = vmatpush1.bf16.msra.mxu1 %v5609_v13  ;;  %v5700_v26 = vld [vmem:[#allocation2 + $0xf28] ss:$16 sps:$4 sm:$0xff]   ;;  %v5705_v13 = vld [vmem:[#allocation2 + $0xf44] ss:$16 sps:$4 sm:$0xff]  }
 0x1f6   :  { %3553 = vmatprep.subr.bf16.mxu0 %v5614_v29  ;;  %3881 = vmatprep.subr.bf16.mxu1 %v5617_v30  ;;  %v5708_v29 = vld [vmem:[#allocation2 + $0xf4c] ss:$16 sps:$4 sm:$0xff]   ;;  %v5703_v30 = vld [vmem:[#allocation2 + $0xf40] ss:$16 sps:$4 sm:$0xff]  }
 0x1f9   :  { %3554 = vmatpush1.bf16.msra.mxu0 %v5612_v31  ;;  %3882 = vmatpush1.bf16.msra.mxu1 %v5615_v32  ;;  %v5706_v31 = vld [vmem:[#allocation2 + $0xf48] ss:$16 sps:$4 sm:$0xff]   ;;  %v5711_v32 = vld [vmem:[#allocation2 + $0xf64] ss:$16 sps:$4 sm:$0xff]  }
 0x1fa   :  { %3555 = vmatprep.subr.bf16.mxu0 %v5620_v15  ;;  %3883 = vmatprep.subr.bf16.mxu1 %v5623_v33  ;;  %v5714_v15 = vld [vmem:[#allocation2 + $0xf6c] ss:$16 sps:$4 sm:$0xff]   ;;  %v5709_v33 = vld [vmem:[#allocation2 + $0xf60] ss:$16 sps:$4 sm:$0xff]  }
 0x1fd   :  { %3556 = vmatpush1.bf16.msra.mxu0 %v5618_v34  ;;  %3884 = vmatpush1.bf16.msra.mxu1 %v5621_v35  ;;  %v5712_v34 = vld [vmem:[#allocation2 + $0xf68] ss:$16 sps:$4 sm:$0xff]   ;;  %v5717_v35 = vld [vmem:[#allocation2 + $0xf84] ss:$16 sps:$4 sm:$0xff]  }
 0x1fe   :  { %3557 = vmatprep.subr.bf16.mxu0 %v5626_v25  ;;  %3885 = vmatprep.subr.bf16.mxu1 %v5629_v37  ;;  %v5720_v25 = vld [vmem:[#allocation2 + $0xf8c] ss:$16 sps:$4 sm:$0xff]   ;;  %v5715_v37 = vld [vmem:[#allocation2 + $0xf80] ss:$16 sps:$4 sm:$0xff]  }
 0x201   :  { %3558 = vmatpush1.bf16.msra.mxu0 %v5624_v27  ;;  %3886 = vmatpush1.bf16.msra.mxu1 %v5627_v39  ;;  %v5718_v27 = vld [vmem:[#allocation2 + $0xf88] ss:$16 sps:$4 sm:$0xff]   ;;  %v5723_v39 = vld [vmem:[#allocation2 + $0xfa4] ss:$16 sps:$4 sm:$0xff]  }
 0x202   :  { %3559 = vmatprep.subr.bf16.mxu0 %v5632_v41  ;;  %3887 = vmatprep.subr.bf16.mxu1 %v5635_v43  ;;  %v5726_v41 = vld [vmem:[#allocation2 + $0xfac] ss:$16 sps:$4 sm:$0xff]   ;;  %v5721_v43 = vld [vmem:[#allocation2 + $0xfa0] ss:$16 sps:$4 sm:$0xff]  }
 0x205   :  { %3560 = vmatpush1.bf16.msra.mxu0 %v5630_v44  ;;  %3888 = vmatpush1.bf16.msra.mxu1 %v5633_v28  ;;  %v5724_v44 = vld [vmem:[#allocation2 + $0xfa8] ss:$16 sps:$4 sm:$0xff]   ;;  %v5729_v28 = vld [vmem:[#allocation2 + $0xfc4] ss:$16 sps:$4 sm:$0xff]  }
 0x206   :  { %3561 = vmatprep.subr.bf16.mxu0 %v5638_v21  ;;  %3889 = vmatprep.subr.bf16.mxu1 %v5641_v45  ;;  %v5732_v21 = vld [vmem:[#allocation2 + $0xfcc] ss:$16 sps:$4 sm:$0xff]   ;;  %v5727_v45 = vld [vmem:[#allocation2 + $0xfc0] ss:$16 sps:$4 sm:$0xff]  }
 0x209   :  { %3562 = vmatpush1.bf16.msra.mxu0 %v5636_v46  ;;  %3890 = vmatpush1.bf16.msra.mxu1 %v5639_v47  ;;  %v5730_v46 = vld [vmem:[#allocation2 + $0xfc8] ss:$16 sps:$4 sm:$0xff]   ;;  %v5735_v47 = vld [vmem:[#allocation2 + $0xfe4] ss:$16 sps:$4 sm:$0xff]  }
 0x20a   :  { %3572 = vmatprep.subr.bf16.mxu0 %v5645_v48  ;;  %3900 = vmatprep.subr.bf16.mxu1 %v5648_v36  ;;  %v5738_v48 = vld [vmem:[#allocation2 + $0xfec] ss:$16 sps:$4 sm:$0xff]   ;;  %v5733_v36 = vld [vmem:[#allocation2 + $0xfe0] ss:$16 sps:$4 sm:$0xff]  }
 0x20c   :  { %3564 = vmatmul.mubr.bf16.vlgmr.msra.gmra.mrb[0].mxu0 %v6066_v51  ;;  %3892 = vmatmul.mubr.bf16.vlgmr.msra.gmra.mrb[0].mxu1 %v6066_v51 }
 0x20d   :  { %3573 = vmatpush1.bf16.msra.mxu0 %v5643_v53  ;;  %3901 = vmatpush1.bf16.msra.mxu1 %v5646_v38  ;;  %v5736_v53 = vld [vmem:[#allocation2 + $0xfe8] ss:$16 sps:$4 sm:$0xff]  }
 0x20e   :  { %3574 = vmatprep.subr.bf16.mxu0 %v5651_v54  ;;  %3902 = vmatprep.subr.bf16.mxu1 %v5654_v55  ;;  %v5739_v38 = vld [vmem:[#allocation7 + $0x40] sm:$0xff]   ;;  %v706_v55 = vcombine.high %v6066_v51, %v6066_v51  ;;  %v5749_v51 = vld [vmem:[#allocation7 + $0x10] sm:$0xff]  }
 0x20f   :  { %3604 = vmatprep.mubr.bf16.mxu0 %v708_v56  ;;  %3932 = vmatprep.mubr.bf16.mxu1 %v708_v56  ;;  %v5740_v54 = vld [vmem:[#allocation7 + $0xc0] sm:$0xff]  }
 0x210   :  { %v5741_v56 = vld [vmem:[#allocation7] sm:$0xff]  }
 0x211   :  { %3575 = vmatpush1.bf16.msra.mxu0 %v5649_v57  ;;  %3903 = vmatpush1.bf16.msra.mxu1 %v5652_v49  ;;  %v5742_v57 = vld [vmem:[#allocation7 + $0x80] sm:$0xff]   ;;  %v5743_v49 = vld [vmem:[#allocation7 + $0x48] sm:$0xff]  }
 0x212   :  { %3576 = vmatprep.subr.bf16.mxu0 %v5657_v40  ;;  %3904 = vmatprep.subr.bf16.mxu1 %v5660_v58  ;;  %v5744_v40 = vld [vmem:[#allocation7 + $0xc8] sm:$0xff]  }
 0x213   :  { %v5745_v58 = vld [vmem:[#allocation7 + $0x8] sm:$0xff]  }
 0x215   :  { %3577 = vmatpush1.bf16.msra.mxu0 %v5655_v59  ;;  %3905 = vmatpush1.bf16.msra.mxu1 %v5658_v60  ;;  %v5746_v59 = vld [vmem:[#allocation7 + $0x88] sm:$0xff]   ;;  %v5747_v60 = vld [vmem:[#allocation7 + $0x50] sm:$0xff]  }
 0x216   :  { %3578 = vmatprep.subr.bf16.mxu0 %v5663_v50  ;;  %3906 = vmatprep.subr.bf16.mxu1 %v5666_v61  ;;  %v5748_v50 = vld [vmem:[#allocation7 + $0xd0] sm:$0xff]  }
 0x217   :  { %v5750_v61 = vld [vmem:[#allocation7 + $0x90] sm:$0xff]  }
 0x219   :  { %3579 = vmatpush1.bf16.msra.mxu0 %v5661_v62  ;;  %3907 = vmatpush1.bf16.msra.mxu1 %v5664_v63  ;;  %v5751_v62 = vld [vmem:[#allocation7 + $0x58] sm:$0xff]  }
 0x21a   :  { %3580 = vmatprep.subr.bf16.mxu0 %v5669_v0  ;;  %3908 = vmatprep.subr.bf16.mxu1 %v5672_v1  ;;  %v5752_v63 = vld [vmem:[#allocation7 + $0xd8] sm:$0xff]  }
 0x21b   :  { %v5753_v0 = vld [vmem:[#allocation7 + $0x18] sm:$0xff]  }
 0x21c   :  { %v5754_v1 = vld [vmem:[#allocation7 + $0x98] sm:$0xff]  }
 0x21d   :  { %3581 = vmatpush1.bf16.msra.mxu0 %v5667_v2  ;;  %3909 = vmatpush1.bf16.msra.mxu1 %v5670_v3  ;;  %v5755_v2 = vld [vmem:[#allocation7 + $0x60] sm:$0xff]  }
 0x21e   :  { %3582 = vmatprep.subr.bf16.mxu0 %v5675_v4  ;;  %3910 = vmatprep.subr.bf16.mxu1 %v5678_v5  ;;  %v5756_v3 = vld [vmem:[#allocation7 + $0xe0] sm:$0xff]  }
 0x21f   :  { %v5757_v4 = vld [vmem:[#allocation7 + $0x20] sm:$0xff]  }
 0x220   :  { %v5758_v5 = vld [vmem:[#allocation7 + $0xa0] sm:$0xff]  }
 0x221   :  { %3583 = vmatpush1.bf16.msra.mxu0 %v5673_v6  ;;  %3911 = vmatpush1.bf16.msra.mxu1 %v5676_v7  ;;  %v5759_v6 = vld [vmem:[#allocation7 + $0x68] sm:$0xff]  }
 0x222   :  { %3584 = vmatprep.subr.bf16.mxu0 %v5681_v8  ;;  %3912 = vmatprep.subr.bf16.mxu1 %v5684_v9  ;;  %v5760_v7 = vld [vmem:[#allocation7 + $0xe8] sm:$0xff]  }
 0x223   :  { %v5761_v8 = vld [vmem:[#allocation7 + $0x28] sm:$0xff]  }
 0x224   :  { %v5762_v9 = vld [vmem:[#allocation7 + $0xa8] sm:$0xff]  }
 0x225   :  { %3585 = vmatpush1.bf16.msra.mxu0 %v5679_v10  ;;  %3913 = vmatpush1.bf16.msra.mxu1 %v5682_v11  ;;  %v5763_v10 = vld [vmem:[#allocation7 + $0x70] sm:$0xff]  }
 0x226   :  { %3586 = vmatprep.subr.bf16.mxu0 %v5687_v12  ;;  %3914 = vmatprep.subr.bf16.mxu1 %v5690_v14  ;;  %v5764_v11 = vld [vmem:[#allocation7 + $0xf0] sm:$0xff]  }
 0x227   :  { %v5765_v12 = vld [vmem:[#allocation7 + $0x30] sm:$0xff]  }
 0x228   :  { %v5766_v14 = vld [vmem:[#allocation7 + $0xb0] sm:$0xff]  }
 0x229   :  { %3587 = vmatpush1.bf16.msra.mxu0 %v5685_v16  ;;  %3915 = vmatpush1.bf16.msra.mxu1 %v5688_v17  ;;  %v5767_v16 = vld [vmem:[#allocation7 + $0x78] sm:$0xff]  }
 0x22a   :  { %3588 = vmatprep.subr.bf16.mxu0 %v5693_v18  ;;  %3916 = vmatprep.subr.bf16.mxu1 %v5696_v19  ;;  %v5768_v17 = vld [vmem:[#allocation7 + $0xf8] sm:$0xff]  }
 0x22b   :  { %v5769_v18 = vld [vmem:[#allocation7 + $0x38] sm:$0xff]  }
 0x22c   :  { %v5770_v19 = vld [vmem:[#allocation7 + $0xb8] sm:$0xff]  }
 0x22d   :  { %3589 = vmatpush1.bf16.msra.mxu0 %v5691_v52  ;;  %3917 = vmatpush1.bf16.msra.mxu1 %v5694_v20  ;;  %v591_v52 = vsub.s32 0, %v5984_v42  ;;  %v599_v20 = vsub.s32 2, %v5984_v42 }
 0x22e   :  { %3590 = vmatprep.subr.bf16.mxu0 %v5699_v22  ;;  %3918 = vmatprep.subr.bf16.mxu1 %v5702_v23  ;;  %v587_v22 = vld [vmem:[#allocation5] sm:$0xf]  ;;  %v595_v23 = vsub.s32 1, %v5984_v42 }
 0x231   :  { %3591 = vmatpush1.bf16.msra.mxu0 %v5697_v24  ;;  %3919 = vmatpush1.bf16.msra.mxu1 %v5700_v26  ;;  %v603_v24 = vsub.s32 3, %v5984_v42  ;;  %v592_v26 = vrot.slane %v587_v22, %v591_v52 }
 0x232   :  { %3592 = vmatprep.subr.bf16.mxu0 %v5705_v13  ;;  %3920 = vmatprep.subr.bf16.mxu1 %v5708_v29  ;;  %v600_v13 = vrot.slane %v587_v22, %v599_v20  ;;  %v596_v29 = vrot.slane %v587_v22, %v595_v23 }
 0x235   :  { %3593 = vmatpush1.bf16.msra.mxu0 %v5703_v30  ;;  %3921 = vmatpush1.bf16.msra.mxu1 %v5706_v31  ;;  %v604_v30 = vrot.slane %v587_v22, %v603_v24 }
 0x236   :  { %3594 = vmatprep.subr.bf16.mxu0 %v5711_v32  ;;  %3922 = vmatprep.subr.bf16.mxu1 %v5714_v15 }
 0x239   :  { %3595 = vmatpush1.bf16.msra.mxu0 %v5709_v33  ;;  %3923 = vmatpush1.bf16.msra.mxu1 %v5712_v34 }
 0x23a   :  { %3596 = vmatprep.subr.bf16.mxu0 %v5717_v35  ;;  %3924 = vmatprep.subr.bf16.mxu1 %v5720_v25 }
 0x23d   :  { %3597 = vmatpush1.bf16.msra.mxu0 %v5715_v37  ;;  %3925 = vmatpush1.bf16.msra.mxu1 %v5718_v27 }
 0x23e   :  { %3598 = vmatprep.subr.bf16.mxu0 %v5723_v39  ;;  %3926 = vmatprep.subr.bf16.mxu1 %v5726_v41 }
 0x241   :  { %3599 = vmatpush1.bf16.msra.mxu0 %v5721_v43  ;;  %3927 = vmatpush1.bf16.msra.mxu1 %v5724_v44 }
 0x242   :  { %3600 = vmatprep.subr.bf16.mxu0 %v5729_v28  ;;  %3928 = vmatprep.subr.bf16.mxu1 %v5732_v21 }
 0x245   :  { %3601 = vmatpush1.bf16.msra.mxu0 %v5727_v45  ;;  %3929 = vmatpush1.bf16.msra.mxu1 %v5730_v46 }
 0x246   :  { %3602 = vmatprep.subr.bf16.mxu0 %v5735_v47  ;;  %3930 = vmatprep.subr.bf16.mxu1 %v5738_v48 }
 0x249   :  { %3603 = vmatpush1.bf16.msra.mxu0 %v5733_v36  ;;  %3931 = vmatpush1.bf16.msra.mxu1 %v5736_v53 }
 0x24a   :  { %4855 = vmatprep.subr.bf16.mxu0 %v5739_v38  ;;  %4877 = vmatprep.subr.bf16.mxu1 %v5740_v54  ;;  %v4822_v38 = vld [vmem:[#allocation8] ss:$0 sm:$0xff] }
 0x24c   :  { %3605 = vmatmul.mubr.bf16.vlgmr.msra.gmra.mrb[0].mxu0 %v706_v55  ;;  %3933 = vmatmul.mubr.bf16.vlgmr.msra.gmra.mrb[0].mxu1 %v706_v55 }
 0x24d   :  { %4856 = vmatpush3.bf16.msra.mxu0 %v5741_v56  ;;  %4878 = vmatpush3.bf16.msra.mxu1 %v5742_v57 }
 0x24e   :  { %4857 = vmatprep.subr.bf16.mxu0 %v5743_v49  ;;  %4879 = vmatprep.subr.bf16.mxu1 %v5744_v40 }
 0x251   :  { %4858 = vmatpush3.bf16.msra.mxu0 %v5745_v58  ;;  %4880 = vmatpush3.bf16.msra.mxu1 %v5746_v59 }
 0x252   :  { %4859 = vmatprep.subr.bf16.mxu0 %v5747_v60  ;;  %4881 = vmatprep.subr.bf16.mxu1 %v5748_v50 }
 0x255   :  { %4860 = vmatpush3.bf16.msra.mxu0 %v5749_v51  ;;  %4882 = vmatpush3.bf16.msra.mxu1 %v5750_v61 }
 0x256   :  { %4861 = vmatprep.subr.bf16.mxu0 %v5751_v62  ;;  %4883 = vmatprep.subr.bf16.mxu1 %v5752_v63 }
 0x259   :  { %4862 = vmatpush3.bf16.msra.mxu0 %v5753_v0  ;;  %4884 = vmatpush3.bf16.msra.mxu1 %v5754_v1 }
 0x25a   :  { %4863 = vmatprep.subr.bf16.mxu0 %v5755_v2  ;;  %4885 = vmatprep.subr.bf16.mxu1 %v5756_v3 }
 0x25d   :  { %4864 = vmatpush3.bf16.msra.mxu0 %v5757_v4  ;;  %4886 = vmatpush3.bf16.msra.mxu1 %v5758_v5 }
 0x25e   :  { %4865 = vmatprep.subr.bf16.mxu0 %v5759_v6  ;;  %4887 = vmatprep.subr.bf16.mxu1 %v5760_v7 }
 0x261   :  { %4866 = vmatpush3.bf16.msra.mxu0 %v5761_v8  ;;  %4888 = vmatpush3.bf16.msra.mxu1 %v5762_v9 }
 0x262   :  { %4867 = vmatprep.subr.bf16.mxu0 %v5763_v10  ;;  %4889 = vmatprep.subr.bf16.mxu1 %v5764_v11 }
 0x265   :  { %4868 = vmatpush3.bf16.msra.mxu0 %v5765_v12  ;;  %4890 = vmatpush3.bf16.msra.mxu1 %v5766_v14 }
 0x266   :  { %4869 = vmatprep.subr.bf16.mxu0 %v5767_v16  ;;  %4891 = vmatprep.subr.bf16.mxu1 %v5768_v17 }
 0x269   :  { %4870 = vmatpush3.bf16.msra.mxu0 %v5769_v18  ;;  %4892 = vmatpush3.bf16.msra.mxu1 %v5770_v19 }
 0x31f   :  { %v3606_v31 = vpop.f32.mrb[0].mxu0  ;;  %v3934_v32 = vpop.f32.mrb[0].mxu1 }
 0x320   :  { %v4899_v15 = vadd.f32 %v3606_v31, %v592_v26  ;;  %v4901_v33 = vadd.f32 %v3934_v32, %v600_v13  ;;  %v3608_v34 = vpop.f32.mrb[1].mxu0  ;;  %v3936_v35 = vpop.f32.mrb[1].mxu1 }
 0x321   :  { %v4900_v25 = vadd.f32 %v3608_v34, %v596_v29  ;;  %v4902_v37 = vadd.f32 %v3936_v35, %v604_v30  ;;  %v3610_v27 = vpop.f32.mrb[2].mxu0  ;;  %v3938_v39 = vpop.f32.mrb[2].mxu1 }
 0x322   :  { %v3941_v41 = vmax.f32 %v4899_v15, 0.0  ;;  %v3943_v43 = vmax.f32 %v4901_v33, 0.0  ;;  %v3611_v44 = vpop.f32.mrb[3].mxu0  ;;  %v3939_v28 = vpop.f32.mrb[3].mxu1 }
 0x323   :  { %v3942_v21 = vmax.f32 %v4900_v25, 0.0  ;;  %v3944_v42 = vmax.f32 %v4902_v37, 0.0 }
 0x324   :  { %v3945_v47 = vpack.c.bf16 %v3941_v41, %v3941_v41  ;;  %v3947_v48 = vpack.c.bf16 %v3943_v43, %v3943_v43 }
 0x325   :  { %v3946_v45 = vpack.c.bf16 %v3942_v21, %v3942_v21  ;;  %v3948_v46 = vpack.c.bf16 %v3944_v42, %v3944_v42 }
 0x327   :  { %4244 = vmatprep.mubr.bf16.mxu0 %v3946_v45  ;;  %4284 = vmatprep.mubr.bf16.mxu1 %v3948_v46 }
 0x328   :  { %4245 = vmatmul.mubr.bf16.vlgmr.msra.gmra.mrb[4].mxu0 %v3945_v47  ;;  %4285 = vmatmul.mubr.bf16.vlgmr.msra.gmra.mrb[4].mxu1 %v3947_v48 }
 0x3fb   :  { %v4871_v36 = vpop.f32.mrb[4].mxu0  ;;  %v4893_v53 = vpop.f32.mrb[4].mxu1 }
 0x3fc   :  { %v4872_v54 = vpop.f32.mrb[5].mxu0  ;;  %v4894_v55 = vpop.f32.mrb[5].mxu1 }
 0x3fd   :  { %v4873_v56 = vadd.f32 %v4872_v54, %v4871_v36  ;;  %v4895_v57 = vadd.f32 %v4894_v55, %v4893_v53  ;;  %v4874_v49 = vpop.f32.mrb[6].mxu0  ;;  %v4896_v40 = vpop.f32.mrb[6].mxu1 }
 0x3fe   :  { %v4875_v58 = vpop.f32.mrb[7].mxu0  ;;  %v4897_v59 = vpop.f32.mrb[7].mxu1 }
 0x3ff   :  { %v4247_v60 = vadd.f32 %v4873_v56, %v4822_v38 }
 0x401   :  { %v4287_v50 = vadd.f32 %v4895_v57, %v4247_v60 }
 0x403   :  { %4292 = vst [vmem:[#allocation10] sm:$0x3] %v4287_v50 }
 0x404   :  { %5870 = shalt.err (!%p5867_p8)
}
 0x405   :  { %s5871_s25 = scalar_lea.hbm %s6095_s5, 32 }
 0x406   :  { %p5872_p9 = scmp.ne.s32.totalorder %s6095_s5, %s5871_s25  ;;  %p5875_p10 = scmp.lt.u32.totalorder %s5871_s25, %s6095_s5 }
 0x408   :  { %p5877_p11 = pnand %p5875_p10, %p5872_p9 }
 0x40a   :  { %5880 = shalt.err (!%p5877_p11)
}
 0x40b   :  { %4302 = dma.vmem_to_hbm [thread:$0]  %s4300_s20, 32, %s6095_s5, [#allocation4]  }
 0x40c   :  { %5887 = dma.done.wait [#allocation4], 32  }
 0x40d   :  { %5888 = vsyncadd [#allocation4], 4294967264 }
 0x40e   :  { %4306 = vsyncpa [#allocation3], 1 }
 0x40f   :  { %4307 = vsyncpa [#allocation6], 1 }
 0x410   :  { %4308 = vsyncpa [#allocation9], 1 }
 0x411   :  { %4309 = vsyncpa [#allocation4], 1 }

// kernel: vgg_like_forward.2
= control target key start
LH: loop header
LB: loop body
LE: loop exit
PB: predicated region body
PF: predicated region fallthrough
CT: control target
= control target key end

     0   :  { %18 = vsyncpa [#allocation11], 0  ;;  %s8871_s0 = inlined_call_operand.vmem [shape: f32[1,9,1800], index: 0, kind: input, shape index: {}]   ;;  %s8872_s1 = inlined_call_operand.hbm [shape: f32[16,9], index: 1, kind: input, shape index: {}]   ;;  %s8873_s2 = inlined_call_operand.vmem [shape: f32[16,1], index: 2, kind: input, shape index: {}]   ;;  %s8874_s3 = inlined_call_operand.hbm [shape: f32[1,1800], index: 3, kind: input, shape index: {}]   ;;  %s8875_s4 = inlined_call_operand.hbm [shape: bf16[16,144], index: 4, kind: input, shape index: {}]   ;;  %s8876_s5 = inlined_call_operand.vmem [shape: f32[16,1], index: 5, kind: input, shape index: {}]   ;;  %s8877_s6 = inlined_call_operand.hbm [shape: bf16[807,256], index: 6, kind: input, shape index: {}]   ;;  %s8878_s7 = inlined_call_operand.hbm [shape: bf16[32,144], index: 7, kind: input, shape index: {}]   ;;  %s8879_s8 = inlined_call_operand.vmem [shape: f32[32,1], index: 8, kind: input, shape index: {}]   ;;  %s8880_s9 = inlined_call_operand.hbm [shape: f32[1,512], index: 9, kind: input, shape index: {}]   ;;  %s8881_s10 = inlined_call_operand.hbm [shape: bf16[32,288], index: 10, kind: input, shape index: {}]   ;;  %s8882_s11 = inlined_call_operand.vmem [shape: f32[32,1], index: 11, kind: input, shape index: {}]   ;;  %s8883_s12 = inlined_call_operand.vmem [shape: bf16[205,64], index: 12, kind: input, shape index: {}]   ;;  %s8884_s13 = inlined_call_operand.vmem [shape: bf16[1,64,64], index: 13, kind: output, shape index: {}]  }
   0x1   :  { %19 = vsyncpa [#allocation13], 0 }
   0x2   :  { %20 = vsyncpa [#allocation16], 0 }
   0x3   :  { %21 = vsyncpa [#allocation19], 0  ;;  %s6794_s25 = smov [#allocation12]   ;;  %s6632_s29 = scalar_lea.hbm %s8874_s3, 240 }
   0x4   :  { %s44_s26 = sshll.u32 %s6794_s25, 4  ;;  %p6633_p0 = scmp.ne.s32.totalorder %s8874_s3, %s6632_s29  ;;  %s45_s26 = int_to_ptr.vmem [resolvable:$true] %s44_s26 }
   0x5   :  { %p6636_p1 = scmp.lt.u32.totalorder %s6632_s29, %s8874_s3 }
   0x7   :  { %p6638_p2 = pnand %p6636_p1, %p6633_p0 }
   0x9   :  { %6641 = shalt.err (!%p6638_p2)
}
   0xa   :  { %s6642_s17 = scalar_lea.vmem %s45_s26, 240  ;;  %s6646_s18 = scalar_lea.vmem %s45_s26, 256 }
   0xb   :  { %p6643_p3 = scmp.ne.s32.totalorder %s45_s26, %s6642_s17  ;;  %p6647_p4 = scmp.lt.s32.totalorder %s45_s26, %s45_s26 }
   0xc   :  { %p6648_p5 = scmp.lt.s32.totalorder %s6646_s18, %s6642_s17 }
   0xe   :  { %p6649_p6 = por %p6648_p5, %p6647_p4 }
  0x10   :  { %p6650_p7 = pnand %p6649_p6, %p6643_p3 }
  0x12   :  { %6653 = shalt.err (!%p6650_p7)
}
  0x13   :  { %47 = dma.hbm_to_vmem [thread:$0]  %s8874_s3, 240, %s45_s26, [#allocation13]  }
  0x14   :  { %s6795_s21 = smov [#allocation15]   ;;  %s6796_s23 = smov [#allocation18]  }
  0x15   :  { %s67_s22 = sshll.u32 %s6795_s21, 4  ;;  %s94_s24 = sshll.u32 %s6796_s23, 4  ;;  %s68_s22 = int_to_ptr.vmem [resolvable:$true] %s67_s22  ;;  %s95_s24 = int_to_ptr.vmem [resolvable:$true] %s94_s24 }
  0x16   :  { %s6654_s28 = scalar_lea.hbm %s8877_s6, 12928 }
  0x17   :  { %p6655_p8 = scmp.ne.s32.totalorder %s8877_s6, %s6654_s28  ;;  %p6658_p9 = scmp.lt.u32.totalorder %s6654_s28, %s8877_s6 }
  0x19   :  { %p6660_p10 = pnand %p6658_p9, %p6655_p8 }
  0x1b   :  { %6663 = shalt.err (!%p6660_p10)
}
  0x1c   :  { %s6664_s3 = scalar_lea.vmem %s68_s22, 12928  ;;  %p6669_p12 = scmp.lt.s32.totalorder %s68_s22, %s68_s22 }
  0x1d   :  { %p6665_p11 = scmp.ne.s32.totalorder %s68_s22, %s6664_s3  ;;  %p6670_p13 = scmp.lt.s32.totalorder %s6664_s3, %s6664_s3 }
  0x1f   :  { %p6671_p0 = por %p6670_p13, %p6669_p12 }
  0x21   :  { %p6672_p1 = pnand %p6671_p0, %p6665_p11 }
  0x23   :  { %6675 = shalt.err (!%p6672_p1)
}
  0x24   :  { %s6797_s26 = smov 128   ;;  %s6798_s16 = smov 8  }
  0x25   :  { %73 = dma.hbm_to_vmem [thread:$0]  %s8877_s6, 12928, %s68_s22, [#allocation16], %s6797_s26, %s6797_s26, %s6798_s16  }
  0x26   :  { %s6676_s21 = scalar_lea.hbm %s8880_s9, 64 }
  0x27   :  { %p6677_p2 = scmp.ne.s32.totalorder %s8880_s9, %s6676_s21  ;;  %p6680_p3 = scmp.lt.u32.totalorder %s6676_s21, %s8880_s9 }
  0x29   :  { %p6682_p4 = pnand %p6680_p3, %p6677_p2 }
  0x2b   :  { %6685 = shalt.err (!%p6682_p4)
}
  0x2c   :  { %s6686_s29 = scalar_lea.vmem %s95_s24, 64  ;;  %p6691_p6 = scmp.lt.s32.totalorder %s95_s24, %s95_s24 }
  0x2d   :  { %p6687_p5 = scmp.ne.s32.totalorder %s95_s24, %s6686_s29  ;;  %p6692_p7 = scmp.lt.s32.totalorder %s6686_s29, %s6686_s29 }
  0x2f   :  { %p6693_p8 = por %p6692_p7, %p6691_p6 }
  0x31   :  { %p6694_p9 = pnand %p6693_p8, %p6687_p5 }
  0x33   :  { %6697 = shalt.err (!%p6694_p9)
}
  0x34   :  { %97 = dma.hbm_to_vmem [thread:$0]  %s8880_s9, 64, %s95_s24, [#allocation19]  }
  0x35   :  { %s6799_s30 = smov [#allocation10]   ;;  %s6800_s15 = smov [#allocation14]  }
  0x36   :  { %s29_s14 = sshll.u32 %s6799_s30, 4  ;;  %s53_s3 = sshll.u32 %s6800_s15, 4  ;;  %s30_s14 = int_to_ptr.vmem [resolvable:$true] %s29_s14  ;;  %s54_s3 = int_to_ptr.vmem [resolvable:$true] %s53_s3 }
  0x37   :  { %s6698_s19 = scalar_lea.hbm %s8872_s1, 256 }
  0x38   :  { %p6699_p10 = scmp.ne.s32.totalorder %s8872_s1, %s6698_s19  ;;  %p6702_p11 = scmp.lt.u32.totalorder %s6698_s19, %s8872_s1 }
  0x3a   :  { %p6704_p12 = pnand %p6702_p11, %p6699_p10 }
  0x3c   :  { %6707 = shalt.err (!%p6704_p12)
}
  0x3d   :  { %s6708_s9 = scalar_lea.vmem %s30_s14, 256  ;;  %p6713_p0 = scmp.lt.s32.totalorder %s30_s14, %s30_s14 }
  0x3e   :  { %p6709_p13 = scmp.ne.s32.totalorder %s30_s14, %s6708_s9  ;;  %p6714_p1 = scmp.lt.s32.totalorder %s6708_s9, %s6708_s9 }
  0x40   :  { %p6715_p2 = por %p6714_p1, %p6713_p0 }
  0x42   :  { %p6716_p3 = pnand %p6715_p2, %p6709_p13 }
  0x44   :  { %6719 = shalt.err (!%p6716_p3)
}
  0x45   :  { %35 = dma.hbm_to_vmem [thread:$0]  %s8872_s1, 256, %s30_s14, [#allocation11], %s6797_s26, %s6797_s26, %s6798_s16  }
  0x46   :  { %s6720_s6 = scalar_lea.hbm %s8875_s4, 256 }
  0x47   :  { %p6721_p4 = scmp.ne.s32.totalorder %s8875_s4, %s6720_s6  ;;  %p6724_p5 = scmp.lt.u32.totalorder %s6720_s6, %s8875_s4 }
  0x49   :  { %p6726_p6 = pnand %p6724_p5, %p6721_p4 }
  0x4b   :  { %6729 = shalt.err (!%p6726_p6)
}
  0x4c   :  { %s6730_s18 = scalar_lea.vmem %s54_s3, 256  ;;  %p6735_p8 = scmp.lt.s32.totalorder %s54_s3, %s54_s3 }
  0x4d   :  { %p6731_p7 = scmp.ne.s32.totalorder %s54_s3, %s6730_s18  ;;  %p6736_p9 = scmp.lt.s32.totalorder %s6730_s18, %s6730_s18 }
  0x4f   :  { %p6737_p10 = por %p6736_p9, %p6735_p8 }
  0x51   :  { %p6738_p11 = pnand %p6737_p10, %p6731_p7 }
  0x53   :  { %6741 = shalt.err (!%p6738_p11)
}
  0x54   :  { %59 = dma.hbm_to_vmem [thread:$0]  %s8875_s4, 256, %s54_s3, [#allocation13], %s6797_s26, %s6797_s26, %s6798_s16  }
  0x55   :  { %s6801_s19 = smov [#allocation17]   ;;  %s6802_s21 = smov [#allocation20]  }
  0x56   :  { %s79_s20 = sshll.u32 %s6801_s19, 4  ;;  %s103_s23 = sshll.u32 %s6802_s21, 4  ;;  %s80_s20 = int_to_ptr.vmem [resolvable:$true] %s79_s20  ;;  %s104_s23 = int_to_ptr.vmem [resolvable:$true] %s103_s23 }
  0x57   :  { %s6742_s24 = scalar_lea.hbm %s8878_s7, 512 }
  0x58   :  { %p6743_p12 = scmp.ne.s32.totalorder %s8878_s7, %s6742_s24  ;;  %p6746_p13 = scmp.lt.u32.totalorder %s6742_s24, %s8878_s7 }
  0x5a   :  { %p6748_p0 = pnand %p6746_p13, %p6743_p12 }
  0x5c   :  { %6751 = shalt.err (!%p6748_p0)
}
  0x5d   :  { %s6752_s4 = scalar_lea.vmem %s80_s20, 512  ;;  %p6757_p2 = scmp.lt.s32.totalorder %s80_s20, %s80_s20 }
  0x5e   :  { %p6753_p1 = scmp.ne.s32.totalorder %s80_s20, %s6752_s4  ;;  %p6758_p3 = scmp.lt.s32.totalorder %s6752_s4, %s6752_s4 }
  0x60   :  { %p6759_p4 = por %p6758_p3, %p6757_p2 }
  0x62   :  { %p6760_p5 = pnand %p6759_p4, %p6753_p1 }
  0x64   :  { %6763 = shalt.err (!%p6760_p5)
}
  0x65   :  { %85 = dma.hbm_to_vmem [thread:$0]  %s8878_s7, 512, %s80_s20, [#allocation16], %s6797_s26, %s6797_s26, %s6798_s16  }
  0x66   :  { %s6764_s17 = scalar_lea.hbm %s8881_s10, 768 }
  0x67   :  { %p6765_p6 = scmp.ne.s32.totalorder %s8881_s10, %s6764_s17  ;;  %p6768_p7 = scmp.lt.u32.totalorder %s6764_s17, %s8881_s10 }
  0x69   :  { %p6770_p8 = pnand %p6768_p7, %p6765_p6 }
  0x6b   :  { %6773 = shalt.err (!%p6770_p8)
}
  0x6c   :  { %s6774_s21 = scalar_lea.vmem %s104_s23, 768  ;;  %p6779_p10 = scmp.lt.s32.totalorder %s104_s23, %s104_s23 }
  0x6d   :  { %p6775_p9 = scmp.ne.s32.totalorder %s104_s23, %s6774_s21  ;;  %p6780_p11 = scmp.lt.s32.totalorder %s6774_s21, %s6774_s21 }
  0x6f   :  { %p6781_p12 = por %p6780_p11, %p6779_p10 }
  0x71   :  { %p6782_p13 = pnand %p6781_p12, %p6775_p9 }
  0x73   :  { %6785 = shalt.err (!%p6782_p13)
}
  0x74   :  { %s6803_s7 = smov 192   ;;  %s6804_s26 = smov 12  }
  0x75   :  { %109 = dma.hbm_to_vmem [thread:$0]  %s8881_s10, 768, %s104_s23, [#allocation19], %s6803_s7, %s6803_s7, %s6804_s26  }
  0x76   :  { %6786 = dma.done.wait [#allocation11], 256  }
  0x77   :  { %6787 = vsyncadd [#allocation11], 4294967040 }
  0x78   :  { %6788 = dma.done.wait [#allocation13], 496  }
  0x79   :  { %6789 = vsyncadd [#allocation13], 4294966800 }
  0x7a   :  { %6790 = dma.done.wait [#allocation16], 13440  }
  0x7b   :  { %6791 = vsyncadd [#allocation16], 4294953856 }
  0x7c   :  { %6792 = dma.done.wait [#allocation19], 832  }
  0x7d   :  { %6793 = vsyncadd [#allocation19], 4294966464  ;;  %v6805_v0 = vmov 0.0   ;;  %v6806_v1 = vmov 0   ;;  %vm187_vm0 = vcmask 1040384   ;;  %vm6807_vm1 = vmmov 1  }
  0x7e   :  { %297 = vmatprep.mubr.f32.mxu0 %v6805_v0  ;;  %374 = vmatprep.mubr.f32.mxu1 %v6805_v0  ;;  %2325 = vst [vmem:[#allocation5] sm:$0xff] %v6806_v1  ;;  %2327 = vst [vmem:[#allocation5 + $0x10] sm:$0xff] %v6806_v1  ;;  %v139_v3 = vld [vmem:[%s8871_s0 + $0x8] sm:$0xff]  ;;  %v154_v4 = vld [vmem:[%s8871_s0 + $0x80] sm:$0x1]  ;;  %vm180_vm3 = vcmask 72704   ;;  %v851_v52 = vlaneseq }
  0x7f   :  { %6433 = vset.pattern.permute.xlu0 %v6806_v1  ;;  %6434 = vset.pattern.permute.xlu1 %v6806_v1  ;;  %vm6992_vm2 = vmpackc.low %vm187_vm0, %vm6807_vm1  ;;  %v141_v5 = vld [vmem:[%s8871_s0 + $0x18] sm:$0xff]  ;;  %v6299_v6 = vpack.c.bf16 %v154_v4, %v139_v3  ;;  %v156_v7 = vld [vmem:[%s8871_s0 + $0x90] sm:$0x1]  ;;  %s6810_s1 = smov 98   ;;  %s6811_s14 = smov 97   ;;  %vm985_vm4 = vcmask 64512  }
  0x80   :  { %v138_v8 = vld [vmem:[%s8871_s0] sm:$0xff]  ;;  %v153_v9 = vld [vmem:[%s8871_s0 + $0x78] sm:$0x1]  ;;  %v6305_v10 = vpack.c.bf16 %v156_v7, %v141_v5  ;;  %v140_v12 = vld [vmem:[%s8871_s0 + $0x10] sm:$0xff]  ;;  %v7162_v53 = vshrl.u32 %v851_v52, 7  ;;  %s6812_s19 = smov 96  }
  0x81   :  { %v6302_v11 = vpack.c.bf16 %v153_v9, %v138_v8  ;;  %v155_v13 = vld [vmem:[%s8871_s0 + $0x88] sm:$0x1]  ;;  %6301 = vmatprep.subr.msk.bf16.mxu0 %vm6992_vm2, %v6299_v6  ;;  %v7022_v15 = vld [vmem:[#allocation10] sm:$0xff]  ;;  %v145_v19 = vld [vmem:[%s8871_s0 + $0x38] sm:$0xff]  ;;  %s6813_s21 = smov 68   ;;  %s6814_s7 = smov 67  }
  0x82   :  { %v6308_v14 = vpack.c.bf16 %v155_v13, %v140_v12  ;;  %v143_v16 = vld [vmem:[%s8871_s0 + $0x28] sm:$0xff]  ;;  %v158_v17 = vld [vmem:[%s8871_s0 + $0xa0] sm:$0x1]  ;;  %6307 = vmatprep.subr.msk.bf16.mxu1 %vm6992_vm2, %v6305_v10  ;;  %v160_v20 = vld [vmem:[%s8871_s0 + $0xb0] sm:$0x1]  ;;  %v7167_v55 = vsub.s32 0, %v7162_v53 }
  0x83   :  { %6304 = vmatpush1.bf16.msk.msra.mxu0 %vm6992_vm2, %v6302_v11  ;;  %v6311_v18 = vpack.c.bf16 %v158_v17, %v143_v16  ;;  %v142_v21 = vld [vmem:[%s8871_s0 + $0x20] sm:$0xff]  ;;  %v6317_v22 = vpack.c.bf16 %v160_v20, %v145_v19  ;;  %v157_v23 = vld [vmem:[%s8871_s0 + $0x98] sm:$0x1]  ;;  %v144_v24 = vld [vmem:[%s8871_s0 + $0x30] sm:$0xff]  ;;  %v7170_v58 = vsub.s32 2, %v7162_v53  ;;  %v7173_v59 = vsub.s32 1, %v7162_v53 }
  0x84   :  { %6310 = vmatpush1.bf16.msk.msra.mxu1 %vm6992_vm2, %v6308_v14  ;;  %v159_v25 = vld [vmem:[%s8871_s0 + $0xa8] sm:$0x1]  ;;  %v6314_v26 = vpack.c.bf16 %v157_v23, %v142_v21  ;;  %v162_v29 = vld [vmem:[%s8871_s0 + $0xc0] sm:$0x1]  ;;  %v149_v30 = vld [vmem:[%s8871_s0 + $0x58] sm:$0xff]  ;;  %v7176_v62 = vsub.s32 3, %v7162_v53 }
  0x85   :  { %6313 = vmatprep.subr.msk.bf16.mxu0 %vm6992_vm2, %v6311_v18  ;;  %v6320_v27 = vpack.c.bf16 %v159_v25, %v144_v24  ;;  %v147_v28 = vld [vmem:[%s8871_s0 + $0x48] sm:$0xff]  ;;  %6319 = vmatprep.subr.msk.bf16.mxu1 %vm6992_vm2, %v6317_v22  ;;  %v164_v32 = vld [vmem:[%s8871_s0 + $0xd0] sm:$0x1]  ;;  %v146_v35 = vld [vmem:[%s8871_s0 + $0x40] sm:$0xff]  ;;  %v869_v16 = vsub.s32 4, %v7162_v53  ;;  %v877_v17 = vsub.s32 6, %v7162_v53 }
  0x86   :  { %5980 = vmatmul.mubr.msk.f32.vlgmr.msra.gmra.mrb[0].mxu0 %vm180_vm3, %v7022_v15  ;;  %v6323_v31 = vpack.c.bf16 %v162_v29, %v147_v28  ;;  %v137_v33 = vld [vmem:[#allocation10 + $0x8] sm:$0xff]  ;;  %v6329_v34 = vpack.c.bf16 %v164_v32, %v149_v30  ;;  %v161_v36 = vld [vmem:[%s8871_s0 + $0xb8] sm:$0x1]  ;;  %v148_v37 = vld [vmem:[%s8871_s0 + $0x50] sm:$0xff]  ;;  %v873_v21 = vsub.s32 5, %v7162_v53  ;;  %v881_v32 = vsub.s32 7, %v7162_v53 }
  0x87   :  { %5984 = vmatmul.mubr.msk.f32.vlgmr.msra.gmra.mrb[0].mxu1 %vm180_vm3, %v7022_v15  ;;  %303 = vmatprep.mubr.f32.mxu0 %v6805_v0  ;;  %v163_v38 = vld [vmem:[%s8871_s0 + $0xc8] sm:$0x1]  ;;  %v166_v40 = vld [vmem:[%s8871_s0 + $0xe0] sm:$0x1]  ;;  %v152_v41 = vld [vmem:[%s8871_s0 + $0x70] sm:$0xff]  ;;  %v6326_v44 = vpack.c.bf16 %v161_v36, %v146_v35  ;;  %s6815_s26 = smov 66  }
  0x88   :  { %380 = vmatprep.mubr.f32.mxu1 %v6805_v0  ;;  %6316 = vmatpush1.bf16.msk.msra.mxu0 %vm6992_vm2, %v6314_v26  ;;  %v151_v39 = vld [vmem:[%s8871_s0 + $0x68] sm:$0xff]  ;;  %v168_v42 = vld [vmem:[%s8873_s2] sm:$0xff]  ;;  %v6332_v45 = vpack.c.bf16 %v163_v38, %v148_v37  ;;  %v165_v49 = vld [vmem:[%s8871_s0 + $0xd8] sm:$0x1]  ;;  %vm1014_vm5 = vcmask 605184   ;;  %vm1964_vm6 = vcmask 130048  }
  0x89   :  { %6322 = vmatpush1.bf16.msk.msra.mxu1 %vm6992_vm2, %v6320_v27  ;;  %6325 = vmatprep.subr.msk.bf16.mxu0 %vm6992_vm2, %v6323_v31  ;;  %v167_v43 = vld [vmem:[%s8871_s0 + $0xe8] sm:$0x1]  ;;  %v6335_v46 = vpack.c.bf16 %v166_v40, %v151_v39  ;;  %v150_v48 = vld [vmem:[%s8871_s0 + $0x60] sm:$0xff]  ;;  %v847_v57 = vld [vmem:[#allocation12] sm:$0xff]  ;;  %s6808_s0 = smov 127   ;;  %vm1072_vm7 = vcmask 1039360  }
  0x8a   :  { %5981 = vmatmul.mubr.msk.f32.gmra.mrb[2].mxu0 %vm180_vm3, %v137_v33  ;;  %6331 = vmatprep.subr.msk.bf16.mxu1 %vm6992_vm2, %v6329_v34  ;;  %v6341_v47 = vpack.c.bf16 %v167_v43, %v152_v41  ;;  %v169_v50 = vld [vmem:[%s8873_s2 + $0x8] sm:$0xff]  ;;  %v6338_v51 = vpack.c.bf16 %v165_v49, %v150_v48  ;;  %v854_v1 = vrot.slane %v847_v57, %v7167_v55  ;;  %s6809_s2 = smov 126   ;;  %vm1268_vm8 = vcmask 801792   ;;  %s6818_s25 = smov 17  }
  0x8b   :  { %5985 = vmatmul.mubr.msk.f32.gmra.mrb[2].mxu1 %vm180_vm3, %v137_v33  ;;  %451 = vmatprep.mubr.f32.mxu0 %v6805_v0  ;;  %v862_v4 = vrot.slane %v847_v57, %v7170_v58  ;;  %v858_v6 = vrot.slane %v847_v57, %v7173_v59  ;;  %v866_v9 = vrot.slane %v847_v57, %v7176_v62  ;;  %vm1170_vm9 = vcmask 1031168   ;;  %s6819_s9 = smov 111   ;;  %s6820_s24 = smov 112  }
  0x8c   :  { %528 = vmatprep.mubr.f32.mxu1 %v6805_v0  ;;  %172 = vperm.xlu0 %6433, %v168_v42   ;;  %v870_v38 = vrot.slane %v847_v57, %v869_v16  ;;  %v878_v39 = vrot.slane %v847_v57, %v877_v17  ;;  %v874_v42 = vrot.slane %v847_v57, %v873_v21  ;;  %vm1464_vm10 = vcmask 785408   ;;  %s6821_s27 = smov 110   ;;  %s6822_s28 = smov 95  }
  0x8d   :  { %vm1366_vm11 = vcmask 793600   ;;  %vm1669_vm12 = vcmask 547840   ;;  %vm1566_vm13 = vcmask 556032   ;;  %vm1772_vm14 = vcmask 539648   ;;  %s6823_s29 = smov 94  }
  0x8e   :  { %5988 = vmatmul.mubr.msk.f32.vlgmr.msra.gmra.mrb[4].mxu0 %vm180_vm3, %v7022_v15  ;;  %vm3441_vm15 = vcmask 1014784   ;;  %vm3030_vm0 = vcmask 1042432   ;;  %vm3031_vm1 = vcmask 1043456  }
  0x8f   :  { %5992 = vmatmul.mubr.msk.f32.vlgmr.msra.gmra.mrb[4].mxu1 %vm180_vm3, %v7022_v15  ;;  %457 = vmatprep.mubr.f32.mxu0 %v6805_v0 }
  0x90   :  { %534 = vmatprep.mubr.f32.mxu1 %v6805_v0  ;;  %6328 = vmatpush1.bf16.msk.msra.mxu0 %vm6992_vm2, %v6326_v44 }
  0x91   :  { %6334 = vmatpush1.bf16.msk.msra.mxu1 %vm6992_vm2, %v6332_v45  ;;  %6337 = vmatprep.subr.msk.bf16.mxu0 %vm6992_vm2, %v6335_v46  ;;  %v882_v45 = vrot.slane %v847_v57, %v881_v32 }
  0x92   :  { %5989 = vmatmul.mubr.msk.f32.gmra.mrb[6].mxu0 %vm180_vm3, %v137_v33  ;;  %6343 = vmatprep.subr.msk.bf16.mxu1 %vm6992_vm2, %v6341_v47 }
  0x93   :  { %5993 = vmatmul.mubr.msk.f32.gmra.mrb[6].mxu1 %vm180_vm3, %v137_v33  ;;  %605 = vmatprep.mubr.f32.mxu0 %v6805_v0 }
  0x94   :  { %682 = vmatprep.mubr.f32.mxu1 %v6805_v0  ;;  %177 = vperm.xlu0 %6433, %v169_v50  }
  0x96   :  { %5996 = vmatmul.mubr.msk.f32.vlgmr.msra.gmra.mrb[8].mxu0 %vm180_vm3, %v7022_v15 }
  0x97   :  { %6000 = vmatmul.mubr.msk.f32.vlgmr.msra.gmra.mrb[8].mxu1 %vm180_vm3, %v7022_v15  ;;  %611 = vmatprep.mubr.f32.mxu0 %v6805_v0 }
  0x98   :  { %688 = vmatprep.mubr.f32.mxu1 %v6805_v0  ;;  %6340 = vmatpush1.bf16.msk.msra.mxu0 %vm6992_vm2, %v6338_v51 }
  0x99   :  { %6346 = vmatpush3.bf16.msk.msra.mxu1 %vm6992_vm2, %v6341_v47  ;;  %vm3026_vm2 = vcmask 318464  }
  0x9a   :  { %5997 = vmatmul.mubr.msk.f32.gmra.mrb[10].mxu0 %vm180_vm3, %v137_v33 }
  0x9b   :  { %6001 = vmatmul.mubr.msk.f32.gmra.mrb[10].mxu1 %vm180_vm3, %v137_v33  ;;  %759 = vmatprep.mubr.f32.mxu0 %v6805_v0 }
  0x9c   :  { %6296 = vmatprep.mubr.msk.f32.mxu1 %vm180_vm3, %v7022_v15 }
  0x9e   :  { %6004 = vmatmul.mubr.msk.f32.vlgmr.msra.gmra.mrb[12].mxu0 %vm180_vm3, %v7022_v15 }
  0x9f   :  { %6297 = vmatmul.mubr.msk.f32.vlgmr.msra.gmra.mrb[12].mxu1 %vm180_vm3, %v137_v33  ;;  %765 = vmatprep.mubr.f32.mxu0 %v6805_v0 }
  0xa2   :  { %6005 = vmatmul.mubr.msk.f32.gmra.mrb[14].mxu0 %vm180_vm3, %v137_v33  ;;  %vm2329_vm3 = vcmask 277504  }
 0x10b   :  { %v7164_v54 = vpop.permute.xlu0 %172 }
 0x113   :  { %v7180_v2 = vpop.permute.xlu0 %177 }
 0x159   :  { %v299_v56 = vpop.f32.mrb[0].mxu0 }
 0x15a   :  { %v376_v60 = vpop.f32.mrb[0].mxu1  ;;  %v301_v61 = vpop.f32.mrb[1].mxu0  ;;  %v300_v0 = vadd.f32 %v299_v56, %v7164_v54 }
 0x15b   :  { %v378_v63 = vpop.f32.mrb[1].mxu1  ;;  %v377_v3 = vadd.f32 %v376_v60, %v7164_v54  ;;  %v302_v5 = vadd.f32 %v301_v61, %v7164_v54 }
 0x15c   :  { %v379_v8 = vadd.f32 %v378_v63, %v7164_v54  ;;  %v926_v18 = vmul.f32 %v854_v1, %v300_v0 }
 0x15d   :  { %v305_v7 = vpop.f32.mrb[2].mxu0  ;;  %v928_v22 = vmul.f32 %v862_v4, %v377_v3  ;;  %v927_v23 = vmul.f32 %v858_v6, %v302_v5  ;;  %v7228_v3 = vld [vmem:[#allocation12 + $0x8] sm:$0x7f] }
 0x15e   :  { %v306_v10 = vadd.f32 %v305_v7, %v7180_v2  ;;  %v382_v11 = vpop.f32.mrb[2].mxu1  ;;  %v307_v12 = vpop.f32.mrb[3].mxu0  ;;  %v929_v27 = vmul.f32 %v866_v9, %v379_v8 }
 0x15f   :  { %v383_v13 = vadd.f32 %v382_v11, %v7180_v2  ;;  %v308_v14 = vadd.f32 %v307_v12, %v7180_v2  ;;  %v384_v15 = vpop.f32.mrb[3].mxu1 }
 0x160   :  { %v941_v19 = vmul.f32 %v854_v1, %v306_v10  ;;  %v385_v20 = vadd.f32 %v384_v15, %v7180_v2 }
 0x161   :  { %v943_v24 = vmul.f32 %v862_v4, %v383_v13  ;;  %v942_v25 = vmul.f32 %v858_v6, %v308_v14  ;;  %v453_v26 = vpop.f32.mrb[4].mxu0  ;;  %v886_v14 = vrot.slane %v7228_v3, %v7167_v55 }
 0x162   :  { %v7195_v28 = vpack.c.bf16 %v941_v19, %v926_v18  ;;  %v944_v29 = vmul.f32 %v866_v9, %v385_v20  ;;  %v530_v30 = vpop.f32.mrb[4].mxu1  ;;  %v455_v31 = vpop.f32.mrb[5].mxu0  ;;  %v454_v37 = vadd.f32 %v453_v26, %v7164_v54  ;;  %v894_v18 = vrot.slane %v7228_v3, %v7170_v58 }
 0x163   :  { %v7198_v33 = vpack.c.bf16 %v943_v24, %v928_v22  ;;  %v7200_v34 = vpack.c.bf16 %v942_v25, %v927_v23  ;;  %v532_v35 = vpop.f32.mrb[5].mxu1  ;;  %v531_v40 = vadd.f32 %v530_v30, %v7164_v54  ;;  %v456_v41 = vadd.f32 %v455_v31, %v7164_v54 }
 0x164   :  { %v7202_v36 = vpack.c.bf16 %v944_v29, %v929_v27  ;;  %1044 = vrot.lane.b32.xlu0 %v7195_v28, %s6808_s0  ;;  %v533_v44 = vadd.f32 %v532_v35, %v7164_v54  ;;  %v930_v52 = vmul.f32 %v870_v38, %v454_v37  ;;  %v890_v20 = vrot.slane %v7228_v3, %v7173_v59 }
 0x165   :  { %v459_v43 = vpop.f32.mrb[6].mxu0  ;;  %1048 = vrot.lane.b32.xlu1 %v7198_v33, %s6808_s0  ;;  %1968 = vmatprep.subr.bf16.mxu0 %v7200_v34  ;;  %v932_v57 = vmul.f32 %v878_v39, %v531_v40  ;;  %v931_v61 = vmul.f32 %v874_v42, %v456_v41  ;;  %v898_v24 = vrot.slane %v7228_v3, %v7176_v62 }
 0x166   :  { %v460_v46 = vadd.f32 %v459_v43, %v7180_v2  ;;  %v536_v47 = vpop.f32.mrb[6].mxu1  ;;  %v461_v48 = vpop.f32.mrb[7].mxu0  ;;  %2011 = vmatprep.subr.bf16.mxu1 %v7202_v36  ;;  %1969 = vmatpush1.bf16.msra.mxu0 %v7195_v28  ;;  %v933_v4 = vmul.f32 %v882_v45, %v533_v44 }
 0x167   :  { %v537_v49 = vadd.f32 %v536_v47, %v7180_v2  ;;  %v462_v50 = vadd.f32 %v461_v48, %v7180_v2  ;;  %v538_v51 = vpop.f32.mrb[7].mxu1  ;;  %2012 = vmatpush1.bf16.msra.mxu1 %v7198_v33 }
 0x168   :  { %v945_v56 = vmul.f32 %v870_v38, %v460_v46  ;;  %v539_v60 = vadd.f32 %v538_v51, %v7180_v2  ;;  %1146 = vrot.lane.b32.xlu0 %v7198_v33, %s6809_s2  ;;  %v910_v38 = vrot.slane %v7228_v3, %v877_v17 }
 0x169   :  { %v947_v63 = vmul.f32 %v878_v39, %v537_v49  ;;  %v946_v0 = vmul.f32 %v874_v42, %v462_v50  ;;  %v607_v1 = vpop.f32.mrb[8].mxu0  ;;  %1142 = vrot.lane.b32.xlu1 %v7195_v28, %s6809_s2 }
 0x16a   :  { %v7232_v5 = vpack.c.bf16 %v945_v56, %v930_v52  ;;  %v948_v6 = vmul.f32 %v882_v45, %v539_v60  ;;  %v684_v7 = vpop.f32.mrb[8].mxu1  ;;  %v609_v8 = vpop.f32.mrb[9].mxu0  ;;  %v608_v13 = vadd.f32 %v607_v1, %v7164_v54  ;;  %v902_v60 = vrot.slane %v7228_v3, %v869_v16 }
 0x16b   :  { %v7234_v9 = vpack.c.bf16 %v947_v63, %v932_v57  ;;  %v7236_v10 = vpack.c.bf16 %v946_v0, %v931_v61  ;;  %v686_v11 = vpop.f32.mrb[9].mxu1  ;;  %v685_v15 = vadd.f32 %v684_v7, %v7164_v54  ;;  %v610_v19 = vadd.f32 %v609_v8, %v7164_v54 }
 0x16c   :  { %v7238_v12 = vpack.c.bf16 %v948_v6, %v933_v4  ;;  %1240 = vrot.lane.b32.xlu0 %v7195_v28, %s6810_s1  ;;  %v687_v23 = vadd.f32 %v686_v11, %v7164_v54  ;;  %v934_v32 = vmul.f32 %v886_v14, %v608_v13  ;;  %v906_v1 = vrot.slane %v7228_v3, %v873_v21 }
 0x16d   :  { %977 = vst [vmem:[#allocation2 + $0x30] sm:$0xff] %v7234_v9  ;;  %v613_v22 = vpop.f32.mrb[10].mxu0  ;;  %1244 = vrot.lane.b32.xlu1 %v7198_v33, %s6810_s1  ;;  %v936_v39 = vmul.f32 %v894_v18, %v685_v15  ;;  %v935_v40 = vmul.f32 %v890_v20, %v610_v19 }
 0x16e   :  { %978 = vst [vmem:[#allocation2 + $0x38] sm:$0xff] %v7238_v12  ;;  %v614_v25 = vadd.f32 %v613_v22, %v7180_v2  ;;  %v690_v26 = vpop.f32.mrb[10].mxu1  ;;  %v615_v27 = vpop.f32.mrb[11].mxu0  ;;  %v937_v44 = vmul.f32 %v898_v24, %v687_v23 }
 0x16f   :  { %v691_v29 = vadd.f32 %v690_v26, %v7180_v2  ;;  %v616_v30 = vadd.f32 %v615_v27, %v7180_v2  ;;  %v692_v31 = vpop.f32.mrb[11].mxu1 }
 0x170   :  { %v949_v35 = vmul.f32 %v886_v14, %v614_v25  ;;  %v693_v37 = vadd.f32 %v692_v31, %v7180_v2  ;;  %1342 = vrot.lane.b32.xlu0 %v7198_v33, %s6811_s14 }
 0x171   :  { %v951_v41 = vmul.f32 %v894_v18, %v691_v29  ;;  %v950_v42 = vmul.f32 %v890_v20, %v616_v30  ;;  %v761_v43 = vpop.f32.mrb[12].mxu0  ;;  %1338 = vrot.lane.b32.xlu1 %v7195_v28, %s6811_s14 }
 0x172   :  { %v7269_v45 = vpack.c.bf16 %v949_v35, %v934_v32  ;;  %v952_v46 = vmul.f32 %v898_v24, %v693_v37  ;;  %v6298_v47 = vpop.f32.mrb[12].mxu1  ;;  %v763_v48 = vpop.f32.mrb[13].mxu0  ;;  %v762_v56 = vadd.f32 %v761_v43, %v7164_v54 }
 0x173   :  { %v7271_v49 = vpack.c.bf16 %v951_v41, %v936_v39  ;;  %v7273_v17 = vpack.c.bf16 %v950_v42, %v935_v40  ;;  %v844_v50 = vadd.f32 %v6298_v47, %v7180_v2  ;;  %v838_v51 = vpop.f32.mrb[13].mxu1  ;;  %v764_v0 = vadd.f32 %v763_v48, %v7164_v54 }
 0x174   :  { %979 = vst [vmem:[#allocation2 + $0x40] sm:$0xff] %v7269_v45  ;;  %v7277_v52 = vpack.c.bf16 %v952_v46, %v937_v44  ;;  %v839_v57 = vadd.f32 %v838_v51, %v7164_v54  ;;  %1436 = vrot.lane.b32.xlu0 %v7195_v28, %s6812_s19  ;;  %v7286_v61 = vld [vmem:[#allocation2 + $0x30] sm:$0xff]  ;;  %v938_v54 = vmul.f32 %v902_v60, %v762_v56 }
 0x175   :  { %981 = vst [vmem:[#allocation2 + $0x50] sm:$0xff] %v7271_v49  ;;  %980 = vst [vmem:[#allocation2 + $0x48] sm:$0xff] %v7273_v17  ;;  %v955_v63 = vmul.f32 %v910_v38, %v844_v50  ;;  %v767_v16 = vpop.f32.mrb[14].mxu0  ;;  %1440 = vrot.lane.b32.xlu1 %v7198_v33, %s6812_s19  ;;  %v7296_v4 = vld [vmem:[#allocation2 + $0x38] sm:$0xff]  ;;  %v939_v21 = vmul.f32 %v906_v1, %v764_v0 }
 0x176   :  { %982 = vst [vmem:[#allocation2 + $0x58] sm:$0xff] %v7277_v52  ;;  %v940_v6 = vmul.f32 %v910_v38, %v839_v57  ;;  %v768_v7 = vadd.f32 %v767_v16, %v7180_v2  ;;  %v769_v8 = vpop.f32.mrb[15].mxu0 }
 0x177   :  { %v770_v11 = vadd.f32 %v769_v8, %v7180_v2 }
 0x178   :  { %v970_v13 = vpack.c.bf16 %v955_v63, %v940_v6  ;;  %v953_v53 = vmul.f32 %v902_v60, %v768_v7  ;;  %1540 = vrot.lane.b32.xlu0 %v7198_v33, %s6813_s21 }
 0x179   :  { %v954_v3 = vmul.f32 %v906_v1, %v770_v11  ;;  %1536 = vrot.lane.b32.xlu1 %v7195_v28, %s6813_s21 }
 0x17a   :  { %986 = vst.msk [vmem:[#allocation2 + $0x70] sm:$0xff] %vm985_vm4, %v970_v13  ;;  %v7305_v14 = vpack.c.bf16 %v953_v53, %v938_v54  ;;  %vm3225_vm4 = vcmask 1047688  }
 0x17b   :  { %v7307_v15 = vpack.c.bf16 %v954_v3, %v939_v21  ;;  %v7309_v18 = vld [vmem:[#allocation2 + $0x40] sm:$0xff] }
 0x17c   :  { %983 = vst [vmem:[#allocation2 + $0x60] sm:$0xff] %v7305_v14  ;;  %1639 = vrot.lane.b32.xlu0 %v7195_v28, %s6814_s7  ;;  %v7314_v2 = vld [vmem:[#allocation2 + $0x48] sm:$0xff]  ;;  %v7316_v19 = vld [vmem:[#allocation2 + $0x50] sm:$0xff] }
 0x17d   :  { %984 = vst [vmem:[#allocation2 + $0x68] sm:$0xff] %v7307_v15  ;;  %1643 = vrot.lane.b32.xlu1 %v7198_v33, %s6814_s7  ;;  %v7321_v20 = vld [vmem:[#allocation2 + $0x58] sm:$0xff] }
 0x180   :  { %1746 = vrot.lane.b32.xlu0 %v7198_v33, %s6815_s26 }
 0x181   :  { %1742 = vrot.lane.b32.xlu1 %v7195_v28, %s6815_s26  ;;  %v7348_v28 = vld [vmem:[#allocation14 + $0x4] ss:$8 sps:$4 sm:$0xff]  }
 0x182   :  { %6011 = vmatprep.mubr.msk.bf16.mxu0 %vm1964_vm6, %v7348_v28  ;;  %6012 = vmatprep.mubr.msk.bf16.mxu1 %vm1964_vm6, %v7348_v28 }
 0x183   :  { %v999_v22 = vld [vmem:[#allocation2 + $0x60] sm:$0xff] }
 0x184   :  { %1050 = vrot.lane.b32.xlu0 %v7202_v36, %s6808_s0  ;;  %v1000_v23 = vld [vmem:[#allocation2 + $0x68] sm:$0xff]  ;;  %1013 = vst [vmem:[#allocation3 + $0x60] sm:$0xff] %v999_v22 }
 0x185   :  { %1046 = vrot.lane.b32.xlu1 %v7200_v34, %s6808_s0  ;;  %1015 = vst.msk [vmem:[#allocation3 + $0x68] sm:$0xff] %vm1014_vm5, %v1000_v23 }
 0x188   :  { %1242 = vrot.lane.b32.xlu0 %v7200_v34, %s6810_s1 }
 0x189   :  { %1144 = vrot.lane.b32.xlu1 %v7200_v34, %s6809_s2 }
 0x18c   :  { %1246 = vrot.lane.b32.xlu0 %v7202_v36, %s6810_s1 }
 0x18d   :  { %1148 = vrot.lane.b32.xlu1 %v7202_v36, %s6809_s2 }
 0x190   :  { %1438 = vrot.lane.b32.xlu0 %v7200_v34, %s6812_s19 }
 0x191   :  { %1340 = vrot.lane.b32.xlu1 %v7200_v34, %s6811_s14 }
 0x194   :  { %1442 = vrot.lane.b32.xlu0 %v7202_v36, %s6812_s19 }
 0x195   :  { %1344 = vrot.lane.b32.xlu1 %v7202_v36, %s6811_s14 }
 0x198   :  { %1641 = vrot.lane.b32.xlu0 %v7200_v34, %s6814_s7 }
 0x199   :  { %1538 = vrot.lane.b32.xlu1 %v7200_v34, %s6813_s21 }
 0x19c   :  { %1645 = vrot.lane.b32.xlu0 %v7202_v36, %s6814_s7 }
 0x19d   :  { %1542 = vrot.lane.b32.xlu1 %v7202_v36, %s6813_s21 }
 0x1a0   :  { %1150 = vrot.lane.b32.xlu0 %v7232_v5, %s6809_s2 }
 0x1a1   :  { %1744 = vrot.lane.b32.xlu1 %v7200_v34, %s6815_s26 }
 0x1a4   :  { %1346 = vrot.lane.b32.xlu0 %v7232_v5, %s6811_s14 }
 0x1a5   :  { %1748 = vrot.lane.b32.xlu1 %v7202_v36, %s6815_s26 }
 0x1a8   :  { %1544 = vrot.lane.b32.xlu0 %v7232_v5, %s6813_s21 }
 0x1a9   :  { %1052 = vrot.lane.b32.xlu1 %v7232_v5, %s6808_s0 }
 0x1ac   :  { %1750 = vrot.lane.b32.xlu0 %v7232_v5, %s6815_s26 }
 0x1ad   :  { %1248 = vrot.lane.b32.xlu1 %v7232_v5, %s6810_s1 }
 0x1b0   :  { %1054 = vrot.lane.b32.xlu0 %v7236_v10, %s6808_s0 }
 0x1b1   :  { %1444 = vrot.lane.b32.xlu1 %v7232_v5, %s6812_s19 }
 0x1b4   :  { %1058 = vrot.lane.b32.xlu0 %v7238_v12, %s6808_s0 }
 0x1b5   :  { %1647 = vrot.lane.b32.xlu1 %v7232_v5, %s6814_s7 }
 0x1b8   :  { %1152 = vrot.lane.b32.xlu0 %v7236_v10, %s6809_s2 }
 0x1b9   :  { %1056 = vrot.lane.b32.xlu1 %v7234_v9, %s6808_s0 }
 0x1bc   :  { %1156 = vrot.lane.b32.xlu0 %v7238_v12, %s6809_s2 }
 0x1bd   :  { %1154 = vrot.lane.b32.xlu1 %v7234_v9, %s6809_s2 }
 0x1c0   :  { %1250 = vrot.lane.b32.xlu0 %v7236_v10, %s6810_s1 }
 0x1c1   :  { %1252 = vrot.lane.b32.xlu1 %v7234_v9, %s6810_s1 }
 0x1c4   :  { %1254 = vrot.lane.b32.xlu0 %v7238_v12, %s6810_s1 }
 0x1c5   :  { %1350 = vrot.lane.b32.xlu1 %v7234_v9, %s6811_s14 }
 0x1c8   :  { %1348 = vrot.lane.b32.xlu0 %v7236_v10, %s6811_s14 }
 0x1c9   :  { %1448 = vrot.lane.b32.xlu1 %v7234_v9, %s6812_s19 }
 0x1cc   :  { %1352 = vrot.lane.b32.xlu0 %v7238_v12, %s6811_s14 }
 0x1cd   :  { %1548 = vrot.lane.b32.xlu1 %v7234_v9, %s6813_s21 }
 0x1d0   :  { %1446 = vrot.lane.b32.xlu0 %v7236_v10, %s6812_s19 }
 0x1d1   :  { %1651 = vrot.lane.b32.xlu1 %v7234_v9, %s6814_s7 }
 0x1d4   :  { %1450 = vrot.lane.b32.xlu0 %v7238_v12, %s6812_s19 }
 0x1d5   :  { %1754 = vrot.lane.b32.xlu1 %v7234_v9, %s6815_s26 }
 0x1d6   :  { %v1045_v33 = vpop.permute.xlu0 %1044 }
 0x1d7   :  { %v1049_v34 = vpop.permute.xlu1 %1048 }
 0x1d8   :  { %1546 = vrot.lane.b32.xlu0 %v7236_v10, %s6813_s21 }
 0x1d9   :  { %1060 = vrot.lane.b32.xlu1 %v7269_v45, %s6808_s0 }
 0x1da   :  { %v1147_v36 = vpop.permute.xlu0 %1146 }
 0x1db   :  { %v1143_v24 = vpop.permute.xlu1 %1142 }
 0x1dc   :  { %1550 = vrot.lane.b32.xlu0 %v7238_v12, %s6813_s21 }
 0x1dd   :  { %1158 = vrot.lane.b32.xlu1 %v7269_v45, %s6809_s2 }
 0x1de   :  { %v1241_v25 = vpop.permute.xlu0 %1240 }
 0x1df   :  { %v1245_v26 = vpop.permute.xlu1 %1244 }
 0x1e0   :  { %1649 = vrot.lane.b32.xlu0 %v7236_v10, %s6814_s7 }
 0x1e1   :  { %1256 = vrot.lane.b32.xlu1 %v7269_v45, %s6810_s1 }
 0x1e2   :  { %v7430_v9 = vpop.permute.xlu0 %1342 }
 0x1e3   :  { %v1339_v27 = vpop.permute.xlu1 %1338 }
 0x1e4   :  { %1653 = vrot.lane.b32.xlu0 %v7238_v12, %s6814_s7 }
 0x1e5   :  { %1354 = vrot.lane.b32.xlu1 %v7269_v45, %s6811_s14 }
 0x1e6   :  { %v1437_v29 = vpop.permute.xlu0 %1436 }
 0x1e7   :  { %v1441_v30 = vpop.permute.xlu1 %1440 }
 0x1e8   :  { %1752 = vrot.lane.b32.xlu0 %v7236_v10, %s6815_s26 }
 0x1e9   :  { %1452 = vrot.lane.b32.xlu1 %v7269_v45, %s6812_s19 }
 0x1ea   :  { %v7440_v31 = vpop.permute.xlu0 %1540 }
 0x1eb   :  { %v7442_v32 = vpop.permute.xlu1 %1536 }
 0x1ec   :  { %1756 = vrot.lane.b32.xlu0 %v7238_v12, %s6815_s26 }
 0x1ed   :  { %1552 = vrot.lane.b32.xlu1 %v7269_v45, %s6813_s21 }
 0x1ee   :  { %v7448_v35 = vpop.permute.xlu0 %1639 }
 0x1ef   :  { %v7450_v37 = vpop.permute.xlu1 %1643 }
 0x1f0   :  { %1062 = vrot.lane.b32.xlu0 %v7273_v17, %s6808_s0 }
 0x1f1   :  { %1655 = vrot.lane.b32.xlu1 %v7269_v45, %s6814_s7 }
 0x1f2   :  { %v7456_v38 = vpop.permute.xlu0 %1746 }
 0x1f3   :  { %v7458_v39 = vpop.permute.xlu1 %1742 }
 0x1f4   :  { %1066 = vrot.lane.b32.xlu0 %v7277_v52, %s6808_s0 }
 0x1f5   :  { %1758 = vrot.lane.b32.xlu1 %v7269_v45, %s6815_s26 }
 0x1f6   :  { %v7464_v12 = vpop.permute.xlu0 %1050 }
 0x1f7   :  { %v1047_v40 = vpop.permute.xlu1 %1046  ;;  %v7468_v41 = vsel %vm1072_vm7, %v1049_v34, %v7464_v12 }
 0x1f8   :  { %v1073_v42 = vsel %vm1072_vm7, %v1045_v33, %v1047_v40  ;;  %v1074_v43 = vsel %vm1072_vm7, %v1047_v40, %v1049_v34  ;;  %1160 = vrot.lane.b32.xlu0 %v7273_v17, %s6809_s2 }
 0x1f9   :  { %1064 = vrot.lane.b32.xlu1 %v7271_v49, %s6808_s0  ;;  %1970 = vmatprep.subr.bf16.mxu0 %v1074_v43 }
 0x1fa   :  { %v1243_v44 = vpop.permute.xlu0 %1242  ;;  %1971 = vmatpush1.bf16.msra.mxu0 %v1073_v42 }
 0x1fb   :  { %v1145_v45 = vpop.permute.xlu1 %1144  ;;  %v1269_v46 = vsel %vm1268_vm8, %v1241_v25, %v1243_v44  ;;  %v1270_v47 = vsel %vm1268_vm8, %v1243_v44, %v1245_v26 }
 0x1fc   :  { %v1171_v48 = vsel %vm1170_vm9, %v1143_v24, %v1145_v45  ;;  %v1172_v50 = vsel %vm1170_vm9, %v1145_v45, %v1147_v36  ;;  %1164 = vrot.lane.b32.xlu0 %v7277_v52, %s6809_s2 }
 0x1fd   :  { %1162 = vrot.lane.b32.xlu1 %v7271_v49, %s6809_s2  ;;  %1972 = vmatprep.subr.bf16.mxu0 %v1172_v50 }
 0x1fe   :  { %v7484_v51 = vpop.permute.xlu0 %1246  ;;  %1973 = vmatpush1.bf16.msra.mxu0 %v1171_v48 }
 0x1ff   :  { %v1149_v56 = vpop.permute.xlu1 %1148  ;;  %v7488_v60 = vsel %vm1268_vm8, %v1245_v26, %v7484_v51  ;;  %1974 = vmatprep.subr.bf16.mxu0 %v1270_v47 }
 0x200   :  { %v7491_v57 = vsel %vm1170_vm9, %v1147_v36, %v1149_v56  ;;  %1258 = vrot.lane.b32.xlu0 %v7273_v17, %s6810_s1 }
 0x201   :  { %1260 = vrot.lane.b32.xlu1 %v7271_v49, %s6810_s1 }
 0x202   :  { %v1439_v63 = vpop.permute.xlu0 %1438  ;;  %1975 = vmatpush1.bf16.msra.mxu0 %v1269_v46 }
 0x203   :  { %v1341_v0 = vpop.permute.xlu1 %1340  ;;  %v1465_v1 = vsel %vm1464_vm10, %v1437_v29, %v1439_v63  ;;  %v1466_v16 = vsel %vm1464_vm10, %v1439_v63, %v1441_v30 }
 0x204   :  { %v1367_v6 = vsel %vm1366_vm11, %v1339_v27, %v1341_v0  ;;  %v1368_v7 = vsel %vm1366_vm11, %v1341_v0, %v7430_v9  ;;  %1262 = vrot.lane.b32.xlu0 %v7277_v52, %s6810_s1 }
 0x205   :  { %1358 = vrot.lane.b32.xlu1 %v7271_v49, %s6811_s14  ;;  %1976 = vmatprep.subr.bf16.mxu0 %v1368_v7 }
 0x206   :  { %v7506_v8 = vpop.permute.xlu0 %1442  ;;  %1977 = vmatpush1.bf16.msra.mxu0 %v1367_v6 }
 0x207   :  { %v1345_v11 = vpop.permute.xlu1 %1344  ;;  %v7510_v54 = vsel %vm1464_vm10, %v1441_v30, %v7506_v8  ;;  %1978 = vmatprep.subr.bf16.mxu0 %v1466_v16 }
 0x208   :  { %v7514_v13 = vsel %vm1366_vm11, %v7430_v9, %v1345_v11  ;;  %1356 = vrot.lane.b32.xlu0 %v7273_v17, %s6811_s14 }
 0x209   :  { %1456 = vrot.lane.b32.xlu1 %v7271_v49, %s6812_s19 }
 0x20a   :  { %v1642_v53 = vpop.permute.xlu0 %1641  ;;  %1979 = vmatpush1.bf16.msra.mxu0 %v1465_v1 }
 0x20b   :  { %v1539_v21 = vpop.permute.xlu1 %1538  ;;  %v1670_v3 = vsel %vm1669_vm12, %v7448_v35, %v1642_v53  ;;  %v1671_v22 = vsel %vm1669_vm12, %v1642_v53, %v7450_v37 }
 0x20c   :  { %v1567_v23 = vsel %vm1566_vm13, %v7442_v32, %v1539_v21  ;;  %v1568_v33 = vsel %vm1566_vm13, %v1539_v21, %v7440_v31  ;;  %1360 = vrot.lane.b32.xlu0 %v7277_v52, %s6811_s14 }
 0x20d   :  { %1556 = vrot.lane.b32.xlu1 %v7271_v49, %s6813_s21  ;;  %1980 = vmatprep.subr.bf16.mxu0 %v1568_v33 }
 0x20e   :  { %v1646_v34 = vpop.permute.xlu0 %1645  ;;  %1981 = vmatpush1.bf16.msra.mxu0 %v1567_v23 }
 0x20f   :  { %v1543_v36 = vpop.permute.xlu1 %1542  ;;  %v7534_v24 = vsel %vm1669_vm12, %v7450_v37, %v1646_v34  ;;  %1982 = vmatprep.subr.bf16.mxu0 %v1671_v22  ;;  %v1520_v22 = vld [vmem:[#allocation2 + $0x70] sm:$0xff] }
 0x210   :  { %v7538_v25 = vsel %vm1566_vm13, %v7440_v31, %v1543_v36  ;;  %1454 = vrot.lane.b32.xlu0 %v7273_v17, %s6812_s19  ;;  %v7553_v31 = vld [vmem:[#allocation14] ss:$8 sps:$4 sm:$0xff]  }
 0x211   :  { %1659 = vrot.lane.b32.xlu1 %v7271_v49, %s6814_s7 }
 0x212   :  { %v1151_v26 = vpop.permute.xlu0 %1150  ;;  %1983 = vmatpush1.bf16.msra.mxu0 %v1670_v3 }
 0x213   :  { %v1745_v9 = vpop.permute.xlu1 %1744  ;;  %v1174_v27 = vsel %vm1170_vm9, %v1149_v56, %v1151_v26 }
 0x214   :  { %v1773_v29 = vsel %vm1772_vm14, %v7458_v39, %v1745_v9  ;;  %v1774_v30 = vsel %vm1772_vm14, %v1745_v9, %v7456_v38  ;;  %1458 = vrot.lane.b32.xlu0 %v7277_v52, %s6812_s19 }
 0x215   :  { %1762 = vrot.lane.b32.xlu1 %v7271_v49, %s6815_s26  ;;  %1984 = vmatprep.subr.bf16.mxu0 %v1774_v30 }
 0x216   :  { %v7555_v32 = vpop.permute.xlu0 %1346  ;;  %1985 = vmatpush1.bf16.msra.mxu0 %v1773_v29 }
 0x217   :  { %v1749_v35 = vpop.permute.xlu1 %1748  ;;  %v1370_v37 = vsel %vm1366_vm11, %v1345_v11, %v7555_v32  ;;  %2054 = vmatprep.subr.bf16.mxu0 %v7236_v10 }
 0x218   :  { %v7562_v39 = vsel %vm1772_vm14, %v7456_v38, %v1749_v35  ;;  %1554 = vrot.lane.b32.xlu0 %v7273_v17, %s6813_s21 }
 0x219   :  { %1068 = vrot.lane.b32.xlu1 %v7305_v14, %s6808_s0  ;;  %2001 = vmatmul.mubr.bf16.vlgmr.msra.gmra.mrb[16].mxu0 %v7553_v31 }
 0x21a   :  { %v7569_v49 = vpop.permute.xlu0 %1544  ;;  %2055 = vmatpush1.bf16.msra.mxu0 %v7232_v5  ;;  %6013 = vmatprep.mubr.msk.bf16.mxu0 %vm1964_vm6, %v7348_v28 }
 0x21b   :  { %v1053_v10 = vpop.permute.xlu1 %1052  ;;  %v1570_v38 = vsel %vm1566_vm13, %v1543_v36, %v7569_v49 }
 0x21c   :  { %v1076_v40 = vsel %vm1072_vm7, %v7464_v12, %v1053_v10  ;;  %1558 = vrot.lane.b32.xlu0 %v7277_v52, %s6813_s21 }
 0x21d   :  { %1166 = vrot.lane.b32.xlu1 %v7305_v14, %s6809_s2  ;;  %2013 = vmatprep.subr.bf16.mxu1 %v1076_v40 }
 0x21e   :  { %v7582_v42 = vpop.permute.xlu0 %1750  ;;  %2014 = vmatpush1.bf16.msra.mxu1 %v7468_v41 }
 0x21f   :  { %v1249_v5 = vpop.permute.xlu1 %1248  ;;  %v1776_v43 = vsel %vm1772_vm14, %v1749_v35, %v7582_v42  ;;  %2015 = vmatprep.subr.bf16.mxu1 %v1174_v27 }
 0x220   :  { %v1272_v44 = vsel %vm1268_vm8, %v7484_v51, %v1249_v5  ;;  %1657 = vrot.lane.b32.xlu0 %v7273_v17, %s6814_s7 }
 0x221   :  { %1264 = vrot.lane.b32.xlu1 %v7305_v14, %s6810_s1 }
 0x222   :  { %v1055_v12 = vpop.permute.xlu0 %1054  ;;  %2016 = vmatpush1.bf16.msra.mxu1 %v7491_v57 }
 0x223   :  { %v7594_v45 = vpop.permute.xlu1 %1444  ;;  %v1077_v41 = vsel %vm1072_vm7, %v1053_v10, %v1055_v12  ;;  %2017 = vmatprep.subr.bf16.mxu1 %v1272_v44 }
 0x224   :  { %v1468_v46 = vsel %vm1464_vm10, %v7506_v8, %v7594_v45  ;;  %1661 = vrot.lane.b32.xlu0 %v7277_v52, %s6814_s7 }
 0x225   :  { %1362 = vrot.lane.b32.xlu1 %v7305_v14, %s6811_s14 }
 0x226   :  { %v7604_v47 = vpop.permute.xlu0 %1058  ;;  %2018 = vmatpush1.bf16.msra.mxu1 %v7488_v60 }
 0x227   :  { %v7607_v48 = vpop.permute.xlu1 %1647  ;;  %2019 = vmatprep.subr.bf16.mxu1 %v1370_v37  ;;  %v1943_v37 = vld [vmem:[%s8876_s5] sm:$0xff] }
 0x228   :  { %v1673_v50 = vsel %vm1669_vm12, %v1646_v34, %v7607_v48  ;;  %1760 = vrot.lane.b32.xlu0 %v7273_v17, %s6815_s26 }
 0x229   :  { %1460 = vrot.lane.b32.xlu1 %v7305_v14, %s6812_s19 }
 0x22a   :  { %v1153_v51 = vpop.permute.xlu0 %1152  ;;  %2020 = vmatpush1.bf16.msra.mxu1 %v7514_v13 }
 0x22b   :  { %v1057_v56 = vpop.permute.xlu1 %1056  ;;  %v1175_v57 = vsel %vm1170_vm9, %v1151_v26, %v1153_v51  ;;  %2021 = vmatprep.subr.bf16.mxu1 %v1468_v46 }
 0x22c   :  { %v1078_v60 = vsel %vm1072_vm7, %v1055_v12, %v1057_v56  ;;  %v7620_v63 = vsel %vm1072_vm7, %v1057_v56, %v7604_v47  ;;  %1764 = vrot.lane.b32.xlu0 %v7277_v52, %s6815_s26 }
 0x22d   :  { %1560 = vrot.lane.b32.xlu1 %v7305_v14, %s6813_s21  ;;  %2056 = vmatprep.subr.bf16.mxu0 %v1078_v60 }
 0x22e   :  { %v7626_v17 = vpop.permute.xlu0 %1156  ;;  %2022 = vmatpush1.bf16.msra.mxu1 %v7510_v54  ;;  %2057 = vmatpush1.bf16.msra.mxu0 %v1077_v41 }
 0x22f   :  { %v1155_v0 = vpop.permute.xlu1 %1154  ;;  %2023 = vmatprep.subr.bf16.mxu1 %v1570_v38 }
 0x230   :  { %v1176_v1 = vsel %vm1170_vm9, %v1153_v51, %v1155_v0  ;;  %v7632_v16 = vsel %vm1170_vm9, %v1155_v0, %v7626_v17  ;;  %1070 = vrot.lane.b32.xlu0 %v7307_v15, %s6808_s0 }
 0x231   :  { %1663 = vrot.lane.b32.xlu1 %v7305_v14, %s6814_s7  ;;  %2058 = vmatprep.subr.bf16.mxu0 %v1176_v1 }
 0x232   :  { %v1251_v52 = vpop.permute.xlu0 %1250  ;;  %2024 = vmatpush1.bf16.msra.mxu1 %v7538_v25  ;;  %2059 = vmatpush1.bf16.msra.mxu0 %v1175_v57 }
 0x233   :  { %v1253_v6 = vpop.permute.xlu1 %1252  ;;  %v1273_v7 = vsel %vm1268_vm8, %v1249_v5, %v1251_v52  ;;  %2025 = vmatprep.subr.bf16.mxu1 %v1673_v50 }
 0x234   :  { %v1274_v8 = vsel %vm1268_vm8, %v1251_v52, %v1253_v6  ;;  %1266 = vrot.lane.b32.xlu0 %v7307_v15, %s6810_s1 }
 0x235   :  { %1766 = vrot.lane.b32.xlu1 %v7305_v14, %s6815_s26  ;;  %2060 = vmatprep.subr.bf16.mxu0 %v1274_v8 }
 0x236   :  { %v7645_v11 = vpop.permute.xlu0 %1254  ;;  %2026 = vmatpush1.bf16.msra.mxu1 %v7534_v24  ;;  %2061 = vmatpush1.bf16.msra.mxu0 %v1273_v7 }
 0x237   :  { %v1351_v54 = vpop.permute.xlu1 %1350  ;;  %v1275_v13 = vsel %vm1268_vm8, %v1253_v6, %v7645_v11  ;;  %2027 = vmatprep.subr.bf16.mxu1 %v1776_v43 }
 0x238   :  { %1462 = vrot.lane.b32.xlu0 %v7307_v15, %s6812_s19 }
 0x239   :  { %1168 = vrot.lane.b32.xlu1 %v7307_v15, %s6809_s2 }
 0x23a   :  { %v1349_v53 = vpop.permute.xlu0 %1348  ;;  %2028 = vmatpush1.bf16.msra.mxu1 %v7562_v39 }
 0x23b   :  { %v1449_v14 = vpop.permute.xlu1 %1448  ;;  %v1371_v21 = vsel %vm1366_vm11, %v7555_v32, %v1349_v53  ;;  %v1372_v3 = vsel %vm1366_vm11, %v1349_v53, %v1351_v54  ;;  %2097 = vmatprep.subr.bf16.mxu1 %v7296_v4 }
 0x23c   :  { %1564 = vrot.lane.b32.xlu0 %v1520_v22, %s6813_s21  ;;  %2062 = vmatprep.subr.bf16.mxu0 %v1372_v3 }
 0x23d   :  { %1364 = vrot.lane.b32.xlu1 %v7307_v15, %s6811_s14  ;;  %2044 = vmatmul.mubr.bf16.vlgmr.msra.gmra.mrb[16].mxu1 %v7553_v31 }
 0x23e   :  { %v1353_v23 = vpop.permute.xlu0 %1352  ;;  %2063 = vmatpush1.bf16.msra.mxu0 %v1371_v21  ;;  %2098 = vmatpush1.bf16.msra.mxu1 %v7286_v61  ;;  %v1944_v61 = vld [vmem:[%s8876_s5 + $0x8] sm:$0xff]  ;;  %s6816_s5 = smov 124  }
 0x23f   :  { %v1549_v33 = vpop.permute.xlu1 %1548  ;;  %v1373_v34 = vsel %vm1366_vm11, %v1351_v54, %v1353_v23  ;;  %6014 = vmatprep.mubr.msk.bf16.mxu1 %vm1964_vm6, %v7348_v28 }
 0x240   :  { %1667 = vrot.lane.b32.xlu0 %v1520_v22, %s6814_s7 }
 0x241   :  { %1562 = vrot.lane.b32.xlu1 %v7307_v15, %s6813_s21 }
 0x242   :  { %v1447_v4 = vpop.permute.xlu0 %1446 }
 0x243   :  { %v1652_v36 = vpop.permute.xlu1 %1651  ;;  %v1469_v24 = vsel %vm1464_vm10, %v7594_v45, %v1447_v4  ;;  %v1470_v25 = vsel %vm1464_vm10, %v1447_v4, %v1449_v14 }
 0x244   :  { %1770 = vrot.lane.b32.xlu0 %v1520_v22, %s6815_s26  ;;  %2064 = vmatprep.subr.bf16.mxu0 %v1470_v25 }
 0x245   :  { %1665 = vrot.lane.b32.xlu1 %v7307_v15, %s6814_s7  ;;  %2065 = vmatpush1.bf16.msra.mxu0 %v1469_v24 }
 0x246   :  { %v1451_v26 = vpop.permute.xlu0 %1450 }
 0x247   :  { %v1755_v9 = vpop.permute.xlu1 %1754  ;;  %v1471_v27 = vsel %vm1464_vm10, %v1449_v14, %v1451_v26 }
 0x248   :  { %1952 = vperm.xlu0 %6433, %v1944_v61  }
 0x249   :  { %1768 = vrot.lane.b32.xlu1 %v7307_v15, %s6815_s26 }
 0x24a   :  { %v1547_v29 = vpop.permute.xlu0 %1546 }
 0x24b   :  { %v1061_v30 = vpop.permute.xlu1 %1060  ;;  %v1571_v32 = vsel %vm1566_vm13, %v7569_v49, %v1547_v29  ;;  %v1572_v35 = vsel %vm1566_vm13, %v1547_v29, %v1549_v33 }
 0x24c   :  { %v1080_v39 = vsel %vm1072_vm7, %v7604_v47, %v1061_v30  ;;  %2066 = vmatprep.subr.bf16.mxu0 %v1572_v35 }
 0x24d   :  { %2099 = vmatprep.subr.bf16.mxu1 %v1080_v39  ;;  %2067 = vmatpush1.bf16.msra.mxu0 %v1571_v32 }
 0x24e   :  { %v1551_v10 = vpop.permute.xlu0 %1550  ;;  %2100 = vmatpush1.bf16.msra.mxu1 %v7620_v63  ;;  %1947 = vperm.xlu1 %6434, %v1943_v37  }
 0x24f   :  { %v1159_v15 = vpop.permute.xlu1 %1158  ;;  %v1573_v38 = vsel %vm1566_vm13, %v1549_v33, %v1551_v10 }
 0x250   :  { %v1178_v49 = vsel %vm1170_vm9, %v7626_v17, %v1159_v15 }
 0x251   :  { %2101 = vmatprep.subr.bf16.mxu1 %v1178_v49 }
 0x252   :  { %v1650_v40 = vpop.permute.xlu0 %1649  ;;  %2102 = vmatpush1.bf16.msra.mxu1 %v7632_v16 }
 0x253   :  { %v7695_v5 = vpop.permute.xlu1 %1256  ;;  %v1674_v43 = vsel %vm1669_vm12, %v7607_v48, %v1650_v40  ;;  %v1675_v44 = vsel %vm1669_vm12, %v1650_v40, %v1652_v36 }
 0x254   :  { %v1276_v12 = vsel %vm1268_vm8, %v7645_v11, %v7695_v5  ;;  %2068 = vmatprep.subr.bf16.mxu0 %v1675_v44 }
 0x255   :  { %2103 = vmatprep.subr.bf16.mxu1 %v1276_v12  ;;  %2069 = vmatpush1.bf16.msra.mxu0 %v1674_v43 }
 0x256   :  { %v1654_v45 = vpop.permute.xlu0 %1653  ;;  %2104 = vmatpush1.bf16.msra.mxu1 %v1275_v13 }
 0x257   :  { %v7703_v41 = vpop.permute.xlu1 %1354  ;;  %v1676_v46 = vsel %vm1669_vm12, %v1652_v36, %v1654_v45 }
 0x258   :  { %v1374_v47 = vsel %vm1366_vm11, %v1353_v23, %v7703_v41 }
 0x259   :  { %2105 = vmatprep.subr.bf16.mxu1 %v1374_v47 }
 0x25a   :  { %v1753_v48 = vpop.permute.xlu0 %1752  ;;  %2106 = vmatpush1.bf16.msra.mxu1 %v1373_v34 }
 0x25b   :  { %v7708_v50 = vpop.permute.xlu1 %1452  ;;  %v1777_v51 = vsel %vm1772_vm14, %v7582_v42, %v1753_v48  ;;  %v1778_v56 = vsel %vm1772_vm14, %v1753_v48, %v1755_v9 }
 0x25c   :  { %v1472_v57 = vsel %vm1464_vm10, %v1451_v26, %v7708_v50  ;;  %2070 = vmatprep.subr.bf16.mxu0 %v1778_v56 }
 0x25d   :  { %2107 = vmatprep.subr.bf16.mxu1 %v1472_v57  ;;  %2071 = vmatpush1.bf16.msra.mxu0 %v1777_v51 }
 0x25e   :  { %v1757_v60 = vpop.permute.xlu0 %1756  ;;  %2108 = vmatpush1.bf16.msra.mxu1 %v1471_v27  ;;  %2140 = vmatprep.subr.bf16.mxu0 %v7314_v2 }
 0x25f   :  { %v7716_v63 = vpop.permute.xlu1 %1552  ;;  %v1779_v17 = vsel %vm1772_vm14, %v1755_v9, %v1757_v60 }
 0x260   :  { %v1574_v0 = vsel %vm1566_vm13, %v1551_v10, %v7716_v63  ;;  %2087 = vmatmul.mubr.bf16.vlgmr.msra.gmra.mrb[20].mxu0 %v7553_v31 }
 0x261   :  { %2109 = vmatprep.subr.bf16.mxu1 %v1574_v0  ;;  %2141 = vmatpush1.bf16.msra.mxu0 %v7309_v18 }
 0x262   :  { %v1063_v42 = vpop.permute.xlu0 %1062  ;;  %2110 = vmatpush1.bf16.msra.mxu1 %v1573_v38  ;;  %6015 = vmatprep.mubr.msk.bf16.mxu0 %vm1964_vm6, %v7348_v28 }
 0x263   :  { %v7725_v1 = vpop.permute.xlu1 %1655  ;;  %v1081_v2 = vsel %vm1072_vm7, %v1061_v30, %v1063_v42 }
 0x264   :  { %v1677_v16 = vsel %vm1669_vm12, %v1654_v45, %v7725_v1 }
 0x265   :  { %2111 = vmatprep.subr.bf16.mxu1 %v1677_v16 }
 0x266   :  { %v1067_v52 = vpop.permute.xlu0 %1066  ;;  %2112 = vmatpush1.bf16.msra.mxu1 %v1676_v46 }
 0x267   :  { %v7730_v6 = vpop.permute.xlu1 %1758 }
 0x268   :  { %v1780_v18 = vsel %vm1772_vm14, %v1757_v60, %v7730_v6 }
 0x269   :  { %2113 = vmatprep.subr.bf16.mxu1 %v1780_v18 }
 0x26a   :  { %v1161_v7 = vpop.permute.xlu0 %1160  ;;  %2114 = vmatpush1.bf16.msra.mxu1 %v1779_v17 }
 0x26b   :  { %v1065_v8 = vpop.permute.xlu1 %1064  ;;  %v1179_v11 = vsel %vm1170_vm9, %v1159_v15, %v1161_v7  ;;  %2183 = vmatprep.subr.bf16.mxu1 %v7321_v20 }
 0x26c   :  { %v1082_v54 = vsel %vm1072_vm7, %v1063_v42, %v1065_v8  ;;  %v1083_v13 = vsel %vm1072_vm7, %v1065_v8, %v1067_v52 }
 0x26d   :  { %2130 = vmatmul.mubr.bf16.vlgmr.msra.gmra.mrb[20].mxu1 %v7553_v31  ;;  %2142 = vmatprep.subr.bf16.mxu0 %v1082_v54 }
 0x26e   :  { %v1165_v53 = vpop.permute.xlu0 %1164  ;;  %2143 = vmatpush1.bf16.msra.mxu0 %v1081_v2  ;;  %2184 = vmatpush1.bf16.msra.mxu1 %v7316_v19  ;;  %v1830_v2 = vld [vmem:[#allocation3 + $0x68] sm:$0xff] }
 0x26f   :  { %v1163_v14 = vpop.permute.xlu1 %1162  ;;  %6016 = vmatprep.mubr.msk.bf16.mxu1 %vm1964_vm6, %v7348_v28 }
 0x270   :  { %v1180_v21 = vsel %vm1170_vm9, %v1161_v7, %v1163_v14  ;;  %v1181_v3 = vsel %vm1170_vm9, %v1163_v14, %v1165_v53 }
 0x271   :  { %2144 = vmatprep.subr.bf16.mxu0 %v1180_v21 }
 0x272   :  { %v1259_v20 = vpop.permute.xlu0 %1258  ;;  %2145 = vmatpush1.bf16.msra.mxu0 %v1179_v11 }
 0x273   :  { %v1261_v22 = vpop.permute.xlu1 %1260  ;;  %v1277_v23 = vsel %vm1268_vm8, %v7695_v5, %v1259_v20 }
 0x274   :  { %v1278_v33 = vsel %vm1268_vm8, %v1259_v20, %v1261_v22 }
 0x275   :  { %2146 = vmatprep.subr.bf16.mxu0 %v1278_v33 }
 0x276   :  { %v1263_v34 = vpop.permute.xlu0 %1262  ;;  %2147 = vmatpush1.bf16.msra.mxu0 %v1277_v23 }
 0x277   :  { %v1359_v19 = vpop.permute.xlu1 %1358  ;;  %v1279_v4 = vsel %vm1268_vm8, %v1261_v22, %v1263_v34 }
 0x27a   :  { %v1357_v36 = vpop.permute.xlu0 %1356 }
 0x27b   :  { %v1457_v24 = vpop.permute.xlu1 %1456  ;;  %v1375_v25 = vsel %vm1366_vm11, %v7703_v41, %v1357_v36  ;;  %v1376_v61 = vsel %vm1366_vm11, %v1357_v36, %v1359_v19 }
 0x27c   :  { %2148 = vmatprep.subr.bf16.mxu0 %v1376_v61 }
 0x27d   :  { %2149 = vmatpush1.bf16.msra.mxu0 %v1375_v25 }
 0x27e   :  { %v1361_v26 = vpop.permute.xlu0 %1360 }
 0x27f   :  { %v1557_v9 = vpop.permute.xlu1 %1556  ;;  %v1377_v27 = vsel %vm1366_vm11, %v1359_v19, %v1361_v26 }
 0x282   :  { %v1455_v29 = vpop.permute.xlu0 %1454 }
 0x283   :  { %v1660_v30 = vpop.permute.xlu1 %1659  ;;  %v1473_v32 = vsel %vm1464_vm10, %v7708_v50, %v1455_v29  ;;  %v1474_v35 = vsel %vm1464_vm10, %v1455_v29, %v1457_v24 }
 0x284   :  { %2150 = vmatprep.subr.bf16.mxu0 %v1474_v35 }
 0x285   :  { %2151 = vmatpush1.bf16.msra.mxu0 %v1473_v32 }
 0x286   :  { %v1459_v37 = vpop.permute.xlu0 %1458 }
 0x287   :  { %v1763_v39 = vpop.permute.xlu1 %1762  ;;  %v1475_v10 = vsel %vm1464_vm10, %v1457_v24, %v1459_v37 }
 0x28a   :  { %v1555_v15 = vpop.permute.xlu0 %1554 }
 0x28b   :  { %v1069_v38 = vpop.permute.xlu1 %1068  ;;  %v1575_v49 = vsel %vm1566_vm13, %v7716_v63, %v1555_v15  ;;  %v1576_v40 = vsel %vm1566_vm13, %v1555_v15, %v1557_v9 }
 0x28c   :  { %v1084_v5 = vsel %vm1072_vm7, %v1067_v52, %v1069_v38  ;;  %2152 = vmatprep.subr.bf16.mxu0 %v1576_v40 }
 0x28d   :  { %2185 = vmatprep.subr.bf16.mxu1 %v1084_v5  ;;  %2153 = vmatpush1.bf16.msra.mxu0 %v1575_v49 }
 0x28e   :  { %v1559_v43 = vpop.permute.xlu0 %1558  ;;  %2186 = vmatpush1.bf16.msra.mxu1 %v1083_v13 }
 0x28f   :  { %v1167_v44 = vpop.permute.xlu1 %1166  ;;  %v1577_v12 = vsel %vm1566_vm13, %v1557_v9, %v1559_v43 }
 0x290   :  { %v1182_v45 = vsel %vm1170_vm9, %v1165_v53, %v1167_v44 }
 0x291   :  { %2187 = vmatprep.subr.bf16.mxu1 %v1182_v45 }
 0x292   :  { %v1658_v41 = vpop.permute.xlu0 %1657  ;;  %2188 = vmatpush1.bf16.msra.mxu1 %v1181_v3 }
 0x293   :  { %v1265_v46 = vpop.permute.xlu1 %1264  ;;  %v1678_v47 = vsel %vm1669_vm12, %v7725_v1, %v1658_v41  ;;  %v1679_v48 = vsel %vm1669_vm12, %v1658_v41, %v1660_v30 }
 0x294   :  { %v1280_v50 = vsel %vm1268_vm8, %v1263_v34, %v1265_v46  ;;  %2154 = vmatprep.subr.bf16.mxu0 %v1679_v48 }
 0x295   :  { %2189 = vmatprep.subr.bf16.mxu1 %v1280_v50  ;;  %2155 = vmatpush1.bf16.msra.mxu0 %v1678_v47 }
 0x296   :  { %v1662_v51 = vpop.permute.xlu0 %1661  ;;  %2190 = vmatpush1.bf16.msra.mxu1 %v1279_v4 }
 0x297   :  { %v1363_v56 = vpop.permute.xlu1 %1362  ;;  %v1680_v57 = vsel %vm1669_vm12, %v1660_v30, %v1662_v51 }
 0x298   :  { %v1378_v60 = vsel %vm1366_vm11, %v1361_v26, %v1363_v56 }
 0x299   :  { %2191 = vmatprep.subr.bf16.mxu1 %v1378_v60 }
 0x29a   :  { %v1761_v63 = vpop.permute.xlu0 %1760  ;;  %2192 = vmatpush1.bf16.msra.mxu1 %v1377_v27 }
 0x29b   :  { %v1461_v17 = vpop.permute.xlu1 %1460  ;;  %v1781_v0 = vsel %vm1772_vm14, %v7730_v6, %v1761_v63  ;;  %v1782_v42 = vsel %vm1772_vm14, %v1761_v63, %v1763_v39  ;;  %v6630_v6 = vld [vmem:[#allocation3 + $0x60] sm:$0xff] }
 0x29c   :  { %v1476_v1 = vsel %vm1464_vm10, %v1459_v37, %v1461_v17  ;;  %2156 = vmatprep.subr.bf16.mxu0 %v1782_v42 }
 0x29d   :  { %2193 = vmatprep.subr.bf16.mxu1 %v1476_v1  ;;  %2157 = vmatpush1.bf16.msra.mxu0 %v1781_v0 }
 0x29e   :  { %v1765_v16 = vpop.permute.xlu0 %1764  ;;  %2194 = vmatpush1.bf16.msra.mxu1 %v1475_v10  ;;  %2226 = vmatprep.subr.bf16.mxu0 %v1830_v2 }
 0x29f   :  { %v1561_v52 = vpop.permute.xlu1 %1560  ;;  %v1783_v18 = vsel %vm1772_vm14, %v1763_v39, %v1765_v16 }
 0x2a0   :  { %v1578_v7 = vsel %vm1566_vm13, %v1559_v43, %v1561_v52  ;;  %2173 = vmatmul.mubr.bf16.vlgmr.msra.gmra.mrb[24].mxu0 %v7553_v31 }
 0x2a1   :  { %2195 = vmatprep.subr.bf16.mxu1 %v1578_v7  ;;  %2227 = vmatpush1.bf16.msra.mxu0 %v6630_v6 }
 0x2a2   :  { %v1071_v8 = vpop.permute.xlu0 %1070  ;;  %2196 = vmatpush1.bf16.msra.mxu1 %v1577_v12  ;;  %6017 = vmatprep.mubr.msk.bf16.mxu0 %vm1964_vm6, %v7348_v28 }
 0x2a3   :  { %v1664_v11 = vpop.permute.xlu1 %1663  ;;  %v1085_v54 = vsel %vm1072_vm7, %v1069_v38, %v1071_v8  ;;  %1113 = vst.msk [vmem:[#allocation3 + $0xd8] sm:$0xff] %vm1014_vm5, %v1071_v8 }
 0x2a4   :  { %v1681_v13 = vsel %vm1669_vm12, %v1662_v51, %v1664_v11 }
 0x2a5   :  { %2197 = vmatprep.subr.bf16.mxu1 %v1681_v13 }
 0x2a6   :  { %v1267_v53 = vpop.permute.xlu0 %1266  ;;  %2198 = vmatpush1.bf16.msra.mxu1 %v1680_v57 }
 0x2a7   :  { %v1767_v14 = vpop.permute.xlu1 %1766  ;;  %v1281_v21 = vsel %vm1268_vm8, %v1265_v46, %v1267_v53  ;;  %1309 = vst.msk [vmem:[#allocation3 + $0x1b8] sm:$0xff] %vm1014_vm5, %v1267_v53 }
 0x2a8   :  { %v1784_v3 = vsel %vm1772_vm14, %v1765_v16, %v1767_v14 }
 0x2a9   :  { %2199 = vmatprep.subr.bf16.mxu1 %v1784_v3 }
 0x2aa   :  { %v1463_v20 = vpop.permute.xlu0 %1462  ;;  %v1844_v28 = vld [vmem:[#allocation3 + $0xd8] sm:$0xff]  ;;  %2200 = vmatpush1.bf16.msra.mxu1 %v1783_v18 }
 0x2ab   :  { %v1169_v22 = vpop.permute.xlu1 %1168  ;;  %v1477_v23 = vsel %vm1464_vm10, %v1461_v17, %v1463_v20  ;;  %1505 = vst.msk [vmem:[#allocation3 + $0x298] sm:$0xff] %vm1014_vm5, %v1463_v20  ;;  %2228 = vmatprep.subr.bf16.mxu0 %v1844_v28 }
 0x2ac   :  { %v1183_v33 = vsel %vm1170_vm9, %v1167_v44, %v1169_v22  ;;  %1211 = vst.msk [vmem:[#allocation3 + $0x148] sm:$0xff] %vm1014_vm5, %v1169_v22  ;;  %2229 = vmatpush1.bf16.msra.mxu0 %v1085_v54 }
 0x2ad   :  { %2216 = vmatmul.mubr.bf16.vlgmr.msra.gmra.mrb[24].mxu1 %v7553_v31 }
 0x2ae   :  { %v1565_v19 = vpop.permute.xlu0 %1564  ;;  %v1872_v9 = vld [vmem:[#allocation3 + $0x1b8] sm:$0xff] }
 0x2af   :  { %v1365_v34 = vpop.permute.xlu1 %1364 }
 0x2b0   :  { %v1379_v4 = vsel %vm1366_vm11, %v1363_v56, %v1365_v34  ;;  %1407 = vst.msk [vmem:[#allocation3 + $0x228] sm:$0xff] %vm1014_vm5, %v1365_v34  ;;  %vm4280_vm11 = vcmask 908288  }
 0x2b2   :  { %v1668_v26 = vpop.permute.xlu0 %1667  ;;  %v1900_v15 = vld [vmem:[#allocation3 + $0x298] sm:$0xff] }
 0x2b3   :  { %v1563_v36 = vpop.permute.xlu1 %1562  ;;  %v1858_v24 = vld [vmem:[#allocation3 + $0x148] sm:$0xff] }
 0x2b4   :  { %v1579_v25 = vsel %vm1566_vm13, %v1561_v52, %v1563_v36  ;;  %v1580_v61 = vsel %vm1566_vm13, %v1563_v36, %v1565_v19  ;;  %2230 = vmatprep.subr.bf16.mxu0 %v1858_v24  ;;  %vm4378_vm13 = vcmask 777216  }
 0x2b5   :  { %1608 = vst.msk [vmem:[#allocation3 + $0x308] sm:$0xff] %vm1014_vm5, %v1580_v61  ;;  %2231 = vmatpush1.bf16.msra.mxu0 %v1183_v33 }
 0x2b6   :  { %2232 = vmatprep.subr.bf16.mxu0 %v1872_v9  ;;  %v1771_v35 = vpop.permute.xlu0 %1770 }
 0x2b7   :  { %v1666_v27 = vpop.permute.xlu1 %1665  ;;  %v1886_v32 = vld [vmem:[#allocation3 + $0x228] sm:$0xff] }
 0x2b8   :  { %v1682_v29 = vsel %vm1669_vm12, %v1664_v11, %v1666_v27  ;;  %v1683_v30 = vsel %vm1669_vm12, %v1666_v27, %v1668_v26  ;;  %vm4313_vm12 = vcmask 900096  }
 0x2b9   :  { %1711 = vst.msk [vmem:[#allocation3 + $0x378] sm:$0xff] %vm1014_vm5, %v1683_v30  ;;  %2233 = vmatpush1.bf16.msra.mxu0 %v1281_v21 }
 0x2ba   :  { %2234 = vmatprep.subr.bf16.mxu0 %v1886_v32 }
 0x2bb   :  { %v1769_v37 = vpop.permute.xlu1 %1768 }
 0x2bc   :  { %v1785_v39 = vsel %vm1772_vm14, %v1767_v14, %v1769_v37  ;;  %v1786_v10 = vsel %vm1772_vm14, %v1769_v37, %v1771_v35  ;;  %v1914_v38 = vld [vmem:[#allocation3 + $0x308] sm:$0xff]  ;;  %vm4411_vm14 = vcmask 769024  }
 0x2bd   :  { %1814 = vst.msk [vmem:[#allocation3 + $0x3e8] sm:$0xff] %vm1014_vm5, %v1786_v10  ;;  %2235 = vmatpush1.bf16.msra.mxu0 %v1379_v4 }
 0x2be   :  { %2236 = vmatprep.subr.bf16.mxu0 %v1900_v15 }
 0x2c0   :  { %v1928_v49 = vld [vmem:[#allocation3 + $0x378] sm:$0xff] }
 0x2c1   :  { %2237 = vmatpush1.bf16.msra.mxu0 %v1477_v23 }
 0x2c2   :  { %2238 = vmatprep.subr.bf16.mxu0 %v1914_v38 }
 0x2c4   :  { %v1942_v40 = vld [vmem:[#allocation3 + $0x3e8] sm:$0xff] }
 0x2c5   :  { %2239 = vmatpush1.bf16.msra.mxu0 %v1579_v25 }
 0x2c6   :  { %2240 = vmatprep.subr.bf16.mxu0 %v1928_v49 }
 0x2c7   :  { %v7803_v45 = vpop.permute.xlu0 %1952 }
 0x2c9   :  { %2241 = vmatpush1.bf16.msra.mxu0 %v1682_v29 }
 0x2ca   :  { %2242 = vmatprep.subr.bf16.mxu0 %v1942_v40 }
 0x2cd   :  { %2243 = vmatpush1.bf16.msra.mxu0 %v1785_v39  ;;  %v7800_v5 = vpop.permute.xlu1 %1947 }
 0x2d0   :  { %2259 = vmatmul.mubr.bf16.vlgmr.msra.gmra.mrb[28].mxu0 %v7553_v31 }
 0x2ec   :  { %v2002_v43 = vpop.f32.mrb[16].mxu0 }
 0x2ed   :  { %v2004_v44 = vpop.f32.mrb[17].mxu0  ;;  %v2003_v12 = vadd.f32 %v2002_v43, %v7800_v5 }
 0x2ee   :  { %v2006_v41 = vpop.f32.mrb[18].mxu0  ;;  %v2005_v46 = vadd.f32 %v2004_v44, %v7800_v5 }
 0x2ef   :  { %v2007_v47 = vadd.f32 %v2006_v41, %v7803_v45  ;;  %v2269_v48 = vmax.f32 %v2003_v12, 0.0  ;;  %v2008_v50 = vpop.f32.mrb[19].mxu0 }
 0x2f0   :  { %v2009_v51 = vadd.f32 %v2008_v50, %v7803_v45  ;;  %v2270_v56 = vmax.f32 %v2005_v46, 0.0 }
 0x2f1   :  { %v2283_v57 = vmax.f32 %v2007_v47, 0.0 }
 0x2f2   :  { %v2284_v31 = vmax.f32 %v2009_v51, 0.0 }
 0x2f3   :  { %v7808_v60 = vpack.c.bf16 %v2283_v57, %v2269_v48 }
 0x2f4   :  { %v7810_v63 = vpack.c.bf16 %v2284_v31, %v2270_v56 }
 0x310   :  { %v2045_v17 = vpop.f32.mrb[16].mxu1 }
 0x311   :  { %v2046_v0 = vadd.f32 %v2045_v17, %v7800_v5  ;;  %v2047_v42 = vpop.f32.mrb[17].mxu1 }
 0x312   :  { %v2048_v1 = vadd.f32 %v2047_v42, %v7800_v5  ;;  %v2049_v2 = vpop.f32.mrb[18].mxu1 }
 0x313   :  { %v2271_v16 = vmax.f32 %v2046_v0, 0.0  ;;  %v2050_v52 = vadd.f32 %v2049_v2, %v7803_v45  ;;  %v2051_v18 = vpop.f32.mrb[19].mxu1 }
 0x314   :  { %v2272_v7 = vmax.f32 %v2048_v1, 0.0  ;;  %v2052_v6 = vadd.f32 %v2051_v18, %v7803_v45 }
 0x315   :  { %v2285_v8 = vmax.f32 %v2050_v52, 0.0 }
 0x316   :  { %v2286_v11 = vmax.f32 %v2052_v6, 0.0 }
 0x317   :  { %v7816_v54 = vpack.c.bf16 %v2285_v8, %v2271_v16 }
 0x318   :  { %v7818_v13 = vpack.c.bf16 %v2286_v11, %v2272_v7 }
 0x333   :  { %v2088_v53 = vpop.f32.mrb[20].mxu0 }
 0x334   :  { %v2089_v14 = vadd.f32 %v2088_v53, %v7800_v5  ;;  %v2090_v21 = vpop.f32.mrb[21].mxu0 }
 0x335   :  { %v2091_v3 = vadd.f32 %v2090_v21, %v7800_v5  ;;  %v2092_v20 = vpop.f32.mrb[22].mxu0  ;;  %v6438_v21 = vld [vmem:[#allocation15] ss:$8 sps:$4 sm:$0xff]  }
 0x336   :  { %v2273_v28 = vmax.f32 %v2089_v14, 0.0  ;;  %v2093_v22 = vadd.f32 %v2092_v20, %v7803_v45  ;;  %v2094_v23 = vpop.f32.mrb[23].mxu0  ;;  %v6443_v20 = vld [vmem:[#allocation15 + $0x14] ss:$8 sps:$4 sm:$0xff]  }
 0x337   :  { %v2274_v33 = vmax.f32 %v2091_v3, 0.0  ;;  %v2095_v34 = vadd.f32 %v2094_v23, %v7803_v45  ;;  %v6440_v3 = vld [vmem:[#allocation15 + $0x4] ss:$8 sps:$4 sm:$0xff]   ;;  %v6444_v23 = vld [vmem:[#allocation15 + $0x20] ss:$8 sps:$4 sm:$0xff]  }
 0x338   :  { %v2287_v19 = vmax.f32 %v2093_v22, 0.0  ;;  %3040 = vmatprep.subr.bf16.mxu1 %v6440_v3  ;;  %3968 = vmatprep.subr.bf16.mxu0 %v6440_v3  ;;  %v6446_v22 = vld [vmem:[#allocation15 + $0x24] ss:$8 sps:$4 sm:$0xff]   ;;  %v6480_v3 = vld [vmem:[#allocation15 + $0xe0] ss:$8 sps:$4 sm:$0xff]  }
 0x339   :  { %v2288_v4 = vmax.f32 %v2095_v34, 0.0  ;;  %3041 = vmatpush1.bf16.msra.mxu1 %v6438_v21  ;;  %3969 = vmatpush1.bf16.msra.mxu0 %v6438_v21  ;;  %v6447_v34 = vld [vmem:[#allocation15 + $0x30] ss:$8 sps:$4 sm:$0xff]   ;;  %v6482_v21 = vld [vmem:[#allocation15 + $0xe4] ss:$8 sps:$4 sm:$0xff]  }
 0x33a   :  { %v7824_v36 = vpack.c.bf16 %v2287_v19, %v2273_v28  ;;  %v6441_v28 = vld [vmem:[#allocation15 + $0x10] ss:$8 sps:$4 sm:$0xff]   ;;  %3042 = vmatprep.subr.bf16.mxu1 %v6443_v20  ;;  %3970 = vmatprep.subr.bf16.mxu0 %v6443_v20  ;;  %v6452_v19 = vld [vmem:[#allocation15 + $0x44] ss:$8 sps:$4 sm:$0xff]  }
 0x33b   :  { %v7826_v24 = vpack.c.bf16 %v2288_v4, %v2274_v33  ;;  %v6449_v33 = vld [vmem:[#allocation15 + $0x34] ss:$8 sps:$4 sm:$0xff]   ;;  %v6450_v4 = vld [vmem:[#allocation15 + $0x40] ss:$8 sps:$4 sm:$0xff]  }
 0x33d   :  { %3043 = vmatpush1.bf16.msra.mxu1 %v6441_v28  ;;  %3971 = vmatpush1.bf16.msra.mxu0 %v6441_v28 }
 0x33e   :  { %3044 = vmatprep.subr.bf16.mxu1 %v6446_v22  ;;  %3972 = vmatprep.subr.bf16.mxu0 %v6446_v22 }
 0x340   :  { %v2131_v25 = vpop.f32.mrb[20].mxu1 }
 0x341   :  { %v2132_v61 = vadd.f32 %v2131_v25, %v7800_v5  ;;  %v2133_v26 = vpop.f32.mrb[21].mxu1  ;;  %3045 = vmatpush1.bf16.msra.mxu1 %v6444_v23  ;;  %3973 = vmatpush1.bf16.msra.mxu0 %v6444_v23  ;;  %v6485_v23 = vld [vmem:[#allocation15 + $0xf4] ss:$8 sps:$4 sm:$0xff]  }
 0x342   :  { %v2134_v9 = vadd.f32 %v2133_v26, %v7800_v5  ;;  %v2135_v27 = vpop.f32.mrb[22].mxu1  ;;  %3046 = vmatprep.subr.bf16.mxu1 %v6449_v33  ;;  %3974 = vmatprep.subr.bf16.mxu0 %v6449_v33 }
 0x343   :  { %v2275_v29 = vmax.f32 %v2132_v61, 0.0  ;;  %v2136_v30 = vadd.f32 %v2135_v27, %v7803_v45  ;;  %v2137_v32 = vpop.f32.mrb[23].mxu1  ;;  %v6455_v61 = vld [vmem:[#allocation15 + $0x54] ss:$8 sps:$4 sm:$0xff]  }
 0x344   :  { %v2276_v35 = vmax.f32 %v2134_v9, 0.0  ;;  %v2138_v37 = vadd.f32 %v2137_v32, %v7803_v45 }
 0x345   :  { %v2289_v39 = vmax.f32 %v2136_v30, 0.0  ;;  %3047 = vmatpush1.bf16.msra.mxu1 %v6447_v34  ;;  %3975 = vmatpush1.bf16.msra.mxu0 %v6447_v34 }
 0x346   :  { %v2290_v10 = vmax.f32 %v2138_v37, 0.0  ;;  %3048 = vmatprep.subr.bf16.mxu1 %v6452_v19  ;;  %3976 = vmatprep.subr.bf16.mxu0 %v6452_v19  ;;  %v6483_v19 = vld [vmem:[#allocation15 + $0xf0] ss:$8 sps:$4 sm:$0xff]  }
 0x347   :  { %v7832_v15 = vpack.c.bf16 %v2289_v39, %v2275_v29  ;;  %v6458_v39 = vld [vmem:[#allocation15 + $0x64] ss:$8 sps:$4 sm:$0xff]  }
 0x348   :  { %v7834_v38 = vpack.c.bf16 %v2290_v10, %v2276_v35  ;;  %v6453_v35 = vld [vmem:[#allocation15 + $0x50] ss:$8 sps:$4 sm:$0xff]  }
 0x349   :  { %3049 = vmatpush1.bf16.msra.mxu1 %v6450_v4  ;;  %3977 = vmatpush1.bf16.msra.mxu0 %v6450_v4 }
 0x34a   :  { %3050 = vmatprep.subr.bf16.mxu1 %v6455_v61  ;;  %3978 = vmatprep.subr.bf16.mxu0 %v6455_v61 }
 0x34d   :  { %3051 = vmatpush1.bf16.msra.mxu1 %v6453_v35  ;;  %3979 = vmatpush1.bf16.msra.mxu0 %v6453_v35 }
 0x34e   :  { %3052 = vmatprep.subr.bf16.mxu1 %v6458_v39  ;;  %3980 = vmatprep.subr.bf16.mxu0 %v6458_v39 }
 0x373   :  { %v2174_v49 = vpop.f32.mrb[24].mxu0 }
 0x374   :  { %v2175_v40 = vadd.f32 %v2174_v49, %v7800_v5  ;;  %v2176_v43 = vpop.f32.mrb[25].mxu0 }
 0x375   :  { %v2177_v44 = vadd.f32 %v2176_v43, %v7800_v5  ;;  %v2178_v12 = vpop.f32.mrb[26].mxu0 }
 0x376   :  { %v2277_v41 = vmax.f32 %v2175_v40, 0.0  ;;  %v2179_v46 = vadd.f32 %v2178_v12, %v7803_v45  ;;  %v2180_v47 = vpop.f32.mrb[27].mxu0 }
 0x377   :  { %v2278_v48 = vmax.f32 %v2177_v44, 0.0  ;;  %v2181_v50 = vadd.f32 %v2180_v47, %v7803_v45  ;;  %v6462_v47 = vld [vmem:[#allocation15 + $0x80] ss:$8 sps:$4 sm:$0xff]  }
 0x378   :  { %v2291_v51 = vmax.f32 %v2179_v46, 0.0  ;;  %v6464_v46 = vld [vmem:[#allocation15 + $0x84] ss:$8 sps:$4 sm:$0xff]  }
 0x379   :  { %v2292_v56 = vmax.f32 %v2181_v50, 0.0  ;;  %v6467_v50 = vld [vmem:[#allocation15 + $0x94] ss:$8 sps:$4 sm:$0xff]  }
 0x37a   :  { %v7840_v57 = vpack.c.bf16 %v2291_v51, %v2277_v41  ;;  %v6461_v41 = vld [vmem:[#allocation15 + $0x74] ss:$8 sps:$4 sm:$0xff]   ;;  %v6470_v51 = vld [vmem:[#allocation15 + $0xa4] ss:$8 sps:$4 sm:$0xff]  }
 0x37b   :  { %v7842_v31 = vpack.c.bf16 %v2292_v56, %v2278_v48  ;;  %v6465_v48 = vld [vmem:[#allocation15 + $0x90] ss:$8 sps:$4 sm:$0xff]   ;;  %v6468_v56 = vld [vmem:[#allocation15 + $0xa0] ss:$8 sps:$4 sm:$0xff]  }
 0x37c   :  { %3246 = vrot.lane.b32.xlu1 %v7840_v57, %s6808_s0 }
 0x37d   :  { %3248 = vrot.lane.b32.xlu0 %v7842_v31, %s6808_s0 }
 0x380   :  { %v2217_v17 = vpop.f32.mrb[24].mxu1 }
 0x381   :  { %v2218_v0 = vadd.f32 %v2217_v17, %v7800_v5  ;;  %v2219_v42 = vpop.f32.mrb[25].mxu1  ;;  %v6473_v17 = vld [vmem:[#allocation15 + $0xb4] ss:$8 sps:$4 sm:$0xff]  }
 0x382   :  { %v2220_v1 = vadd.f32 %v2219_v42, %v7800_v5  ;;  %v2221_v2 = vpop.f32.mrb[26].mxu1 }
 0x383   :  { %v2222_v16 = vadd.f32 %v2221_v2, %v7803_v45  ;;  %v2223_v52 = vpop.f32.mrb[27].mxu1  ;;  %v2279_v7 = vmax.f32 %v2218_v0, 0.0  ;;  %v6471_v0 = vld [vmem:[#allocation15 + $0xb0] ss:$8 sps:$4 sm:$0xff]  }
 0x384   :  { %v2224_v18 = vadd.f32 %v2223_v52, %v7803_v45  ;;  %v2280_v8 = vmax.f32 %v2220_v1, 0.0  ;;  %v6476_v52 = vld [vmem:[#allocation15 + $0xc4] ss:$8 sps:$4 sm:$0xff]  }
 0x385   :  { %v2293_v6 = vmax.f32 %v2222_v16, 0.0 }
 0x386   :  { %v2294_v11 = vmax.f32 %v2224_v18, 0.0  ;;  %v6474_v18 = vld [vmem:[#allocation15 + $0xc0] ss:$8 sps:$4 sm:$0xff]  }
 0x387   :  { %v7852_v53 = vpack.c.bf16 %v2293_v6, %v2279_v7  ;;  %v6479_v7 = vld [vmem:[#allocation15 + $0xd4] ss:$8 sps:$4 sm:$0xff]   ;;  %v6477_v6 = vld [vmem:[#allocation15 + $0xd0] ss:$8 sps:$4 sm:$0xff]  }
 0x388   :  { %v7854_v14 = vpack.c.bf16 %v2294_v11, %v2280_v8 }
 0x389   :  { %3250 = vrot.lane.b32.xlu1 %v7852_v53, %s6808_s0 }
 0x38a   :  { %3252 = vrot.lane.b32.xlu0 %v7854_v14, %s6808_s0 }
 0x38d   :  { %3244 = vrot.lane.b32.xlu1 %v7834_v38, %s6808_s0 }
 0x38e   :  { %2347 = vrot.lane.b32.xlu0 %v7810_v63, %s6808_s0 }
 0x391   :  { %2349 = vrot.lane.b32.xlu1 %v7816_v54, %s6808_s0 }
 0x392   :  { %2351 = vrot.lane.b32.xlu0 %v7818_v13, %s6808_s0 }
 0x395   :  { %2345 = vrot.lane.b32.xlu1 %v7808_v60, %s6808_s0 }
 0x3a3   :  { %v2260_v25 = vpop.f32.mrb[28].mxu0 }
 0x3a4   :  { %v2261_v26 = vadd.f32 %v2260_v25, %v7800_v5  ;;  %v2262_v9 = vpop.f32.mrb[29].mxu0 }
 0x3a5   :  { %v2263_v27 = vadd.f32 %v2262_v9, %v7800_v5  ;;  %v2264_v29 = vpop.f32.mrb[30].mxu0  ;;  %v6456_v5 = vld [vmem:[#allocation15 + $0x60] ss:$8 sps:$4 sm:$0xff]  }
 0x3a6   :  { %v2265_v30 = vadd.f32 %v2264_v29, %v7803_v45  ;;  %v2266_v32 = vpop.f32.mrb[31].mxu0  ;;  %v2281_v10 = vmax.f32 %v2261_v26, 0.0  ;;  %3053 = vmatpush1.bf16.msra.mxu1 %v6456_v5  ;;  %3981 = vmatpush1.bf16.msra.mxu0 %v6456_v5 }
 0x3a7   :  { %v2267_v37 = vadd.f32 %v2266_v32, %v7803_v45  ;;  %v2282_v40 = vmax.f32 %v2263_v27, 0.0  ;;  %v6459_v45 = vld [vmem:[#allocation15 + $0x70] ss:$8 sps:$4 sm:$0xff]   ;;  %3054 = vmatprep.subr.bf16.mxu1 %v6461_v41  ;;  %3982 = vmatprep.subr.bf16.mxu0 %v6461_v41 }
 0x3a8   :  { %v2295_v49 = vmax.f32 %v2265_v30, 0.0 }
 0x3a9   :  { %v2296_v43 = vmax.f32 %v2267_v37, 0.0 }
 0x3aa   :  { %v7874_v44 = vpack.c.bf16 %v2295_v49, %v2281_v10  ;;  %3055 = vmatpush1.bf16.msra.mxu1 %v6459_v45  ;;  %3983 = vmatpush1.bf16.msra.mxu0 %v6459_v45 }
 0x3ab   :  { %v2310_v12 = vpack.c.bf16 %v2296_v43, %v2282_v40  ;;  %3056 = vmatprep.subr.bf16.mxu1 %v6464_v46  ;;  %3984 = vmatprep.subr.bf16.mxu0 %v6464_v46 }
 0x3ad   :  { %2324 = vst.msk [vmem:[#allocation4 + $0x68] sm:$0xff] %vm1014_vm5, %v2310_v12  ;;  %vm3220_vm5 = vcmask 138240  }
 0x3ae   :  { %3057 = vmatpush1.bf16.msra.mxu1 %v6462_v47  ;;  %3985 = vmatpush1.bf16.msra.mxu0 %v6462_v47 }
 0x3af   :  { %3058 = vmatprep.subr.bf16.mxu1 %v6467_v50  ;;  %3986 = vmatprep.subr.bf16.mxu0 %v6467_v50 }
 0x3b2   :  { %3059 = vmatpush1.bf16.msra.mxu1 %v6465_v48  ;;  %3987 = vmatpush1.bf16.msra.mxu0 %v6465_v48 }
 0x3b3   :  { %3060 = vmatprep.subr.bf16.mxu1 %v6470_v51  ;;  %3988 = vmatprep.subr.bf16.mxu0 %v6470_v51 }
 0x3b4   :  { %v7903_v32 = vld [vmem:[#allocation4 + $0x68] sm:$0xff] }
 0x3b6   :  { %3061 = vmatpush1.bf16.msra.mxu1 %v6468_v56  ;;  %3989 = vmatpush1.bf16.msra.mxu0 %v6468_v56 }
 0x3b7   :  { %3062 = vmatprep.subr.bf16.mxu1 %v6473_v17  ;;  %3990 = vmatprep.subr.bf16.mxu0 %v6473_v17 }
 0x3ba   :  { %3063 = vmatpush1.bf16.msra.mxu1 %v6471_v0  ;;  %3991 = vmatpush1.bf16.msra.mxu0 %v6471_v0 }
 0x3bb   :  { %3064 = vmatprep.subr.bf16.mxu1 %v6476_v52  ;;  %3992 = vmatprep.subr.bf16.mxu0 %v6476_v52 }
 0x3be   :  { %3065 = vmatpush1.bf16.msra.mxu1 %v6474_v18  ;;  %3993 = vmatpush1.bf16.msra.mxu0 %v6474_v18 }
 0x3bf   :  { %3066 = vmatprep.subr.bf16.mxu1 %v6479_v7  ;;  %3994 = vmatprep.subr.bf16.mxu0 %v6479_v7 }
 0x3c2   :  { %3067 = vmatpush1.bf16.msra.mxu1 %v6477_v6  ;;  %3995 = vmatpush1.bf16.msra.mxu0 %v6477_v6 }
 0x3c3   :  { %3068 = vmatprep.subr.bf16.mxu1 %v6482_v21  ;;  %3996 = vmatprep.subr.bf16.mxu0 %v6482_v21  ;;  %v7981_v21 = vld [vmem:[#allocation15 + $0x130] ss:$8 sps:$4 sm:$0xff]  }
 0x3c6   :  { %3069 = vmatpush1.bf16.msra.mxu1 %v6480_v3  ;;  %3997 = vmatpush1.bf16.msra.mxu0 %v6480_v3  ;;  %v7987_v3 = vld [vmem:[#allocation15 + $0x140] ss:$8 sps:$4 sm:$0xff]  }
 0x3c7   :  { %3070 = vmatprep.subr.bf16.mxu1 %v6485_v23  ;;  %3998 = vmatprep.subr.bf16.mxu0 %v6485_v23  ;;  %v7996_v23 = vld [vmem:[#allocation15 + $0x164] ss:$8 sps:$4 sm:$0xff]  }
 0x3ca   :  { %3071 = vmatpush1.bf16.msra.mxu1 %v6483_v19  ;;  %3999 = vmatpush1.bf16.msra.mxu0 %v6483_v19  ;;  %v8005_v19 = vld [vmem:[#allocation15 + $0x170] ss:$8 sps:$4 sm:$0xff]  }
 0x3ee   :  { %v3247_v42 = vpop.permute.xlu1 %3246 }
 0x3ef   :  { %v3249_v1 = vpop.permute.xlu0 %3248 }
 0x3f0   :  { %v3259_v2 = vsel %vm1072_vm7, %v3247_v42, %v3249_v1 }
 0x3f1   :  { %v7879_v16 = vmax.bf16 %v3259_v2, %v7840_v57  ;;  %v7949_v2 = vld [vmem:[#allocation15 + $0x114] ss:$8 sps:$4 sm:$0xff]  }
 0x3f3   :  { %3287 = vrot.lane.b32.xlu0 %v7879_v16, %s6810_s1 }
 0x3fb   :  { %v3251_v8 = vpop.permute.xlu1 %3250 }
 0x3fc   :  { %v3253_v11 = vpop.permute.xlu0 %3252  ;;  %v3260_v4 = vsel %vm1072_vm7, %v3249_v1, %v3251_v8  ;;  %v7947_v1 = vld [vmem:[#allocation15 + $0x100] ss:$8 sps:$4 sm:$0xff]  }
 0x3fd   :  { %v3261_v57 = vsel %vm1072_vm7, %v3251_v8, %v3253_v11  ;;  %v3273_v61 = vmax.bf16 %v3260_v4, %v7842_v31  ;;  %v6488_v31 = vld [vmem:[#allocation15 + $0x104] ss:$8 sps:$4 sm:$0xff]   ;;  %v7963_v8 = vld [vmem:[#allocation15 + $0x110] ss:$8 sps:$4 sm:$0xff]  }
 0x3fe   :  { %v7885_v20 = vmax.bf16 %v3261_v57, %v7852_v53  ;;  %3083 = vmatprep.subr.bf16.mxu1 %v6488_v31  ;;  %4011 = vmatprep.subr.bf16.mxu0 %v6488_v31  ;;  %v7984_v57 = vld [vmem:[#allocation15 + $0x144] ss:$8 sps:$4 sm:$0xff]   ;;  %v8038_v31 = vld [vmem:[#allocation15 + $0x1d4] ss:$8 sps:$4 sm:$0xff]  }
 0x3ff   :  { %v3245_v28 = vpop.permute.xlu1 %3244  ;;  %v8008_v4 = vld [vmem:[#allocation15 + $0x184] ss:$8 sps:$4 sm:$0xff]  }
 0x400   :  { %v3258_v22 = vsel %vm1072_vm7, %v3245_v28, %v3247_v42  ;;  %3291 = vrot.lane.b32.xlu0 %v7885_v20, %s6810_s1  ;;  %v2348_v34 = vpop.permute.xlu0 %2347  ;;  %v7990_v28 = vld [vmem:[#allocation15 + $0x154] ss:$8 sps:$4 sm:$0xff]  }
 0x401   :  { %v3271_v33 = vmax.bf16 %v3258_v22, %v7834_v38  ;;  %v7993_v22 = vld [vmem:[#allocation15 + $0x150] ss:$8 sps:$4 sm:$0xff]  }
 0x403   :  { %v2350_v53 = vpop.permute.xlu1 %2349  ;;  %3285 = vrot.lane.b32.xlu1 %v3271_v33, %s6810_s1 }
 0x404   :  { %v2360_v25 = vsel %vm1072_vm7, %v2348_v34, %v2350_v53  ;;  %3254 = vrot.lane.b32.xlu0 %v7874_v44, %s6808_s0  ;;  %v2352_v26 = vpop.permute.xlu0 %2351 }
 0x405   :  { %v2373_v38 = vmax.bf16 %v2360_v25, %v7810_v63  ;;  %v2361_v30 = vsel %vm1072_vm7, %v2350_v53, %v2352_v26  ;;  %v8011_v53 = vld [vmem:[#allocation15 + $0x180] ss:$8 sps:$4 sm:$0xff]   ;;  %v8014_v25 = vld [vmem:[#allocation15 + $0x194] ss:$8 sps:$4 sm:$0xff]  }
 0x406   :  { %v7909_v63 = vmax.bf16 %v2361_v30, %v7816_v54  ;;  %v8035_v30 = vld [vmem:[#allocation15 + $0x1c0] ss:$8 sps:$4 sm:$0xff]  }
 0x407   :  { %3289 = vrot.lane.b32.xlu1 %v3273_v61, %s6810_s1  ;;  %v2346_v9 = vpop.permute.xlu1 %2345 }
 0x408   :  { %v2359_v27 = vsel %vm1072_vm7, %v2346_v9, %v2348_v34  ;;  %2388 = vrot.lane.b32.xlu0 %v2373_v38, %s6810_s1  ;;  %v8002_v34 = vld [vmem:[#allocation15 + $0x174] ss:$8 sps:$4 sm:$0xff]  }
 0x409   :  { %v2372_v29 = vmax.bf16 %v2359_v27, %v7808_v60  ;;  %v8026_v9 = vld [vmem:[#allocation15 + $0x1b4] ss:$8 sps:$4 sm:$0xff]   ;;  %v8029_v27 = vld [vmem:[#allocation15 + $0x1b0] ss:$8 sps:$4 sm:$0xff]  }
 0x40b   :  { %3256 = vrot.lane.b32.xlu1 %v7903_v32, %s6808_s0 }
 0x40c   :  { %2386 = vrot.lane.b32.xlu0 %v2372_v29, %s6810_s1 }
 0x40f   :  { %2390 = vrot.lane.b32.xlu1 %v7909_v63, %s6810_s1 }
 0x410   :  { %2355 = vrot.lane.b32.xlu0 %v7826_v24, %s6808_s0 }
 0x413   :  { %2353 = vrot.lane.b32.xlu1 %v7824_v36, %s6808_s0 }
 0x465   :  { %v3288_v60 = vpop.permute.xlu0 %3287 }
 0x472   :  { %v7917_v35 = vpop.permute.xlu0 %3291 }
 0x475   :  { %v3286_v37 = vpop.permute.xlu1 %3285 }
 0x476   :  { %v3299_v39 = vsel %vm1268_vm8, %v3286_v37, %v3288_v60  ;;  %v3255_v54 = vpop.permute.xlu0 %3254  ;;  %v8044_v37 = vld [vmem:[#allocation15 + $0x1e4] ss:$8 sps:$4 sm:$0xff]  }
 0x477   :  { %v3312_v10 = vmax.bf16 %v3299_v39, %v3271_v33  ;;  %v3262_v45 = vsel %vm1072_vm7, %v3253_v11, %v3255_v54  ;;  %v7966_v11 = vld [vmem:[#allocation15 + $0x124] ss:$8 sps:$4 sm:$0xff]   ;;  %v7999_v33 = vld [vmem:[#allocation15 + $0x160] ss:$8 sps:$4 sm:$0xff]  }
 0x478   :  { %v7933_v50 = vmax.bf16 %v3262_v45, %v7854_v14  ;;  %v8047_v39 = vld [vmem:[#allocation15 + $0x1e0] ss:$8 sps:$4 sm:$0xff]  }
 0x479   :  { %3427 = vrot.lane.b32.xlu1 %v3312_v10, %s6816_s5  ;;  %v3290_v49 = vpop.permute.xlu1 %3289  ;;  %v8053_v10 = vld [vmem:[#allocation15 + $0x1f0] ss:$8 sps:$4 sm:$0xff]  }
 0x47a   :  { %v3300_v40 = vsel %vm1268_vm8, %v3288_v60, %v3290_v49  ;;  %v3301_v43 = vsel %vm1268_vm8, %v3290_v49, %v7917_v35  ;;  %v2389_v5 = vpop.permute.xlu0 %2388  ;;  %v8041_v60 = vld [vmem:[#allocation15 + $0x1d0] ss:$8 sps:$4 sm:$0xff]   ;;  %v8056_v49 = vld [vmem:[#allocation15 + $0x204] ss:$8 sps:$4 sm:$0xff]  }
 0x47b   :  { %v3313_v12 = vmax.bf16 %v3300_v40, %v7879_v16  ;;  %v3314_v41 = vmax.bf16 %v3301_v43, %v3273_v61  ;;  %v8017_v61 = vld [vmem:[#allocation15 + $0x190] ss:$8 sps:$4 sm:$0xff]  }
 0x47d   :  { %3431 = vrot.lane.b32.xlu0 %v3314_v41, %s6816_s5  ;;  %3429 = vrot.lane.b32.xlu1 %v3313_v12, %s6816_s5  ;;  %v7928_v46 = vpop.permute.xlu1 %3256 }
 0x47e   :  { %v3263_v47 = vsel %vm1072_vm7, %v3255_v54, %v7928_v46  ;;  %v2387_v48 = vpop.permute.xlu0 %2386  ;;  %v8050_v54 = vld [vmem:[#allocation15 + $0x1f4] ss:$8 sps:$4 sm:$0xff]  }
 0x47f   :  { %v7936_v51 = vmax.bf16 %v3263_v47, %v7874_v44  ;;  %v2400_v56 = vsel %vm1268_vm8, %v2387_v48, %v2389_v5 }
 0x480   :  { %v2413_v14 = vmax.bf16 %v2400_v56, %v2372_v29  ;;  %v8032_v29 = vld [vmem:[#allocation15 + $0x1c4] ss:$8 sps:$4 sm:$0xff]  }
 0x481   :  { %3293 = vrot.lane.b32.xlu0 %v7933_v50, %s6810_s1  ;;  %3295 = vrot.lane.b32.xlu1 %v7936_v51, %s6810_s1  ;;  %v7943_v17 = vpop.permute.xlu1 %2390 }
 0x482   :  { %v2401_v0 = vsel %vm1268_vm8, %v2389_v5, %v7943_v17  ;;  %v7951_v44 = vpop.permute.xlu0 %2355 }
 0x483   :  { %v2414_v42 = vmax.bf16 %v2401_v0, %v2373_v38  ;;  %v8020_v38 = vld [vmem:[#allocation15 + $0x1a4] ss:$8 sps:$4 sm:$0xff]  }
 0x485   :  { %3072 = vmatprep.mubr.bf16.mxu1 %v2414_v42  ;;  %v2354_v16 = vpop.permute.xlu1 %2353 }
 0x486   :  { %v2362_v52 = vsel %vm1072_vm7, %v2352_v26, %v2354_v16  ;;  %v2363_v18 = vsel %vm1072_vm7, %v2354_v16, %v7951_v44  ;;  %3073 = vmatmul.mubr.bf16.vlgmr.msra.gmra.mrb[28].mxu1 %v2413_v14  ;;  %v8023_v26 = vld [vmem:[#allocation15 + $0x1a0] ss:$8 sps:$4 sm:$0xff]   ;;  %v8097_v16 = vld [vmem:[#allocation15 + $0x214] ss:$8 sps:$4 sm:$0xff]  }
 0x487   :  { %v7957_v7 = vmax.bf16 %v2362_v52, %v7818_v13  ;;  %v7960_v6 = vmax.bf16 %v2363_v18, %v7824_v36  ;;  %3084 = vmatpush1.bf16.msra.mxu1 %v7947_v1  ;;  %v7973_v13 = vld [vmem:[#allocation15 + $0x120] ss:$8 sps:$4 sm:$0xff]   ;;  %v7976_v36 = vld [vmem:[#allocation15 + $0x134] ss:$8 sps:$4 sm:$0xff]  }
 0x488   :  { %3085 = vmatprep.subr.bf16.mxu1 %v7949_v2 }
 0x489   :  { %2394 = vrot.lane.b32.xlu1 %v7960_v6, %s6810_s1  ;;  %2392 = vrot.lane.b32.xlu0 %v7957_v7, %s6810_s1 }
 0x48b   :  { %3086 = vmatpush1.bf16.msra.mxu1 %v7963_v8 }
 0x48c   :  { %3087 = vmatprep.subr.bf16.mxu1 %v7966_v11 }
 0x48d   :  { %2357 = vrot.lane.b32.xlu0 %v7832_v15, %s6808_s0 }
 0x48f   :  { %3088 = vmatpush1.bf16.msra.mxu1 %v7973_v13 }
 0x490   :  { %3089 = vmatprep.subr.bf16.mxu1 %v7976_v36 }
 0x493   :  { %3090 = vmatpush1.bf16.msra.mxu1 %v7981_v21 }
 0x494   :  { %3091 = vmatprep.subr.bf16.mxu1 %v7984_v57 }
 0x497   :  { %3092 = vmatpush1.bf16.msra.mxu1 %v7987_v3 }
 0x498   :  { %3093 = vmatprep.subr.bf16.mxu1 %v7990_v28 }
 0x49b   :  { %3094 = vmatpush1.bf16.msra.mxu1 %v7993_v22 }
 0x49c   :  { %3095 = vmatprep.subr.bf16.mxu1 %v7996_v23 }
 0x49f   :  { %3096 = vmatpush1.bf16.msra.mxu1 %v7999_v33 }
 0x4a0   :  { %3097 = vmatprep.subr.bf16.mxu1 %v8002_v34 }
 0x4a3   :  { %3098 = vmatpush1.bf16.msra.mxu1 %v8005_v19 }
 0x4a4   :  { %3099 = vmatprep.subr.bf16.mxu1 %v8008_v4 }
 0x4a7   :  { %3100 = vmatpush1.bf16.msra.mxu1 %v8011_v53 }
 0x4a8   :  { %3101 = vmatprep.subr.bf16.mxu1 %v8014_v25 }
 0x4ab   :  { %3102 = vmatpush1.bf16.msra.mxu1 %v8017_v61 }
 0x4ac   :  { %3103 = vmatprep.subr.bf16.mxu1 %v8020_v38 }
 0x4af   :  { %3104 = vmatpush1.bf16.msra.mxu1 %v8023_v26 }
 0x4b0   :  { %3105 = vmatprep.subr.bf16.mxu1 %v8026_v9 }
 0x4b3   :  { %3106 = vmatpush1.bf16.msra.mxu1 %v8029_v27 }
 0x4b4   :  { %3107 = vmatprep.subr.bf16.mxu1 %v8032_v29 }
 0x4b7   :  { %3108 = vmatpush1.bf16.msra.mxu1 %v8035_v30 }
 0x4b8   :  { %3109 = vmatprep.subr.bf16.mxu1 %v8038_v31 }
 0x4bb   :  { %3110 = vmatpush1.bf16.msra.mxu1 %v8041_v60 }
 0x4bc   :  { %3111 = vmatprep.subr.bf16.mxu1 %v8044_v37 }
 0x4bf   :  { %3112 = vmatpush1.bf16.msra.mxu1 %v8047_v39 }
 0x4c0   :  { %3113 = vmatprep.subr.bf16.mxu1 %v8050_v54 }
 0x4c3   :  { %3114 = vmatpush1.bf16.msra.mxu1 %v8053_v10 }
 0x4c4   :  { %3126 = vmatprep.subr.bf16.mxu1 %v8056_v49 }
 0x4eb   :  { %v3428_v40 = vpop.permute.xlu1 %3427 }
 0x4ef   :  { %v8060_v43 = vpop.permute.xlu0 %3431  ;;  %v3430_v5 = vpop.permute.xlu1 %3429 }
 0x4f0   :  { %v3443_v12 = vsel %vm3441_vm15, %v3430_v5, %v8060_v43  ;;  %v3442_v41 = vsel %vm3441_vm15, %v3428_v40, %v3430_v5 }
 0x4f1   :  { %4000 = vmatprep.mubr.bf16.mxu0 %v3443_v12 }
 0x4f2   :  { %4001 = vmatmul.mubr.bf16.vlgmr.msra.gmra.mrb[32].mxu0 %v3442_v41 }
 0x4f3   :  { %v3294_v45 = vpop.permute.xlu0 %3293  ;;  %v8065_v47 = vpop.permute.xlu1 %3295  ;;  %4012 = vmatpush1.bf16.msra.mxu0 %v7947_v1  ;;  %v8080_v1 = vmax.bf16 %v7928_v46, %v7903_v32  ;;  %v8095_v46 = vld [vmem:[#allocation15 + $0x200] ss:$8 sps:$4 sm:$0xff]  }
 0x4f4   :  { %v3302_v48 = vsel %vm1268_vm8, %v7917_v35, %v3294_v45  ;;  %v3303_v56 = vsel %vm1268_vm8, %v3294_v45, %v8065_v47  ;;  %4013 = vmatprep.subr.bf16.mxu0 %v7949_v2 }
 0x4f5   :  { %v3315_v0 = vmax.bf16 %v3302_v48, %v7885_v20  ;;  %v3316_v42 = vmax.bf16 %v3303_v56, %v7933_v50  ;;  %v2520_v48 = vld [vmem:[#allocation15 + $0x320] sm:$0xff] }
 0x4f7   :  { %3433 = vrot.lane.b32.xlu1 %v3315_v0, %s6816_s5  ;;  %3435 = vrot.lane.b32.xlu0 %v3316_v42, %s6816_s5 }
 0x4f8   :  { %4014 = vmatpush1.bf16.msra.mxu0 %v7963_v8  ;;  %v8130_v8 = vld [vmem:[#allocation15 + $0x230] ss:$8 sps:$4 sm:$0xff]  }
 0x4f9   :  { %4015 = vmatprep.subr.bf16.mxu0 %v7966_v11  ;;  %v8133_v11 = vld [vmem:[#allocation15 + $0x244] ss:$8 sps:$4 sm:$0xff]  }
 0x4fb   :  { %3297 = vrot.lane.b32.xlu1 %v8080_v1, %s6810_s1  ;;  %v2393_v35 = vpop.permute.xlu0 %2392  ;;  %v8085_v14 = vpop.permute.xlu1 %2394 }
 0x4fc   :  { %v2402_v20 = vsel %vm1268_vm8, %v7943_v17, %v2393_v35  ;;  %v2403_v50 = vsel %vm1268_vm8, %v2393_v35, %v8085_v14  ;;  %4016 = vmatpush1.bf16.msra.mxu0 %v7973_v13  ;;  %v8138_v13 = vld [vmem:[#allocation15 + $0x240] ss:$8 sps:$4 sm:$0xff]  }
 0x4fd   :  { %v2415_v2 = vmax.bf16 %v2402_v20, %v7909_v63  ;;  %v2416_v32 = vmax.bf16 %v2403_v50, %v7957_v7  ;;  %4017 = vmatprep.subr.bf16.mxu0 %v7976_v36  ;;  %v8110_v7 = vld [vmem:[#allocation15 + $0x210] ss:$8 sps:$4 sm:$0xff]   ;;  %v8141_v36 = vld [vmem:[#allocation15 + $0x254] ss:$8 sps:$4 sm:$0xff]   ;;  %v6582_v35 = vld [vmem:[#allocation15 + $0x300] ss:$8 sps:$4 sm:$0xff]   ;;  %v6119_v50 = vcombine.high %v2520_v48, %v2520_v48 }
 0x4fe   :  { %v6587_v20 = vld [vmem:[#allocation15 + $0x314] ss:$8 sps:$4 sm:$0xff]  }
 0x4ff   :  { %v2358_v52 = vpop.permute.xlu0 %2357  ;;  %3115 = vmatprep.mubr.bf16.mxu1 %v2416_v32  ;;  %v6118_v32 = vcombine.low %v2520_v48, %v2520_v48 }
 0x500   :  { %v2364_v17 = vsel %vm1072_vm7, %v7951_v44, %v2358_v52  ;;  %v8102_v18 = vmax.bf16 %v2358_v52, %v7832_v15  ;;  %3116 = vmatmul.mubr.bf16.vlgmr.msra.gmra.mrb[28].mxu1 %v2415_v2  ;;  %4018 = vmatpush1.bf16.msra.mxu0 %v7981_v21  ;;  %v8115_v44 = vld [vmem:[#allocation15 + $0x224] ss:$8 sps:$4 sm:$0xff]   ;;  %v8125_v15 = vld [vmem:[#allocation15 + $0x234] ss:$8 sps:$4 sm:$0xff]   ;;  %v8146_v21 = vld [vmem:[#allocation15 + $0x250] ss:$8 sps:$4 sm:$0xff]  }
 0x501   :  { %v8106_v63 = vmax.bf16 %v2364_v17, %v7826_v24  ;;  %3127 = vmatpush1.bf16.msra.mxu1 %v8095_v46  ;;  %4019 = vmatprep.subr.bf16.mxu0 %v7984_v57  ;;  %v8122_v24 = vld [vmem:[#allocation15 + $0x220] ss:$8 sps:$4 sm:$0xff]   ;;  %v8149_v57 = vld [vmem:[#allocation15 + $0x264] ss:$8 sps:$4 sm:$0xff]  }
 0x502   :  { %2398 = vrot.lane.b32.xlu1 %v8102_v18, %s6810_s1  ;;  %3128 = vmatprep.subr.bf16.mxu1 %v8097_v16 }
 0x503   :  { %2396 = vrot.lane.b32.xlu0 %v8106_v63, %s6810_s1 }
 0x504   :  { %4020 = vmatpush1.bf16.msra.mxu0 %v7987_v3  ;;  %v8154_v3 = vld [vmem:[#allocation15 + $0x260] ss:$8 sps:$4 sm:$0xff]  }
 0x505   :  { %3129 = vmatpush1.bf16.msra.mxu1 %v8110_v7  ;;  %4021 = vmatprep.subr.bf16.mxu0 %v7990_v28  ;;  %v8157_v28 = vld [vmem:[#allocation15 + $0x274] ss:$8 sps:$4 sm:$0xff]  }
 0x506   :  { %3130 = vmatprep.subr.bf16.mxu1 %v8115_v44 }
 0x508   :  { %4022 = vmatpush1.bf16.msra.mxu0 %v7993_v22  ;;  %v8162_v22 = vld [vmem:[#allocation15 + $0x270] ss:$8 sps:$4 sm:$0xff]  }
 0x509   :  { %3131 = vmatpush1.bf16.msra.mxu1 %v8122_v24  ;;  %4023 = vmatprep.subr.bf16.mxu0 %v7996_v23  ;;  %v8165_v23 = vld [vmem:[#allocation15 + $0x284] ss:$8 sps:$4 sm:$0xff]  }
 0x50a   :  { %3132 = vmatprep.subr.bf16.mxu1 %v8125_v15 }
 0x50c   :  { %4024 = vmatpush1.bf16.msra.mxu0 %v7999_v33  ;;  %v8170_v33 = vld [vmem:[#allocation15 + $0x280] ss:$8 sps:$4 sm:$0xff]  }
 0x50d   :  { %3133 = vmatpush1.bf16.msra.mxu1 %v8130_v8  ;;  %4025 = vmatprep.subr.bf16.mxu0 %v8002_v34  ;;  %v8173_v34 = vld [vmem:[#allocation15 + $0x294] ss:$8 sps:$4 sm:$0xff]  }
 0x50e   :  { %3134 = vmatprep.subr.bf16.mxu1 %v8133_v11 }
 0x510   :  { %4026 = vmatpush1.bf16.msra.mxu0 %v8005_v19  ;;  %v8178_v19 = vld [vmem:[#allocation15 + $0x290] ss:$8 sps:$4 sm:$0xff]  }
 0x511   :  { %3135 = vmatpush1.bf16.msra.mxu1 %v8138_v13  ;;  %4027 = vmatprep.subr.bf16.mxu0 %v8008_v4  ;;  %v8181_v4 = vld [vmem:[#allocation15 + $0x2a4] ss:$8 sps:$4 sm:$0xff]  }
 0x512   :  { %3136 = vmatprep.subr.bf16.mxu1 %v8141_v36 }
 0x514   :  { %4028 = vmatpush1.bf16.msra.mxu0 %v8011_v53  ;;  %v8186_v53 = vld [vmem:[#allocation15 + $0x2a0] ss:$8 sps:$4 sm:$0xff]  }
 0x515   :  { %3137 = vmatpush1.bf16.msra.mxu1 %v8146_v21  ;;  %4029 = vmatprep.subr.bf16.mxu0 %v8014_v25  ;;  %v8189_v25 = vld [vmem:[#allocation15 + $0x2b4] ss:$8 sps:$4 sm:$0xff]  }
 0x516   :  { %3138 = vmatprep.subr.bf16.mxu1 %v8149_v57 }
 0x518   :  { %4030 = vmatpush1.bf16.msra.mxu0 %v8017_v61  ;;  %v8194_v61 = vld [vmem:[#allocation15 + $0x2b0] ss:$8 sps:$4 sm:$0xff]  }
 0x519   :  { %3139 = vmatpush1.bf16.msra.mxu1 %v8154_v3  ;;  %4031 = vmatprep.subr.bf16.mxu0 %v8020_v38  ;;  %v8197_v38 = vld [vmem:[#allocation15 + $0x2c4] ss:$8 sps:$4 sm:$0xff]  }
 0x51a   :  { %3140 = vmatprep.subr.bf16.mxu1 %v8157_v28 }
 0x51c   :  { %4032 = vmatpush1.bf16.msra.mxu0 %v8023_v26  ;;  %v8202_v26 = vld [vmem:[#allocation15 + $0x2c0] ss:$8 sps:$4 sm:$0xff]  }
 0x51d   :  { %3141 = vmatpush1.bf16.msra.mxu1 %v8162_v22  ;;  %4033 = vmatprep.subr.bf16.mxu0 %v8026_v9  ;;  %v8205_v9 = vld [vmem:[#allocation15 + $0x2d4] ss:$8 sps:$4 sm:$0xff]  }
 0x51e   :  { %3142 = vmatprep.subr.bf16.mxu1 %v8165_v23 }
 0x520   :  { %4034 = vmatpush1.bf16.msra.mxu0 %v8029_v27  ;;  %v8209_v27 = vld [vmem:[#allocation15 + $0x2d0] ss:$8 sps:$4 sm:$0xff]  }
 0x521   :  { %3143 = vmatpush1.bf16.msra.mxu1 %v8170_v33  ;;  %4035 = vmatprep.subr.bf16.mxu0 %v8032_v29  ;;  %v8213_v29 = vld [vmem:[#allocation15 + $0x2e4] ss:$8 sps:$4 sm:$0xff]  }
 0x522   :  { %3144 = vmatprep.subr.bf16.mxu1 %v8173_v34 }
 0x524   :  { %4036 = vmatpush1.bf16.msra.mxu0 %v8035_v30  ;;  %v8216_v30 = vld [vmem:[#allocation15 + $0x2e0] ss:$8 sps:$4 sm:$0xff]  }
 0x525   :  { %3145 = vmatpush1.bf16.msra.mxu1 %v8178_v19  ;;  %4037 = vmatprep.subr.bf16.mxu0 %v8038_v31  ;;  %v8219_v31 = vld [vmem:[#allocation15 + $0x2f4] ss:$8 sps:$4 sm:$0xff]  }
 0x526   :  { %3146 = vmatprep.subr.bf16.mxu1 %v8181_v4 }
 0x528   :  { %4038 = vmatpush1.bf16.msra.mxu0 %v8041_v60  ;;  %v8222_v60 = vld [vmem:[#allocation15 + $0x2f0] ss:$8 sps:$4 sm:$0xff]  }
 0x529   :  { %3147 = vmatpush1.bf16.msra.mxu1 %v8186_v53  ;;  %4039 = vmatprep.subr.bf16.mxu0 %v8044_v37  ;;  %v8225_v37 = vld [vmem:[#allocation15 + $0x304] ss:$8 sps:$4 sm:$0xff]  }
 0x52a   :  { %3148 = vmatprep.subr.bf16.mxu1 %v8189_v25 }
 0x52c   :  { %4040 = vmatpush1.bf16.msra.mxu0 %v8047_v39 }
 0x52d   :  { %3149 = vmatpush1.bf16.msra.mxu1 %v8194_v61  ;;  %4041 = vmatprep.subr.bf16.mxu0 %v8050_v54 }
 0x52e   :  { %3150 = vmatprep.subr.bf16.mxu1 %v8197_v38 }
 0x530   :  { %4042 = vmatpush1.bf16.msra.mxu0 %v8053_v10 }
 0x531   :  { %3151 = vmatpush1.bf16.msra.mxu1 %v8202_v26  ;;  %4054 = vmatprep.subr.bf16.mxu0 %v8056_v49 }
 0x532   :  { %3152 = vmatprep.subr.bf16.mxu1 %v8205_v9 }
 0x535   :  { %3153 = vmatpush1.bf16.msra.mxu1 %v8209_v27 }
 0x536   :  { %3154 = vmatprep.subr.bf16.mxu1 %v8213_v29 }
 0x539   :  { %3155 = vmatpush1.bf16.msra.mxu1 %v8216_v30 }
 0x53a   :  { %3156 = vmatprep.subr.bf16.mxu1 %v8219_v31 }
 0x53d   :  { %3157 = vmatpush1.bf16.msra.mxu1 %v8222_v60 }
 0x53e   :  { %3169 = vmatprep.subr.bf16.mxu1 %v8225_v37 }
 0x569   :  { %v8229_v39 = vpop.permute.xlu0 %3435  ;;  %v3434_v54 = vpop.permute.xlu1 %3433 }
 0x56a   :  { %v3445_v10 = vsel %vm3441_vm15, %v3434_v54, %v8229_v39  ;;  %v3444_v49 = vsel %vm3441_vm15, %v8060_v43, %v3434_v54 }
 0x56b   :  { %4043 = vmatprep.mubr.bf16.mxu0 %v3445_v10 }
 0x56c   :  { %4044 = vmatmul.mubr.bf16.vlgmr.msra.gmra.mrb[32].mxu0 %v3444_v49 }
 0x56d   :  { %v3298_v40 = vpop.permute.xlu1 %3297  ;;  %4055 = vmatpush1.bf16.msra.mxu0 %v8095_v46  ;;  %v8255_v46 = vld [vmem:[#allocation5] sm:$0xff] }
 0x56e   :  { %v3304_v5 = vsel %vm1268_vm8, %v8065_v47, %v3298_v40  ;;  %v3318_v12 = vmax.bf16 %v3298_v40, %v8080_v1  ;;  %4056 = vmatprep.subr.bf16.mxu0 %v8097_v16  ;;  %2330 = vst.msk [vmem:[#allocation5 + $0x20] sm:$0xff] %vm2329_vm3, %v8255_v46 }
 0x56f   :  { %v3317_v41 = vmax.bf16 %v3304_v5, %v7936_v51  ;;  %v6817_v51 = vmov 65535  }
 0x570   :  { %3439 = vrot.lane.b32.xlu1 %v3318_v12, %s6816_s5  ;;  %v3032_v0 = vsel %vm3030_vm0, 4294967295, %v6817_v51 }
 0x571   :  { %3437 = vrot.lane.b32.xlu0 %v3317_v41, %s6816_s5  ;;  %4057 = vmatpush1.bf16.msra.mxu0 %v8110_v7  ;;  %v3033_v2 = vsel %vm3031_vm1, %v3032_v0, 0 }
 0x572   :  { %4058 = vmatprep.subr.bf16.mxu0 %v8115_v44  ;;  %v3035_v16 = vand.u32 %v6118_v32, %v3033_v2 }
 0x574   :  { %v2399_v43 = vpop.permute.xlu1 %2398 }
 0x575   :  { %v2397_v45 = vpop.permute.xlu0 %2396  ;;  %4059 = vmatpush1.bf16.msra.mxu0 %v8122_v24  ;;  %v2419_v52 = vmax.bf16 %v2399_v43, %v8102_v18 }
 0x576   :  { %v2404_v47 = vsel %vm1268_vm8, %v8085_v14, %v2397_v45  ;;  %v2405_v56 = vsel %vm1268_vm8, %v2397_v45, %v2399_v43  ;;  %4060 = vmatprep.subr.bf16.mxu0 %v8125_v15  ;;  %v6585_v14 = vld [vmem:[#allocation15 + $0x310] ss:$8 sps:$4 sm:$0xff]   ;;  %vm4247_vm8 = vcmask 916480  }
 0x577   :  { %v2417_v42 = vmax.bf16 %v2404_v47, %v7960_v6  ;;  %v2418_v1 = vmax.bf16 %v2405_v56, %v8106_v63  ;;  %v3038_v6 = vand.u32 %v6119_v50, %v3033_v2 }
 0x579   :  { %3158 = vmatprep.mubr.bf16.mxu1 %v2418_v1  ;;  %4061 = vmatpush1.bf16.msra.mxu0 %v8130_v8 }
 0x57a   :  { %3159 = vmatmul.mubr.bf16.vlgmr.msra.gmra.mrb[28].mxu1 %v2417_v42  ;;  %4062 = vmatprep.subr.bf16.mxu0 %v8133_v11 }
 0x57b   :  { %3170 = vmatpush1.bf16.msra.mxu1 %v6582_v35  ;;  %3201 = vmatprep.mubr.bf16.mxu1 %v8255_v46 }
 0x57c   :  { %3171 = vmatprep.subr.bf16.mxu1 %v6587_v20 }
 0x57d   :  { %4063 = vmatpush1.bf16.msra.mxu0 %v8138_v13 }
 0x57e   :  { %4064 = vmatprep.subr.bf16.mxu0 %v8141_v36 }
 0x57f   :  { %3172 = vmatpush1.bf16.msra.mxu1 %v6585_v14 }
 0x580   :  { %3173 = vmatprep.subr.bf16.mxu1 %v3038_v6 }
 0x581   :  { %4065 = vmatpush1.bf16.msra.mxu0 %v8146_v21 }
 0x582   :  { %4066 = vmatprep.subr.bf16.mxu0 %v8149_v57 }
 0x583   :  { %3174 = vmatpush1.bf16.msra.mxu1 %v3035_v16 }
 0x585   :  { %4067 = vmatpush1.bf16.msra.mxu0 %v8154_v3 }
 0x586   :  { %6120 = vmatmul.mubr.msk.bf16.vlgmr.msra.gmra.mrb[28].mxu1 %vm3026_vm2, %v2419_v52  ;;  %4068 = vmatprep.subr.bf16.mxu0 %v8157_v28 }
 0x589   :  { %4069 = vmatpush1.bf16.msra.mxu0 %v8162_v22 }
 0x58a   :  { %4070 = vmatprep.subr.bf16.mxu0 %v8165_v23 }
 0x58d   :  { %4071 = vmatpush1.bf16.msra.mxu0 %v8170_v33 }
 0x58e   :  { %4072 = vmatprep.subr.bf16.mxu0 %v8173_v34 }
 0x591   :  { %4073 = vmatpush1.bf16.msra.mxu0 %v8178_v19 }
 0x592   :  { %4074 = vmatprep.subr.bf16.mxu0 %v8181_v4 }
 0x595   :  { %4075 = vmatpush1.bf16.msra.mxu0 %v8186_v53 }
 0x596   :  { %4076 = vmatprep.subr.bf16.mxu0 %v8189_v25 }
 0x599   :  { %4077 = vmatpush1.bf16.msra.mxu0 %v8194_v61 }
 0x59a   :  { %4078 = vmatprep.subr.bf16.mxu0 %v8197_v38 }
 0x59d   :  { %4079 = vmatpush1.bf16.msra.mxu0 %v8202_v26  ;;  %v6590_v26 = vld [vmem:[#allocation17 + $0x4] ss:$8 sps:$4 sm:$0xff]  }
 0x59e   :  { %4080 = vmatprep.subr.bf16.mxu0 %v8205_v9  ;;  %6228 = vmatprep.mubr.msk.bf16.mxu1 %vm1964_vm6, %v6590_v26  ;;  %v4464_v9 = vld [vmem:[%s8879_s8] sm:$0xff] }
 0x5a1   :  { %4081 = vmatpush1.bf16.msra.mxu0 %v8209_v27  ;;  %v4466_v27 = vld [vmem:[%s8879_s8 + $0x10] sm:$0xff] }
 0x5a2   :  { %4082 = vmatprep.subr.bf16.mxu0 %v8213_v29  ;;  %v4465_v29 = vld [vmem:[%s8879_s8 + $0x8] sm:$0xff] }
 0x5a5   :  { %4083 = vmatpush1.bf16.msra.mxu0 %v8216_v30  ;;  %v4467_v30 = vld [vmem:[%s8879_s8 + $0x18] sm:$0xff] }
 0x5a6   :  { %4084 = vmatprep.subr.bf16.mxu0 %v8219_v31 }
 0x5a9   :  { %4085 = vmatpush1.bf16.msra.mxu0 %v8222_v60 }
 0x5aa   :  { %4097 = vmatprep.subr.bf16.mxu0 %v8225_v37 }
 0x5e2   :  { %v3440_v17 = vpop.permute.xlu1 %3439 }
 0x5e3   :  { %v3438_v18 = vpop.permute.xlu0 %3437 }
 0x5e4   :  { %v3447_v63 = vsel %vm3441_vm15, %v3438_v18, %v3440_v17  ;;  %v3446_v7 = vsel %vm3441_vm15, %v8229_v39, %v3438_v18  ;;  %vm5657_vm15 = vcmask 629760  }
 0x5e5   :  { %4086 = vmatprep.mubr.bf16.mxu0 %v3447_v63 }
 0x5e6   :  { %4087 = vmatmul.mubr.bf16.vlgmr.msra.gmra.mrb[32].mxu0 %v3446_v7 }
 0x5e7   :  { %4098 = vmatpush1.bf16.msra.mxu0 %v6582_v35  ;;  %4129 = vmatprep.mubr.bf16.mxu0 %v8255_v46 }
 0x5e8   :  { %4099 = vmatprep.subr.bf16.mxu0 %v6587_v20 }
 0x5eb   :  { %4100 = vmatpush1.bf16.msra.mxu0 %v6585_v14 }
 0x5ec   :  { %4101 = vmatprep.subr.bf16.mxu0 %v3038_v6 }
 0x5ef   :  { %4102 = vmatpush1.bf16.msra.mxu0 %v3035_v16 }
 0x5f2   :  { %6223 = vmatmul.mubr.msk.bf16.vlgmr.msra.gmra.mrb[32].mxu0 %vm3026_vm2, %v3440_v17 }
 0x5f3   :  { %6230 = vmatprep.mubr.msk.bf16.mxu0 %vm1964_vm6, %v6590_v26 }
 0x659   :  { %v3203_v44 = vpop.f32.mrb[28].mxu1 }
 0x65a   :  { %v3205_v24 = vpop.f32.mrb[29].mxu1 }
 0x65b   :  { %v3207_v15 = vpop.f32.mrb[30].mxu1 }
 0x65c   :  { %v3212_v8 = vpack.c.bf16 %v3207_v15, %v3203_v44  ;;  %v3209_v11 = vpop.f32.mrb[31].mxu1 }
 0x65d   :  { %v3213_v13 = vpack.c.bf16 %v3209_v11, %v3205_v24 }
 0x65e   :  { %3216 = vrot.lane.b32.xlu0 %v3212_v8, %s6818_s25 }
 0x65f   :  { %3218 = vrot.lane.b32.xlu1 %v3213_v13, %s6818_s25 }
 0x6c5   :  { %v4131_v36 = vpop.f32.mrb[32].mxu0 }
 0x6c6   :  { %v4133_v21 = vpop.f32.mrb[33].mxu0 }
 0x6c7   :  { %v4135_v57 = vpop.f32.mrb[34].mxu0 }
 0x6c8   :  { %v4140_v3 = vpack.c.bf16 %v4135_v57, %v4131_v36  ;;  %v4137_v28 = vpop.f32.mrb[35].mxu0 }
 0x6c9   :  { %v4141_v22 = vpack.c.bf16 %v4137_v28, %v4133_v21 }
 0x6ca   :  { %4144 = vrot.lane.b32.xlu0 %v4140_v3, %s6818_s25 }
 0x6cb   :  { %4146 = vrot.lane.b32.xlu1 %v4141_v22, %s6818_s25 }
 0x6d0   :  { %v3217_v23 = vpop.permute.xlu0 %3216 }
 0x6d1   :  { %3226 = vst.msk [vmem:[#allocation5] sm:$0xff] %vm3225_vm4, %v3217_v23  ;;  %v3219_v33 = vpop.permute.xlu1 %3218 }
 0x6d2   :  { %v3221_v34 = vsel %vm3220_vm5, %v3217_v23, %v3219_v33  ;;  %3229 = vst.msk [vmem:[#allocation5 + $0x10] sm:$0xff] %vm3220_vm5, %v3219_v33 }
 0x6d3   :  { %4207 = vrot.lane.b32.xlu1 %v3221_v34, %s6809_s2  ;;  %4175 = vrot.lane.b32.xlu0 %v3221_v34, %s6808_s0 }
 0x6d4   :  { %4512 = vmatprep.subr.bf16.mxu1 %v3221_v34 }
 0x6d8   :  { %v4155_v19 = vld [vmem:[#allocation5] sm:$0xff] }
 0x6d9   :  { %4513 = vmatpush1.bf16.msra.mxu1 %v4155_v19  ;;  %4205 = vrot.lane.b32.xlu1 %v4155_v19, %s6809_s2 }
 0x6da   :  { %4173 = vrot.lane.b32.xlu0 %v4155_v19, %s6808_s0 }
 0x6dd   :  { %4272 = vrot.lane.b32.xlu1 %v3221_v34, %s6819_s9 }
 0x6de   :  { %4239 = vrot.lane.b32.xlu0 %v3221_v34, %s6820_s24 }
 0x6e1   :  { %4270 = vrot.lane.b32.xlu1 %v4155_v19, %s6819_s9 }
 0x6e2   :  { %4237 = vrot.lane.b32.xlu0 %v4155_v19, %s6820_s24 }
 0x6e5   :  { %4338 = vrot.lane.b32.xlu1 %v3221_v34, %s6812_s19 }
 0x6e6   :  { %4305 = vrot.lane.b32.xlu0 %v3221_v34, %s6821_s27 }
 0x6e9   :  { %4336 = vrot.lane.b32.xlu1 %v4155_v19, %s6812_s19 }
 0x6ea   :  { %4303 = vrot.lane.b32.xlu0 %v4155_v19, %s6821_s27 }
 0x6ee   :  { %4370 = vrot.lane.b32.xlu0 %v3221_v34, %s6822_s28 }
 0x73c   :  { %v4145_v4 = vpop.permute.xlu0 %4144 }
 0x73d   :  { %4152 = vst.msk [vmem:[#allocation5 + $0x10] sm:$0xff] %vm3225_vm4, %v4145_v4  ;;  %v4147_v53 = vpop.permute.xlu1 %4146 }
 0x73e   :  { %v4148_v25 = vsel %vm3220_vm5, %v4145_v4, %v4147_v53  ;;  %4154 = vst.msk [vmem:[#allocation5 + $0x20] sm:$0xff] %vm3220_vm5, %v4147_v53 }
 0x73f   :  { %4565 = vmatprep.subr.bf16.mxu0 %v4148_v25 }
 0x744   :  { %v4165_v61 = vld [vmem:[#allocation5 + $0x10] sm:$0xff] }
 0x745   :  { %4177 = vrot.lane.b32.xlu1 %v4165_v61, %s6808_s0  ;;  %4209 = vrot.lane.b32.xlu0 %v4165_v61, %s6809_s2  ;;  %v4199_v38 = vld [vmem:[#allocation5 + $0x20] sm:$0xff]  ;;  %v4176_v31 = vpop.permute.xlu0 %4175  ;;  %v4208_v37 = vpop.permute.xlu1 %4207 }
 0x746   :  { %4566 = vmatpush1.bf16.msra.mxu0 %v4165_v61 }
 0x749   :  { %4241 = vrot.lane.b32.xlu1 %v4165_v61, %s6820_s24  ;;  %4274 = vrot.lane.b32.xlu0 %v4165_v61, %s6819_s9 }
 0x74b   :  { %v4206_v39 = vpop.permute.xlu1 %4205 }
 0x74c   :  { %v4174_v60 = vpop.permute.xlu0 %4173  ;;  %v4215_v20 = vsel %vm1170_vm9, %v4206_v39, %v4208_v37 }
 0x74d   :  { %4307 = vrot.lane.b32.xlu1 %v4165_v61, %s6821_s27  ;;  %4340 = vrot.lane.b32.xlu0 %v4165_v61, %s6812_s19  ;;  %v4183_v0 = vsel %vm1072_vm7, %v4174_v60, %v4176_v31 }
 0x74f   :  { %v4273_v10 = vpop.permute.xlu1 %4272 }
 0x750   :  { %v4240_v54 = vpop.permute.xlu0 %4239 }
 0x751   :  { %4213 = vrot.lane.b32.xlu1 %v4199_v38, %s6809_s2  ;;  %4181 = vrot.lane.b32.xlu0 %v4199_v38, %s6808_s0 }
 0x753   :  { %v4271_v40 = vpop.permute.xlu1 %4270 }
 0x754   :  { %v4238_v49 = vpop.permute.xlu0 %4237  ;;  %v4281_v17 = vsel %vm4280_vm11, %v4271_v40, %v4273_v10  ;;  %v6592_v40 = vld [vmem:[#allocation17] ss:$8 sps:$4 sm:$0xff]  }
 0x755   :  { %4278 = vrot.lane.b32.xlu1 %v4199_v38, %s6819_s9  ;;  %4245 = vrot.lane.b32.xlu0 %v4199_v38, %s6820_s24  ;;  %v4248_v32 = vsel %vm4247_vm8, %v4238_v49, %v4240_v54 }
 0x757   :  { %v4339_v12 = vpop.permute.xlu1 %4338 }
 0x758   :  { %v4306_v5 = vpop.permute.xlu0 %4305 }
 0x759   :  { %4344 = vrot.lane.b32.xlu1 %v4199_v38, %s6812_s19  ;;  %4311 = vrot.lane.b32.xlu0 %v4199_v38, %s6821_s27 }
 0x75b   :  { %v4337_v43 = vpop.permute.xlu1 %4336 }
 0x75c   :  { %v4304_v41 = vpop.permute.xlu0 %4303  ;;  %v4346_v11 = vsel %vm1464_vm10, %v4337_v43, %v4339_v12 }
 0x75d   :  { %4211 = vrot.lane.b32.xlu0 %v4148_v25, %s6809_s2  ;;  %4179 = vrot.lane.b32.xlu1 %v4148_v25, %s6808_s0  ;;  %v4314_v44 = vsel %vm4313_vm12, %v4304_v41, %v4306_v5 }
 0x760   :  { %v4371_v45 = vpop.permute.xlu0 %4370 }
 0x761   :  { %4368 = vrot.lane.b32.xlu0 %v4155_v19, %s6822_s28  ;;  %4372 = vrot.lane.b32.xlu1 %v4165_v61, %s6822_s28 }
 0x765   :  { %4276 = vrot.lane.b32.xlu0 %v4148_v25, %s6819_s9  ;;  %4243 = vrot.lane.b32.xlu1 %v4148_v25, %s6820_s24 }
 0x769   :  { %4376 = vrot.lane.b32.xlu0 %v4199_v38, %s6822_s28  ;;  %4403 = vrot.lane.b32.xlu1 %v3221_v34, %s6823_s29 }
 0x76d   :  { %4342 = vrot.lane.b32.xlu0 %v4148_v25, %s6812_s19  ;;  %4309 = vrot.lane.b32.xlu1 %v4148_v25, %s6821_s27 }
 0x771   :  { %4405 = vrot.lane.b32.xlu0 %v4165_v61, %s6823_s29  ;;  %4401 = vrot.lane.b32.xlu1 %v4155_v19, %s6823_s29 }
 0x775   :  { %4407 = vrot.lane.b32.xlu0 %v4148_v25, %s6823_s29  ;;  %4374 = vrot.lane.b32.xlu1 %v4148_v25, %s6822_s28 }
 0x779   :  { %4470 = vperm.xlu0 %6433, %v4464_v9   ;;  %4409 = vrot.lane.b32.xlu1 %v4199_v38, %s6823_s29 }
 0x77d   :  { %4480 = vperm.xlu0 %6433, %v4466_v27   ;;  %4475 = vperm.xlu1 %6434, %v4465_v29  }
 0x781   :  { %4485 = vperm.xlu1 %6434, %v4467_v30  }
 0x7b7   :  { %v4210_v48 = vpop.permute.xlu0 %4209  ;;  %v4178_v47 = vpop.permute.xlu1 %4177 }
 0x7b8   :  { %v4184_v56 = vsel %vm1072_vm7, %v4176_v31, %v4178_v47  ;;  %v4216_v42 = vsel %vm1170_vm9, %v4208_v37, %v4210_v48 }
 0x7b9   :  { %4514 = vmatprep.subr.bf16.mxu1 %v4184_v56 }
 0x7ba   :  { %4515 = vmatpush1.bf16.msra.mxu1 %v4183_v0  ;;  %v6595_v0 = vld [vmem:[#allocation17 + $0x10] ss:$8 sps:$4 sm:$0xff]  }
 0x7bb   :  { %v4275_v1 = vpop.permute.xlu0 %4274  ;;  %4516 = vmatprep.subr.bf16.mxu1 %v4216_v42  ;;  %v4242_v35 = vpop.permute.xlu1 %4241  ;;  %v4618_v42 = vld [vmem:[#allocation18] sm:$0xf] }
 0x7bc   :  { %v4249_v50 = vsel %vm4247_vm8, %v4240_v54, %v4242_v35  ;;  %v4282_v6 = vsel %vm4280_vm11, %v4273_v10, %v4275_v1 }
 0x7be   :  { %4517 = vmatpush1.bf16.msra.mxu1 %v4215_v20 }
 0x7bf   :  { %v8355_v2 = vpop.permute.xlu0 %4340  ;;  %4518 = vmatprep.subr.bf16.mxu1 %v4249_v50  ;;  %v4308_v14 = vpop.permute.xlu1 %4307 }
 0x7c0   :  { %v4315_v18 = vsel %vm4313_vm12, %v4306_v5, %v4308_v14  ;;  %v4347_v24 = vsel %vm1464_vm10, %v4339_v12, %v8355_v2  ;;  %v6593_v5 = vld [vmem:[#allocation17 + $0x14] ss:$8 sps:$4 sm:$0xff]  }
 0x7c2   :  { %4519 = vmatpush1.bf16.msra.mxu1 %v4248_v32 }
 0x7c3   :  { %v4182_v16 = vpop.permute.xlu0 %4181  ;;  %4520 = vmatprep.subr.bf16.mxu1 %v4282_v6  ;;  %v4214_v52 = vpop.permute.xlu1 %4213  ;;  %v4627_v6 = vrot.slane %v4618_v42, %v7173_v59  ;;  %v4631_v59 = vrot.slane %v4618_v42, %v7170_v58 }
 0x7c6   :  { %4521 = vmatpush1.bf16.msra.mxu1 %v4281_v17 }
 0x7c7   :  { %v4246_v63 = vpop.permute.xlu0 %4245  ;;  %4522 = vmatprep.subr.bf16.mxu1 %v4315_v18  ;;  %v4279_v7 = vpop.permute.xlu1 %4278 }
 0x7ca   :  { %4523 = vmatpush1.bf16.msra.mxu1 %v4314_v44 }
 0x7cb   :  { %v4312_v15 = vpop.permute.xlu0 %4311  ;;  %4524 = vmatprep.subr.bf16.mxu1 %v4347_v24  ;;  %v4345_v8 = vpop.permute.xlu1 %4344 }
 0x7ce   :  { %4525 = vmatpush1.bf16.msra.mxu1 %v4346_v11 }
 0x7cf   :  { %v4212_v13 = vpop.permute.xlu0 %4211  ;;  %v4180_v36 = vpop.permute.xlu1 %4179 }
 0x7d0   :  { %v4186_v21 = vsel %vm1072_vm7, %v4180_v36, %v4182_v16  ;;  %v4185_v57 = vsel %vm1072_vm7, %v4178_v47, %v4180_v36  ;;  %v4218_v3 = vsel %vm1170_vm9, %v4212_v13, %v4214_v52  ;;  %v4217_v34 = vsel %vm1170_vm9, %v4210_v48, %v4212_v13 }
 0x7d1   :  { %4567 = vmatprep.subr.bf16.mxu0 %v4186_v21 }
 0x7d2   :  { %4568 = vmatpush1.bf16.msra.mxu0 %v4185_v57 }
 0x7d3   :  { %v4369_v28 = vpop.permute.xlu0 %4368  ;;  %4569 = vmatprep.subr.bf16.mxu0 %v4218_v3  ;;  %v4373_v22 = vpop.permute.xlu1 %4372 }
 0x7d4   :  { %v4379_v23 = vsel %vm4378_vm13, %v4369_v28, %v4371_v45  ;;  %v4380_v33 = vsel %vm4378_vm13, %v4371_v45, %v4373_v22 }
 0x7d5   :  { %4526 = vmatprep.subr.bf16.mxu1 %v4380_v33  ;;  %v4635_v33 = vrot.slane %v4618_v42, %v7176_v62 }
 0x7d6   :  { %4527 = vmatpush1.bf16.msra.mxu1 %v4379_v23  ;;  %4570 = vmatpush1.bf16.msra.mxu0 %v4217_v34 }
 0x7d7   :  { %v4277_v19 = vpop.permute.xlu0 %4276  ;;  %v4244_v4 = vpop.permute.xlu1 %4243 }
 0x7d8   :  { %v4251_v53 = vsel %vm4247_vm8, %v4244_v4, %v4246_v63  ;;  %v4250_v25 = vsel %vm4247_vm8, %v4242_v35, %v4244_v4  ;;  %v4284_v61 = vsel %vm4280_vm11, %v4277_v19, %v4279_v7  ;;  %v4283_v9 = vsel %vm4280_vm11, %v4275_v1, %v4277_v19 }
 0x7d9   :  { %4571 = vmatprep.subr.bf16.mxu0 %v4251_v53 }
 0x7da   :  { %4572 = vmatpush1.bf16.msra.mxu0 %v4250_v25 }
 0x7db   :  { %v4377_v38 = vpop.permute.xlu0 %4376  ;;  %4573 = vmatprep.subr.bf16.mxu0 %v4284_v61  ;;  %v4404_v26 = vpop.permute.xlu1 %4403 }
 0x7de   :  { %4574 = vmatpush1.bf16.msra.mxu0 %v4283_v9 }
 0x7df   :  { %v4343_v27 = vpop.permute.xlu0 %4342  ;;  %v4310_v29 = vpop.permute.xlu1 %4309 }
 0x7e0   :  { %v4316_v30 = vsel %vm4313_vm12, %v4308_v14, %v4310_v29  ;;  %v4317_v31 = vsel %vm4313_vm12, %v4310_v29, %v4312_v15  ;;  %v4349_v60 = vsel %vm1464_vm10, %v4343_v27, %v4345_v8  ;;  %v4348_v49 = vsel %vm1464_vm10, %v8355_v2, %v4343_v27 }
 0x7e1   :  { %4575 = vmatprep.subr.bf16.mxu0 %v4317_v31  ;;  %v4623_v2 = vrot.slane %v4618_v42, %v7167_v55 }
 0x7e2   :  { %4576 = vmatpush1.bf16.msra.mxu0 %v4316_v30 }
 0x7e3   :  { %v4406_v37 = vpop.permute.xlu0 %4405  ;;  %4577 = vmatprep.subr.bf16.mxu0 %v4349_v60  ;;  %v4402_v39 = vpop.permute.xlu1 %4401 }
 0x7e4   :  { %v4412_v54 = vsel %vm4411_vm14, %v4402_v39, %v4404_v26  ;;  %v4413_v10 = vsel %vm4411_vm14, %v4404_v26, %v4406_v37 }
 0x7e5   :  { %4528 = vmatprep.subr.bf16.mxu1 %v4413_v10 }
 0x7e6   :  { %4529 = vmatpush1.bf16.msra.mxu1 %v4412_v54  ;;  %4578 = vmatpush1.bf16.msra.mxu0 %v4348_v49 }
 0x7e7   :  { %v4375_v12 = vpop.permute.xlu1 %4374  ;;  %v4408_v45 = vpop.permute.xlu0 %4407 }
 0x7e8   :  { %v4381_v41 = vsel %vm4378_vm13, %v4373_v22, %v4375_v12  ;;  %v4382_v43 = vsel %vm4378_vm13, %v4375_v12, %v4377_v38  ;;  %v4414_v56 = vsel %vm4411_vm14, %v4406_v37, %v4408_v45 }
 0x7e9   :  { %4545 = vmatmul.mubr.bf16.vlgmr.msra.gmra.mrb[32].mxu1 %v6592_v40  ;;  %4579 = vmatprep.subr.bf16.mxu0 %v4382_v43 }
 0x7ea   :  { %4580 = vmatpush1.bf16.msra.mxu0 %v4381_v41  ;;  %6229 = vmatprep.mubr.msk.bf16.mxu1 %vm1964_vm6, %v6593_v5 }
 0x7eb   :  { %v4410_v48 = vpop.permute.xlu1 %4409 }
 0x7ec   :  { %v4415_v47 = vsel %vm4411_vm14, %v4408_v45, %v4410_v48 }
 0x7ed   :  { %4581 = vmatprep.subr.bf16.mxu0 %v4415_v47 }
 0x7ee   :  { %4582 = vmatpush1.bf16.msra.mxu0 %v4414_v56 }
 0x7f1   :  { %4555 = vmatmul.mubr.bf16.gmra.mrb[36].mxu1 %v6595_v0  ;;  %4598 = vmatmul.mubr.bf16.vlgmr.msra.gmra.mrb[36].mxu0 %v6592_v40 }
 0x7f2   :  { %6231 = vmatprep.mubr.msk.bf16.mxu0 %vm1964_vm6, %v6593_v5  ;;  %vm5255_vm6 = vcmask 261120  }
 0x7f8   :  { %v4471_v1 = vpop.permute.xlu0 %4470 }
 0x7f9   :  { %4608 = vmatmul.mubr.bf16.gmra.mrb[40].mxu0 %v6595_v0 }
 0x7fc   :  { %v4476_v20 = vpop.permute.xlu1 %4475  ;;  %v4481_v15 = vpop.permute.xlu0 %4480 }
 0x800   :  { %v4486_v8 = vpop.permute.xlu1 %4485 }
 0x8bc   :  { %v4546_v35 = vpop.f32.mrb[32].mxu1 }
 0x8bd   :  { %v4547_v50 = vadd.f32 %v4546_v35, %v4471_v1  ;;  %v4548_v14 = vpop.f32.mrb[33].mxu1 }
 0x8be   :  { %v4549_v32 = vadd.f32 %v4548_v14, %v4471_v1  ;;  %v4550_v16 = vpop.f32.mrb[34].mxu1 }
 0x8bf   :  { %v4551_v52 = vadd.f32 %v4550_v16, %v4476_v20  ;;  %v4552_v17 = vpop.f32.mrb[35].mxu1  ;;  %v4640_v63 = vmul.f32 %v4623_v2, %v4547_v50 }
 0x8c0   :  { %v4553_v18 = vadd.f32 %v4552_v17, %v4476_v20  ;;  %v4641_v44 = vmul.f32 %v4627_v6, %v4549_v32 }
 0x8c1   :  { %v4644_v7 = vmul.f32 %v4623_v2, %v4551_v52 }
 0x8c2   :  { %v4645_v24 = vmul.f32 %v4627_v6, %v4553_v18 }
 0x8c3   :  { %v8390_v11 = vpack.c.bf16 %v4644_v7, %v4640_v63  ;;  %v5201_v63 = vld [vmem:[%s8882_s11] sm:$0xff]  ;;  %v5202_v7 = vld [vmem:[%s8882_s11 + $0x8] sm:$0xff] }
 0x8c4   :  { %v8392_v13 = vpack.c.bf16 %v4645_v24, %v4641_v44  ;;  %v4556_v36 = vpop.f32.mrb[36].mxu1  ;;  %v4599_v55 = vpop.f32.mrb[36].mxu0 }
 0x8c5   :  { %v4557_v21 = vadd.f32 %v4556_v36, %v4481_v15  ;;  %v4600_v57 = vadd.f32 %v4599_v55, %v4471_v1  ;;  %v4558_v3 = vpop.f32.mrb[37].mxu1  ;;  %v4601_v28 = vpop.f32.mrb[37].mxu0  ;;  %4921 = vrot.lane.b32.xlu1 %v8390_v11, %s6821_s27  ;;  %4705 = vrot.lane.b32.xlu0 %v8390_v11, %s6808_s0 }
 0x8c6   :  { %v4559_v22 = vadd.f32 %v4558_v3, %v4481_v15  ;;  %v4602_v23 = vadd.f32 %v4601_v28, %v4471_v1  ;;  %v4560_v34 = vpop.f32.mrb[38].mxu1  ;;  %v4603_v19 = vpop.f32.mrb[38].mxu0  ;;  %5262 = vmatprep.subr.bf16.mxu1 %v8392_v13 }
 0x8c7   :  { %v4561_v4 = vadd.f32 %v4560_v34, %v4486_v8  ;;  %v4604_v53 = vadd.f32 %v4603_v19, %v4476_v20  ;;  %v4562_v25 = vpop.f32.mrb[39].mxu1  ;;  %v4605_v58 = vpop.f32.mrb[39].mxu0  ;;  %5263 = vmatpush1.bf16.msra.mxu1 %v8390_v11  ;;  %v4648_v61 = vmul.f32 %v4623_v2, %v4557_v21  ;;  %v4642_v9 = vmul.f32 %v4631_v59, %v4600_v57 }
 0x8c8   :  { %v4563_v38 = vadd.f32 %v4562_v25, %v4486_v8  ;;  %v4606_v26 = vadd.f32 %v4605_v58, %v4476_v20  ;;  %v4649_v62 = vmul.f32 %v4627_v6, %v4559_v22  ;;  %v4643_v30 = vmul.f32 %v4635_v33, %v4602_v23 }
 0x8c9   :  { %v4652_v27 = vmul.f32 %v4623_v2, %v4561_v4  ;;  %v4646_v29 = vmul.f32 %v4631_v59, %v4604_v53  ;;  %4923 = vrot.lane.b32.xlu1 %v8392_v13, %s6821_s27  ;;  %4759 = vrot.lane.b32.xlu0 %v8390_v11, %s6809_s2  ;;  %v6598_v2 = vld [vmem:[#allocation20 + $0x4] ss:$12 sps:$4 sm:$0xff]  }
 0x8ca   :  { %v4653_v31 = vmul.f32 %v4627_v6, %v4563_v38  ;;  %v4647_v60 = vmul.f32 %v4635_v33, %v4606_v26  ;;  %5294 = vmatprep.mubr.bf16.mxu1 %v6598_v2  ;;  %5400 = vmatprep.mubr.bf16.mxu0 %v6598_v2 }
 0x8cb   :  { %v8406_v37 = vpack.c.bf16 %v4652_v27, %v4648_v61  ;;  %v8408_v39 = vpack.c.bf16 %v4646_v29, %v4642_v9 }
 0x8cc   :  { %v8410_v54 = vpack.c.bf16 %v4653_v31, %v4649_v62  ;;  %v8412_v10 = vpack.c.bf16 %v4647_v60, %v4643_v30  ;;  %v4609_v49 = vpop.f32.mrb[40].mxu0 }
 0x8cd   :  { %v4610_v40 = vadd.f32 %v4609_v49, %v4481_v15  ;;  %v4611_v5 = vpop.f32.mrb[41].mxu0  ;;  %4709 = vrot.lane.b32.xlu1 %v8408_v39, %s6808_s0  ;;  %4813 = vrot.lane.b32.xlu0 %v8390_v11, %s6820_s24 }
 0x8ce   :  { %4684 = vst.msk [vmem:[#allocation8 + $0x18] sm:$0xff] %vm4411_vm14, %v8412_v10  ;;  %v4612_v12 = vadd.f32 %v4611_v5, %v4481_v15  ;;  %v4613_v41 = vpop.f32.mrb[42].mxu0  ;;  %5264 = vmatprep.subr.bf16.mxu1 %v8410_v54  ;;  %v5203_v15 = vld [vmem:[%s8882_s11 + $0x10] sm:$0xff] }
 0x8cf   :  { %v4614_v43 = vadd.f32 %v4613_v41, %v4486_v8  ;;  %v4615_v45 = vpop.f32.mrb[43].mxu0  ;;  %5265 = vmatpush1.bf16.msra.mxu1 %v8406_v37  ;;  %v4650_v47 = vmul.f32 %v4631_v59, %v4610_v40 }
 0x8d0   :  { %v4616_v48 = vadd.f32 %v4615_v45, %v4486_v8  ;;  %v4651_v0 = vmul.f32 %v4635_v33, %v4612_v12  ;;  %v5204_v8 = vld [vmem:[%s8882_s11 + $0x18] sm:$0xff] }
 0x8d1   :  { %v4654_v56 = vmul.f32 %v4631_v59, %v4614_v43  ;;  %4763 = vrot.lane.b32.xlu1 %v8408_v39, %s6809_s2  ;;  %4867 = vrot.lane.b32.xlu0 %v8390_v11, %s6819_s9 }
 0x8d2   :  { %v4655_v42 = vmul.f32 %v4635_v33, %v4616_v48 }
 0x8d3   :  { %v4662_v1 = vpack.c.bf16 %v4654_v56, %v4650_v47 }
 0x8d4   :  { %v8426_v35 = vpack.c.bf16 %v4655_v42, %v4651_v0 }
 0x8d5   :  { %4817 = vrot.lane.b32.xlu1 %v8408_v39, %s6820_s24  ;;  %4707 = vrot.lane.b32.xlu0 %v8392_v13, %s6808_s0  ;;  %v5132_v20 = vld [vmem:[#allocation8 + $0x18] sm:$0xff] }
 0x8d6   :  { %4688 = vst.msk [vmem:[#allocation8 + $0x38] sm:$0xff] %vm4411_vm14, %v8426_v35  ;;  %5368 = vmatprep.subr.bf16.mxu0 %v5132_v20 }
 0x8d7   :  { %5369 = vmatpush1.bf16.msra.mxu0 %v8408_v39 }
 0x8d9   :  { %4871 = vrot.lane.b32.xlu1 %v8408_v39, %s6819_s9  ;;  %4761 = vrot.lane.b32.xlu0 %v8392_v13, %s6809_s2 }
 0x8dd   :  { %4815 = vrot.lane.b32.xlu0 %v8392_v13, %s6820_s24  ;;  %4713 = vrot.lane.b32.xlu1 %v8406_v37, %s6808_s0  ;;  %v5136_v50 = vld [vmem:[#allocation8 + $0x38] sm:$0xff] }
 0x8de   :  { %5370 = vmatprep.subr.bf16.mxu0 %v5136_v50 }
 0x8df   :  { %5371 = vmatpush1.bf16.msra.mxu0 %v4662_v1 }
 0x8e1   :  { %4869 = vrot.lane.b32.xlu0 %v8392_v13, %s6819_s9  ;;  %4767 = vrot.lane.b32.xlu1 %v8406_v37, %s6809_s2 }
 0x8e5   :  { %4925 = vrot.lane.b32.xlu0 %v8408_v39, %s6821_s27  ;;  %4821 = vrot.lane.b32.xlu1 %v8406_v37, %s6820_s24 }
 0x8e9   :  { %4711 = vrot.lane.b32.xlu0 %v8412_v10, %s6808_s0  ;;  %4875 = vrot.lane.b32.xlu1 %v8406_v37, %s6819_s9 }
 0x8ed   :  { %4765 = vrot.lane.b32.xlu0 %v8412_v10, %s6809_s2  ;;  %4929 = vrot.lane.b32.xlu1 %v8406_v37, %s6821_s27 }
 0x8f1   :  { %4979 = vrot.lane.b32.xlu0 %v8408_v39, %s6812_s19  ;;  %4715 = vrot.lane.b32.xlu1 %v8410_v54, %s6808_s0 }
 0x8f5   :  { %4717 = vrot.lane.b32.xlu0 %v4662_v1, %s6808_s0  ;;  %4977 = vrot.lane.b32.xlu1 %v8392_v13, %s6812_s19 }
 0x8f9   :  { %4819 = vrot.lane.b32.xlu0 %v8412_v10, %s6820_s24  ;;  %4769 = vrot.lane.b32.xlu1 %v8410_v54, %s6809_s2 }
 0x8fd   :  { %4771 = vrot.lane.b32.xlu0 %v4662_v1, %s6809_s2  ;;  %4975 = vrot.lane.b32.xlu1 %v8390_v11, %s6812_s19 }
 0x901   :  { %5033 = vrot.lane.b32.xlu0 %v8408_v39, %s6822_s28  ;;  %4823 = vrot.lane.b32.xlu1 %v8410_v54, %s6820_s24 }
 0x905   :  { %4825 = vrot.lane.b32.xlu0 %v4662_v1, %s6820_s24  ;;  %4983 = vrot.lane.b32.xlu1 %v8406_v37, %s6812_s19 }
 0x909   :  { %4879 = vrot.lane.b32.xlu0 %v4662_v1, %s6819_s9  ;;  %4877 = vrot.lane.b32.xlu1 %v8410_v54, %s6819_s9 }
 0x90d   :  { %4933 = vrot.lane.b32.xlu0 %v4662_v1, %s6821_s27  ;;  %4931 = vrot.lane.b32.xlu1 %v8410_v54, %s6821_s27 }
 0x911   :  { %4987 = vrot.lane.b32.xlu0 %v4662_v1, %s6812_s19  ;;  %4985 = vrot.lane.b32.xlu1 %v8410_v54, %s6812_s19 }
 0x915   :  { %4719 = vrot.lane.b32.xlu0 %v8426_v35, %s6808_s0  ;;  %5031 = vrot.lane.b32.xlu1 %v8392_v13, %s6822_s28 }
 0x919   :  { %5041 = vrot.lane.b32.xlu0 %v4662_v1, %s6822_s28  ;;  %5029 = vrot.lane.b32.xlu1 %v8390_v11, %s6822_s28 }
 0x91d   :  { %4773 = vrot.lane.b32.xlu0 %v8426_v35, %s6809_s2  ;;  %5039 = vrot.lane.b32.xlu1 %v8410_v54, %s6822_s28 }
 0x921   :  { %4873 = vrot.lane.b32.xlu0 %v8412_v10, %s6819_s9  ;;  %5037 = vrot.lane.b32.xlu1 %v8406_v37, %s6822_s28 }
 0x925   :  { %4827 = vrot.lane.b32.xlu0 %v8426_v35, %s6820_s24  ;;  %5085 = vrot.lane.b32.xlu1 %v8392_v13, %s6823_s29 }
 0x929   :  { %4927 = vrot.lane.b32.xlu0 %v8412_v10, %s6821_s27  ;;  %4881 = vrot.lane.b32.xlu1 %v8426_v35, %s6819_s9 }
 0x92d   :  { %5087 = vrot.lane.b32.xlu0 %v8408_v39, %s6823_s29  ;;  %5083 = vrot.lane.b32.xlu1 %v8390_v11, %s6823_s29 }
 0x931   :  { %5095 = vrot.lane.b32.xlu0 %v4662_v1, %s6823_s29  ;;  %5093 = vrot.lane.b32.xlu1 %v8410_v54, %s6823_s29 }
 0x935   :  { %4935 = vrot.lane.b32.xlu0 %v8426_v35, %s6821_s27  ;;  %5091 = vrot.lane.b32.xlu1 %v8406_v37, %s6823_s29 }
 0x937   :  { %v4706_v14 = vpop.permute.xlu0 %4705  ;;  %v4922_v32 = vpop.permute.xlu1 %4921 }
 0x939   :  { %4981 = vrot.lane.b32.xlu0 %v8412_v10, %s6812_s19  ;;  %4989 = vrot.lane.b32.xlu1 %v8426_v35, %s6812_s19 }
 0x93b   :  { %v4760_v6 = vpop.permute.xlu0 %4759  ;;  %v4924_v16 = vpop.permute.xlu1 %4923 }
 0x93c   :  { %v8528_v52 = vsel %vm4313_vm12, %v4922_v32, %v4924_v16 }
 0x93d   :  { %5035 = vrot.lane.b32.xlu0 %v8412_v10, %s6822_s28  ;;  %5089 = vrot.lane.b32.xlu1 %v8412_v10, %s6823_s29 }
 0x93f   :  { %v4814_v17 = vpop.permute.xlu0 %4813  ;;  %v4710_v18 = vpop.permute.xlu1 %4709 }
 0x941   :  { %5043 = vrot.lane.b32.xlu0 %v8426_v35, %s6822_s28  ;;  %5097 = vrot.lane.b32.xlu1 %v8426_v35, %s6823_s29 }
 0x943   :  { %v4868_v44 = vpop.permute.xlu0 %4867  ;;  %v4764_v24 = vpop.permute.xlu1 %4763 }
 0x945   :  { %5207 = vperm.xlu0 %6433, %v5201_v63   ;;  %5212 = vperm.xlu1 %6434, %v5202_v7  }
 0x947   :  { %v4708_v11 = vpop.permute.xlu0 %4707  ;;  %v4818_v13 = vpop.permute.xlu1 %4817 }
 0x948   :  { %v4721_v36 = vsel %vm1072_vm7, %v4706_v14, %v4708_v11  ;;  %v4722_v55 = vsel %vm1072_vm7, %v4708_v11, %v4710_v18 }
 0x949   :  { %5217 = vperm.xlu0 %6433, %v5203_v15   ;;  %5222 = vperm.xlu1 %6434, %v5204_v8  }
 0x94a   :  { %5266 = vmatprep.subr.bf16.mxu1 %v4722_v55 }
 0x94b   :  { %v4762_v21 = vpop.permute.xlu0 %4761  ;;  %v8552_v57 = vpop.permute.xlu1 %4871  ;;  %5267 = vmatpush1.bf16.msra.mxu1 %v4721_v36 }
 0x94c   :  { %v4775_v59 = vsel %vm1170_vm9, %v4760_v6, %v4762_v21  ;;  %v4776_v3 = vsel %vm1170_vm9, %v4762_v21, %v4764_v24 }
 0x94f   :  { %v4816_v28 = vpop.permute.xlu0 %4815  ;;  %v4714_v22 = vpop.permute.xlu1 %4713 }
 0x950   :  { %v4829_v23 = vsel %vm4247_vm8, %v4814_v17, %v4816_v28  ;;  %v4830_v33 = vsel %vm4247_vm8, %v4816_v28, %v4818_v13 }
 0x953   :  { %v4870_v34 = vpop.permute.xlu0 %4869  ;;  %v4768_v19 = vpop.permute.xlu1 %4767 }
 0x954   :  { %v4883_v4 = vsel %vm4280_vm11, %v4868_v44, %v4870_v34  ;;  %v4884_v53 = vsel %vm4280_vm11, %v4870_v34, %v8552_v57 }
 0x957   :  { %v8561_v25 = vpop.permute.xlu0 %4925  ;;  %v4822_v58 = vpop.permute.xlu1 %4821 }
 0x958   :  { %v4938_v61 = vsel %vm4313_vm12, %v4924_v16, %v8561_v25 }
 0x95b   :  { %v4712_v38 = vpop.permute.xlu0 %4711  ;;  %v4876_v26 = vpop.permute.xlu1 %4875 }
 0x95c   :  { %v4723_v9 = vsel %vm1072_vm7, %v4710_v18, %v4712_v38  ;;  %4738 = vst.msk [vmem:[#allocation8 + $0x58] sm:$0xff] %vm4411_vm14, %v4712_v38 }
 0x95f   :  { %v4766_v27 = vpop.permute.xlu0 %4765  ;;  %v4930_v29 = vpop.permute.xlu1 %4929 }
 0x960   :  { %v8568_v62 = vsel %vm1170_vm9, %v4764_v24, %v4766_v27  ;;  %4792 = vst.msk [vmem:[#allocation8 + $0x98] sm:$0xff] %vm4411_vm14, %v4766_v27 }
 0x963   :  { %v8571_v30 = vpop.permute.xlu0 %4979  ;;  %v4716_v31 = vpop.permute.xlu1 %4715  ;;  %v5140_v60 = vld [vmem:[#allocation8 + $0x58] sm:$0xff] }
 0x964   :  { %v4724_v37 = vsel %vm1072_vm7, %v4714_v22, %v4716_v31  ;;  %5372 = vmatprep.subr.bf16.mxu0 %v5140_v60 }
 0x965   :  { %5373 = vmatpush1.bf16.msra.mxu0 %v4723_v9  ;;  %v8622_v9 = vld [vmem:[#allocation20] ss:$12 sps:$4 sm:$0xff]  }
 0x967   :  { %v4718_v39 = vpop.permute.xlu0 %4717  ;;  %v4978_v54 = vpop.permute.xlu1 %4977 }
 0x968   :  { %v4725_v10 = vsel %vm1072_vm7, %v4716_v31, %v4718_v39  ;;  %v4992_v49 = vsel %vm1464_vm10, %v4978_v54, %v8571_v30 }
 0x969   :  { %5268 = vmatprep.subr.bf16.mxu1 %v4725_v10 }
 0x96a   :  { %5269 = vmatpush1.bf16.msra.mxu1 %v4724_v37 }
 0x96b   :  { %v4820_v40 = vpop.permute.xlu0 %4819  ;;  %v4770_v5 = vpop.permute.xlu1 %4769  ;;  %5270 = vmatprep.subr.bf16.mxu1 %v4776_v3 }
 0x96c   :  { %v8578_v12 = vsel %vm4247_vm8, %v4818_v13, %v4820_v40  ;;  %4846 = vst.msk [vmem:[#allocation8 + $0xd8] sm:$0xff] %vm4411_vm14, %v4820_v40  ;;  %v4778_v41 = vsel %vm1170_vm9, %v4768_v19, %v4770_v5 }
 0x96e   :  { %5271 = vmatpush1.bf16.msra.mxu1 %v4775_v59 }
 0x96f   :  { %v4772_v43 = vpop.permute.xlu0 %4771  ;;  %v4976_v45 = vpop.permute.xlu1 %4975 }
 0x970   :  { %v4779_v48 = vsel %vm1170_vm9, %v4770_v5, %v4772_v43  ;;  %v4991_v47 = vsel %vm1464_vm10, %v4976_v45, %v4978_v54 }
 0x971   :  { %5272 = vmatprep.subr.bf16.mxu1 %v4779_v48 }
 0x972   :  { %5273 = vmatpush1.bf16.msra.mxu1 %v4778_v41 }
 0x973   :  { %v8584_v56 = vpop.permute.xlu0 %5033  ;;  %v4824_v0 = vpop.permute.xlu1 %4823  ;;  %5274 = vmatprep.subr.bf16.mxu1 %v4830_v33 }
 0x974   :  { %v4832_v42 = vsel %vm4247_vm8, %v4822_v58, %v4824_v0 }
 0x976   :  { %5275 = vmatpush1.bf16.msra.mxu1 %v4829_v23  ;;  %v5148_v23 = vld [vmem:[#allocation8 + $0x98] sm:$0xff] }
 0x977   :  { %v4826_v1 = vpop.permute.xlu0 %4825  ;;  %v4984_v35 = vpop.permute.xlu1 %4983 }
 0x978   :  { %v4833_v20 = vsel %vm4247_vm8, %v4824_v0, %v4826_v1 }
 0x979   :  { %5276 = vmatprep.subr.bf16.mxu1 %v4833_v20 }
 0x97a   :  { %5277 = vmatpush1.bf16.msra.mxu1 %v4832_v42  ;;  %v6602_v42 = vld [vmem:[#allocation20 + $0x8] ss:$12 sps:$4 sm:$0xff]  }
 0x97b   :  { %v8588_v50 = vpop.permute.xlu0 %4879  ;;  %v4878_v2 = vpop.permute.xlu1 %4877  ;;  %5278 = vmatprep.subr.bf16.mxu1 %v4884_v53 }
 0x97c   :  { %v4886_v14 = vsel %vm4280_vm11, %v4876_v26, %v4878_v2  ;;  %v4887_v32 = vsel %vm4280_vm11, %v4878_v2, %v8588_v50  ;;  %v5156_v26 = vld [vmem:[#allocation8 + $0xd8] sm:$0xff] }
 0x97e   :  { %5279 = vmatpush1.bf16.msra.mxu1 %v4883_v4 }
 0x97f   :  { %v8593_v6 = vpop.permute.xlu0 %4933  ;;  %v4932_v16 = vpop.permute.xlu1 %4931  ;;  %5280 = vmatprep.subr.bf16.mxu1 %v4887_v32 }
 0x980   :  { %v4940_v17 = vsel %vm4313_vm12, %v4930_v29, %v4932_v16  ;;  %v4941_v18 = vsel %vm4313_vm12, %v4932_v16, %v8593_v6  ;;  %v6603_v16 = vld [vmem:[#allocation20 + $0x20] ss:$12 sps:$4 sm:$0xff]  }
 0x982   :  { %5281 = vmatpush1.bf16.msra.mxu1 %v4886_v14 }
 0x983   :  { %v8598_v63 = vpop.permute.xlu0 %4987  ;;  %v4986_v7 = vpop.permute.xlu1 %4985  ;;  %5282 = vmatprep.subr.bf16.mxu1 %v4938_v61 }
 0x984   :  { %v4994_v44 = vsel %vm1464_vm10, %v4984_v35, %v4986_v7  ;;  %v4995_v24 = vsel %vm1464_vm10, %v4986_v7, %v8598_v63 }
 0x986   :  { %5283 = vmatpush1.bf16.msra.mxu1 %v8528_v52 }
 0x987   :  { %v4720_v15 = vpop.permute.xlu0 %4719  ;;  %v5032_v8 = vpop.permute.xlu1 %5031  ;;  %5284 = vmatprep.subr.bf16.mxu1 %v4941_v18 }
 0x988   :  { %v4726_v11 = vsel %vm1072_vm7, %v4718_v39, %v4720_v15  ;;  %4742 = vst.msk [vmem:[#allocation8 + $0x78] sm:$0xff] %vm4411_vm14, %v4720_v15  ;;  %v5046_v13 = vsel %vm4378_vm13, %v5032_v8, %v8584_v56 }
 0x98a   :  { %5285 = vmatpush1.bf16.msra.mxu1 %v4940_v17 }
 0x98b   :  { %v8608_v36 = vpop.permute.xlu0 %5041  ;;  %v5030_v55 = vpop.permute.xlu1 %5029  ;;  %5286 = vmatprep.subr.bf16.mxu1 %v4992_v49  ;;  %v8637_v49 = vld [vmem:[#allocation20 + $0x18] ss:$12 sps:$4 sm:$0xff]  }
 0x98c   :  { %v5045_v21 = vsel %vm4378_vm13, %v5030_v55, %v5032_v8 }
 0x98e   :  { %5287 = vmatpush1.bf16.msra.mxu1 %v4991_v47 }
 0x98f   :  { %v4774_v59 = vpop.permute.xlu0 %4773  ;;  %v5040_v52 = vpop.permute.xlu1 %5039  ;;  %v5144_v3 = vld [vmem:[#allocation8 + $0x78] sm:$0xff]  ;;  %5288 = vmatprep.subr.bf16.mxu1 %v4995_v24 }
 0x990   :  { %v4780_v28 = vsel %vm1170_vm9, %v4772_v43, %v4774_v59  ;;  %4796 = vst.msk [vmem:[#allocation8 + $0xb8] sm:$0xff] %vm4411_vm14, %v4774_v59  ;;  %v5049_v22 = vsel %vm4378_vm13, %v5040_v52, %v8608_v36  ;;  %5374 = vmatprep.subr.bf16.mxu0 %v5144_v3  ;;  %vm5664_vm9 = vcmask 1045504  }
 0x991   :  { %5375 = vmatpush1.bf16.msra.mxu0 %v4726_v11 }
 0x992   :  { %5376 = vmatprep.subr.bf16.mxu0 %v5148_v23  ;;  %5289 = vmatpush1.bf16.msra.mxu1 %v4994_v44 }
 0x993   :  { %v4874_v33 = vpop.permute.xlu0 %4873  ;;  %v5038_v34 = vpop.permute.xlu1 %5037  ;;  %5290 = vmatprep.subr.bf16.mxu1 %v5046_v13 }
 0x994   :  { %v4885_v19 = vsel %vm4280_vm11, %v8552_v57, %v4874_v33  ;;  %4900 = vst.msk [vmem:[#allocation8 + $0x118] sm:$0xff] %vm4411_vm14, %v4874_v33  ;;  %v5048_v4 = vsel %vm4378_vm13, %v5038_v34, %v5040_v52  ;;  %v8624_v57 = vld [vmem:[#allocation20 + $0x1c] ss:$12 sps:$4 sm:$0xff]  }
 0x995   :  { %5377 = vmatpush1.bf16.msra.mxu0 %v8568_v62 }
 0x996   :  { %5291 = vmatpush1.bf16.msra.mxu1 %v5045_v21 }
 0x997   :  { %v4828_v53 = vpop.permute.xlu0 %4827  ;;  %v5086_v58 = vpop.permute.xlu1 %5085  ;;  %v5152_v61 = vld [vmem:[#allocation8 + $0xb8] sm:$0xff]  ;;  %5292 = vmatprep.subr.bf16.mxu1 %v5049_v22 }
 0x998   :  { %v4834_v38 = vsel %vm4247_vm8, %v4826_v1, %v4828_v53  ;;  %4850 = vst.msk [vmem:[#allocation8 + $0xf8] sm:$0xff] %vm4411_vm14, %v4828_v53  ;;  %5378 = vmatprep.subr.bf16.mxu0 %v5152_v61 }
 0x999   :  { %5379 = vmatpush1.bf16.msra.mxu0 %v4780_v28 }
 0x99a   :  { %5380 = vmatprep.subr.bf16.mxu0 %v5156_v26  ;;  %5293 = vmatpush1.bf16.msra.mxu1 %v5048_v4 }
 0x99b   :  { %v4928_v27 = vpop.permute.xlu0 %4927  ;;  %v4882_v29 = vpop.permute.xlu1 %4881  ;;  %v5164_v10 = vld [vmem:[#allocation8 + $0x118] sm:$0xff] }
 0x99c   :  { %v4939_v62 = vsel %vm4313_vm12, %v8561_v25, %v4928_v27  ;;  %4954 = vst.msk [vmem:[#allocation8 + $0x158] sm:$0xff] %vm4411_vm14, %v4928_v27  ;;  %v4888_v31 = vsel %vm4280_vm11, %v8588_v50, %v4882_v29  ;;  %4904 = vst.msk [vmem:[#allocation8 + $0x138] sm:$0xff] %vm4411_vm14, %v4882_v29 }
 0x99d   :  { %5381 = vmatpush1.bf16.msra.mxu0 %v8578_v12  ;;  %5295 = vmatmul.mubr.bf16.vlgmr.msra.gmra.mrb[40].mxu1 %v8622_v9 }
 0x99e   :  { %5304 = vmatprep.mubr.bf16.mxu1 %v8624_v57 }
 0x99f   :  { %v5088_v60 = vpop.permute.xlu0 %5087  ;;  %v5084_v37 = vpop.permute.xlu1 %5083  ;;  %v5160_v39 = vld [vmem:[#allocation8 + $0xf8] sm:$0xff] }
 0x9a0   :  { %v5100_v54 = vsel %vm4411_vm14, %v5086_v58, %v5088_v60  ;;  %v5099_v25 = vsel %vm4411_vm14, %v5084_v37, %v5086_v58  ;;  %5382 = vmatprep.subr.bf16.mxu0 %v5160_v39 }
 0x9a1   :  { %5383 = vmatpush1.bf16.msra.mxu0 %v4834_v38  ;;  %5315 = vmatprep.subr.bf16.mxu1 %v5100_v54 }
 0x9a2   :  { %5384 = vmatprep.subr.bf16.mxu0 %v5164_v10  ;;  %5316 = vmatpush1.bf16.msra.mxu1 %v5099_v25 }
 0x9a3   :  { %v5096_v40 = vpop.permute.xlu0 %5095  ;;  %v5094_v5 = vpop.permute.xlu1 %5093  ;;  %v5168_v41 = vld [vmem:[#allocation8 + $0x138] sm:$0xff] }
 0x9a4   :  { %v5103_v12 = vsel %vm4411_vm14, %v5094_v5, %v5096_v40  ;;  %v5172_v0 = vld [vmem:[#allocation8 + $0x158] sm:$0xff] }
 0x9a5   :  { %5385 = vmatpush1.bf16.msra.mxu0 %v4885_v19  ;;  %5305 = vmatmul.mubr.bf16.gmra.mrb[44].mxu1 %v8637_v49 }
 0x9a6   :  { %5386 = vmatprep.subr.bf16.mxu0 %v5168_v41  ;;  %5317 = vmatprep.subr.bf16.mxu1 %v5103_v12 }
 0x9a7   :  { %v4936_v43 = vpop.permute.xlu0 %4935  ;;  %v5092_v45 = vpop.permute.xlu1 %5091  ;;  %5347 = vmatprep.mubr.bf16.mxu1 %v8255_v46 }
 0x9a8   :  { %v4942_v48 = vsel %vm4313_vm12, %v8593_v6, %v4936_v43  ;;  %4958 = vst.msk [vmem:[#allocation8 + $0x178] sm:$0xff] %vm4411_vm14, %v4936_v43  ;;  %v5102_v47 = vsel %vm4411_vm14, %v5092_v45, %v5094_v5 }
 0x9a9   :  { %5387 = vmatpush1.bf16.msra.mxu0 %v4888_v31  ;;  %5318 = vmatpush1.bf16.msra.mxu1 %v5102_v47 }
 0x9aa   :  { %5388 = vmatprep.subr.bf16.mxu0 %v5172_v0 }
 0x9ab   :  { %v4982_v1 = vpop.permute.xlu0 %4981  ;;  %v4990_v35 = vpop.permute.xlu1 %4989 }
 0x9ac   :  { %v4993_v20 = vsel %vm1464_vm10, %v8571_v30, %v4982_v1  ;;  %5008 = vst.msk [vmem:[#allocation8 + $0x198] sm:$0xff] %vm4411_vm14, %v4982_v1  ;;  %v4996_v50 = vsel %vm1464_vm10, %v8598_v63, %v4990_v35  ;;  %5012 = vst.msk [vmem:[#allocation8 + $0x1b8] sm:$0xff] %vm4411_vm14, %v4990_v35  ;;  %vm5665_vm10 = vcmask 1046528  }
 0x9ad   :  { %5389 = vmatpush1.bf16.msra.mxu0 %v4939_v62  ;;  %6238 = vmatmul.mubr.msk.bf16.vlgmr.msra.gmra.mrb[40].mxu1 %vm5255_vm6, %v6602_v42 }
 0x9ae   :  { %5357 = vmatprep.mubr.bf16.mxu1 %v8255_v46 }
 0x9af   :  { %v5036_v2 = vpop.permute.xlu0 %5035  ;;  %v5090_v14 = vpop.permute.xlu1 %5089  ;;  %v5176_v32 = vld [vmem:[#allocation8 + $0x178] sm:$0xff] }
 0x9b0   :  { %v5047_v6 = vsel %vm4378_vm13, %v8584_v56, %v5036_v2  ;;  %5062 = vst.msk [vmem:[#allocation8 + $0x1d8] sm:$0xff] %vm4411_vm14, %v5036_v2  ;;  %v5101_v30 = vsel %vm4411_vm14, %v5088_v60, %v5090_v14  ;;  %5116 = vst.msk [vmem:[#allocation8 + $0x218] sm:$0xff] %vm4411_vm14, %v5090_v14  ;;  %5390 = vmatprep.subr.bf16.mxu0 %v5176_v32 }
 0x9b1   :  { %5391 = vmatpush1.bf16.msra.mxu0 %v4942_v48 }
 0x9b3   :  { %v5044_v17 = vpop.permute.xlu0 %5043  ;;  %v5098_v18 = vpop.permute.xlu1 %5097  ;;  %v5180_v63 = vld [vmem:[#allocation8 + $0x198] sm:$0xff] }
 0x9b4   :  { %v5050_v7 = vsel %vm4378_vm13, %v8608_v36, %v5044_v17  ;;  %5066 = vst.msk [vmem:[#allocation8 + $0x1f8] sm:$0xff] %vm4411_vm14, %v5044_v17  ;;  %v5104_v44 = vsel %vm4411_vm14, %v5096_v40, %v5098_v18  ;;  %5120 = vst.msk [vmem:[#allocation8 + $0x238] sm:$0xff] %vm4411_vm14, %v5098_v18  ;;  %5392 = vmatprep.subr.bf16.mxu0 %v5180_v63  ;;  %v5184_v56 = vld [vmem:[#allocation8 + $0x1b8] sm:$0xff] }
 0x9b5   :  { %5393 = vmatpush1.bf16.msra.mxu0 %v4993_v20  ;;  %6239 = vmatmul.mubr.msk.bf16.gmra.mrb[44].mxu1 %vm5255_vm6, %v6603_v16 }
 0x9b6   :  { %5394 = vmatprep.subr.bf16.mxu0 %v5184_v56  ;;  %5453 = vmatprep.mubr.bf16.mxu1 %v8255_v46 }
 0x9b7   :  { %v5196_v24 = vld [vmem:[#allocation8 + $0x218] sm:$0xff] }
 0x9b8   :  { %5421 = vmatprep.subr.bf16.mxu1 %v5196_v24  ;;  %v5188_v15 = vld [vmem:[#allocation8 + $0x1d8] sm:$0xff] }
 0x9b9   :  { %5395 = vmatpush1.bf16.msra.mxu0 %v4996_v50  ;;  %5422 = vmatpush1.bf16.msra.mxu1 %v5101_v30 }
 0x9ba   :  { %5396 = vmatprep.subr.bf16.mxu0 %v5188_v15 }
 0x9bb   :  { %v5200_v8 = vld [vmem:[#allocation8 + $0x238] sm:$0xff] }
 0x9bc   :  { %5423 = vmatprep.subr.bf16.mxu1 %v5200_v8  ;;  %v5192_v11 = vld [vmem:[#allocation8 + $0x1f8] sm:$0xff] }
 0x9bd   :  { %5397 = vmatpush1.bf16.msra.mxu0 %v5047_v6  ;;  %5424 = vmatpush1.bf16.msra.mxu1 %v5104_v44 }
 0x9be   :  { %5398 = vmatprep.subr.bf16.mxu0 %v5192_v11  ;;  %5671 = vmatprep.subr.bf16.mxu1 %v8255_v46 }
 0x9c0   :  { %6240 = vmatmul.mubr.msk.bf16.vlgmr.msra.gmra.mrb[48].mxu1 %vm5255_vm6, %v6602_v42 }
 0x9c1   :  { %5399 = vmatpush1.bf16.msra.mxu0 %v5050_v7  ;;  %5463 = vmatprep.mubr.bf16.mxu1 %v8255_v46 }
 0x9c2   :  { %5901 = vmatprep.subr.bf16.mxu0 %v8255_v46 }
 0x9c4   :  { %5401 = vmatmul.mubr.bf16.vlgmr.msra.gmra.mrb[44].mxu0 %v8622_v9  ;;  %v5208_v13 = vpop.permute.xlu0 %5207  ;;  %v5213_v59 = vpop.permute.xlu1 %5212 }
 0x9c5   :  { %5410 = vmatprep.mubr.bf16.mxu0 %v8624_v57 }
 0x9c8   :  { %6241 = vmatmul.mubr.msk.bf16.gmra.mrb[52].mxu1 %vm5255_vm6, %v6603_v16  ;;  %v5218_v58 = vpop.permute.xlu0 %5217  ;;  %v5223_v57 = vpop.permute.xlu1 %5222 }
 0x9cc   :  { %5411 = vmatmul.mubr.bf16.gmra.mrb[48].mxu0 %v8637_v49 }
 0xa80   :  { %v5349_v36 = vpop.f32.mrb[40].mxu1 }
 0xa81   :  { %v6347_v55 = vadd.f32 %v5349_v36, %v5208_v13  ;;  %v5351_v21 = vpop.f32.mrb[41].mxu1 }
 0xa82   :  { %v6348_v52 = vadd.f32 %v5351_v21, %v5208_v13  ;;  %v5353_v3 = vpop.f32.mrb[42].mxu1 }
 0xa83   :  { %v6349_v28 = vadd.f32 %v5353_v3, %v5213_v59  ;;  %v5355_v22 = vpop.f32.mrb[43].mxu1  ;;  %v5474_v33 = vmax.f32 %v6347_v55, 0.0 }
 0xa84   :  { %v6350_v23 = vadd.f32 %v5355_v22, %v5213_v59  ;;  %v5475_v19 = vmax.f32 %v6348_v52, 0.0 }
 0xa85   :  { %v5478_v34 = vmax.f32 %v6349_v28, 0.0 }
 0xa86   :  { %v5479_v4 = vmax.f32 %v6350_v23, 0.0 }
 0xa87   :  { %v8674_v53 = vpack.c.bf16 %v5478_v34, %v5474_v33 }
 0xa88   :  { %v8676_v61 = vpack.c.bf16 %v5479_v4, %v5475_v19  ;;  %v5359_v38 = vpop.f32.mrb[44].mxu1 }
 0xa89   :  { %v6351_v26 = vadd.f32 %v5359_v38, %v5218_v58  ;;  %v5361_v9 = vpop.f32.mrb[45].mxu1  ;;  %5514 = vrot.lane.b32.xlu0 %v8674_v53, %s6808_s0 }
 0xa8a   :  { %v6352_v27 = vadd.f32 %v5361_v9, %v5218_v58  ;;  %v5363_v29 = vpop.f32.mrb[46].mxu1  ;;  %5516 = vrot.lane.b32.xlu1 %v8676_v61, %s6808_s0  ;;  %v6609_v9 = vld [vmem:[%s8883_s12] sm:$0xff]  }
 0xa8b   :  { %v6353_v62 = vadd.f32 %v5363_v29, %v5223_v57  ;;  %v5365_v31 = vpop.f32.mrb[47].mxu1  ;;  %v5482_v37 = vmax.f32 %v6351_v26, 0.0  ;;  %v6605_v26 = vld [vmem:[%s8883_s12 + $0x8] sm:$0xff]   ;;  %5902 = vmatpush1.bf16.msra.mxu0 %v6609_v9  ;;  %v6613_v29 = vld [vmem:[%s8883_s12 + $0x10] sm:$0xff]  }
 0xa8c   :  { %v6354_v60 = vadd.f32 %v5365_v31, %v5223_v57  ;;  %v5483_v54 = vmax.f32 %v6352_v27, 0.0  ;;  %5903 = vmatprep.subr.bf16.mxu0 %v8255_v46  ;;  %v6606_v27 = vld [vmem:[%s8883_s12 + $0x10] sm:$0xff]   ;;  %v6607_v31 = vld [vmem:[%s8883_s12 + $0x18] sm:$0xff]  }
 0xa8d   :  { %v5486_v39 = vmax.f32 %v6353_v62, 0.0 }
 0xa8e   :  { %v5487_v25 = vmax.f32 %v6354_v60, 0.0  ;;  %v6615_v60 = vld [vmem:[%s8883_s12 + $0x18] sm:$0xff]  }
 0xa8f   :  { %v8682_v10 = vpack.c.bf16 %v5486_v39, %v5482_v37  ;;  %v6608_v37 = vld [vmem:[%s8883_s12 + $0x20] sm:$0xff]  }
 0xa90   :  { %v8684_v49 = vpack.c.bf16 %v5487_v25, %v5483_v54  ;;  %v6617_v39 = vld [vmem:[%s8883_s12 + $0x20] sm:$0xff]   ;;  %v6610_v54 = vld [vmem:[%s8883_s12 + $0x28] sm:$0xff]  }
 0xa91   :  { %v6619_v25 = vld [vmem:[%s8883_s12 + $0x28] sm:$0xff]  }
 0xa93   :  { %v5455_v40 = vpop.f32.mrb[48].mxu1 }
 0xa94   :  { %v5457_v5 = vpop.f32.mrb[49].mxu1 }
 0xa95   :  { %v5459_v12 = vpop.f32.mrb[50].mxu1 }
 0xa96   :  { %v5461_v41 = vpop.f32.mrb[51].mxu1 }
 0xa97   :  { %v5402_v43 = vpop.f32.mrb[44].mxu0 }
 0xa98   :  { %v5403_v45 = vadd.f32 %v5402_v43, %v5208_v13  ;;  %v5404_v48 = vpop.f32.mrb[45].mxu0  ;;  %v6616_v43 = vld [vmem:[%s8883_s12 + $0x40] sm:$0xff]  }
 0xa99   :  { %v5405_v47 = vadd.f32 %v5404_v48, %v5208_v13  ;;  %v5406_v0 = vpop.f32.mrb[46].mxu0  ;;  %v6620_v48 = vld [vmem:[%s8883_s12 + $0x50] sm:$0xff]  }
 0xa9a   :  { %v5407_v42 = vadd.f32 %v5406_v0, %v5213_v59  ;;  %v5456_v1 = vadd.f32 %v5455_v40, %v5403_v45  ;;  %v5408_v35 = vpop.f32.mrb[47].mxu0  ;;  %v6612_v40 = vld [vmem:[%s8883_s12 + $0x30] sm:$0xff]   ;;  %v6618_v45 = vld [vmem:[%s8883_s12 + $0x48] sm:$0xff]   ;;  %v6624_v0 = vld [vmem:[%s8883_s12 + $0x60] sm:$0x7f]  }
 0xa9b   :  { %v5409_v20 = vadd.f32 %v5408_v35, %v5213_v59  ;;  %v5458_v50 = vadd.f32 %v5457_v5, %v5405_v47  ;;  %v5465_v2 = vpop.f32.mrb[52].mxu1  ;;  %v6621_v5 = vld [vmem:[%s8883_s12 + $0x30] sm:$0xff]   ;;  %v6622_v47 = vld [vmem:[%s8883_s12 + $0x58] sm:$0xff]  }
 0xa9c   :  { %v5460_v14 = vadd.f32 %v5459_v12, %v5407_v42  ;;  %v5467_v32 = vpop.f32.mrb[53].mxu1  ;;  %v5476_v16 = vmax.f32 %v5456_v1, 0.0  ;;  %v6614_v12 = vld [vmem:[%s8883_s12 + $0x38] sm:$0xff]   ;;  %v5666_v42 = vsel %vm5664_vm9, 4294967295, %v6817_v51 }
 0xa9d   :  { %v5462_v6 = vadd.f32 %v5461_v41, %v5409_v20  ;;  %v5469_v30 = vpop.f32.mrb[54].mxu1  ;;  %v5477_v63 = vmax.f32 %v5458_v50, 0.0  ;;  %v6623_v41 = vld [vmem:[%s8883_s12 + $0x38] sm:$0xff]   ;;  %v5667_v1 = vsel %vm5665_vm10, %v5666_v42, 0  ;;  %v6625_v20 = vld [vmem:[%s8883_s12 + $0x40] sm:$0xff]   ;;  %v6626_v50 = vld [vmem:[%s8883_s12 + $0x48] sm:$0xff]  }
 0xa9e   :  { %v5480_v17 = vmax.f32 %v5460_v14, 0.0  ;;  %v5471_v18 = vpop.f32.mrb[55].mxu1  ;;  %v5669_v35 = vand.u32 %v6624_v0, %v5667_v1 }
 0xa9f   :  { %v5481_v7 = vmax.f32 %v5462_v6, 0.0  ;;  %v5412_v44 = vpop.f32.mrb[48].mxu0 }
 0xaa0   :  { %v8686_v56 = vpack.c.bf16 %v5480_v17, %v5476_v16  ;;  %v5413_v24 = vadd.f32 %v5412_v44, %v5218_v58  ;;  %v5414_v15 = vpop.f32.mrb[49].mxu0  ;;  %v6628_v16 = vld [vmem:[%s8883_s12 + $0x58] sm:$0xff]  }
 0xaa1   :  { %v5493_v8 = vpack.c.bf16 %v5481_v7, %v5477_v63  ;;  %v5415_v11 = vadd.f32 %v5414_v15, %v5218_v58  ;;  %v5416_v13 = vpop.f32.mrb[50].mxu0  ;;  %v6604_v58 = vld [vmem:[%s8883_s12] sm:$0xff]  }
 0xaa2   :  { %v5417_v36 = vadd.f32 %v5416_v13, %v5223_v57  ;;  %v5466_v55 = vadd.f32 %v5465_v2, %v5413_v24  ;;  %v5418_v21 = vpop.f32.mrb[51].mxu0  ;;  %5749 = vrot.lane.b32.xlu0 %v8686_v56, %s6808_s0  ;;  %5672 = vmatpush1.bf16.msra.mxu1 %v6604_v58  ;;  %v6627_v2 = vld [vmem:[%s8883_s12 + $0x50] sm:$0xff]  }
 0xaa3   :  { %5501 = vst.msk [vmem:[#allocation9 + $0x18] sm:$0xff] %vm4411_vm14, %v5493_v8  ;;  %v5419_v59 = vadd.f32 %v5418_v21, %v5223_v57  ;;  %v5468_v52 = vadd.f32 %v5467_v32, %v5415_v11  ;;  %5673 = vmatprep.subr.bf16.mxu1 %v8255_v46  ;;  %v6611_v57 = vld [vmem:[%s8883_s12 + $0x8] sm:$0xff]  }
 0xaa4   :  { %v5470_v3 = vadd.f32 %v5469_v30, %v5417_v36  ;;  %v5484_v22 = vmax.f32 %v5466_v55, 0.0  ;;  %5904 = vmatpush1.bf16.msra.mxu0 %v6611_v57 }
 0xaa5   :  { %v5472_v28 = vadd.f32 %v5471_v18, %v5419_v59  ;;  %v5485_v33 = vmax.f32 %v5468_v52, 0.0  ;;  %5905 = vmatprep.subr.bf16.mxu0 %v8255_v46 }
 0xaa6   :  { %v5488_v23 = vmax.f32 %v5470_v3, 0.0  ;;  %5518 = vrot.lane.b32.xlu0 %v8682_v10, %s6808_s0  ;;  %5674 = vmatpush1.bf16.msra.mxu1 %v6605_v26 }
 0xaa7   :  { %v5489_v34 = vmax.f32 %v5472_v28, 0.0  ;;  %5675 = vmatprep.subr.bf16.mxu1 %v8255_v46 }
 0xaa8   :  { %v8693_v19 = vpack.c.bf16 %v5488_v23, %v5484_v22  ;;  %5906 = vmatpush1.bf16.msra.mxu0 %v6613_v29 }
 0xaa9   :  { %v5497_v4 = vpack.c.bf16 %v5489_v34, %v5485_v33  ;;  %5907 = vmatprep.subr.bf16.mxu0 %v8255_v46 }
 0xaaa   :  { %v8698_v38 = vld [vmem:[#allocation9 + $0x18] sm:$0xff]  ;;  %5753 = vrot.lane.b32.xlu0 %v8693_v19, %s6808_s0  ;;  %5676 = vmatpush1.bf16.msra.mxu1 %v6606_v27 }
 0xaab   :  { %5505 = vst.msk [vmem:[#allocation9 + $0x38] sm:$0xff] %vm4411_vm14, %v5497_v4  ;;  %5751 = vrot.lane.b32.xlu1 %v8698_v38, %s6808_s0  ;;  %5677 = vmatprep.subr.bf16.mxu1 %v8255_v46 }
 0xaac   :  { %5908 = vmatpush1.bf16.msra.mxu0 %v6615_v60 }
 0xaad   :  { %5909 = vmatprep.subr.bf16.mxu0 %v8255_v46 }
 0xaae   :  { %5678 = vmatpush1.bf16.msra.mxu1 %v6607_v31 }
 0xaaf   :  { %5520 = vrot.lane.b32.xlu1 %v8684_v49, %s6808_s0  ;;  %5679 = vmatprep.subr.bf16.mxu1 %v8255_v46 }
 0xab0   :  { %5910 = vmatpush1.bf16.msra.mxu0 %v6617_v39 }
 0xab1   :  { %5911 = vmatprep.subr.bf16.mxu0 %v8255_v46 }
 0xab2   :  { %v8725_v62 = vld [vmem:[#allocation9 + $0x38] sm:$0xff]  ;;  %5680 = vmatpush1.bf16.msra.mxu1 %v6608_v37 }
 0xab3   :  { %5755 = vrot.lane.b32.xlu1 %v8725_v62, %s6808_s0  ;;  %5681 = vmatprep.subr.bf16.mxu1 %v8255_v46 }
 0xab4   :  { %5912 = vmatpush1.bf16.msra.mxu0 %v6619_v25 }
 0xab5   :  { %5913 = vmatprep.subr.bf16.mxu0 %v8255_v46 }
 0xab6   :  { %5682 = vmatpush1.bf16.msra.mxu1 %v6610_v54 }
 0xab7   :  { %5683 = vmatprep.subr.bf16.mxu1 %v8255_v46 }
 0xab8   :  { %5914 = vmatpush1.bf16.msra.mxu0 %v6621_v5 }
 0xab9   :  { %5915 = vmatprep.subr.bf16.mxu0 %v8255_v46 }
 0xaba   :  { %5684 = vmatpush1.bf16.msra.mxu1 %v6612_v40 }
 0xabb   :  { %5685 = vmatprep.subr.bf16.mxu1 %v8255_v46 }
 0xabc   :  { %5916 = vmatpush1.bf16.msra.mxu0 %v6623_v41 }
 0xabd   :  { %5917 = vmatprep.subr.bf16.mxu0 %v8255_v46 }
 0xabe   :  { %5686 = vmatpush1.bf16.msra.mxu1 %v6614_v12 }
 0xabf   :  { %5687 = vmatprep.subr.bf16.mxu1 %v8255_v46 }
 0xac0   :  { %5918 = vmatpush1.bf16.msra.mxu0 %v6625_v20 }
 0xac1   :  { %5919 = vmatprep.subr.bf16.mxu0 %v8255_v46 }
 0xac2   :  { %5688 = vmatpush1.bf16.msra.mxu1 %v6616_v43 }
 0xac3   :  { %5689 = vmatprep.subr.bf16.mxu1 %v8255_v46 }
 0xac4   :  { %5920 = vmatpush1.bf16.msra.mxu0 %v6626_v50 }
 0xac5   :  { %5921 = vmatprep.subr.bf16.mxu0 %v8255_v46 }
 0xac6   :  { %5690 = vmatpush1.bf16.msra.mxu1 %v6618_v45 }
 0xac7   :  { %5691 = vmatprep.subr.bf16.mxu1 %v8255_v46 }
 0xac8   :  { %5922 = vmatpush1.bf16.msra.mxu0 %v6627_v2 }
 0xac9   :  { %5923 = vmatprep.subr.bf16.mxu0 %v8255_v46 }
 0xaca   :  { %5692 = vmatpush1.bf16.msra.mxu1 %v6620_v48 }
 0xacb   :  { %5693 = vmatprep.subr.bf16.mxu1 %v8255_v46 }
 0xacc   :  { %5924 = vmatpush1.bf16.msra.mxu0 %v6628_v16 }
 0xacd   :  { %5925 = vmatprep.subr.bf16.mxu0 %v8255_v46 }
 0xace   :  { %5694 = vmatpush1.bf16.msra.mxu1 %v6622_v47 }
 0xacf   :  { %5695 = vmatprep.subr.bf16.mxu1 %v8255_v46 }
 0xad2   :  { %5696 = vmatpush1.bf16.msra.mxu1 %v5669_v35 }
 0xafb   :  { %v5515_v51 = vpop.permute.xlu0 %5514 }
 0xafc   :  { %v5517_v14 = vpop.permute.xlu1 %5516 }
 0xafd   :  { %v5522_v32 = vsel %vm1072_vm7, %v5515_v51, %v5517_v14  ;;  %v5529_v6 = vmax.bf16 %v5517_v14, %v8676_v61  ;;  %v6629_v61 = vld [vmem:[%s8883_s12 + $0x60] sm:$0x7f]  }
 0xafe   :  { %v5528_v30 = vmax.bf16 %v5522_v32, %v8674_v53  ;;  %v5899_v17 = vand.u32 %v6629_v61, %v5667_v1 }
 0xaff   :  { %5538 = vrot.lane.b32.xlu1 %v5529_v6, %s6820_s24 }
 0xb00   :  { %5536 = vrot.lane.b32.xlu0 %v5528_v30, %s6820_s24  ;;  %5926 = vmatpush1.bf16.msra.mxu0 %v5899_v17 }
 0xb14   :  { %v5750_v53 = vpop.permute.xlu0 %5749 }
 0xb18   :  { %v5519_v24 = vpop.permute.xlu0 %5518 }
 0xb1c   :  { %v5754_v13 = vpop.permute.xlu0 %5753 }
 0xb1d   :  { %v5752_v18 = vpop.permute.xlu1 %5751 }
 0xb1e   :  { %v5757_v63 = vsel %vm1072_vm7, %v5750_v53, %v5752_v18  ;;  %v5764_v7 = vmax.bf16 %v5752_v18, %v8698_v38 }
 0xb1f   :  { %v5763_v44 = vmax.bf16 %v5757_v63, %v8686_v56 }
 0xb20   :  { %5773 = vrot.lane.b32.xlu1 %v5764_v7, %s6820_s24 }
 0xb21   :  { %5771 = vrot.lane.b32.xlu0 %v5763_v44, %s6820_s24  ;;  %v5521_v46 = vpop.permute.xlu1 %5520 }
 0xb22   :  { %v5523_v15 = vsel %vm1072_vm7, %v5519_v24, %v5521_v46  ;;  %v5531_v8 = vmax.bf16 %v5521_v46, %v8684_v49 }
 0xb23   :  { %v5530_v11 = vmax.bf16 %v5523_v15, %v8682_v10 }
 0xb24   :  { %5542 = vrot.lane.b32.xlu1 %v5531_v8, %s6820_s24 }
 0xb25   :  { %5540 = vrot.lane.b32.xlu0 %v5530_v11, %s6820_s24  ;;  %v5756_v36 = vpop.permute.xlu1 %5755 }
 0xb26   :  { %v5758_v56 = vsel %vm1072_vm7, %v5754_v13, %v5756_v36  ;;  %v5766_v55 = vmax.bf16 %v5756_v36, %v8725_v62  ;;  %vm5736_vm7 = vcmask 519168  }
 0xb27   :  { %v5765_v21 = vmax.bf16 %v5758_v56, %v8693_v19 }
 0xb28   :  { %5777 = vrot.lane.b32.xlu1 %v5766_v55, %s6820_s24 }
 0xb29   :  { %5775 = vrot.lane.b32.xlu0 %v5765_v21, %s6820_s24 }
 0xb71   :  { %v5539_v59 = vpop.permute.xlu1 %5538 }
 0xb72   :  { %v5551_v49 = vmax.bf16 %v5539_v59, %v5529_v6  ;;  %v5537_v10 = vpop.permute.xlu0 %5536 }
 0xb73   :  { %v5544_v52 = vsel %vm4247_vm8, %v5537_v10, %v5539_v59 }
 0xb74   :  { %v5550_v3 = vmax.bf16 %v5544_v52, %v5528_v30  ;;  %6255 = vmatprep.mubr.msk.bf16.mxu1 %vm5657_vm15, %v5551_v49 }
 0xb76   :  { %5704 = vmatmul.mubr.bf16.vlgmr.msra.gmra.mrb[56].mxu1 %v5550_v3 }
 0xb92   :  { %v5774_v28 = vpop.permute.xlu1 %5773 }
 0xb93   :  { %v5786_v22 = vmax.bf16 %v5774_v28, %v5764_v7  ;;  %v5772_v23 = vpop.permute.xlu0 %5771 }
 0xb94   :  { %v5779_v33 = vsel %vm4247_vm8, %v5772_v23, %v5774_v28 }
 0xb95   :  { %v5785_v34 = vmax.bf16 %v5779_v33, %v5763_v44  ;;  %6274 = vmatprep.mubr.msk.bf16.mxu0 %vm5657_vm15, %v5786_v22 }
 0xb96   :  { %v5543_v19 = vpop.permute.xlu1 %5542 }
 0xb97   :  { %v5553_v4 = vmax.bf16 %v5543_v19, %v5531_v8  ;;  %v5541_v58 = vpop.permute.xlu0 %5540  ;;  %5934 = vmatmul.mubr.bf16.vlgmr.msra.gmra.mrb[52].mxu0 %v5785_v34 }
 0xb98   :  { %v5545_v38 = vsel %vm4247_vm8, %v5541_v58, %v5543_v19 }
 0xb99   :  { %v5552_v26 = vmax.bf16 %v5545_v38, %v5530_v11  ;;  %6256 = vmatprep.mubr.msk.bf16.mxu1 %vm5657_vm15, %v5553_v4 }
 0xb9a   :  { %v5778_v9 = vpop.permute.xlu1 %5777 }
 0xb9b   :  { %v5788_v57 = vmax.bf16 %v5778_v9, %v5766_v55  ;;  %v5776_v27 = vpop.permute.xlu0 %5775  ;;  %5712 = vmatmul.mubr.bf16.gmra.mrb[60].mxu1 %v5552_v26 }
 0xb9c   :  { %v5780_v29 = vsel %vm4247_vm8, %v5776_v27, %v5778_v9 }
 0xb9d   :  { %v5787_v62 = vmax.bf16 %v5780_v29, %v5765_v21  ;;  %6275 = vmatprep.mubr.msk.bf16.mxu0 %vm5657_vm15, %v5788_v57 }
 0xb9f   :  { %5942 = vmatmul.mubr.bf16.gmra.mrb[56].mxu0 %v5787_v62 }
 0xc49   :  { %v5705_v31 = vpop.f32.mrb[56].mxu1 }
 0xc4a   :  { %v6280_v60 = vpack.c.bf16 %v5705_v31, %v5705_v31  ;;  %v5707_v37 = vpop.f32.mrb[57].mxu1 }
 0xc4b   :  { %v5708_v39 = vpop.f32.mrb[58].mxu1 }
 0xc4c   :  { %5737 = vst.msk [vmem:[%s8884_s13] sm:$0xf] %vm5736_vm7, %v6280_v60  ;;  %v6281_v54 = vpack.c.bf16 %v5708_v39, %v5708_v39  ;;  %v5710_v25 = vpop.f32.mrb[59].mxu1 }
 0xc4e   :  { %5738 = vst.msk [vmem:[%s8884_s13 + $0x4] sm:$0xf] %vm5736_vm7, %v6281_v54 }
 0xc6a   :  { %v5935_v40 = vpop.f32.mrb[52].mxu0 }
 0xc6b   :  { %v6284_v5 = vpack.c.bf16 %v5935_v40, %v5935_v40  ;;  %v5937_v12 = vpop.f32.mrb[53].mxu0 }
 0xc6c   :  { %v5938_v41 = vpop.f32.mrb[54].mxu0 }
 0xc6d   :  { %5966 = vst.msk [vmem:[%s8884_s13 + $0x10] sm:$0xf] %vm5736_vm7, %v6284_v5  ;;  %v6285_v43 = vpack.c.bf16 %v5938_v41, %v5938_v41  ;;  %v5940_v45 = vpop.f32.mrb[55].mxu0 }
 0xc6e   :  { %v5713_v48 = vpop.f32.mrb[60].mxu1 }
 0xc6f   :  { %5967 = vst.msk [vmem:[%s8884_s13 + $0x14] sm:$0xf] %vm5736_vm7, %v6285_v43  ;;  %v6282_v47 = vpack.c.bf16 %v5713_v48, %v5713_v48  ;;  %v5715_v0 = vpop.f32.mrb[61].mxu1 }
 0xc70   :  { %v5716_v42 = vpop.f32.mrb[62].mxu1 }
 0xc71   :  { %5739 = vst.msk [vmem:[%s8884_s13 + $0x8] sm:$0xf] %vm5736_vm7, %v6282_v47  ;;  %v6283_v1 = vpack.c.bf16 %v5716_v42, %v5716_v42  ;;  %v5718_v35 = vpop.f32.mrb[63].mxu1 }
 0xc72   :  { %v5943_v20 = vpop.f32.mrb[56].mxu0 }
 0xc73   :  { %5740 = vst.msk [vmem:[%s8884_s13 + $0xc] sm:$0xf] %vm5736_vm7, %v6283_v1  ;;  %v6286_v50 = vpack.c.bf16 %v5943_v20, %v5943_v20  ;;  %v5945_v2 = vpop.f32.mrb[57].mxu0 }
 0xc74   :  { %v5946_v51 = vpop.f32.mrb[58].mxu0 }
 0xc75   :  { %5968 = vst.msk [vmem:[%s8884_s13 + $0x18] sm:$0xf] %vm5736_vm7, %v6286_v50  ;;  %v6287_v14 = vpack.c.bf16 %v5946_v51, %v5946_v51  ;;  %v5948_v32 = vpop.f32.mrb[59].mxu0 }
 0xc77   :  { %5969 = vst.msk [vmem:[%s8884_s13 + $0x1c] sm:$0xf] %vm5736_vm7, %v6287_v14 }
 0xc78   :  { %5974 = vsyncpa [#allocation11], 1 }
 0xc79   :  { %5975 = vsyncpa [#allocation13], 1 }
 0xc7a   :  { %5976 = vsyncpa [#allocation16], 1 }
 0xc7b   :  { %5977 = vsyncpa [#allocation19], 1 }

</bundles_post_ra>
